<compile_context>
chip_gen: v7x
topology: tpu7x:2x2x1
jax: 0.10.0
libtpu: 0.0.40
codegen_flags: <defaults>
</compile_context>

<pallas_src>
import functools

import jax
import jax.numpy as jnp
from jax import lax
from jax.experimental import pallas as pl
from jax.experimental.pallas import tpu as pltpu


def _fcn_kernel(H, Wp,
                x_ref,
                w1_ref, b1_ref, w2_ref, b2_ref, w3_ref, b3_ref,
                w4_ref, b4_ref, w5_ref, b5_ref, mask_ref,
                o_ref,
                pad_a, pad_b):
    """Fused 5-layer 3x3 conv + ReLU for one image (grid axis = batch).

    x_ref   : (1, canvas, Cin_pad)   flattened zero-padded input canvas
    w*_ref  : (9*Cin, Cout)          tap t occupies rows [t*Cin, (t+1)*Cin)
    b*_ref  : (1, Cout)
    mask_ref: (H*Wp, 1)              1.0 for valid columns, 0.0 for the 2 garbage cols
    o_ref   : (1, H*Wp, Cout_pad)
    pad_a/b : (canvas, 32) VMEM      ping-pong padded canvases for intermediates
    """
    M = H * Wp                      # computed positions per layer (incl. 2 garbage cols/row)
    mask = mask_ref[...]            # (M, 1)

    # Zero the canvases so all borders are zero (garbage cols are masked to zero
    # before being written, so borders stay zero across layers).
    pad_a[...] = jnp.zeros_like(pad_a)
    pad_b[...] = jnp.zeros_like(pad_b)

    def conv_relu(load_patch, w_ref, b_ref):
        cin = w_ref.shape[0] // 9
        cout = w_ref.shape[1]
        acc = jnp.zeros((M, cout), jnp.float32)
        for dy in range(3):
            for dx in range(3):
                off = dy * Wp + dx                       # static sublane offset
                tap = dy * 3 + dx
                patch = load_patch(off)                  # (M, cin)
                wtap = w_ref[tap * cin:(tap + 1) * cin, :]
                acc = acc + jnp.dot(patch, wtap,
                                    preferred_element_type=jnp.float32)
        return jnp.maximum(acc + b_ref[...], 0.0)        # (M, cout)

    def repad(dst_ref, y):
        # Zero the 2 garbage columns (they land exactly on the zero borders of
        # the next layer's canvas) and write into the canvas interior.
        dst_ref[Wp + 1:Wp + 1 + M, :] = y * mask

    # Layer 1: (padded) 8 -> 32
    y = conv_relu(lambda off: x_ref[0, off:off + M, :], w1_ref, b1_ref)
    repad(pad_a, y)
    # Layer 2: 32 -> 32
    y = conv_relu(lambda off: pad_a[off:off + M, :], w2_ref, b2_ref)
    repad(pad_b, y)
    # Layer 3: 32 -> 32
    y = conv_relu(lambda off: pad_b[off:off + M, :], w3_ref, b3_ref)
    repad(pad_a, y)
    # Layer 4: 32 -> 32
    y = conv_relu(lambda off: pad_a[off:off + M, :], w4_ref, b4_ref)
    repad(pad_b, y)
    # Layer 5: 32 -> (padded) 8
    y = conv_relu(lambda off: pad_b[off:off + M, :], w5_ref, b5_ref)
    o_ref[0] = y.astype(o_ref.dtype)


def fcn_forward(x, params):
    """JAX/Pallas equivalent of FCN.forward.

    x      : (N, 3, H, W) float32, NCHW (PyTorch convention)
    params : list of 5 (weight, bias) pairs, weight in OIHW (Cout, Cin, 3, 3)
    returns: (N, 1, H, W) float32
    """
    N, Cin, H, W = x.shape
    assert Cin == 3 and len(params) == 5
    CIN_PAD = 8       # pad input channels 3 -> 8 (sublane-aligned matmul K)
    COUT_PAD = 8      # pad final output channels 1 -> 8
    Wp = W + 2
    canvas = (H + 3) * Wp          # 1 top + 2 bottom rows of padding (2nd bottom
    M = H * Wp                     # row absorbs the wrap-around tap reads)

    # ---- layout plumbing (wrapper-side) ----
    # NCHW -> NHWC, pad spatially (H: 1,2 / W: 1,1) and channels 3 -> 8, flatten.
    x_nhwc = jnp.transpose(x, (0, 2, 3, 1)).astype(jnp.float32)
    x_pad = jnp.pad(x_nhwc, ((0, 0), (1, 2), (1, 1), (0, CIN_PAD - Cin)))
    x_flat = x_pad.reshape(N, canvas, CIN_PAD)

    def prep_w(w, cin_pad=None):
        cout, cin, kh, kw = w.shape
        w_ = jnp.transpose(w, (2, 3, 1, 0)).astype(jnp.float32)   # (kh, kw, cin, cout)
        if cin_pad is not None and cin_pad > cin:
            w_ = jnp.pad(w_, ((0, 0), (0, 0), (0, cin_pad - cin), (0, 0)))
            cin = cin_pad
        return w_.reshape(kh * kw * cin, cout)                    # row = tap*cin + ci

    ws, bs = [], []
    for li, (w, b) in enumerate(params):
        w2 = prep_w(w, cin_pad=CIN_PAD if li == 0 else None)
        b2 = b.reshape(1, -1).astype(jnp.float32)
        if li == 4:   # pad Cout 1 -> 8
            w2 = jnp.pad(w2, ((0, 0), (0, COUT_PAD - w2.shape[1])))
            b2 = jnp.pad(b2, ((0, 0), (0, COUT_PAD - b2.shape[1])))
        ws.append(w2)
        bs.append(b2)

    # Validity mask over the (H, Wp) computed grid: last 2 columns of each row
    # are "wrap" garbage and must be zeroed before repadding.
    col = jnp.arange(M, dtype=jnp.int32) % Wp
    mask = (col < W).astype(jnp.float32).reshape(M, 1)

    kernel = functools.partial(_fcn_kernel, H, Wp)

    def full_spec(shape):
        return pl.BlockSpec(shape, lambda n: (0,) * len(shape))

    in_specs = [pl.BlockSpec((1, canvas, CIN_PAD), lambda n: (n, 0, 0))]
    for w2, b2 in zip(ws, bs):
        in_specs.append(full_spec(w2.shape))
        in_specs.append(full_spec(b2.shape))
    in_specs.append(full_spec(mask.shape))

    flops = 2 * N * H * W * 9 * (3 * 32 + 3 * 32 * 32 + 32 * 1)
    bytes_accessed = 4 * (x_flat.size + N * M * COUT_PAD
                          + sum(w.size for w in ws) + sum(b.size for b in bs)
                          + mask.size)

    out = pl.pallas_call(
        kernel,
        out_shape=jax.ShapeDtypeStruct((N, M, COUT_PAD), jnp.float32),
        grid_spec=pltpu.PrefetchScalarGridSpec(
            num_scalar_prefetch=0,
            grid=(N,),
            in_specs=in_specs,
            out_specs=pl.BlockSpec((1, M, COUT_PAD), lambda n: (n, 0, 0)),
            scratch_shapes=[pltpu.VMEM((canvas, 32), jnp.float32),
                            pltpu.VMEM((canvas, 32), jnp.float32)],
        ),
        compiler_params=pltpu.CompilerParams(
            dimension_semantics=("parallel",),   # batch across TCs on v7x
        ),
        cost_estimate=pl.CostEstimate(flops=int(flops), transcendentals=0,
                                      bytes_accessed=int(bytes_accessed)),
    )(x_flat, ws[0], bs[0], ws[1], bs[1], ws[2], bs[2],
      ws[3], bs[3], ws[4], bs[4], mask)

    # (N, H*Wp, 8) -> drop garbage columns & channel padding -> NCHW (N, 1, H, W)
    y = out.reshape(N, H, Wp, COUT_PAD)[:, :, :W, :1]
    return jnp.transpose(y, (0, 3, 1, 2))


if __name__ == "__main__":
    key = jax.random.PRNGKey(0)
    keys = jax.random.split(key, 11)

    N, C, H, W = 2, 3, 16, 16
    x = jax.random.normal(keys[0], (N, C, H, W), dtype=jnp.float32)

    layer_chans = [(3, 32), (32, 32), (32, 32), (32, 32), (32, 1)]
    params = []
    for li, (cin, cout) in enumerate(layer_chans):
        wk, bk = keys[1 + 2 * li], keys[2 + 2 * li]
        w = jax.random.normal(wk, (cout, cin, 3, 3), dtype=jnp.float32) \
            * (1.0 / (3.0 * (cin ** 0.5)))
        b = jax.random.normal(bk, (cout,), dtype=jnp.float32) * 0.1
        params.append((w, b))

    out = fcn_forward(x, params)
    out = jax.block_until_ready(out)

    # Pure-JAX reference (matches the PyTorch FCN forward).
    ref = x
    for (w, b) in params:
        ref = lax.conv_general_dilated(
            ref, w, window_strides=(1, 1), padding=((1, 1), (1, 1)),
            dimension_numbers=('NCHW', 'OIHW', 'NCHW'))
        ref = jnp.maximum(ref + b.reshape(1, -1, 1, 1), 0.0)

    assert out.shape == ref.shape == (N, 1, H, W), (out.shape, ref.shape)
    max_err = float(jnp.max(jnp.abs(out - ref)))
    assert jnp.allclose(out, ref, atol=3e-2, rtol=3e-2), max_err

    print("KERNEL_OK")
</pallas_src>

<mosaic_0001>
module attributes {stable_mosaic.version = 11 : i64} {
  func.func @_fcn_kernel(%arg0: i32, %arg1: memref<1x342x8xf32, #tpu.memory_space<vmem>>, %arg2: memref<72x32xf32, #tpu.memory_space<vmem>>, %arg3: memref<1x32xf32, #tpu.memory_space<vmem>>, %arg4: memref<288x32xf32, #tpu.memory_space<vmem>>, %arg5: memref<1x32xf32, #tpu.memory_space<vmem>>, %arg6: memref<288x32xf32, #tpu.memory_space<vmem>>, %arg7: memref<1x32xf32, #tpu.memory_space<vmem>>, %arg8: memref<288x32xf32, #tpu.memory_space<vmem>>, %arg9: memref<1x32xf32, #tpu.memory_space<vmem>>, %arg10: memref<288x8xf32, #tpu.memory_space<vmem>>, %arg11: memref<1x8xf32, #tpu.memory_space<vmem>>, %arg12: memref<288x1xf32, #tpu.memory_space<vmem>>, %arg13: memref<1x288x8xf32, #tpu.memory_space<vmem>>, %arg14: memref<342x32xf32, #tpu.memory_space<vmem>>, %arg15: memref<342x32xf32, #tpu.memory_space<vmem>>) attributes {dimension_semantics = [#tpu.dimension_semantics<parallel>], iteration_bounds = array<i64: 2>, scalar_prefetch = 0 : i64, scratch_operands = 2 : i64, tpu.core_type = #tpu.core_type<tc>, window_params = [{transform_indices = @transform_0, window_bounds = array<i64: 1, 342, 8>}, {pipeline_mode = #tpu.pipeline_mode<synchronous>, transform_indices = @transform_1, window_bounds = array<i64: 72, 32>}, {pipeline_mode = #tpu.pipeline_mode<synchronous>, transform_indices = @transform_2, window_bounds = array<i64: 1, 32>}, {pipeline_mode = #tpu.pipeline_mode<synchronous>, transform_indices = @transform_3, window_bounds = array<i64: 288, 32>}, {pipeline_mode = #tpu.pipeline_mode<synchronous>, transform_indices = @transform_4, window_bounds = array<i64: 1, 32>}, {pipeline_mode = #tpu.pipeline_mode<synchronous>, transform_indices = @transform_5, window_bounds = array<i64: 288, 32>}, {pipeline_mode = #tpu.pipeline_mode<synchronous>, transform_indices = @transform_6, window_bounds = array<i64: 1, 32>}, {pipeline_mode = #tpu.pipeline_mode<synchronous>, transform_indices = @transform_7, window_bounds = array<i64: 288, 32>}, {pipeline_mode = #tpu.pipeline_mode<synchronous>, transform_indices = @transform_8, window_bounds = array<i64: 1, 32>}, {pipeline_mode = #tpu.pipeline_mode<synchronous>, transform_indices = @transform_9, window_bounds = array<i64: 288, 8>}, {pipeline_mode = #tpu.pipeline_mode<synchronous>, transform_indices = @transform_10, window_bounds = array<i64: 1, 8>}, {pipeline_mode = #tpu.pipeline_mode<synchronous>, transform_indices = @transform_11, window_bounds = array<i64: 288, 1>}, {transform_indices = @transform_12, window_bounds = array<i64: 1, 288, 8>}]} {
    %c0 = arith.constant 0 : index
    %c0_0 = arith.constant 0 : index
    %0 = vector.load %arg12[%c0, %c0_0] : memref<288x1xf32, #tpu.memory_space<vmem>>, vector<288x1xf32>
    %cst = arith.constant 0.000000e+00 : f32
    %1 = vector.broadcast %cst : f32 to vector<342x32xf32>
    %c0_1 = arith.constant 0 : index
    %c0_2 = arith.constant 0 : index
    %2 = vector.load %arg14[%c0_1, %c0_2] : memref<342x32xf32, #tpu.memory_space<vmem>>, vector<342x32xf32>
    tpu.vector_store %arg14[%c0_1, %c0_2], %1 {strides = array<i32>} : memref<342x32xf32, #tpu.memory_space<vmem>>, vector<342x32xf32>,
    %cst_3 = arith.constant 0.000000e+00 : f32
    %3 = vector.broadcast %cst_3 : f32 to vector<342x32xf32>
    %c0_4 = arith.constant 0 : index
    %c0_5 = arith.constant 0 : index
    %4 = vector.load %arg15[%c0_4, %c0_5] : memref<342x32xf32, #tpu.memory_space<vmem>>, vector<342x32xf32>
    tpu.vector_store %arg15[%c0_4, %c0_5], %3 {strides = array<i32>} : memref<342x32xf32, #tpu.memory_space<vmem>>, vector<342x32xf32>,
    %cst_6 = arith.constant 0.000000e+00 : f32
    %5 = vector.broadcast %cst_6 : f32 to vector<288x32xf32>
    %c0_7 = arith.constant 0 : index
    %c0_8 = arith.constant 0 : index
    %c0_9 = arith.constant 0 : index
    %6 = vector.load %arg1[%c0_7, %c0_8, %c0_9] : memref<1x342x8xf32, #tpu.memory_space<vmem>>, vector<1x288x8xf32>
    %7 = vector.shape_cast %6 : vector<1x288x8xf32> to vector<288x8xf32>
    %c0_10 = arith.constant 0 : index
    %c0_11 = arith.constant 0 : index
    %8 = vector.load %arg2[%c0_10, %c0_11] : memref<72x32xf32, #tpu.memory_space<vmem>>, vector<8x32xf32>
    %cst_12 = arith.constant dense<0.000000e+00> : vector<288x32xf32>
    %9 = tpu.matmul %7, %8, %cst_12 {dimension_numbers = #tpu.dot_dimension_numbers<[1], [0], [0], [1], [0, 0, 1, 1], [], []>} : vector<288x8xf32>, vector<8x32xf32>, vector<288x32xf32> -> vector<288x32xf32>
    %10 = arith.addf %5, %9 : vector<288x32xf32>
    %c0_13 = arith.constant 0 : index
    %c1 = arith.constant 1 : index
    %c0_14 = arith.constant 0 : index
    %11 = vector.load %arg1[%c0_13, %c1, %c0_14] : memref<1x342x8xf32, #tpu.memory_space<vmem>>, vector<1x288x8xf32>
    %12 = vector.shape_cast %11 : vector<1x288x8xf32> to vector<288x8xf32>
    %c8 = arith.constant 8 : index
    %c0_15 = arith.constant 0 : index
    %13 = vector.load %arg2[%c8, %c0_15] : memref<72x32xf32, #tpu.memory_space<vmem>>, vector<8x32xf32>
    %cst_16 = arith.constant dense<0.000000e+00> : vector<288x32xf32>
    %14 = tpu.matmul %12, %13, %cst_16 {dimension_numbers = #tpu.dot_dimension_numbers<[1], [0], [0], [1], [0, 0, 1, 1], [], []>} : vector<288x8xf32>, vector<8x32xf32>, vector<288x32xf32> -> vector<288x32xf32>
    %15 = arith.addf %10, %14 : vector<288x32xf32>
    %c0_17 = arith.constant 0 : index
    %c2 = arith.constant 2 : index
    %c0_18 = arith.constant 0 : index
    %16 = vector.load %arg1[%c0_17, %c2, %c0_18] : memref<1x342x8xf32, #tpu.memory_space<vmem>>, vector<1x288x8xf32>
    %17 = vector.shape_cast %16 : vector<1x288x8xf32> to vector<288x8xf32>
    %c16 = arith.constant 16 : index
    %c0_19 = arith.constant 0 : index
    %18 = vector.load %arg2[%c16, %c0_19] : memref<72x32xf32, #tpu.memory_space<vmem>>, vector<8x32xf32>
    %cst_20 = arith.constant dense<0.000000e+00> : vector<288x32xf32>
    %19 = tpu.matmul %17, %18, %cst_20 {dimension_numbers = #tpu.dot_dimension_numbers<[1], [0], [0], [1], [0, 0, 1, 1], [], []>} : vector<288x8xf32>, vector<8x32xf32>, vector<288x32xf32> -> vector<288x32xf32>
    %20 = arith.addf %15, %19 : vector<288x32xf32>
    %c0_21 = arith.constant 0 : index
    %c18 = arith.constant 18 : index
    %c0_22 = arith.constant 0 : index
    %21 = vector.load %arg1[%c0_21, %c18, %c0_22] : memref<1x342x8xf32, #tpu.memory_space<vmem>>, vector<1x288x8xf32>
    %22 = vector.shape_cast %21 : vector<1x288x8xf32> to vector<288x8xf32>
    %c24 = arith.constant 24 : index
    %c0_23 = arith.constant 0 : index
    %23 = vector.load %arg2[%c24, %c0_23] : memref<72x32xf32, #tpu.memory_space<vmem>>, vector<8x32xf32>
    %cst_24 = arith.constant dense<0.000000e+00> : vector<288x32xf32>
    %24 = tpu.matmul %22, %23, %cst_24 {dimension_numbers = #tpu.dot_dimension_numbers<[1], [0], [0], [1], [0, 0, 1, 1], [], []>} : vector<288x8xf32>, vector<8x32xf32>, vector<288x32xf32> -> vector<288x32xf32>
    %25 = arith.addf %20, %24 : vector<288x32xf32>
    %c0_25 = arith.constant 0 : index
    %c19 = arith.constant 19 : index
    %c0_26 = arith.constant 0 : index
    %26 = vector.load %arg1[%c0_25, %c19, %c0_26] : memref<1x342x8xf32, #tpu.memory_space<vmem>>, vector<1x288x8xf32>
    %27 = vector.shape_cast %26 : vector<1x288x8xf32> to vector<288x8xf32>
    %c32 = arith.constant 32 : index
    %c0_27 = arith.constant 0 : index
    %28 = vector.load %arg2[%c32, %c0_27] : memref<72x32xf32, #tpu.memory_space<vmem>>, vector<8x32xf32>
    %cst_28 = arith.constant dense<0.000000e+00> : vector<288x32xf32>
    %29 = tpu.matmul %27, %28, %cst_28 {dimension_numbers = #tpu.dot_dimension_numbers<[1], [0], [0], [1], [0, 0, 1, 1], [], []>} : vector<288x8xf32>, vector<8x32xf32>, vector<288x32xf32> -> vector<288x32xf32>
    %30 = arith.addf %25, %29 : vector<288x32xf32>
    %c0_29 = arith.constant 0 : index
    %c20 = arith.constant 20 : index
    %c0_30 = arith.constant 0 : index
    %31 = vector.load %arg1[%c0_29, %c20, %c0_30] : memref<1x342x8xf32, #tpu.memory_space<vmem>>, vector<1x288x8xf32>
    %32 = vector.shape_cast %31 : vector<1x288x8xf32> to vector<288x8xf32>
    %c40 = arith.constant 40 : index
    %c0_31 = arith.constant 0 : index
    %33 = vector.load %arg2[%c40, %c0_31] : memref<72x32xf32, #tpu.memory_space<vmem>>, vector<8x32xf32>
    %cst_32 = arith.constant dense<0.000000e+00> : vector<288x32xf32>
    %34 = tpu.matmul %32, %33, %cst_32 {dimension_numbers = #tpu.dot_dimension_numbers<[1], [0], [0], [1], [0, 0, 1, 1], [], []>} : vector<288x8xf32>, vector<8x32xf32>, vector<288x32xf32> -> vector<288x32xf32>
    %35 = arith.addf %30, %34 : vector<288x32xf32>
    %c0_33 = arith.constant 0 : index
    %c36 = arith.constant 36 : index
    %c0_34 = arith.constant 0 : index
    %36 = vector.load %arg1[%c0_33, %c36, %c0_34] : memref<1x342x8xf32, #tpu.memory_space<vmem>>, vector<1x288x8xf32>
    %37 = vector.shape_cast %36 : vector<1x288x8xf32> to vector<288x8xf32>
    %c48 = arith.constant 48 : index
    %c0_35 = arith.constant 0 : index
    %38 = vector.load %arg2[%c48, %c0_35] : memref<72x32xf32, #tpu.memory_space<vmem>>, vector<8x32xf32>
    %cst_36 = arith.constant dense<0.000000e+00> : vector<288x32xf32>
    %39 = tpu.matmul %37, %38, %cst_36 {dimension_numbers = #tpu.dot_dimension_numbers<[1], [0], [0], [1], [0, 0, 1, 1], [], []>} : vector<288x8xf32>, vector<8x32xf32>, vector<288x32xf32> -> vector<288x32xf32>
    %40 = arith.addf %35, %39 : vector<288x32xf32>
    %c0_37 = arith.constant 0 : index
    %c37 = arith.constant 37 : index
    %c0_38 = arith.constant 0 : index
    %41 = vector.load %arg1[%c0_37, %c37, %c0_38] : memref<1x342x8xf32, #tpu.memory_space<vmem>>, vector<1x288x8xf32>
    %42 = vector.shape_cast %41 : vector<1x288x8xf32> to vector<288x8xf32>
    %c56 = arith.constant 56 : index
    %c0_39 = arith.constant 0 : index
    %43 = vector.load %arg2[%c56, %c0_39] : memref<72x32xf32, #tpu.memory_space<vmem>>, vector<8x32xf32>
    %cst_40 = arith.constant dense<0.000000e+00> : vector<288x32xf32>
    %44 = tpu.matmul %42, %43, %cst_40 {dimension_numbers = #tpu.dot_dimension_numbers<[1], [0], [0], [1], [0, 0, 1, 1], [], []>} : vector<288x8xf32>, vector<8x32xf32>, vector<288x32xf32> -> vector<288x32xf32>
    %45 = arith.addf %40, %44 : vector<288x32xf32>
    %c0_41 = arith.constant 0 : index
    %c38 = arith.constant 38 : index
    %c0_42 = arith.constant 0 : index
    %46 = vector.load %arg1[%c0_41, %c38, %c0_42] : memref<1x342x8xf32, #tpu.memory_space<vmem>>, vector<1x288x8xf32>
    %47 = vector.shape_cast %46 : vector<1x288x8xf32> to vector<288x8xf32>
    %c64 = arith.constant 64 : index
    %c0_43 = arith.constant 0 : index
    %48 = vector.load %arg2[%c64, %c0_43] : memref<72x32xf32, #tpu.memory_space<vmem>>, vector<8x32xf32>
    %cst_44 = arith.constant dense<0.000000e+00> : vector<288x32xf32>
    %49 = tpu.matmul %47, %48, %cst_44 {dimension_numbers = #tpu.dot_dimension_numbers<[1], [0], [0], [1], [0, 0, 1, 1], [], []>} : vector<288x8xf32>, vector<8x32xf32>, vector<288x32xf32> -> vector<288x32xf32>
    %50 = arith.addf %45, %49 : vector<288x32xf32>
    %c0_45 = arith.constant 0 : index
    %c0_46 = arith.constant 0 : index
    %51 = vector.load %arg3[%c0_45, %c0_46] : memref<1x32xf32, #tpu.memory_space<vmem>>, vector<1x32xf32>
    %52 = vector.broadcast %51 : vector<1x32xf32> to vector<288x32xf32>
    %53 = arith.addf %50, %52 : vector<288x32xf32>
    %cst_47 = arith.constant 0.000000e+00 : f32
    %54 = vector.broadcast %cst_47 : f32 to vector<288x32xf32>
    %55 = arith.maximumf %53, %54 : vector<288x32xf32>
    %56 = vector.broadcast %0 : vector<288x1xf32> to vector<288x32xf32>
    %57 = arith.mulf %55, %56 : vector<288x32xf32>
    %c19_48 = arith.constant 19 : index
    %c0_49 = arith.constant 0 : index
    %58 = vector.load %arg14[%c19_48, %c0_49] : memref<342x32xf32, #tpu.memory_space<vmem>>, vector<288x32xf32>
    tpu.vector_store %arg14[%c19_48, %c0_49], %57 {strides = array<i32>} : memref<342x32xf32, #tpu.memory_space<vmem>>, vector<288x32xf32>,
    %cst_50 = arith.constant 0.000000e+00 : f32
    %59 = vector.broadcast %cst_50 : f32 to vector<288x32xf32>
    %c0_51 = arith.constant 0 : index
    %c0_52 = arith.constant 0 : index
    %60 = vector.load %arg14[%c0_51, %c0_52] : memref<342x32xf32, #tpu.memory_space<vmem>>, vector<288x32xf32>
    %c0_53 = arith.constant 0 : index
    %c0_54 = arith.constant 0 : index
    %61 = vector.load %arg4[%c0_53, %c0_54] : memref<288x32xf32, #tpu.memory_space<vmem>>, vector<32x32xf32>
    %cst_55 = arith.constant dense<0.000000e+00> : vector<288x32xf32>
    %62 = tpu.matmul %60, %61, %cst_55 {dimension_numbers = #tpu.dot_dimension_numbers<[1], [0], [0], [1], [0, 0, 1, 1], [], []>} : vector<288x32xf32>, vector<32x32xf32>, vector<288x32xf32> -> vector<288x32xf32>
    %63 = arith.addf %59, %62 : vector<288x32xf32>
    %c1_56 = arith.constant 1 : index
    %c0_57 = arith.constant 0 : index
    %64 = vector.load %arg14[%c1_56, %c0_57] : memref<342x32xf32, #tpu.memory_space<vmem>>, vector<288x32xf32>
    %c32_58 = arith.constant 32 : index
    %c0_59 = arith.constant 0 : index
    %65 = vector.load %arg4[%c32_58, %c0_59] : memref<288x32xf32, #tpu.memory_space<vmem>>, vector<32x32xf32>
    %cst_60 = arith.constant dense<0.000000e+00> : vector<288x32xf32>
    %66 = tpu.matmul %64, %65, %cst_60 {dimension_numbers = #tpu.dot_dimension_numbers<[1], [0], [0], [1], [0, 0, 1, 1], [], []>} : vector<288x32xf32>, vector<32x32xf32>, vector<288x32xf32> -> vector<288x32xf32>
    %67 = arith.addf %63, %66 : vector<288x32xf32>
    %c2_61 = arith.constant 2 : index
    %c0_62 = arith.constant 0 : index
    %68 = vector.load %arg14[%c2_61, %c0_62] : memref<342x32xf32, #tpu.memory_space<vmem>>, vector<288x32xf32>
    %c64_63 = arith.constant 64 : index
    %c0_64 = arith.constant 0 : index
    %69 = vector.load %arg4[%c64_63, %c0_64] : memref<288x32xf32, #tpu.memory_space<vmem>>, vector<32x32xf32>
    %cst_65 = arith.constant dense<0.000000e+00> : vector<288x32xf32>
    %70 = tpu.matmul %68, %69, %cst_65 {dimension_numbers = #tpu.dot_dimension_numbers<[1], [0], [0], [1], [0, 0, 1, 1], [], []>} : vector<288x32xf32>, vector<32x32xf32>, vector<288x32xf32> -> vector<288x32xf32>
    %71 = arith.addf %67, %70 : vector<288x32xf32>
    %c18_66 = arith.constant 18 : index
    %c0_67 = arith.constant 0 : index
    %72 = vector.load %arg14[%c18_66, %c0_67] : memref<342x32xf32, #tpu.memory_space<vmem>>, vector<288x32xf32>
    %c96 = arith.constant 96 : index
    %c0_68 = arith.constant 0 : index
    %73 = vector.load %arg4[%c96, %c0_68] : memref<288x32xf32, #tpu.memory_space<vmem>>, vector<32x32xf32>
    %cst_69 = arith.constant dense<0.000000e+00> : vector<288x32xf32>
    %74 = tpu.matmul %72, %73, %cst_69 {dimension_numbers = #tpu.dot_dimension_numbers<[1], [0], [0], [1], [0, 0, 1, 1], [], []>} : vector<288x32xf32>, vector<32x32xf32>, vector<288x32xf32> -> vector<288x32xf32>
    %75 = arith.addf %71, %74 : vector<288x32xf32>
    %c19_70 = arith.constant 19 : index
    %c0_71 = arith.constant 0 : index
    %76 = vector.load %arg14[%c19_70, %c0_71] : memref<342x32xf32, #tpu.memory_space<vmem>>, vector<288x32xf32>
    %c128 = arith.constant 128 : index
    %c0_72 = arith.constant 0 : index
    %77 = vector.load %arg4[%c128, %c0_72] : memref<288x32xf32, #tpu.memory_space<vmem>>, vector<32x32xf32>
    %cst_73 = arith.constant dense<0.000000e+00> : vector<288x32xf32>
    %78 = tpu.matmul %76, %77, %cst_73 {dimension_numbers = #tpu.dot_dimension_numbers<[1], [0], [0], [1], [0, 0, 1, 1], [], []>} : vector<288x32xf32>, vector<32x32xf32>, vector<288x32xf32> -> vector<288x32xf32>
    %79 = arith.addf %75, %78 : vector<288x32xf32>
    %c20_74 = arith.constant 20 : index
    %c0_75 = arith.constant 0 : index
    %80 = vector.load %arg14[%c20_74, %c0_75] : memref<342x32xf32, #tpu.memory_space<vmem>>, vector<288x32xf32>
    %c160 = arith.constant 160 : index
    %c0_76 = arith.constant 0 : index
    %81 = vector.load %arg4[%c160, %c0_76] : memref<288x32xf32, #tpu.memory_space<vmem>>, vector<32x32xf32>
    %cst_77 = arith.constant dense<0.000000e+00> : vector<288x32xf32>
    %82 = tpu.matmul %80, %81, %cst_77 {dimension_numbers = #tpu.dot_dimension_numbers<[1], [0], [0], [1], [0, 0, 1, 1], [], []>} : vector<288x32xf32>, vector<32x32xf32>, vector<288x32xf32> -> vector<288x32xf32>
    %83 = arith.addf %79, %82 : vector<288x32xf32>
    %c36_78 = arith.constant 36 : index
    %c0_79 = arith.constant 0 : index
    %84 = vector.load %arg14[%c36_78, %c0_79] : memref<342x32xf32, #tpu.memory_space<vmem>>, vector<288x32xf32>
    %c192 = arith.constant 192 : index
    %c0_80 = arith.constant 0 : index
    %85 = vector.load %arg4[%c192, %c0_80] : memref<288x32xf32, #tpu.memory_space<vmem>>, vector<32x32xf32>
    %cst_81 = arith.constant dense<0.000000e+00> : vector<288x32xf32>
    %86 = tpu.matmul %84, %85, %cst_81 {dimension_numbers = #tpu.dot_dimension_numbers<[1], [0], [0], [1], [0, 0, 1, 1], [], []>} : vector<288x32xf32>, vector<32x32xf32>, vector<288x32xf32> -> vector<288x32xf32>
    %87 = arith.addf %83, %86 : vector<288x32xf32>
    %c37_82 = arith.constant 37 : index
    %c0_83 = arith.constant 0 : index
    %88 = vector.load %arg14[%c37_82, %c0_83] : memref<342x32xf32, #tpu.memory_space<vmem>>, vector<288x32xf32>
    %c224 = arith.constant 224 : index
    %c0_84 = arith.constant 0 : index
    %89 = vector.load %arg4[%c224, %c0_84] : memref<288x32xf32, #tpu.memory_space<vmem>>, vector<32x32xf32>
    %cst_85 = arith.constant dense<0.000000e+00> : vector<288x32xf32>
    %90 = tpu.matmul %88, %89, %cst_85 {dimension_numbers = #tpu.dot_dimension_numbers<[1], [0], [0], [1], [0, 0, 1, 1], [], []>} : vector<288x32xf32>, vector<32x32xf32>, vector<288x32xf32> -> vector<288x32xf32>
    %91 = arith.addf %87, %90 : vector<288x32xf32>
    %c38_86 = arith.constant 38 : index
    %c0_87 = arith.constant 0 : index
    %92 = vector.load %arg14[%c38_86, %c0_87] : memref<342x32xf32, #tpu.memory_space<vmem>>, vector<288x32xf32>
    %c256 = arith.constant 256 : index
    %c0_88 = arith.constant 0 : index
    %93 = vector.load %arg4[%c256, %c0_88] : memref<288x32xf32, #tpu.memory_space<vmem>>, vector<32x32xf32>
    %cst_89 = arith.constant dense<0.000000e+00> : vector<288x32xf32>
    %94 = tpu.matmul %92, %93, %cst_89 {dimension_numbers = #tpu.dot_dimension_numbers<[1], [0], [0], [1], [0, 0, 1, 1], [], []>} : vector<288x32xf32>, vector<32x32xf32>, vector<288x32xf32> -> vector<288x32xf32>
    %95 = arith.addf %91, %94 : vector<288x32xf32>
    %c0_90 = arith.constant 0 : index
    %c0_91 = arith.constant 0 : index
    %96 = vector.load %arg5[%c0_90, %c0_91] : memref<1x32xf32, #tpu.memory_space<vmem>>, vector<1x32xf32>
    %97 = vector.broadcast %96 : vector<1x32xf32> to vector<288x32xf32>
    %98 = arith.addf %95, %97 : vector<288x32xf32>
    %cst_92 = arith.constant 0.000000e+00 : f32
    %99 = vector.broadcast %cst_92 : f32 to vector<288x32xf32>
    %100 = arith.maximumf %98, %99 : vector<288x32xf32>
    %101 = vector.broadcast %0 : vector<288x1xf32> to vector<288x32xf32>
    %102 = arith.mulf %100, %101 : vector<288x32xf32>
    %c19_93 = arith.constant 19 : index
    %c0_94 = arith.constant 0 : index
    %103 = vector.load %arg15[%c19_93, %c0_94] : memref<342x32xf32, #tpu.memory_space<vmem>>, vector<288x32xf32>
    tpu.vector_store %arg15[%c19_93, %c0_94], %102 {strides = array<i32>} : memref<342x32xf32, #tpu.memory_space<vmem>>, vector<288x32xf32>,
    %cst_95 = arith.constant 0.000000e+00 : f32
    %104 = vector.broadcast %cst_95 : f32 to vector<288x32xf32>
    %c0_96 = arith.constant 0 : index
    %c0_97 = arith.constant 0 : index
    %105 = vector.load %arg15[%c0_96, %c0_97] : memref<342x32xf32, #tpu.memory_space<vmem>>, vector<288x32xf32>
    %c0_98 = arith.constant 0 : index
    %c0_99 = arith.constant 0 : index
    %106 = vector.load %arg6[%c0_98, %c0_99] : memref<288x32xf32, #tpu.memory_space<vmem>>, vector<32x32xf32>
    %cst_100 = arith.constant dense<0.000000e+00> : vector<288x32xf32>
    %107 = tpu.matmul %105, %106, %cst_100 {dimension_numbers = #tpu.dot_dimension_numbers<[1], [0], [0], [1], [0, 0, 1, 1], [], []>} : vector<288x32xf32>, vector<32x32xf32>, vector<288x32xf32> -> vector<288x32xf32>
    %108 = arith.addf %104, %107 : vector<288x32xf32>
    %c1_101 = arith.constant 1 : index
    %c0_102 = arith.constant 0 : index
    %109 = vector.load %arg15[%c1_101, %c0_102] : memref<342x32xf32, #tpu.memory_space<vmem>>, vector<288x32xf32>
    %c32_103 = arith.constant 32 : index
    %c0_104 = arith.constant 0 : index
    %110 = vector.load %arg6[%c32_103, %c0_104] : memref<288x32xf32, #tpu.memory_space<vmem>>, vector<32x32xf32>
    %cst_105 = arith.constant dense<0.000000e+00> : vector<288x32xf32>
    %111 = tpu.matmul %109, %110, %cst_105 {dimension_numbers = #tpu.dot_dimension_numbers<[1], [0], [0], [1], [0, 0, 1, 1], [], []>} : vector<288x32xf32>, vector<32x32xf32>, vector<288x32xf32> -> vector<288x32xf32>
    %112 = arith.addf %108, %111 : vector<288x32xf32>
    %c2_106 = arith.constant 2 : index
    %c0_107 = arith.constant 0 : index
    %113 = vector.load %arg15[%c2_106, %c0_107] : memref<342x32xf32, #tpu.memory_space<vmem>>, vector<288x32xf32>
    %c64_108 = arith.constant 64 : index
    %c0_109 = arith.constant 0 : index
    %114 = vector.load %arg6[%c64_108, %c0_109] : memref<288x32xf32, #tpu.memory_space<vmem>>, vector<32x32xf32>
    %cst_110 = arith.constant dense<0.000000e+00> : vector<288x32xf32>
    %115 = tpu.matmul %113, %114, %cst_110 {dimension_numbers = #tpu.dot_dimension_numbers<[1], [0], [0], [1], [0, 0, 1, 1], [], []>} : vector<288x32xf32>, vector<32x32xf32>, vector<288x32xf32> -> vector<288x32xf32>
    %116 = arith.addf %112, %115 : vector<288x32xf32>
    %c18_111 = arith.constant 18 : index
    %c0_112 = arith.constant 0 : index
    %117 = vector.load %arg15[%c18_111, %c0_112] : memref<342x32xf32, #tpu.memory_space<vmem>>, vector<288x32xf32>
    %c96_113 = arith.constant 96 : index
    %c0_114 = arith.constant 0 : index
    %118 = vector.load %arg6[%c96_113, %c0_114] : memref<288x32xf32, #tpu.memory_space<vmem>>, vector<32x32xf32>
    %cst_115 = arith.constant dense<0.000000e+00> : vector<288x32xf32>
    %119 = tpu.matmul %117, %118, %cst_115 {dimension_numbers = #tpu.dot_dimension_numbers<[1], [0], [0], [1], [0, 0, 1, 1], [], []>} : vector<288x32xf32>, vector<32x32xf32>, vector<288x32xf32> -> vector<288x32xf32>
    %120 = arith.addf %116, %119 : vector<288x32xf32>
    %c19_116 = arith.constant 19 : index
    %c0_117 = arith.constant 0 : index
    %121 = vector.load %arg15[%c19_116, %c0_117] : memref<342x32xf32, #tpu.memory_space<vmem>>, vector<288x32xf32>
    %c128_118 = arith.constant 128 : index
    %c0_119 = arith.constant 0 : index
    %122 = vector.load %arg6[%c128_118, %c0_119] : memref<288x32xf32, #tpu.memory_space<vmem>>, vector<32x32xf32>
    %cst_120 = arith.constant dense<0.000000e+00> : vector<288x32xf32>
    %123 = tpu.matmul %121, %122, %cst_120 {dimension_numbers = #tpu.dot_dimension_numbers<[1], [0], [0], [1], [0, 0, 1, 1], [], []>} : vector<288x32xf32>, vector<32x32xf32>, vector<288x32xf32> -> vector<288x32xf32>
    %124 = arith.addf %120, %123 : vector<288x32xf32>
    %c20_121 = arith.constant 20 : index
    %c0_122 = arith.constant 0 : index
    %125 = vector.load %arg15[%c20_121, %c0_122] : memref<342x32xf32, #tpu.memory_space<vmem>>, vector<288x32xf32>
    %c160_123 = arith.constant 160 : index
    %c0_124 = arith.constant 0 : index
    %126 = vector.load %arg6[%c160_123, %c0_124] : memref<288x32xf32, #tpu.memory_space<vmem>>, vector<32x32xf32>
    %cst_125 = arith.constant dense<0.000000e+00> : vector<288x32xf32>
    %127 = tpu.matmul %125, %126, %cst_125 {dimension_numbers = #tpu.dot_dimension_numbers<[1], [0], [0], [1], [0, 0, 1, 1], [], []>} : vector<288x32xf32>, vector<32x32xf32>, vector<288x32xf32> -> vector<288x32xf32>
    %128 = arith.addf %124, %127 : vector<288x32xf32>
    %c36_126 = arith.constant 36 : index
    %c0_127 = arith.constant 0 : index
    %129 = vector.load %arg15[%c36_126, %c0_127] : memref<342x32xf32, #tpu.memory_space<vmem>>, vector<288x32xf32>
    %c192_128 = arith.constant 192 : index
    %c0_129 = arith.constant 0 : index
    %130 = vector.load %arg6[%c192_128, %c0_129] : memref<288x32xf32, #tpu.memory_space<vmem>>, vector<32x32xf32>
    %cst_130 = arith.constant dense<0.000000e+00> : vector<288x32xf32>
    %131 = tpu.matmul %129, %130, %cst_130 {dimension_numbers = #tpu.dot_dimension_numbers<[1], [0], [0], [1], [0, 0, 1, 1], [], []>} : vector<288x32xf32>, vector<32x32xf32>, vector<288x32xf32> -> vector<288x32xf32>
    %132 = arith.addf %128, %131 : vector<288x32xf32>
    %c37_131 = arith.constant 37 : index
    %c0_132 = arith.constant 0 : index
    %133 = vector.load %arg15[%c37_131, %c0_132] : memref<342x32xf32, #tpu.memory_space<vmem>>, vector<288x32xf32>
    %c224_133 = arith.constant 224 : index
    %c0_134 = arith.constant 0 : index
    %134 = vector.load %arg6[%c224_133, %c0_134] : memref<288x32xf32, #tpu.memory_space<vmem>>, vector<32x32xf32>
    %cst_135 = arith.constant dense<0.000000e+00> : vector<288x32xf32>
    %135 = tpu.matmul %133, %134, %cst_135 {dimension_numbers = #tpu.dot_dimension_numbers<[1], [0], [0], [1], [0, 0, 1, 1], [], []>} : vector<288x32xf32>, vector<32x32xf32>, vector<288x32xf32> -> vector<288x32xf32>
    %136 = arith.addf %132, %135 : vector<288x32xf32>
    %c38_136 = arith.constant 38 : index
    %c0_137 = arith.constant 0 : index
    %137 = vector.load %arg15[%c38_136, %c0_137] : memref<342x32xf32, #tpu.memory_space<vmem>>, vector<288x32xf32>
    %c256_138 = arith.constant 256 : index
    %c0_139 = arith.constant 0 : index
    %138 = vector.load %arg6[%c256_138, %c0_139] : memref<288x32xf32, #tpu.memory_space<vmem>>, vector<32x32xf32>
    %cst_140 = arith.constant dense<0.000000e+00> : vector<288x32xf32>
    %139 = tpu.matmul %137, %138, %cst_140 {dimension_numbers = #tpu.dot_dimension_numbers<[1], [0], [0], [1], [0, 0, 1, 1], [], []>} : vector<288x32xf32>, vector<32x32xf32>, vector<288x32xf32> -> vector<288x32xf32>
    %140 = arith.addf %136, %139 : vector<288x32xf32>
    %c0_141 = arith.constant 0 : index
    %c0_142 = arith.constant 0 : index
    %141 = vector.load %arg7[%c0_141, %c0_142] : memref<1x32xf32, #tpu.memory_space<vmem>>, vector<1x32xf32>
    %142 = vector.broadcast %141 : vector<1x32xf32> to vector<288x32xf32>
    %143 = arith.addf %140, %142 : vector<288x32xf32>
    %cst_143 = arith.constant 0.000000e+00 : f32
    %144 = vector.broadcast %cst_143 : f32 to vector<288x32xf32>
    %145 = arith.maximumf %143, %144 : vector<288x32xf32>
    %146 = vector.broadcast %0 : vector<288x1xf32> to vector<288x32xf32>
    %147 = arith.mulf %145, %146 : vector<288x32xf32>
    %c19_144 = arith.constant 19 : index
    %c0_145 = arith.constant 0 : index
    %148 = vector.load %arg14[%c19_144, %c0_145] : memref<342x32xf32, #tpu.memory_space<vmem>>, vector<288x32xf32>
    tpu.vector_store %arg14[%c19_144, %c0_145], %147 {strides = array<i32>} : memref<342x32xf32, #tpu.memory_space<vmem>>, vector<288x32xf32>,
    %cst_146 = arith.constant 0.000000e+00 : f32
    %149 = vector.broadcast %cst_146 : f32 to vector<288x32xf32>
    %c0_147 = arith.constant 0 : index
    %c0_148 = arith.constant 0 : index
    %150 = vector.load %arg14[%c0_147, %c0_148] : memref<342x32xf32, #tpu.memory_space<vmem>>, vector<288x32xf32>
    %c0_149 = arith.constant 0 : index
    %c0_150 = arith.constant 0 : index
    %151 = vector.load %arg8[%c0_149, %c0_150] : memref<288x32xf32, #tpu.memory_space<vmem>>, vector<32x32xf32>
    %cst_151 = arith.constant dense<0.000000e+00> : vector<288x32xf32>
    %152 = tpu.matmul %150, %151, %cst_151 {dimension_numbers = #tpu.dot_dimension_numbers<[1], [0], [0], [1], [0, 0, 1, 1], [], []>} : vector<288x32xf32>, vector<32x32xf32>, vector<288x32xf32> -> vector<288x32xf32>
    %153 = arith.addf %149, %152 : vector<288x32xf32>
    %c1_152 = arith.constant 1 : index
    %c0_153 = arith.constant 0 : index
    %154 = vector.load %arg14[%c1_152, %c0_153] : memref<342x32xf32, #tpu.memory_space<vmem>>, vector<288x32xf32>
    %c32_154 = arith.constant 32 : index
    %c0_155 = arith.constant 0 : index
    %155 = vector.load %arg8[%c32_154, %c0_155] : memref<288x32xf32, #tpu.memory_space<vmem>>, vector<32x32xf32>
    %cst_156 = arith.constant dense<0.000000e+00> : vector<288x32xf32>
    %156 = tpu.matmul %154, %155, %cst_156 {dimension_numbers = #tpu.dot_dimension_numbers<[1], [0], [0], [1], [0, 0, 1, 1], [], []>} : vector<288x32xf32>, vector<32x32xf32>, vector<288x32xf32> -> vector<288x32xf32>
    %157 = arith.addf %153, %156 : vector<288x32xf32>
    %c2_157 = arith.constant 2 : index
    %c0_158 = arith.constant 0 : index
    %158 = vector.load %arg14[%c2_157, %c0_158] : memref<342x32xf32, #tpu.memory_space<vmem>>, vector<288x32xf32>
    %c64_159 = arith.constant 64 : index
    %c0_160 = arith.constant 0 : index
    %159 = vector.load %arg8[%c64_159, %c0_160] : memref<288x32xf32, #tpu.memory_space<vmem>>, vector<32x32xf32>
    %cst_161 = arith.constant dense<0.000000e+00> : vector<288x32xf32>
    %160 = tpu.matmul %158, %159, %cst_161 {dimension_numbers = #tpu.dot_dimension_numbers<[1], [0], [0], [1], [0, 0, 1, 1], [], []>} : vector<288x32xf32>, vector<32x32xf32>, vector<288x32xf32> -> vector<288x32xf32>
    %161 = arith.addf %157, %160 : vector<288x32xf32>
    %c18_162 = arith.constant 18 : index
    %c0_163 = arith.constant 0 : index
    %162 = vector.load %arg14[%c18_162, %c0_163] : memref<342x32xf32, #tpu.memory_space<vmem>>, vector<288x32xf32>
    %c96_164 = arith.constant 96 : index
    %c0_165 = arith.constant 0 : index
    %163 = vector.load %arg8[%c96_164, %c0_165] : memref<288x32xf32, #tpu.memory_space<vmem>>, vector<32x32xf32>
    %cst_166 = arith.constant dense<0.000000e+00> : vector<288x32xf32>
    %164 = tpu.matmul %162, %163, %cst_166 {dimension_numbers = #tpu.dot_dimension_numbers<[1], [0], [0], [1], [0, 0, 1, 1], [], []>} : vector<288x32xf32>, vector<32x32xf32>, vector<288x32xf32> -> vector<288x32xf32>
    %165 = arith.addf %161, %164 : vector<288x32xf32>
    %c19_167 = arith.constant 19 : index
    %c0_168 = arith.constant 0 : index
    %166 = vector.load %arg14[%c19_167, %c0_168] : memref<342x32xf32, #tpu.memory_space<vmem>>, vector<288x32xf32>
    %c128_169 = arith.constant 128 : index
    %c0_170 = arith.constant 0 : index
    %167 = vector.load %arg8[%c128_169, %c0_170] : memref<288x32xf32, #tpu.memory_space<vmem>>, vector<32x32xf32>
    %cst_171 = arith.constant dense<0.000000e+00> : vector<288x32xf32>
    %168 = tpu.matmul %166, %167, %cst_171 {dimension_numbers = #tpu.dot_dimension_numbers<[1], [0], [0], [1], [0, 0, 1, 1], [], []>} : vector<288x32xf32>, vector<32x32xf32>, vector<288x32xf32> -> vector<288x32xf32>
    %169 = arith.addf %165, %168 : vector<288x32xf32>
    %c20_172 = arith.constant 20 : index
    %c0_173 = arith.constant 0 : index
    %170 = vector.load %arg14[%c20_172, %c0_173] : memref<342x32xf32, #tpu.memory_space<vmem>>, vector<288x32xf32>
    %c160_174 = arith.constant 160 : index
    %c0_175 = arith.constant 0 : index
    %171 = vector.load %arg8[%c160_174, %c0_175] : memref<288x32xf32, #tpu.memory_space<vmem>>, vector<32x32xf32>
    %cst_176 = arith.constant dense<0.000000e+00> : vector<288x32xf32>
    %172 = tpu.matmul %170, %171, %cst_176 {dimension_numbers = #tpu.dot_dimension_numbers<[1], [0], [0], [1], [0, 0, 1, 1], [], []>} : vector<288x32xf32>, vector<32x32xf32>, vector<288x32xf32> -> vector<288x32xf32>
    %173 = arith.addf %169, %172 : vector<288x32xf32>
    %c36_177 = arith.constant 36 : index
    %c0_178 = arith.constant 0 : index
    %174 = vector.load %arg14[%c36_177, %c0_178] : memref<342x32xf32, #tpu.memory_space<vmem>>, vector<288x32xf32>
    %c192_179 = arith.constant 192 : index
    %c0_180 = arith.constant 0 : index
    %175 = vector.load %arg8[%c192_179, %c0_180] : memref<288x32xf32, #tpu.memory_space<vmem>>, vector<32x32xf32>
    %cst_181 = arith.constant dense<0.000000e+00> : vector<288x32xf32>
    %176 = tpu.matmul %174, %175, %cst_181 {dimension_numbers = #tpu.dot_dimension_numbers<[1], [0], [0], [1], [0, 0, 1, 1], [], []>} : vector<288x32xf32>, vector<32x32xf32>, vector<288x32xf32> -> vector<288x32xf32>
    %177 = arith.addf %173, %176 : vector<288x32xf32>
    %c37_182 = arith.constant 37 : index
    %c0_183 = arith.constant 0 : index
    %178 = vector.load %arg14[%c37_182, %c0_183] : memref<342x32xf32, #tpu.memory_space<vmem>>, vector<288x32xf32>
    %c224_184 = arith.constant 224 : index
    %c0_185 = arith.constant 0 : index
    %179 = vector.load %arg8[%c224_184, %c0_185] : memref<288x32xf32, #tpu.memory_space<vmem>>, vector<32x32xf32>
    %cst_186 = arith.constant dense<0.000000e+00> : vector<288x32xf32>
    %180 = tpu.matmul %178, %179, %cst_186 {dimension_numbers = #tpu.dot_dimension_numbers<[1], [0], [0], [1], [0, 0, 1, 1], [], []>} : vector<288x32xf32>, vector<32x32xf32>, vector<288x32xf32> -> vector<288x32xf32>
    %181 = arith.addf %177, %180 : vector<288x32xf32>
    %c38_187 = arith.constant 38 : index
    %c0_188 = arith.constant 0 : index
    %182 = vector.load %arg14[%c38_187, %c0_188] : memref<342x32xf32, #tpu.memory_space<vmem>>, vector<288x32xf32>
    %c256_189 = arith.constant 256 : index
    %c0_190 = arith.constant 0 : index
    %183 = vector.load %arg8[%c256_189, %c0_190] : memref<288x32xf32, #tpu.memory_space<vmem>>, vector<32x32xf32>
    %cst_191 = arith.constant dense<0.000000e+00> : vector<288x32xf32>
    %184 = tpu.matmul %182, %183, %cst_191 {dimension_numbers = #tpu.dot_dimension_numbers<[1], [0], [0], [1], [0, 0, 1, 1], [], []>} : vector<288x32xf32>, vector<32x32xf32>, vector<288x32xf32> -> vector<288x32xf32>
    %185 = arith.addf %181, %184 : vector<288x32xf32>
    %c0_192 = arith.constant 0 : index
    %c0_193 = arith.constant 0 : index
    %186 = vector.load %arg9[%c0_192, %c0_193] : memref<1x32xf32, #tpu.memory_space<vmem>>, vector<1x32xf32>
    %187 = vector.broadcast %186 : vector<1x32xf32> to vector<288x32xf32>
    %188 = arith.addf %185, %187 : vector<288x32xf32>
    %cst_194 = arith.constant 0.000000e+00 : f32
    %189 = vector.broadcast %cst_194 : f32 to vector<288x32xf32>
    %190 = arith.maximumf %188, %189 : vector<288x32xf32>
    %191 = vector.broadcast %0 : vector<288x1xf32> to vector<288x32xf32>
    %192 = arith.mulf %190, %191 : vector<288x32xf32>
    %c19_195 = arith.constant 19 : index
    %c0_196 = arith.constant 0 : index
    %193 = vector.load %arg15[%c19_195, %c0_196] : memref<342x32xf32, #tpu.memory_space<vmem>>, vector<288x32xf32>
    tpu.vector_store %arg15[%c19_195, %c0_196], %192 {strides = array<i32>} : memref<342x32xf32, #tpu.memory_space<vmem>>, vector<288x32xf32>,
    %cst_197 = arith.constant 0.000000e+00 : f32
    %194 = vector.broadcast %cst_197 : f32 to vector<288x8xf32>
    %c0_198 = arith.constant 0 : index
    %c0_199 = arith.constant 0 : index
    %195 = vector.load %arg15[%c0_198, %c0_199] : memref<342x32xf32, #tpu.memory_space<vmem>>, vector<288x32xf32>
    %c0_200 = arith.constant 0 : index
    %c0_201 = arith.constant 0 : index
    %196 = vector.load %arg10[%c0_200, %c0_201] : memref<288x8xf32, #tpu.memory_space<vmem>>, vector<32x8xf32>
    %cst_202 = arith.constant dense<0.000000e+00> : vector<288x8xf32>
    %197 = tpu.matmul %195, %196, %cst_202 {dimension_numbers = #tpu.dot_dimension_numbers<[1], [0], [0], [1], [0, 0, 1, 1], [], []>} : vector<288x32xf32>, vector<32x8xf32>, vector<288x8xf32> -> vector<288x8xf32>
    %198 = arith.addf %194, %197 : vector<288x8xf32>
    %c1_203 = arith.constant 1 : index
    %c0_204 = arith.constant 0 : index
    %199 = vector.load %arg15[%c1_203, %c0_204] : memref<342x32xf32, #tpu.memory_space<vmem>>, vector<288x32xf32>
    %c32_205 = arith.constant 32 : index
    %c0_206 = arith.constant 0 : index
    %200 = vector.load %arg10[%c32_205, %c0_206] : memref<288x8xf32, #tpu.memory_space<vmem>>, vector<32x8xf32>
    %cst_207 = arith.constant dense<0.000000e+00> : vector<288x8xf32>
    %201 = tpu.matmul %199, %200, %cst_207 {dimension_numbers = #tpu.dot_dimension_numbers<[1], [0], [0], [1], [0, 0, 1, 1], [], []>} : vector<288x32xf32>, vector<32x8xf32>, vector<288x8xf32> -> vector<288x8xf32>
    %202 = arith.addf %198, %201 : vector<288x8xf32>
    %c2_208 = arith.constant 2 : index
    %c0_209 = arith.constant 0 : index
    %203 = vector.load %arg15[%c2_208, %c0_209] : memref<342x32xf32, #tpu.memory_space<vmem>>, vector<288x32xf32>
    %c64_210 = arith.constant 64 : index
    %c0_211 = arith.constant 0 : index
    %204 = vector.load %arg10[%c64_210, %c0_211] : memref<288x8xf32, #tpu.memory_space<vmem>>, vector<32x8xf32>
    %cst_212 = arith.constant dense<0.000000e+00> : vector<288x8xf32>
    %205 = tpu.matmul %203, %204, %cst_212 {dimension_numbers = #tpu.dot_dimension_numbers<[1], [0], [0], [1], [0, 0, 1, 1], [], []>} : vector<288x32xf32>, vector<32x8xf32>, vector<288x8xf32> -> vector<288x8xf32>
    %206 = arith.addf %202, %205 : vector<288x8xf32>
    %c18_213 = arith.constant 18 : index
    %c0_214 = arith.constant 0 : index
    %207 = vector.load %arg15[%c18_213, %c0_214] : memref<342x32xf32, #tpu.memory_space<vmem>>, vector<288x32xf32>
    %c96_215 = arith.constant 96 : index
    %c0_216 = arith.constant 0 : index
    %208 = vector.load %arg10[%c96_215, %c0_216] : memref<288x8xf32, #tpu.memory_space<vmem>>, vector<32x8xf32>
    %cst_217 = arith.constant dense<0.000000e+00> : vector<288x8xf32>
    %209 = tpu.matmul %207, %208, %cst_217 {dimension_numbers = #tpu.dot_dimension_numbers<[1], [0], [0], [1], [0, 0, 1, 1], [], []>} : vector<288x32xf32>, vector<32x8xf32>, vector<288x8xf32> -> vector<288x8xf32>
    %210 = arith.addf %206, %209 : vector<288x8xf32>
    %c19_218 = arith.constant 19 : index
    %c0_219 = arith.constant 0 : index
    %211 = vector.load %arg15[%c19_218, %c0_219] : memref<342x32xf32, #tpu.memory_space<vmem>>, vector<288x32xf32>
    %c128_220 = arith.constant 128 : index
    %c0_221 = arith.constant 0 : index
    %212 = vector.load %arg10[%c128_220, %c0_221] : memref<288x8xf32, #tpu.memory_space<vmem>>, vector<32x8xf32>
    %cst_222 = arith.constant dense<0.000000e+00> : vector<288x8xf32>
    %213 = tpu.matmul %211, %212, %cst_222 {dimension_numbers = #tpu.dot_dimension_numbers<[1], [0], [0], [1], [0, 0, 1, 1], [], []>} : vector<288x32xf32>, vector<32x8xf32>, vector<288x8xf32> -> vector<288x8xf32>
    %214 = arith.addf %210, %213 : vector<288x8xf32>
    %c20_223 = arith.constant 20 : index
    %c0_224 = arith.constant 0 : index
    %215 = vector.load %arg15[%c20_223, %c0_224] : memref<342x32xf32, #tpu.memory_space<vmem>>, vector<288x32xf32>
    %c160_225 = arith.constant 160 : index
    %c0_226 = arith.constant 0 : index
    %216 = vector.load %arg10[%c160_225, %c0_226] : memref<288x8xf32, #tpu.memory_space<vmem>>, vector<32x8xf32>
    %cst_227 = arith.constant dense<0.000000e+00> : vector<288x8xf32>
    %217 = tpu.matmul %215, %216, %cst_227 {dimension_numbers = #tpu.dot_dimension_numbers<[1], [0], [0], [1], [0, 0, 1, 1], [], []>} : vector<288x32xf32>, vector<32x8xf32>, vector<288x8xf32> -> vector<288x8xf32>
    %218 = arith.addf %214, %217 : vector<288x8xf32>
    %c36_228 = arith.constant 36 : index
    %c0_229 = arith.constant 0 : index
    %219 = vector.load %arg15[%c36_228, %c0_229] : memref<342x32xf32, #tpu.memory_space<vmem>>, vector<288x32xf32>
    %c192_230 = arith.constant 192 : index
    %c0_231 = arith.constant 0 : index
    %220 = vector.load %arg10[%c192_230, %c0_231] : memref<288x8xf32, #tpu.memory_space<vmem>>, vector<32x8xf32>
    %cst_232 = arith.constant dense<0.000000e+00> : vector<288x8xf32>
    %221 = tpu.matmul %219, %220, %cst_232 {dimension_numbers = #tpu.dot_dimension_numbers<[1], [0], [0], [1], [0, 0, 1, 1], [], []>} : vector<288x32xf32>, vector<32x8xf32>, vector<288x8xf32> -> vector<288x8xf32>
    %222 = arith.addf %218, %221 : vector<288x8xf32>
    %c37_233 = arith.constant 37 : index
    %c0_234 = arith.constant 0 : index
    %223 = vector.load %arg15[%c37_233, %c0_234] : memref<342x32xf32, #tpu.memory_space<vmem>>, vector<288x32xf32>
    %c224_235 = arith.constant 224 : index
    %c0_236 = arith.constant 0 : index
    %224 = vector.load %arg10[%c224_235, %c0_236] : memref<288x8xf32, #tpu.memory_space<vmem>>, vector<32x8xf32>
    %cst_237 = arith.constant dense<0.000000e+00> : vector<288x8xf32>
    %225 = tpu.matmul %223, %224, %cst_237 {dimension_numbers = #tpu.dot_dimension_numbers<[1], [0], [0], [1], [0, 0, 1, 1], [], []>} : vector<288x32xf32>, vector<32x8xf32>, vector<288x8xf32> -> vector<288x8xf32>
    %226 = arith.addf %222, %225 : vector<288x8xf32>
    %c38_238 = arith.constant 38 : index
    %c0_239 = arith.constant 0 : index
    %227 = vector.load %arg15[%c38_238, %c0_239] : memref<342x32xf32, #tpu.memory_space<vmem>>, vector<288x32xf32>
    %c256_240 = arith.constant 256 : index
    %c0_241 = arith.constant 0 : index
    %228 = vector.load %arg10[%c256_240, %c0_241] : memref<288x8xf32, #tpu.memory_space<vmem>>, vector<32x8xf32>
    %cst_242 = arith.constant dense<0.000000e+00> : vector<288x8xf32>
    %229 = tpu.matmul %227, %228, %cst_242 {dimension_numbers = #tpu.dot_dimension_numbers<[1], [0], [0], [1], [0, 0, 1, 1], [], []>} : vector<288x32xf32>, vector<32x8xf32>, vector<288x8xf32> -> vector<288x8xf32>
    %230 = arith.addf %226, %229 : vector<288x8xf32>
    %c0_243 = arith.constant 0 : index
    %c0_244 = arith.constant 0 : index
    %231 = vector.load %arg11[%c0_243, %c0_244] : memref<1x8xf32, #tpu.memory_space<vmem>>, vector<1x8xf32>
    %232 = vector.broadcast %231 : vector<1x8xf32> to vector<288x8xf32>
    %233 = arith.addf %230, %232 : vector<288x8xf32>
    %cst_245 = arith.constant 0.000000e+00 : f32
    %234 = vector.broadcast %cst_245 : f32 to vector<288x8xf32>
    %235 = arith.maximumf %233, %234 : vector<288x8xf32>
    %c0_246 = arith.constant 0 : index
    %c0_247 = arith.constant 0 : index
    %c0_248 = arith.constant 0 : index
    %236 = vector.load %arg13[%c0_246, %c0_247, %c0_248] : memref<1x288x8xf32, #tpu.memory_space<vmem>>, vector<1x288x8xf32>
    %237 = vector.shape_cast %236 : vector<1x288x8xf32> to vector<288x8xf32>
    %238 = vector.shape_cast %235 : vector<288x8xf32> to vector<1x288x8xf32>
    tpu.vector_store %arg13[%c0_246, %c0_247, %c0_248], %238 {strides = array<i32>} : memref<1x288x8xf32, #tpu.memory_space<vmem>>, vector<1x288x8xf32>,
    return
  }
  func.func @transform_0(%arg0: i32) -> (i32, i32, i32) {
    %c0_i32 = arith.constant 0 : i32
    %c0_i32_0 = arith.constant 0 : i32
    %c0_i32_1 = arith.constant 0 : i32
    return %arg0, %c0_i32, %c0_i32_0 : i32, i32, i32
  }
  func.func @transform_1(%arg0: i32) -> (i32, i32) {
    %c0_i32 = arith.constant 0 : i32
    %c0_i32_0 = arith.constant 0 : i32
    %c0_i32_1 = arith.constant 0 : i32
    return %c0_i32, %c0_i32_0 : i32, i32
  }
  func.func @transform_2(%arg0: i32) -> (i32, i32) {
    %c0_i32 = arith.constant 0 : i32
    %c0_i32_0 = arith.constant 0 : i32
    %c0_i32_1 = arith.constant 0 : i32
    return %c0_i32, %c0_i32_0 : i32, i32
  }
  func.func @transform_3(%arg0: i32) -> (i32, i32) {
    %c0_i32 = arith.constant 0 : i32
    %c0_i32_0 = arith.constant 0 : i32
    %c0_i32_1 = arith.constant 0 : i32
    return %c0_i32, %c0_i32_0 : i32, i32
  }
  func.func @transform_4(%arg0: i32) -> (i32, i32) {
    %c0_i32 = arith.constant 0 : i32
    %c0_i32_0 = arith.constant 0 : i32
    %c0_i32_1 = arith.constant 0 : i32
    return %c0_i32, %c0_i32_0 : i32, i32
  }
  func.func @transform_5(%arg0: i32) -> (i32, i32) {
    %c0_i32 = arith.constant 0 : i32
    %c0_i32_0 = arith.constant 0 : i32
    %c0_i32_1 = arith.constant 0 : i32
    return %c0_i32, %c0_i32_0 : i32, i32
  }
  func.func @transform_6(%arg0: i32) -> (i32, i32) {
    %c0_i32 = arith.constant 0 : i32
    %c0_i32_0 = arith.constant 0 : i32
    %c0_i32_1 = arith.constant 0 : i32
    return %c0_i32, %c0_i32_0 : i32, i32
  }
  func.func @transform_7(%arg0: i32) -> (i32, i32) {
    %c0_i32 = arith.constant 0 : i32
    %c0_i32_0 = arith.constant 0 : i32
    %c0_i32_1 = arith.constant 0 : i32
    return %c0_i32, %c0_i32_0 : i32, i32
  }
  func.func @transform_8(%arg0: i32) -> (i32, i32) {
    %c0_i32 = arith.constant 0 : i32
    %c0_i32_0 = arith.constant 0 : i32
    %c0_i32_1 = arith.constant 0 : i32
    return %c0_i32, %c0_i32_0 : i32, i32
  }
  func.func @transform_9(%arg0: i32) -> (i32, i32) {
    %c0_i32 = arith.constant 0 : i32
    %c0_i32_0 = arith.constant 0 : i32
    %c0_i32_1 = arith.constant 0 : i32
    return %c0_i32, %c0_i32_0 : i32, i32
  }
  func.func @transform_10(%arg0: i32) -> (i32, i32) {
    %c0_i32 = arith.constant 0 : i32
    %c0_i32_0 = arith.constant 0 : i32
    %c0_i32_1 = arith.constant 0 : i32
    return %c0_i32, %c0_i32_0 : i32, i32
  }
  func.func @transform_11(%arg0: i32) -> (i32, i32) {
    %c0_i32 = arith.constant 0 : i32
    %c0_i32_0 = arith.constant 0 : i32
    %c0_i32_1 = arith.constant 0 : i32
    return %c0_i32, %c0_i32_0 : i32, i32
  }
  func.func @transform_12(%arg0: i32) -> (i32, i32, i32) {
    %c0_i32 = arith.constant 0 : i32
    %c0_i32_0 = arith.constant 0 : i32
    %c0_i32_1 = arith.constant 0 : i32
    return %arg0, %c0_i32, %c0_i32_0 : i32, i32, i32
  }
}

</mosaic_0001>

<bundles_post_ra>
// kernel: tpu_custom_call.1
= control target key start
LH: loop header
LB: loop body
LE: loop exit
PB: predicated region body
PF: predicated region fallthrough
CT: control target
= control target key end

     0   :  { %s28374_s21 = smov 0   ;;  %s32569_s0 = inlined_call_operand.vmem [shape: f32[2,342,8], index: 0, kind: input, shape index: {}]   ;;  %s32570_s1 = inlined_call_operand.vmem [shape: f32[72,32], index: 1, kind: input, shape index: {}]   ;;  %s32571_s2 = inlined_call_operand.vmem [shape: f32[1,32], index: 2, kind: input, shape index: {}]   ;;  %s32572_s3 = inlined_call_operand.vmem [shape: f32[288,32], index: 3, kind: input, shape index: {}]   ;;  %s32573_s4 = inlined_call_operand.vmem [shape: f32[1,32], index: 4, kind: input, shape index: {}]   ;;  %s32574_s5 = inlined_call_operand.vmem [shape: f32[288,32], index: 5, kind: input, shape index: {}]   ;;  %s32575_s6 = inlined_call_operand.vmem [shape: f32[1,32], index: 6, kind: input, shape index: {}]   ;;  %s32576_s7 = inlined_call_operand.vmem [shape: f32[288,32], index: 7, kind: input, shape index: {}]   ;;  %s32577_s8 = inlined_call_operand.vmem [shape: f32[1,32], index: 8, kind: input, shape index: {}]   ;;  %s32578_s9 = inlined_call_operand.vmem [shape: f32[288,8], index: 9, kind: input, shape index: {}]   ;;  %s32579_s10 = inlined_call_operand.vmem [shape: f32[1,8], index: 10, kind: input, shape index: {}]   ;;  %s32580_s11 = inlined_call_operand.vmem [shape: f32[288,1], index: 11, kind: input, shape index: {}]   ;;  %s32581_s12 = inlined_call_operand.vmem [shape: f32[2,288,8], index: 12, kind: output, shape index: {}]  }
   0x1 LB: > { %s20411_s22 = sadd.s32 4294967295, %s28305_s21   ;;  %p20415_p0 = scmp.ge.s32.totalorder %s28305_s21, 1  ;;  %s28305_s21 = sphi %s28374_s21, %s22_s21  }
   0x2   : > { %p362_p1 = scmp.lt.s32.totalorder %s28305_s21, 3 }
   0x4   : > { %p363_p2 = pnand %p20415_p0, %p362_p1 }
   0x6   : > { %366 = sbr.rel (%p363_p2) target bundleno = 3761 (0xeb1), region = 68 }
   0xd   : > { %v611_v0 = vld [vmem:[%s32570_s1 + $0x8] sm:$0xff]  ;;  %v28388_v1 = vld [vmem:[%s32570_s1 + $0x20] sm:$0xff]  ;;  %p404_p3 = scmp.lt.s32.totalorder %s20411_s22, 1  ;;  %vm612_vm0 = vcmask 64512   ;;  %v28419_v10 = vld [vmem:[%s32570_s1 + $0x30] sm:$0xff]  ;;  %vm450_vm1 = vcmask 261120  }
   0xe   : > { %v574_v2 = vld [vmem:[%s32570_s1] sm:$0xff]  ;;  %23818 = vmatprep.subr.mxu1 %v611_v0  ;;  %24042 = vmatprep.subr.mxu0 %v28388_v1  ;;  %v2633_v3 = vld [vmem:[%s32570_s1 + $0x28] sm:$0xff]  ;;  %v28424_v11 = vld [vmem:[%s32570_s1 + $0x10] sm:$0xff] }
   0xf   : > { %23819 = vmatpush3.msra.mxu1 %v611_v0  ;;  %24043 = vmatpush3.msra.mxu0 %v28388_v1  ;;  %s32661_s22 = smov (!%p404_p3, %s20411_s22), 1  ;;  %v28503_v48 = vld [vmem:[%s32570_s1 + $0x38] sm:$0xff] }
  0x10   : > { %23874 = vmatprep.subr.mxu1 %v574_v2  ;;  %24098 = vmatprep.subr.mxu0 %v2633_v3  ;;  %s28284_s13 = smul.u32 344, %s32661_s22 }
  0x12   : > { %s28404_s16 = scalar_lea.vmem %s32569_s0, %s28284_s13 }
  0x13   : > { %v575_v4 = vld [vmem:[%s28404_s16 + $0x1] sm:$0xff]  ;;  %v2171_v5 = vld [vmem:[%s28404_s16 + $0x13] sm:$0xff]  ;;  %v576_v6 = vld [vmem:[%s28404_s16 + $0x9] sm:$0xff] }
  0x14   : > { %23820 = vmatprep.mubr.msk.f32.mxu1 %vm612_vm0, %v575_v4  ;;  %24044 = vmatprep.mubr.msk.f32.mxu0 %vm612_vm0, %v2171_v5  ;;  %v2172_v7 = vld [vmem:[%s28404_s16 + $0x1b] sm:$0xff]  ;;  %v577_v8 = vld [vmem:[%s28404_s16 + $0x11] sm:$0xff]  ;;  %v2173_v9 = vld [vmem:[%s28404_s16 + $0x23] sm:$0xff] }
  0x15   : > { %23821 = vmatmul.mubr.msk.f32.vlgmr.msra.gmra.mrb[0].mxu1 %vm612_vm0, %v576_v6  ;;  %24045 = vmatmul.mubr.msk.f32.vlgmr.msra.gmra.mrb[0].mxu0 %vm612_vm0, %v2172_v7  ;;  %v578_v12 = vld [vmem:[%s28404_s16 + $0x19] sm:$0xff]  ;;  %v2174_v13 = vld [vmem:[%s28404_s16 + $0x2b] sm:$0xff]  ;;  %v579_v14 = vld [vmem:[%s28404_s16 + $0x21] sm:$0xff] }
  0x16   : > { %23875 = vmatpush3.msra.mxu1 %v574_v2  ;;  %24099 = vmatpush3.msra.mxu0 %v2633_v3  ;;  %v2175_v15 = vld [vmem:[%s28404_s16 + $0x33] sm:$0xff]  ;;  %v580_v16 = vld [vmem:[%s28404_s16 + $0x29] sm:$0xff]  ;;  %v2176_v17 = vld [vmem:[%s28404_s16 + $0x3b] sm:$0xff] }
  0x17   : > { %23823 = vmatprep.mubr.msk.f32.mxu1 %vm612_vm0, %v577_v8  ;;  %24047 = vmatprep.mubr.msk.f32.mxu0 %vm612_vm0, %v2173_v9  ;;  %v581_v18 = vld [vmem:[%s28404_s16 + $0x31] sm:$0xff]  ;;  %v2177_v19 = vld [vmem:[%s28404_s16 + $0x43] sm:$0xff]  ;;  %v582_v20 = vld [vmem:[%s28404_s16 + $0x39] sm:$0xff] }
  0x18   : > { %24154 = vmatprep.subr.mxu0 %v28419_v10  ;;  %23930 = vmatprep.subr.mxu1 %v28424_v11  ;;  %v2178_v21 = vld [vmem:[%s28404_s16 + $0x4b] sm:$0xff]  ;;  %v583_v22 = vld [vmem:[%s28404_s16 + $0x41] sm:$0xff]  ;;  %v2179_v23 = vld [vmem:[%s28404_s16 + $0x53] sm:$0xff] }
  0x19   : > { %23824 = vmatmul.mubr.msk.f32.gmra.mrb[2].mxu1 %vm612_vm0, %v578_v12  ;;  %24048 = vmatmul.mubr.msk.f32.gmra.mrb[2].mxu0 %vm612_vm0, %v2174_v13  ;;  %v584_v24 = vld [vmem:[%s28404_s16 + $0x49] sm:$0xff]  ;;  %v2180_v25 = vld [vmem:[%s28404_s16 + $0x5b] sm:$0xff]  ;;  %v585_v26 = vld [vmem:[%s28404_s16 + $0x51] sm:$0xff] }
  0x1a   : > { %23826 = vmatprep.mubr.msk.f32.mxu1 %vm612_vm0, %v579_v14  ;;  %24050 = vmatprep.mubr.msk.f32.mxu0 %vm612_vm0, %v2175_v15  ;;  %v2181_v27 = vld [vmem:[%s28404_s16 + $0x63] sm:$0xff]  ;;  %v586_v28 = vld [vmem:[%s28404_s16 + $0x59] sm:$0xff]  ;;  %v2182_v29 = vld [vmem:[%s28404_s16 + $0x6b] sm:$0xff] }
  0x1b   : > { %v587_v30 = vld [vmem:[%s28404_s16 + $0x61] sm:$0xff]  ;;  %v2183_v31 = vld [vmem:[%s28404_s16 + $0x73] sm:$0xff]  ;;  %v588_v32 = vld [vmem:[%s28404_s16 + $0x69] sm:$0xff] }
  0x1c   : > { %v2184_v33 = vld [vmem:[%s28404_s16 + $0x7b] sm:$0xff]  ;;  %v589_v34 = vld [vmem:[%s28404_s16 + $0x71] sm:$0xff]  ;;  %v2185_v35 = vld [vmem:[%s28404_s16 + $0x83] sm:$0xff] }
  0x1d   : > { %23827 = vmatmul.mubr.msk.f32.gmra.mrb[4].mxu1 %vm612_vm0, %v580_v16  ;;  %24051 = vmatmul.mubr.msk.f32.gmra.mrb[4].mxu0 %vm612_vm0, %v2176_v17  ;;  %v590_v36 = vld [vmem:[%s28404_s16 + $0x79] sm:$0xff]  ;;  %v2186_v37 = vld [vmem:[%s28404_s16 + $0x8b] sm:$0xff]  ;;  %v591_v38 = vld [vmem:[%s28404_s16 + $0x81] sm:$0xff] }
  0x1e   : > { %23829 = vmatprep.mubr.msk.f32.mxu1 %vm612_vm0, %v581_v18  ;;  %24053 = vmatprep.mubr.msk.f32.mxu0 %vm612_vm0, %v2177_v19  ;;  %v2187_v39 = vld [vmem:[%s28404_s16 + $0x93] sm:$0xff]  ;;  %v592_v40 = vld [vmem:[%s28404_s16 + $0x89] sm:$0xff]  ;;  %v2188_v41 = vld [vmem:[%s28404_s16 + $0x9b] sm:$0xff] }
  0x1f   : > { %v593_v42 = vld [vmem:[%s28404_s16 + $0x91] sm:$0xff]  ;;  %v594_v44 = vld [vmem:[%s28404_s16 + $0x99] sm:$0xff]  ;;  %v595_v46 = vld [vmem:[%s28404_s16 + $0xa1] sm:$0xff] }
  0x20   : > { %v2597_v43 = vld [vmem:[%s28404_s16 + $0x14] sm:$0xff]  ;;  %v2598_v45 = vld [vmem:[%s28404_s16 + $0x1c] sm:$0xff]  ;;  %v28498_v47 = vld [vmem:[%s28404_s16 + $0x24] sm:$0xff] }
  0x21   : > { %23830 = vmatmul.mubr.msk.f32.gmra.mrb[6].mxu1 %vm612_vm0, %v582_v20  ;;  %24054 = vmatmul.mubr.msk.f32.gmra.mrb[6].mxu0 %vm612_vm0, %v2178_v21  ;;  %v596_v49 = vld [vmem:[%s28404_s16 + $0xa9] sm:$0xff]  ;;  %v597_v51 = vld [vmem:[%s28404_s16 + $0xb1] sm:$0xff]  ;;  %v598_v53 = vld [vmem:[%s28404_s16 + $0xb9] sm:$0xff] }
  0x22   : > { %23832 = vmatprep.mubr.msk.f32.mxu1 %vm612_vm0, %v583_v22  ;;  %24056 = vmatprep.mubr.msk.f32.mxu0 %vm612_vm0, %v2179_v23  ;;  %v28511_v50 = vld [vmem:[%s28404_s16 + $0x2c] sm:$0xff]  ;;  %v28517_v52 = vld [vmem:[%s28404_s16 + $0x34] sm:$0xff]  ;;  %v28528_v54 = vld [vmem:[%s28404_s16 + $0x3c] sm:$0xff] }
  0x23   : > { %v599_v55 = vld [vmem:[%s28404_s16 + $0xc1] sm:$0xff]  ;;  %v600_v57 = vld [vmem:[%s28404_s16 + $0xc9] sm:$0xff]  ;;  %v601_v59 = vld [vmem:[%s28404_s16 + $0xd1] sm:$0xff] }
  0x24   : > { %v28532_v56 = vld [vmem:[%s28404_s16 + $0x44] sm:$0xff]  ;;  %v28542_v58 = vld [vmem:[%s28404_s16 + $0x4c] sm:$0xff]  ;;  %v28546_v60 = vld [vmem:[%s28404_s16 + $0x54] sm:$0xff] }
  0x25   : > { %23833 = vmatmul.mubr.msk.f32.gmra.mrb[8].mxu1 %vm612_vm0, %v584_v24  ;;  %24057 = vmatmul.mubr.msk.f32.gmra.mrb[8].mxu0 %vm612_vm0, %v2180_v25  ;;  %v602_v61 = vld [vmem:[%s28404_s16 + $0xd9] sm:$0xff]  ;;  %v603_v63 = vld [vmem:[%s28404_s16 + $0xe1] sm:$0xff]  ;;  %v604_v2 = vld [vmem:[%s28404_s16 + $0xe9] sm:$0xff] }
  0x26   : > { %23835 = vmatprep.mubr.msk.f32.mxu1 %vm612_vm0, %v585_v26  ;;  %24059 = vmatprep.mubr.msk.f32.mxu0 %vm612_vm0, %v2181_v27  ;;  %v28556_v62 = vld [vmem:[%s28404_s16 + $0x5c] sm:$0xff]  ;;  %v28560_v0 = vld [vmem:[%s28404_s16 + $0x64] sm:$0xff]  ;;  %v28570_v3 = vld [vmem:[%s28404_s16 + $0x6c] sm:$0xff] }
  0x27   : > { %v605_v4 = vld [vmem:[%s28404_s16 + $0xf1] sm:$0xff]  ;;  %v606_v6 = vld [vmem:[%s28404_s16 + $0xf9] sm:$0xff]  ;;  %v607_v8 = vld [vmem:[%s28404_s16 + $0x101] sm:$0xff] }
  0x28   : > { %v28574_v5 = vld [vmem:[%s28404_s16 + $0x74] sm:$0xff]  ;;  %v28584_v7 = vld [vmem:[%s28404_s16 + $0x7c] sm:$0xff]  ;;  %v28588_v9 = vld [vmem:[%s28404_s16 + $0x84] sm:$0xff] }
  0x29   : > { %23836 = vmatmul.mubr.msk.f32.gmra.mrb[10].mxu1 %vm612_vm0, %v586_v28  ;;  %24060 = vmatmul.mubr.msk.f32.gmra.mrb[10].mxu0 %vm612_vm0, %v2182_v29  ;;  %v28598_v12 = vld [vmem:[%s28404_s16 + $0x8c] sm:$0xff]  ;;  %v28602_v14 = vld [vmem:[%s28404_s16 + $0x94] sm:$0xff]  ;;  %v28612_v16 = vld [vmem:[%s28404_s16 + $0x9c] sm:$0xff] }
  0x2a   : > { %23838 = vmatprep.mubr.msk.f32.mxu1 %vm612_vm0, %v587_v30  ;;  %24062 = vmatprep.mubr.msk.f32.mxu0 %vm612_vm0, %v2183_v31  ;;  %v609_v13 = vld [vmem:[%s28404_s16 + $0x111] sm:$0xff]  ;;  %v610_v15 = vld [vmem:[%s28404_s16 + $0x119] sm:$0xff]  ;;  %v28616_v18 = vld [vmem:[%s28404_s16 + $0xa4] sm:$0xff] }
  0x2b   : > { %v538_v17 = vld [vmem:[%s28404_s16] sm:$0xff]  ;;  %v539_v19 = vld [vmem:[%s28404_s16 + $0x8] sm:$0xff]  ;;  %v540_v21 = vld [vmem:[%s28404_s16 + $0x10] sm:$0xff] }
  0x2c   : > { %v28626_v20 = vld [vmem:[%s28404_s16 + $0xac] sm:$0xff]  ;;  %v28630_v22 = vld [vmem:[%s28404_s16 + $0xb4] sm:$0xff]  ;;  %v28644_v25 = vld [vmem:[%s28404_s16 + $0xbc] sm:$0xff] }
  0x2d   : > { %23839 = vmatmul.mubr.msk.f32.gmra.mrb[12].mxu1 %vm612_vm0, %v588_v32  ;;  %24063 = vmatmul.mubr.msk.f32.gmra.mrb[12].mxu0 %vm612_vm0, %v2184_v33  ;;  %v28635_v23 = vld [vmem:[%s32570_s1 + $0x18] sm:$0xff]  ;;  %v542_v26 = vld [vmem:[%s28404_s16 + $0x20] sm:$0xff]  ;;  %v28661_v28 = vld [vmem:[%s28404_s16 + $0xcc] sm:$0xff] }
  0x2e   : > { %23841 = vmatprep.mubr.msk.f32.mxu1 %vm612_vm0, %v589_v34  ;;  %24065 = vmatprep.mubr.msk.f32.mxu0 %vm612_vm0, %v2185_v35  ;;  %v541_v24 = vld [vmem:[%s28404_s16 + $0x18] sm:$0xff]  ;;  %v28650_v27 = vld [vmem:[%s28404_s16 + $0xc4] sm:$0xff]  ;;  %v544_v29 = vld [vmem:[%s28404_s16 + $0x30] sm:$0xff] }
  0x2f   : > { %v28665_v30 = vld [vmem:[%s28404_s16 + $0xd4] sm:$0xff]  ;;  %v28675_v32 = vld [vmem:[%s28404_s16 + $0xdc] sm:$0xff]  ;;  %v28679_v34 = vld [vmem:[%s28404_s16 + $0xe4] sm:$0xff] }
  0x30   : > { %v545_v31 = vld [vmem:[%s28404_s16 + $0x38] sm:$0xff]  ;;  %v546_v33 = vld [vmem:[%s28404_s16 + $0x40] sm:$0xff]  ;;  %v547_v35 = vld [vmem:[%s28404_s16 + $0x48] sm:$0xff] }
  0x31   : > { %23842 = vmatmul.mubr.msk.f32.gmra.mrb[14].mxu1 %vm612_vm0, %v590_v36  ;;  %24066 = vmatmul.mubr.msk.f32.gmra.mrb[14].mxu0 %vm612_vm0, %v2186_v37  ;;  %v28689_v36 = vld [vmem:[%s28404_s16 + $0xec] sm:$0xff] }
  0x32   : > { %23844 = vmatprep.mubr.msk.f32.mxu1 %vm612_vm0, %v591_v38  ;;  %24068 = vmatprep.mubr.msk.f32.mxu0 %vm612_vm0, %v2187_v39  ;;  %v548_v37 = vld [vmem:[%s28404_s16 + $0x50] sm:$0xff]  ;;  %v549_v39 = vld [vmem:[%s28404_s16 + $0x58] sm:$0xff] }
  0x33   : > { %v28693_v38 = vld [vmem:[%s28404_s16 + $0xf4] sm:$0xff] }
  0x35   : > { %23845 = vmatmul.mubr.msk.f32.gmra.mrb[16].mxu1 %vm612_vm0, %v592_v40  ;;  %24069 = vmatmul.mubr.msk.f32.gmra.mrb[16].mxu0 %vm612_vm0, %v2188_v41  ;;  %v28703_v40 = vld [vmem:[%s28404_s16 + $0xfc] sm:$0xff] }
  0x36   : > { %23847 = vmatprep.mubr.msk.f32.mxu1 %vm612_vm0, %v593_v42  ;;  %24100 = vmatprep.mubr.msk.f32.mxu0 %vm612_vm0, %v2597_v43  ;;  %v550_v41 = vld [vmem:[%s28404_s16 + $0x60] sm:$0xff]  ;;  %v551_v43 = vld [vmem:[%s28404_s16 + $0x68] sm:$0xff] }
  0x37   : > { %v28707_v42 = vld [vmem:[%s28404_s16 + $0x104] sm:$0xff] }
  0x39   : > { %23848 = vmatmul.mubr.msk.f32.gmra.mrb[18].mxu1 %vm612_vm0, %v594_v44  ;;  %24101 = vmatmul.mubr.msk.f32.vlgmr.msra.gmra.mrb[0].mxu0 %vm612_vm0, %v2598_v45  ;;  %v28717_v44 = vld [vmem:[%s28404_s16 + $0x10c] sm:$0xff] }
  0x3a   : > { %24155 = vmatpush3.msra.mxu0 %v28419_v10  ;;  %23850 = vmatprep.mubr.msk.f32.mxu1 %vm612_vm0, %v595_v46  ;;  %v608_v10 = vld [vmem:[%s28404_s16 + $0x109] sm:$0xff]  ;;  %v28721_v46 = vld [vmem:[%s28404_s16 + $0x114] sm:$0xff] }
  0x3b   : > { %24103 = vmatprep.mubr.msk.f32.mxu0 %vm612_vm0, %v28498_v47  ;;  %24210 = vmatprep.subr.mxu0 %v28503_v48  ;;  %v552_v45 = vld [vmem:[%s28404_s16 + $0x70] sm:$0xff] }
  0x3d   : > { %23851 = vmatmul.mubr.msk.f32.gmra.mrb[20].mxu1 %vm612_vm0, %v596_v49  ;;  %24104 = vmatmul.mubr.msk.f32.gmra.mrb[2].mxu0 %vm612_vm0, %v28511_v50  ;;  %v553_v49 = vld [vmem:[%s28404_s16 + $0x78] sm:$0xff] }
  0x3e   : > { %23853 = vmatprep.mubr.msk.f32.mxu1 %vm612_vm0, %v597_v51  ;;  %24106 = vmatprep.mubr.msk.f32.mxu0 %vm612_vm0, %v28517_v52  ;;  %v28731_v51 = vld [vmem:[%s28404_s16 + $0x11c] sm:$0xff] }
  0x41   : > { %23854 = vmatmul.mubr.msk.f32.gmra.mrb[22].mxu1 %vm612_vm0, %v598_v53  ;;  %24107 = vmatmul.mubr.msk.f32.gmra.mrb[4].mxu0 %vm612_vm0, %v28528_v54  ;;  %v554_v53 = vld [vmem:[%s28404_s16 + $0x80] sm:$0xff] }
  0x42   : > { %23856 = vmatprep.mubr.msk.f32.mxu1 %vm612_vm0, %v599_v55  ;;  %24109 = vmatprep.mubr.msk.f32.mxu0 %vm612_vm0, %v28532_v56  ;;  %v28735_v55 = vld [vmem:[%s28404_s16 + $0x124] sm:$0xff] }
  0x45   : > { %23857 = vmatmul.mubr.msk.f32.gmra.mrb[24].mxu1 %vm612_vm0, %v600_v57  ;;  %24110 = vmatmul.mubr.msk.f32.gmra.mrb[6].mxu0 %vm612_vm0, %v28542_v58  ;;  %v555_v57 = vld [vmem:[%s28404_s16 + $0x88] sm:$0xff] }
  0x46   : > { %23859 = vmatprep.mubr.msk.f32.mxu1 %vm612_vm0, %v601_v59  ;;  %24112 = vmatprep.mubr.msk.f32.mxu0 %vm612_vm0, %v28546_v60  ;;  %v28745_v59 = vld [vmem:[%s28404_s16 + $0x12c] sm:$0xff] }
  0x49   : > { %23860 = vmatmul.mubr.msk.f32.gmra.mrb[26].mxu1 %vm612_vm0, %v602_v61  ;;  %24113 = vmatmul.mubr.msk.f32.gmra.mrb[8].mxu0 %vm612_vm0, %v28556_v62  ;;  %v556_v61 = vld [vmem:[%s28404_s16 + $0x90] sm:$0xff] }
  0x4a   : > { %23862 = vmatprep.mubr.msk.f32.mxu1 %vm612_vm0, %v603_v63  ;;  %24115 = vmatprep.mubr.msk.f32.mxu0 %vm612_vm0, %v28560_v0  ;;  %v557_v63 = vld [vmem:[%s28404_s16 + $0x98] sm:$0xff] }
  0x4d   : > { %23863 = vmatmul.mubr.msk.f32.gmra.mrb[28].mxu1 %vm612_vm0, %v604_v2  ;;  %24116 = vmatmul.mubr.msk.f32.gmra.mrb[10].mxu0 %vm612_vm0, %v28570_v3  ;;  %v558_v2 = vld [vmem:[%s28404_s16 + $0xa0] sm:$0xff] }
  0x4e   : > { %23865 = vmatprep.mubr.msk.f32.mxu1 %vm612_vm0, %v605_v4  ;;  %24118 = vmatprep.mubr.msk.f32.mxu0 %vm612_vm0, %v28574_v5  ;;  %v28759_v4 = vld [vmem:[%s32570_s1 + $0x40] sm:$0xff] }
  0x51   : > { %23866 = vmatmul.mubr.msk.f32.gmra.mrb[30].mxu1 %vm612_vm0, %v606_v6  ;;  %24119 = vmatmul.mubr.msk.f32.gmra.mrb[12].mxu0 %vm612_vm0, %v28584_v7  ;;  %v560_v6 = vld [vmem:[%s28404_s16 + $0xb0] sm:$0xff] }
  0x52   : > { %23868 = vmatprep.mubr.msk.f32.mxu1 %vm612_vm0, %v607_v8  ;;  %24121 = vmatprep.mubr.msk.f32.mxu0 %vm612_vm0, %v28588_v9  ;;  %v573_v8 = vld [vmem:[%s28404_s16 + $0x118] sm:$0xff] }
  0x55   : > { %23869 = vmatmul.mubr.msk.f32.gmra.mrb[32].mxu1 %vm612_vm0, %v608_v10  ;;  %24122 = vmatmul.mubr.msk.f32.gmra.mrb[14].mxu0 %vm612_vm0, %v28598_v12  ;;  %v1320_v10 = vld [vmem:[%s28404_s16 + $0xa] sm:$0xff] }
  0x56   : > { %23871 = vmatprep.mubr.msk.f32.mxu1 %vm612_vm0, %v609_v13  ;;  %24124 = vmatprep.mubr.msk.f32.mxu0 %vm612_vm0, %v28602_v14  ;;  %v28838_v13 = vld [vmem:[%s28404_s16 + $0x12] sm:$0xff] }
  0x59   : > { %23872 = vmatmul.mubr.msk.f32.gmra.mrb[34].mxu1 %vm612_vm0, %v610_v15  ;;  %24125 = vmatmul.mubr.msk.f32.gmra.mrb[16].mxu0 %vm612_vm0, %v28612_v16  ;;  %v28847_v15 = vld [vmem:[%s28404_s16 + $0x1a] sm:$0xff] }
  0x5a   : > { %23876 = vmatprep.mubr.msk.f32.mxu1 %vm612_vm0, %v538_v17  ;;  %24127 = vmatprep.mubr.msk.f32.mxu0 %vm612_vm0, %v28616_v18  ;;  %v415_v17 = vld [vmem:[%s32580_s11 + $0x8] sm:$0xff] }
  0x5d   : > { %23877 = vmatmul.mubr.msk.f32.vlgmr.msra.gmra.mrb[0].mxu1 %vm612_vm0, %v539_v19  ;;  %24128 = vmatmul.mubr.msk.f32.gmra.mrb[18].mxu0 %vm612_vm0, %v28626_v20  ;;  %v28870_v19 = vld [vmem:[%s28404_s16 + $0x2a] sm:$0xff] }
  0x5e   : > { %23931 = vmatpush3.msra.mxu1 %v28424_v11  ;;  %23879 = vmatprep.mubr.msk.f32.mxu1 %vm612_vm0, %v540_v21  ;;  %v543_v11 = vld [vmem:[%s28404_s16 + $0x28] sm:$0xff]  ;;  %v28879_v21 = vld [vmem:[%s28404_s16 + $0x32] sm:$0xff] }
  0x5f   : > { %24130 = vmatprep.mubr.msk.f32.mxu0 %vm612_vm0, %v28630_v22  ;;  %23986 = vmatprep.subr.mxu1 %v28635_v23 }
  0x61   : > { %23880 = vmatmul.mubr.msk.f32.gmra.mrb[2].mxu1 %vm612_vm0, %v541_v24  ;;  %24131 = vmatmul.mubr.msk.f32.gmra.mrb[20].mxu0 %vm612_vm0, %v28644_v25  ;;  %v420_v24 = vld [vmem:[%s32580_s11 + $0x30] sm:$0xff] }
  0x62   : > { %23882 = vmatprep.mubr.msk.f32.mxu1 %vm612_vm0, %v542_v26  ;;  %24133 = vmatprep.mubr.msk.f32.mxu0 %vm612_vm0, %v28650_v27  ;;  %v28910_v26 = vld [vmem:[%s28404_s16 + $0x4a] sm:$0xff] }
  0x65   : > { %23883 = vmatmul.mubr.msk.f32.gmra.mrb[4].mxu1 %vm612_vm0, %v543_v11  ;;  %24134 = vmatmul.mubr.msk.f32.gmra.mrb[22].mxu0 %vm612_vm0, %v28661_v28  ;;  %v422_v11 = vld [vmem:[%s32580_s11 + $0x40] sm:$0xff] }
  0x66   : > { %23885 = vmatprep.mubr.msk.f32.mxu1 %vm612_vm0, %v544_v29  ;;  %24136 = vmatprep.mubr.msk.f32.mxu0 %vm612_vm0, %v28665_v30  ;;  %v28930_v29 = vld [vmem:[%s28404_s16 + $0x5a] sm:$0xff] }
  0x69   : > { %23886 = vmatmul.mubr.msk.f32.gmra.mrb[6].mxu1 %vm612_vm0, %v545_v31  ;;  %24137 = vmatmul.mubr.msk.f32.gmra.mrb[24].mxu0 %vm612_vm0, %v28675_v32  ;;  %v424_v31 = vld [vmem:[%s32580_s11 + $0x50] sm:$0xff] }
  0x6a   : > { %23888 = vmatprep.mubr.msk.f32.mxu1 %vm612_vm0, %v546_v33  ;;  %24139 = vmatprep.mubr.msk.f32.mxu0 %vm612_vm0, %v28679_v34  ;;  %v28950_v33 = vld [vmem:[%s28404_s16 + $0x6a] sm:$0xff] }
  0x6d   : > { %23889 = vmatmul.mubr.msk.f32.gmra.mrb[8].mxu1 %vm612_vm0, %v547_v35  ;;  %24140 = vmatmul.mubr.msk.f32.gmra.mrb[26].mxu0 %vm612_vm0, %v28689_v36  ;;  %v426_v35 = vld [vmem:[%s32580_s11 + $0x60] sm:$0xff] }
  0x6e   : > { %23891 = vmatprep.mubr.msk.f32.mxu1 %vm612_vm0, %v548_v37  ;;  %24142 = vmatprep.mubr.msk.f32.mxu0 %vm612_vm0, %v28693_v38  ;;  %v28970_v37 = vld [vmem:[%s28404_s16 + $0x7a] sm:$0xff] }
  0x71   : > { %23892 = vmatmul.mubr.msk.f32.gmra.mrb[10].mxu1 %vm612_vm0, %v549_v39  ;;  %24143 = vmatmul.mubr.msk.f32.gmra.mrb[28].mxu0 %vm612_vm0, %v28703_v40  ;;  %v428_v39 = vld [vmem:[%s32580_s11 + $0x70] sm:$0xff] }
  0x72   : > { %23894 = vmatprep.mubr.msk.f32.mxu1 %vm612_vm0, %v550_v41  ;;  %24145 = vmatprep.mubr.msk.f32.mxu0 %vm612_vm0, %v28707_v42  ;;  %v3057_v41 = vld [vmem:[%s28404_s16 + $0x134] sm:$0xff] }
  0x75   : > { %23895 = vmatmul.mubr.msk.f32.gmra.mrb[12].mxu1 %vm612_vm0, %v551_v43  ;;  %24146 = vmatmul.mubr.msk.f32.gmra.mrb[30].mxu0 %vm612_vm0, %v28717_v44  ;;  %v3058_v43 = vld [vmem:[%s28404_s16 + $0x13c] sm:$0xff] }
  0x76   : > { %23897 = vmatprep.mubr.msk.f32.mxu1 %vm612_vm0, %v552_v45  ;;  %24148 = vmatprep.mubr.msk.f32.mxu0 %vm612_vm0, %v28721_v46  ;;  %v430_v45 = vld [vmem:[%s32580_s11 + $0x80] sm:$0xff] }
  0x79   : > { %23898 = vmatmul.mubr.msk.f32.gmra.mrb[14].mxu1 %vm612_vm0, %v553_v49  ;;  %24149 = vmatmul.mubr.msk.f32.gmra.mrb[32].mxu0 %vm612_vm0, %v28731_v51  ;;  %v3449_v49 = vld [vmem:[%s28404_s16 + $0x25] sm:$0xff] }
  0x7a   : > { %23900 = vmatprep.mubr.msk.f32.mxu1 %vm612_vm0, %v554_v53  ;;  %24151 = vmatprep.mubr.msk.f32.mxu0 %vm612_vm0, %v28735_v55  ;;  %v3450_v53 = vld [vmem:[%s28404_s16 + $0x2d] sm:$0xff] }
  0x7d   : > { %23901 = vmatmul.mubr.msk.f32.gmra.mrb[16].mxu1 %vm612_vm0, %v555_v57  ;;  %24152 = vmatmul.mubr.msk.f32.gmra.mrb[34].mxu0 %vm612_vm0, %v28745_v59  ;;  %v432_v57 = vld [vmem:[%s32580_s11 + $0x90] sm:$0xff] }
  0x7e   : > { %23903 = vmatprep.mubr.msk.f32.mxu1 %vm612_vm0, %v556_v61  ;;  %24156 = vmatprep.mubr.msk.f32.mxu0 %vm612_vm0, %v28498_v47  ;;  %v559_v47 = vld [vmem:[%s28404_s16 + $0xa8] sm:$0xff]  ;;  %v3451_v61 = vld [vmem:[%s28404_s16 + $0x35] sm:$0xff] }
  0x81   : > { %23904 = vmatmul.mubr.msk.f32.gmra.mrb[18].mxu1 %vm612_vm0, %v557_v63  ;;  %24157 = vmatmul.mubr.msk.f32.vlgmr.msra.gmra.mrb[0].mxu0 %vm612_vm0, %v28511_v50  ;;  %v562_v50 = vld [vmem:[%s28404_s16 + $0xc0] sm:$0xff]  ;;  %v29027_v63 = vld [vmem:[%s28404_s16 + $0xaa] sm:$0xff] }
  0x82   : > { %24211 = vmatpush3.msra.mxu0 %v28503_v48  ;;  %23906 = vmatprep.mubr.msk.f32.mxu1 %vm612_vm0, %v558_v2  ;;  %v561_v48 = vld [vmem:[%s28404_s16 + $0xb8] sm:$0xff] }
  0x83   : > { %24159 = vmatprep.mubr.msk.f32.mxu0 %vm612_vm0, %v28517_v52  ;;  %24266 = vmatprep.subr.mxu0 %v28759_v4  ;;  %v563_v52 = vld [vmem:[%s28404_s16 + $0xc8] sm:$0xff]  ;;  %v3452_v2 = vld [vmem:[%s28404_s16 + $0x3d] sm:$0xff] }
  0x85   : > { %23907 = vmatmul.mubr.msk.f32.gmra.mrb[20].mxu1 %vm612_vm0, %v559_v47  ;;  %24160 = vmatmul.mubr.msk.f32.gmra.mrb[2].mxu0 %vm612_vm0, %v28528_v54  ;;  %v564_v54 = vld [vmem:[%s28404_s16 + $0xd0] sm:$0xff]  ;;  %v433_v47 = vld [vmem:[%s32580_s11 + $0x98] sm:$0xff] }
  0x86   : > { %23909 = vmatprep.mubr.msk.f32.mxu1 %vm612_vm0, %v560_v6  ;;  %24162 = vmatprep.mubr.msk.f32.mxu0 %vm612_vm0, %v28532_v56  ;;  %v565_v56 = vld [vmem:[%s28404_s16 + $0xd8] sm:$0xff]  ;;  %v434_v6 = vld [vmem:[%s32580_s11 + $0xa0] sm:$0xff] }
  0x89   : > { %23910 = vmatmul.mubr.msk.f32.gmra.mrb[22].mxu1 %vm612_vm0, %v561_v48  ;;  %24163 = vmatmul.mubr.msk.f32.gmra.mrb[4].mxu0 %vm612_vm0, %v28542_v58  ;;  %v566_v58 = vld [vmem:[%s28404_s16 + $0xe0] sm:$0xff]  ;;  %v29041_v48 = vld [vmem:[%s28404_s16 + $0xb2] sm:$0xff] }
  0x8a   : > { %23912 = vmatprep.mubr.msk.f32.mxu1 %vm612_vm0, %v562_v50  ;;  %24165 = vmatprep.mubr.msk.f32.mxu0 %vm612_vm0, %v28546_v60  ;;  %v567_v60 = vld [vmem:[%s28404_s16 + $0xe8] sm:$0xff] }
  0x8b   : > { %v3453_v50 = vld [vmem:[%s28404_s16 + $0x45] sm:$0xff] }
  0x8d   : > { %23913 = vmatmul.mubr.msk.f32.gmra.mrb[24].mxu1 %vm612_vm0, %v563_v52  ;;  %24166 = vmatmul.mubr.msk.f32.gmra.mrb[6].mxu0 %vm612_vm0, %v28556_v62  ;;  %v568_v62 = vld [vmem:[%s28404_s16 + $0xf0] sm:$0xff] }
  0x8e   : > { %23915 = vmatprep.mubr.msk.f32.mxu1 %vm612_vm0, %v564_v54  ;;  %24168 = vmatprep.mubr.msk.f32.mxu0 %vm612_vm0, %v28560_v0  ;;  %v569_v0 = vld [vmem:[%s28404_s16 + $0xf8] sm:$0xff]  ;;  %v3454_v52 = vld [vmem:[%s28404_s16 + $0x4d] sm:$0xff] }
  0x8f   : > { %v435_v54 = vld [vmem:[%s32580_s11 + $0xa8] sm:$0xff] }
  0x91   : > { %23916 = vmatmul.mubr.msk.f32.gmra.mrb[26].mxu1 %vm612_vm0, %v565_v56  ;;  %24169 = vmatmul.mubr.msk.f32.gmra.mrb[8].mxu0 %vm612_vm0, %v28570_v3  ;;  %v570_v3 = vld [vmem:[%s28404_s16 + $0x100] sm:$0xff]  ;;  %v436_v56 = vld [vmem:[%s32580_s11 + $0xb0] sm:$0xff] }
  0x92   : > { %23918 = vmatprep.mubr.msk.f32.mxu1 %vm612_vm0, %v566_v58  ;;  %24171 = vmatprep.mubr.msk.f32.mxu0 %vm612_vm0, %v28574_v5  ;;  %v571_v5 = vld [vmem:[%s28404_s16 + $0x108] sm:$0xff] }
  0x93   : > { %v29061_v58 = vld [vmem:[%s28404_s16 + $0xc2] sm:$0xff] }
  0x95   : > { %23919 = vmatmul.mubr.msk.f32.gmra.mrb[28].mxu1 %vm612_vm0, %v567_v60  ;;  %24172 = vmatmul.mubr.msk.f32.gmra.mrb[10].mxu0 %vm612_vm0, %v28584_v7  ;;  %v572_v7 = vld [vmem:[%s28404_s16 + $0x110] sm:$0xff] }
  0x96   : > { %23921 = vmatprep.mubr.msk.f32.mxu1 %vm612_vm0, %v568_v62  ;;  %24174 = vmatprep.mubr.msk.f32.mxu0 %vm612_vm0, %v28588_v9  ;;  %v1319_v9 = vld [vmem:[%s28404_s16 + $0x2] sm:$0xff]  ;;  %v3455_v60 = vld [vmem:[%s28404_s16 + $0x55] sm:$0xff]  ;;  %v29068_v62 = vld [vmem:[%s28404_s16 + $0xca] sm:$0xff] }
  0x99   : > { %23922 = vmatmul.mubr.msk.f32.gmra.mrb[30].mxu1 %vm612_vm0, %v569_v0  ;;  %24175 = vmatmul.mubr.msk.f32.gmra.mrb[12].mxu0 %vm612_vm0, %v28598_v12  ;;  %v414_v12 = vld [vmem:[%s32580_s11] sm:$0xff] }
  0x9a   : > { %23924 = vmatprep.mubr.msk.f32.mxu1 %vm612_vm0, %v570_v3  ;;  %24177 = vmatprep.mubr.msk.f32.mxu0 %vm612_vm0, %v28602_v14  ;;  %v28307_v14 = vmov 0   ;;  %v3456_v0 = vld [vmem:[%s28404_s16 + $0x5d] sm:$0xff] }
  0x9b   : > { %28296 = vset.pattern.permute.xlu0 %v28307_v14  ;;  %28297 = vset.pattern.permute.xlu1 %v28307_v14  ;;  %v437_v3 = vld [vmem:[%s32580_s11 + $0xb8] sm:$0xff]  ;;  %v3458_v14 = vld [vmem:[%s28404_s16 + $0x6d] sm:$0xff] }
  0x9c   : > { %4382 = vperm.xlu0 %28296, %v414_v12   ;;  %v29097_v12 = vld [vmem:[%s28404_s16 + $0xda] sm:$0xff] }
  0x9d   : > { %23925 = vmatmul.mubr.msk.f32.gmra.mrb[32].mxu1 %vm612_vm0, %v571_v5  ;;  %24178 = vmatmul.mubr.msk.f32.gmra.mrb[14].mxu0 %vm612_vm0, %v28612_v16  ;;  %v416_v16 = vld [vmem:[%s32580_s11 + $0x10] sm:$0xff]  ;;  %v438_v5 = vld [vmem:[%s32580_s11 + $0xc0] sm:$0xff] }
  0x9e   : > { %23927 = vmatprep.mubr.msk.f32.mxu1 %vm612_vm0, %v572_v7  ;;  %24180 = vmatprep.mubr.msk.f32.mxu0 %vm612_vm0, %v28616_v18  ;;  %v28858_v18 = vld [vmem:[%s28404_s16 + $0x22] sm:$0xff]  ;;  %v29081_v7 = vld [vmem:[%s28404_s16 + $0xd2] sm:$0xff] }
  0x9f   : > { %4392 = vperm.xlu1 %28297, %v416_v16   ;;  %v29101_v16 = vld [vmem:[%s28404_s16 + $0xe2] sm:$0xff] }
  0xa0   : > { %4387 = vperm.xlu0 %28296, %v415_v17   ;;  %v3459_v17 = vld [vmem:[%s28404_s16 + $0x75] sm:$0xff] }
  0xa1   : > { %23928 = vmatmul.mubr.msk.f32.gmra.mrb[34].mxu1 %vm612_vm0, %v573_v8  ;;  %24181 = vmatmul.mubr.msk.f32.gmra.mrb[16].mxu0 %vm612_vm0, %v28626_v20  ;;  %v418_v20 = vld [vmem:[%s32580_s11 + $0x20] sm:$0xff] }
  0xa2   : > { %23932 = vmatprep.mubr.msk.f32.mxu1 %vm612_vm0, %v1319_v9  ;;  %24183 = vmatprep.mubr.msk.f32.mxu0 %vm612_vm0, %v28630_v22  ;;  %v28890_v22 = vld [vmem:[%s28404_s16 + $0x3a] sm:$0xff]  ;;  %v3457_v8 = vld [vmem:[%s28404_s16 + $0x65] sm:$0xff] }
  0xa3   : > { %v439_v9 = vld [vmem:[%s32580_s11 + $0xc8] sm:$0xff] }
  0xa4   : > { %4402 = vperm.xlu0 %28296, %v418_v20   ;;  %v442_v20 = vld [vmem:[%s32580_s11 + $0xe0] sm:$0xff] }
  0xa5   : > { %23933 = vmatmul.mubr.msk.f32.vlgmr.msra.gmra.mrb[0].mxu1 %vm612_vm0, %v1320_v10  ;;  %24184 = vmatmul.mubr.msk.f32.gmra.mrb[18].mxu0 %vm612_vm0, %v28644_v25  ;;  %v28899_v25 = vld [vmem:[%s28404_s16 + $0x42] sm:$0xff]  ;;  %v440_v10 = vld [vmem:[%s32580_s11 + $0xd0] sm:$0xff] }
  0xa6   : > { %23987 = vmatpush3.msra.mxu1 %v28635_v23  ;;  %23935 = vmatprep.mubr.msk.f32.mxu1 %vm612_vm0, %v28838_v13  ;;  %v419_v23 = vld [vmem:[%s32580_s11 + $0x28] sm:$0xff] }
  0xa7   : > { %24186 = vmatprep.mubr.msk.f32.mxu0 %vm612_vm0, %v28650_v27  ;;  %26842 = vmatprep.subr.mxu1 %v28388_v1  ;;  %v417_v1 = vld [vmem:[%s32580_s11 + $0x18] sm:$0xff] }
  0xa8   : > { %4397 = vperm.xlu1 %28297, %v417_v1   ;;  %4412 = vperm.xlu0 %28296, %v420_v24   ;;  %v421_v27 = vld [vmem:[%s32580_s11 + $0x38] sm:$0xff] }
  0xa9   : > { %23936 = vmatmul.mubr.msk.f32.gmra.mrb[2].mxu1 %vm612_vm0, %v28847_v15  ;;  %24187 = vmatmul.mubr.msk.f32.gmra.mrb[20].mxu0 %vm612_vm0, %v28661_v28  ;;  %v28919_v28 = vld [vmem:[%s28404_s16 + $0x52] sm:$0xff]  ;;  %v3460_v24 = vld [vmem:[%s28404_s16 + $0x7d] sm:$0xff] }
  0xaa   : > { %23938 = vmatprep.mubr.msk.f32.mxu1 %vm612_vm0, %v28858_v18  ;;  %24189 = vmatprep.mubr.msk.f32.mxu0 %vm612_vm0, %v28665_v30  ;;  %v423_v30 = vld [vmem:[%s32580_s11 + $0x48] sm:$0xff]  ;;  %v441_v1 = vld [vmem:[%s32580_s11 + $0xd8] sm:$0xff] }
  0xac   : > { %4407 = vperm.xlu1 %28297, %v419_v23   ;;  %4422 = vperm.xlu0 %28296, %v422_v11   ;;  %v29117_v23 = vld [vmem:[%s28404_s16 + $0xea] sm:$0xff] }
  0xad   : > { %23939 = vmatmul.mubr.msk.f32.gmra.mrb[4].mxu1 %vm612_vm0, %v28870_v19  ;;  %24190 = vmatmul.mubr.msk.f32.gmra.mrb[22].mxu0 %vm612_vm0, %v28675_v32  ;;  %v28939_v32 = vld [vmem:[%s28404_s16 + $0x62] sm:$0xff] }
  0xae   : > { %23941 = vmatprep.mubr.msk.f32.mxu1 %vm612_vm0, %v28879_v21  ;;  %24192 = vmatprep.mubr.msk.f32.mxu0 %vm612_vm0, %v28679_v34  ;;  %v425_v34 = vld [vmem:[%s32580_s11 + $0x58] sm:$0xff]  ;;  %v3461_v11 = vld [vmem:[%s28404_s16 + $0x85] sm:$0xff] }
  0xb0   : > { %4417 = vperm.xlu1 %28297, %v421_v27   ;;  %4432 = vperm.xlu0 %28296, %v424_v31   ;;  %v29121_v27 = vld [vmem:[%s28404_s16 + $0xf2] sm:$0xff] }
  0xb1   : > { %23942 = vmatmul.mubr.msk.f32.gmra.mrb[6].mxu1 %vm612_vm0, %v28890_v22  ;;  %24193 = vmatmul.mubr.msk.f32.gmra.mrb[24].mxu0 %vm612_vm0, %v28689_v36  ;;  %v28959_v36 = vld [vmem:[%s28404_s16 + $0x72] sm:$0xff] }
  0xb2   : > { %23944 = vmatprep.mubr.msk.f32.mxu1 %vm612_vm0, %v28899_v25  ;;  %24195 = vmatprep.mubr.msk.f32.mxu0 %vm612_vm0, %v28693_v38  ;;  %v427_v38 = vld [vmem:[%s32580_s11 + $0x68] sm:$0xff]  ;;  %v444_v31 = vld [vmem:[%s32580_s11 + $0xf0] sm:$0xff] }
  0xb4   : > { %4427 = vperm.xlu1 %28297, %v423_v30   ;;  %4442 = vperm.xlu0 %28296, %v426_v35   ;;  %v443_v30 = vld [vmem:[%s32580_s11 + $0xe8] sm:$0xff] }
  0xb5   : > { %23945 = vmatmul.mubr.msk.f32.gmra.mrb[8].mxu1 %vm612_vm0, %v28910_v26  ;;  %24196 = vmatmul.mubr.msk.f32.gmra.mrb[26].mxu0 %vm612_vm0, %v28703_v40  ;;  %v28979_v40 = vld [vmem:[%s28404_s16 + $0x82] sm:$0xff]  ;;  %v3462_v35 = vld [vmem:[%s28404_s16 + $0x8d] sm:$0xff] }
  0xb6   : > { %23947 = vmatprep.mubr.msk.f32.mxu1 %vm612_vm0, %v28919_v28  ;;  %24198 = vmatprep.mubr.msk.f32.mxu0 %vm612_vm0, %v28707_v42  ;;  %v28987_v42 = vld [vmem:[%s28404_s16 + $0x8a] sm:$0xff] }
  0xb8   : > { %4437 = vperm.xlu1 %28297, %v425_v34   ;;  %4452 = vperm.xlu0 %28296, %v428_v39   ;;  %v29137_v34 = vld [vmem:[%s28404_s16 + $0xfa] sm:$0xff] }
  0xb9   : > { %23948 = vmatmul.mubr.msk.f32.gmra.mrb[10].mxu1 %vm612_vm0, %v28930_v29  ;;  %24199 = vmatmul.mubr.msk.f32.gmra.mrb[28].mxu0 %vm612_vm0, %v28717_v44  ;;  %v429_v44 = vld [vmem:[%s32580_s11 + $0x78] sm:$0xff] }
  0xba   : > { %23950 = vmatprep.mubr.msk.f32.mxu1 %vm612_vm0, %v28939_v32  ;;  %24201 = vmatprep.mubr.msk.f32.mxu0 %vm612_vm0, %v28721_v46  ;;  %v29000_v46 = vld [vmem:[%s28404_s16 + $0x92] sm:$0xff] }
  0xbb   : > { %v3463_v39 = vld [vmem:[%s28404_s16 + $0x95] sm:$0xff] }
  0xbc   : > { %4447 = vperm.xlu1 %28297, %v427_v38   ;;  %4462 = vperm.xlu0 %28296, %v430_v45   ;;  %v29141_v38 = vld [vmem:[%s28404_s16 + $0x102] sm:$0xff] }
  0xbd   : > { %23951 = vmatmul.mubr.msk.f32.gmra.mrb[12].mxu1 %vm612_vm0, %v28950_v33  ;;  %24202 = vmatmul.mubr.msk.f32.gmra.mrb[30].mxu0 %vm612_vm0, %v28731_v51  ;;  %v29007_v51 = vld [vmem:[%s28404_s16 + $0x9a] sm:$0xff] }
  0xbe   : > { %23953 = vmatprep.mubr.msk.f32.mxu1 %vm612_vm0, %v28959_v36  ;;  %24204 = vmatprep.mubr.msk.f32.mxu0 %vm612_vm0, %v28735_v55  ;;  %v431_v55 = vld [vmem:[%s32580_s11 + $0x88] sm:$0xff]  ;;  %v3464_v45 = vld [vmem:[%s28404_s16 + $0x9d] sm:$0xff] }
  0xc0   : > { %4457 = vperm.xlu1 %28297, %v429_v44   ;;  %4472 = vperm.xlu0 %28296, %v432_v57   ;;  %v29157_v44 = vld [vmem:[%s28404_s16 + $0x10a] sm:$0xff] }
  0xc1   : > { %23954 = vmatmul.mubr.msk.f32.gmra.mrb[14].mxu1 %vm612_vm0, %v28970_v37  ;;  %24205 = vmatmul.mubr.msk.f32.gmra.mrb[32].mxu0 %vm612_vm0, %v28745_v59  ;;  %v29020_v59 = vld [vmem:[%s28404_s16 + $0xa2] sm:$0xff]  ;;  %v448_v57 = vld [vmem:[%s32580_s11 + $0x110] sm:$0xff] }
  0xc2   : > { %23956 = vmatprep.mubr.msk.f32.mxu1 %vm612_vm0, %v28979_v40  ;;  %24207 = vmatprep.mubr.msk.f32.mxu0 %vm612_vm0, %v3057_v41  ;;  %v445_v41 = vld [vmem:[%s32580_s11 + $0xf8] sm:$0xff] }
  0xc4   : > { %4467 = vperm.xlu1 %28297, %v431_v55   ;;  %4482 = vperm.xlu0 %28296, %v434_v6   ;;  %v447_v55 = vld [vmem:[%s32580_s11 + $0x108] sm:$0xff]  ;;  %v449_v6 = vld [vmem:[%s32580_s11 + $0x118] sm:$0xff] }
  0xc5   : > { %23957 = vmatmul.mubr.msk.f32.gmra.mrb[16].mxu1 %vm612_vm0, %v28987_v42  ;;  %24208 = vmatmul.mubr.msk.f32.gmra.mrb[34].mxu0 %vm612_vm0, %v3058_v43  ;;  %v446_v43 = vld [vmem:[%s32580_s11 + $0x100] sm:$0xff] }
  0xc6   : > { %23959 = vmatprep.mubr.msk.f32.mxu1 %vm612_vm0, %v29000_v46  ;;  %24212 = vmatprep.mubr.msk.f32.mxu0 %vm612_vm0, %v3449_v49  ;;  %v29161_v49 = vld [vmem:[%s28404_s16 + $0x112] sm:$0xff] }
  0xc8   : > { %4477 = vperm.xlu1 %28297, %v433_v47   ;;  %4492 = vperm.xlu0 %28296, %v436_v56   ;;  %v3467_v47 = vld [vmem:[%s28404_s16 + $0xb5] sm:$0xff] }
  0xc9   : > { %23960 = vmatmul.mubr.msk.f32.gmra.mrb[18].mxu1 %vm612_vm0, %v29007_v51  ;;  %24213 = vmatmul.mubr.msk.f32.vlgmr.msra.gmra.mrb[0].mxu0 %vm612_vm0, %v3450_v53  ;;  %v3465_v53 = vld [vmem:[%s28404_s16 + $0xa5] sm:$0xff]  ;;  %v3471_v56 = vld [vmem:[%s28404_s16 + $0xd5] sm:$0xff] }
  0xca   : > { %24267 = vmatpush3.msra.mxu0 %v28759_v4  ;;  %23962 = vmatprep.mubr.msk.f32.mxu1 %vm612_vm0, %v29020_v59  ;;  %v29048_v4 = vld [vmem:[%s28404_s16 + $0xba] sm:$0xff] }
  0xcb   : > { %24215 = vmatprep.mubr.msk.f32.mxu0 %vm612_vm0, %v3451_v61  ;;  %v29177_v61 = vld [vmem:[%s28404_s16 + $0x11a] sm:$0xff] }
  0xcc   : > { %4487 = vperm.xlu1 %28297, %v435_v54   ;;  %4502 = vperm.xlu0 %28296, %v438_v5   ;;  %v28298_v54 = vld [vmem:[%s32570_s1 + $0x20] sm:$0xff]  ;;  %v3888_v5 = vld [vmem:[%s28404_s16 + $0x8e] sm:$0xff] }
  0xcd   : > { %23963 = vmatmul.mubr.msk.f32.gmra.mrb[20].mxu1 %vm612_vm0, %v29027_v63  ;;  %24216 = vmatmul.mubr.msk.f32.gmra.mrb[2].mxu0 %vm612_vm0, %v3452_v2  ;;  %v3466_v2 = vld [vmem:[%s28404_s16 + $0xad] sm:$0xff] }
  0xce   : > { %23965 = vmatprep.mubr.msk.f32.mxu1 %vm612_vm0, %v29041_v48  ;;  %24218 = vmatprep.mubr.msk.f32.mxu0 %vm612_vm0, %v3453_v50  ;;  %v3468_v50 = vld [vmem:[%s28404_s16 + $0xbd] sm:$0xff] }
  0xd0   : > { %4497 = vperm.xlu1 %28297, %v437_v3   ;;  %4512 = vperm.xlu0 %28296, %v440_v10   ;;  %v3887_v3 = vld [vmem:[%s28404_s16 + $0x86] sm:$0xff] }
  0xd1   : > { %23966 = vmatmul.mubr.msk.f32.gmra.mrb[22].mxu1 %vm612_vm0, %v29048_v4  ;;  %24219 = vmatmul.mubr.msk.f32.gmra.mrb[4].mxu0 %vm612_vm0, %v3454_v52  ;;  %v3469_v52 = vld [vmem:[%s28404_s16 + $0xc5] sm:$0xff] }
  0xd2   : > { %23968 = vmatprep.mubr.msk.f32.mxu1 %vm612_vm0, %v29061_v58  ;;  %24221 = vmatprep.mubr.msk.f32.mxu0 %vm612_vm0, %v3455_v60  ;;  %v3473_v60 = vld [vmem:[%s28404_s16 + $0xe5] sm:$0xff] }
  0xd3   : > { %v3891_v10 = vld [vmem:[%s28404_s16 + $0xa6] sm:$0xff] }
  0xd4   : > { %4507 = vperm.xlu1 %28297, %v439_v9   ;;  %4522 = vperm.xlu0 %28296, %v442_v20   ;;  %v1779_v9 = vld [vmem:[%s28404_s16 + $0x122] sm:$0xff] }
  0xd5   : > { %23969 = vmatmul.mubr.msk.f32.gmra.mrb[24].mxu1 %vm612_vm0, %v29068_v62  ;;  %24222 = vmatmul.mubr.msk.f32.gmra.mrb[6].mxu0 %vm612_vm0, %v3456_v0  ;;  %v3886_v0 = vld [vmem:[%s28404_s16 + $0x7e] sm:$0xff] }
  0xd6   : > { %23971 = vmatprep.mubr.msk.f32.mxu1 %vm612_vm0, %v29081_v7  ;;  %24224 = vmatprep.mubr.msk.f32.mxu0 %vm612_vm0, %v3457_v8  ;;  %v3890_v8 = vld [vmem:[%s28404_s16 + $0x9e] sm:$0xff] }
  0xd7   : > { %v3894_v20 = vld [vmem:[%s28404_s16 + $0xbe] sm:$0xff] }
  0xd8   : > { %4517 = vperm.xlu1 %28297, %v441_v1   ;;  %4532 = vperm.xlu0 %28296, %v444_v31   ;;  %v2190_v1 = vld [vmem:[%s28404_s16 + $0xab] sm:$0xff]  ;;  %v3897_v31 = vld [vmem:[%s28404_s16 + $0xd6] sm:$0xff] }
  0xd9   : > { %23972 = vmatmul.mubr.msk.f32.gmra.mrb[26].mxu1 %vm612_vm0, %v29097_v12  ;;  %24225 = vmatmul.mubr.msk.f32.gmra.mrb[8].mxu0 %vm612_vm0, %v3458_v14  ;;  %v3892_v14 = vld [vmem:[%s28404_s16 + $0xae] sm:$0xff] }
  0xda   : > { %23974 = vmatprep.mubr.msk.f32.mxu1 %vm612_vm0, %v29101_v16  ;;  %24227 = vmatprep.mubr.msk.f32.mxu0 %vm612_vm0, %v3459_v17  ;;  %v3893_v17 = vld [vmem:[%s28404_s16 + $0xb6] sm:$0xff] }
  0xdc   : > { %4527 = vperm.xlu1 %28297, %v443_v30   ;;  %4542 = vperm.xlu0 %28296, %v446_v43   ;;  %v2193_v30 = vld [vmem:[%s28404_s16 + $0xc3] sm:$0xff]  ;;  %v3900_v43 = vld [vmem:[%s28404_s16 + $0xee] sm:$0xff] }
  0xdd   : > { %23975 = vmatmul.mubr.msk.f32.gmra.mrb[28].mxu1 %vm612_vm0, %v29117_v23  ;;  %24228 = vmatmul.mubr.msk.f32.gmra.mrb[10].mxu0 %vm612_vm0, %v3460_v24  ;;  %v3895_v24 = vld [vmem:[%s28404_s16 + $0xc6] sm:$0xff] }
  0xde   : > { %23977 = vmatprep.mubr.msk.f32.mxu1 %vm612_vm0, %v29121_v27  ;;  %24230 = vmatprep.mubr.msk.f32.mxu0 %vm612_vm0, %v3461_v11  ;;  %v3896_v11 = vld [vmem:[%s28404_s16 + $0xce] sm:$0xff] }
  0xe0   : > { %4537 = vperm.xlu1 %28297, %v445_v41   ;;  %4552 = vperm.xlu0 %28296, %v448_v57   ;;  %v2196_v41 = vld [vmem:[%s28404_s16 + $0xdb] sm:$0xff]  ;;  %v3903_v57 = vld [vmem:[%s28404_s16 + $0x106] sm:$0xff] }
  0xe1   : > { %23978 = vmatmul.mubr.msk.f32.gmra.mrb[30].mxu1 %vm612_vm0, %v29137_v34  ;;  %24231 = vmatmul.mubr.msk.f32.gmra.mrb[12].mxu0 %vm612_vm0, %v3462_v35  ;;  %v3898_v35 = vld [vmem:[%s28404_s16 + $0xde] sm:$0xff] }
  0xe2   : > { %23980 = vmatprep.mubr.msk.f32.mxu1 %vm612_vm0, %v29141_v38  ;;  %24233 = vmatprep.mubr.msk.f32.mxu0 %vm612_vm0, %v3463_v39  ;;  %v3899_v39 = vld [vmem:[%s28404_s16 + $0xe6] sm:$0xff] }
  0xe4   : > { %4547 = vperm.xlu1 %28297, %v447_v55   ;;  %v2199_v55 = vld [vmem:[%s28404_s16 + $0xf3] sm:$0xff] }
  0xe5   : > { %23981 = vmatmul.mubr.msk.f32.gmra.mrb[32].mxu1 %vm612_vm0, %v29157_v44  ;;  %24234 = vmatmul.mubr.msk.f32.gmra.mrb[14].mxu0 %vm612_vm0, %v3464_v45  ;;  %v3901_v45 = vld [vmem:[%s28404_s16 + $0xf6] sm:$0xff] }
  0xe6   : > { %23983 = vmatprep.mubr.msk.f32.mxu1 %vm612_vm0, %v29161_v49  ;;  %24236 = vmatprep.mubr.msk.f32.mxu0 %vm612_vm0, %v3465_v53  ;;  %v3902_v53 = vld [vmem:[%s28404_s16 + $0xfe] sm:$0xff] }
  0xe8   : > { %4557 = vperm.xlu1 %28297, %v449_v6   ;;  %v3905_v6 = vld [vmem:[%s28404_s16 + $0x116] sm:$0xff] }
  0xe9   : > { %23984 = vmatmul.mubr.msk.f32.gmra.mrb[34].mxu1 %vm612_vm0, %v29177_v61  ;;  %24237 = vmatmul.mubr.msk.f32.gmra.mrb[16].mxu0 %vm612_vm0, %v3466_v2  ;;  %v3904_v2 = vld [vmem:[%s28404_s16 + $0x10e] sm:$0xff] }
  0xea   : > { %23988 = vmatprep.mubr.msk.f32.mxu1 %vm612_vm0, %v28838_v13  ;;  %24239 = vmatprep.mubr.msk.f32.mxu0 %vm612_vm0, %v3467_v47  ;;  %v3470_v13 = vld [vmem:[%s28404_s16 + $0xcd] sm:$0xff]  ;;  %v2201_v47 = vld [vmem:[%s28404_s16 + $0x103] sm:$0xff] }
  0xed   : > { %23989 = vmatmul.mubr.msk.f32.vlgmr.msra.gmra.mrb[0].mxu1 %vm612_vm0, %v28847_v15  ;;  %24240 = vmatmul.mubr.msk.f32.gmra.mrb[18].mxu0 %vm612_vm0, %v3468_v50  ;;  %v3472_v15 = vld [vmem:[%s28404_s16 + $0xdd] sm:$0xff]  ;;  %v2202_v50 = vld [vmem:[%s28404_s16 + $0x10b] sm:$0xff] }
  0xee   : > { %26843 = vmatpush3.msra.mxu1 %v28298_v54  ;;  %23991 = vmatprep.mubr.msk.f32.mxu1 %vm612_vm0, %v28858_v18  ;;  %v3474_v18 = vld [vmem:[%s28404_s16 + $0xed] sm:$0xff] }
  0xef   : > { %24242 = vmatprep.mubr.msk.f32.mxu0 %vm612_vm0, %v3469_v52  ;;  %v3906_v52 = vld [vmem:[%s28404_s16 + $0x11e] sm:$0xff]  ;;  %v2203_v54 = vld [vmem:[%s28404_s16 + $0x113] sm:$0xff] }
  0xf1   : > { %23992 = vmatmul.mubr.msk.f32.gmra.mrb[2].mxu1 %vm612_vm0, %v28870_v19  ;;  %24243 = vmatmul.mubr.msk.f32.gmra.mrb[20].mxu0 %vm612_vm0, %v3470_v13  ;;  %v3475_v19 = vld [vmem:[%s28404_s16 + $0xf5] sm:$0xff]  ;;  %v3907_v13 = vld [vmem:[%s28404_s16 + $0x126] sm:$0xff] }
  0xf2   : > { %23994 = vmatprep.mubr.msk.f32.mxu1 %vm612_vm0, %v28879_v21  ;;  %24245 = vmatprep.mubr.msk.f32.mxu0 %vm612_vm0, %v3471_v56  ;;  %v3476_v21 = vld [vmem:[%s28404_s16 + $0xfd] sm:$0xff] }
  0xf3   : > { %v4708_v56 = vld [vmem:[%s32572_s3 + $0x20] sm:$0xff] }
  0xf5   : > { %23995 = vmatmul.mubr.msk.f32.gmra.mrb[4].mxu1 %vm612_vm0, %v28890_v22  ;;  %24246 = vmatmul.mubr.msk.f32.gmra.mrb[22].mxu0 %vm612_vm0, %v3472_v15  ;;  %v3477_v22 = vld [vmem:[%s28404_s16 + $0x105] sm:$0xff] }
  0xf6   : > { %23997 = vmatprep.mubr.msk.f32.mxu1 %vm612_vm0, %v28899_v25  ;;  %24248 = vmatprep.mubr.msk.f32.mxu0 %vm612_vm0, %v3473_v60  ;;  %v3478_v25 = vld [vmem:[%s28404_s16 + $0x10d] sm:$0xff]  ;;  %v2204_v60 = vld [vmem:[%s28404_s16 + $0x11b] sm:$0xff] }
  0xf7   : > { %v4709_v15 = vld [vmem:[%s32572_s3 + $0x28] sm:$0xff] }
  0xf9   : > { %23998 = vmatmul.mubr.msk.f32.gmra.mrb[6].mxu1 %vm612_vm0, %v28910_v26  ;;  %24249 = vmatmul.mubr.msk.f32.gmra.mrb[24].mxu0 %vm612_vm0, %v3474_v18  ;;  %v3479_v26 = vld [vmem:[%s28404_s16 + $0x115] sm:$0xff] }
  0xfa   : > { %24000 = vmatprep.mubr.msk.f32.mxu1 %vm612_vm0, %v28919_v28  ;;  %24251 = vmatprep.mubr.msk.f32.mxu0 %vm612_vm0, %v3475_v19  ;;  %v3480_v28 = vld [vmem:[%s28404_s16 + $0x11d] sm:$0xff]  ;;  %v3908_v18 = vld [vmem:[%s28404_s16 + $0x12e] sm:$0xff]  ;;  %v26554_v19 = vpack.c.bf16 %v4709_v15, %v4708_v56 }
  0xfc   : > { %26555 = vmatprep.subr.bf16.mxu1 %v26554_v19 }
  0xfd   : > { %24001 = vmatmul.mubr.msk.f32.gmra.mrb[8].mxu1 %vm612_vm0, %v28930_v29  ;;  %24252 = vmatmul.mubr.msk.f32.gmra.mrb[26].mxu0 %vm612_vm0, %v3476_v21  ;;  %v3481_v29 = vld [vmem:[%s28404_s16 + $0x125] sm:$0xff] }
  0xfe   : > { %24003 = vmatprep.mubr.msk.f32.mxu1 %vm612_vm0, %v28939_v32  ;;  %24254 = vmatprep.mubr.msk.f32.mxu0 %vm612_vm0, %v3477_v22  ;;  %v3482_v32 = vld [vmem:[%s28404_s16 + $0x12d] sm:$0xff]  ;;  %v2205_v21 = vld [vmem:[%s28404_s16 + $0x123] sm:$0xff]  ;;  %v3909_v22 = vld [vmem:[%s28404_s16 + $0x136] sm:$0xff] }
 0x101   : > { %24004 = vmatmul.mubr.msk.f32.gmra.mrb[10].mxu1 %vm612_vm0, %v28950_v33  ;;  %24255 = vmatmul.mubr.msk.f32.gmra.mrb[28].mxu0 %vm612_vm0, %v3478_v25  ;;  %v3483_v33 = vld [vmem:[%s28404_s16 + $0x135] sm:$0xff]  ;;  %v2206_v25 = vld [vmem:[%s28404_s16 + $0x12b] sm:$0xff] }
 0x102   : > { %24006 = vmatprep.mubr.msk.f32.mxu1 %vm612_vm0, %v28959_v36  ;;  %24257 = vmatprep.mubr.msk.f32.mxu0 %vm612_vm0, %v3479_v26  ;;  %v3484_v36 = vld [vmem:[%s28404_s16 + $0x13d] sm:$0xff] }
 0x103   : > { %v3910_v26 = vld [vmem:[%s28404_s16 + $0x13e] sm:$0xff] }
 0x105   : > { %24007 = vmatmul.mubr.msk.f32.gmra.mrb[12].mxu1 %vm612_vm0, %v28970_v37  ;;  %24258 = vmatmul.mubr.msk.f32.gmra.mrb[30].mxu0 %vm612_vm0, %v3480_v28  ;;  %v3875_v37 = vld [vmem:[%s28404_s16 + $0x26] sm:$0xff]  ;;  %v4710_v28 = vld [vmem:[%s32572_s3 + $0x30] sm:$0xff] }
 0x106   : > { %24009 = vmatprep.mubr.msk.f32.mxu1 %vm612_vm0, %v28979_v40  ;;  %24260 = vmatprep.mubr.msk.f32.mxu0 %vm612_vm0, %v3481_v29  ;;  %v3876_v40 = vld [vmem:[%s28404_s16 + $0x2e] sm:$0xff]  ;;  %v4711_v29 = vld [vmem:[%s32572_s3 + $0x38] sm:$0xff] }
 0x109   : > { %24010 = vmatmul.mubr.msk.f32.gmra.mrb[14].mxu1 %vm612_vm0, %v28987_v42  ;;  %24261 = vmatmul.mubr.msk.f32.gmra.mrb[32].mxu0 %vm612_vm0, %v3482_v32  ;;  %v3877_v42 = vld [vmem:[%s28404_s16 + $0x36] sm:$0xff]  ;;  %v29417_v32 = vpack.c.bf16 %v4711_v29, %v4710_v28 }
 0x10a   : > { %24012 = vmatprep.mubr.msk.f32.mxu1 %vm612_vm0, %v29000_v46  ;;  %24263 = vmatprep.mubr.msk.f32.mxu0 %vm612_vm0, %v3483_v33  ;;  %v3878_v46 = vld [vmem:[%s28404_s16 + $0x3e] sm:$0xff]  ;;  %v28308_v33 = vmov 0.0  }
 0x10b   : > { %454 = vst.msk [vmem:[#allocation2 + $0x18] sm:$0xff] %vm450_vm1, %v28308_v33  ;;  %455 = vst.msk [vmem:[#allocation2 + $0x20] sm:$0xff] %vm450_vm1, %v28308_v33 }
 0x10c   : > { %451 = vst.msk [vmem:[#allocation2] sm:$0xff] %vm450_vm1, %v28308_v33  ;;  %452 = vst.msk [vmem:[#allocation2 + $0x8] sm:$0xff] %vm450_vm1, %v28308_v33 }
 0x10d   : > { %24013 = vmatmul.mubr.msk.f32.gmra.mrb[16].mxu1 %vm612_vm0, %v29007_v51  ;;  %24264 = vmatmul.mubr.msk.f32.gmra.mrb[34].mxu0 %vm612_vm0, %v3484_v36  ;;  %v3879_v51 = vld [vmem:[%s28404_s16 + $0x46] sm:$0xff]  ;;  %453 = vst.msk [vmem:[#allocation2 + $0x10] sm:$0xff] %vm450_vm1, %v28308_v33  ;;  %456 = vst.msk [vmem:[#allocation2 + $0x28] sm:$0xff] %vm450_vm1, %v28308_v33 }
 0x10e   : > { %24015 = vmatprep.mubr.msk.f32.mxu1 %vm612_vm0, %v29020_v59  ;;  %24268 = vmatprep.mubr.msk.f32.mxu0 %vm612_vm0, %v3875_v37  ;;  %v3880_v59 = vld [vmem:[%s28404_s16 + $0x4e] sm:$0xff]  ;;  %457 = vst.msk [vmem:[#allocation2 + $0x30] sm:$0xff] %vm450_vm1, %v28308_v33  ;;  %458 = vst.msk [vmem:[#allocation2 + $0x38] sm:$0xff] %vm450_vm1, %v28308_v33 }
 0x10f   : > { %459 = vst.msk [vmem:[#allocation2 + $0x40] sm:$0xff] %vm450_vm1, %v28308_v33  ;;  %460 = vst.msk [vmem:[#allocation2 + $0x48] sm:$0xff] %vm450_vm1, %v28308_v33 }
 0x110   : > { %461 = vst.msk [vmem:[#allocation2 + $0x50] sm:$0xff] %vm450_vm1, %v28308_v33  ;;  %462 = vst.msk [vmem:[#allocation2 + $0x58] sm:$0xff] %vm450_vm1, %v28308_v33 }
 0x111   : > { %24016 = vmatmul.mubr.msk.f32.gmra.mrb[18].mxu1 %vm612_vm0, %v29027_v63  ;;  %24269 = vmatmul.mubr.msk.f32.vlgmr.msra.gmra.mrb[0].mxu0 %vm612_vm0, %v3876_v40  ;;  %v3881_v63 = vld [vmem:[%s28404_s16 + $0x56] sm:$0xff]  ;;  %463 = vst.msk [vmem:[#allocation2 + $0x60] sm:$0xff] %vm450_vm1, %v28308_v33  ;;  %464 = vst.msk [vmem:[#allocation2 + $0x68] sm:$0xff] %vm450_vm1, %v28308_v33  ;;  %v4668_v40 = vld [vmem:[%s32572_s3] sm:$0xff] }
 0x112   : > { %24018 = vmatprep.mubr.msk.f32.mxu1 %vm612_vm0, %v29041_v48  ;;  %24271 = vmatprep.mubr.msk.f32.mxu0 %vm612_vm0, %v3877_v42  ;;  %v3882_v48 = vld [vmem:[%s28404_s16 + $0x5e] sm:$0xff]  ;;  %465 = vst.msk [vmem:[#allocation2 + $0x70] sm:$0xff] %vm450_vm1, %v28308_v33  ;;  %466 = vst.msk [vmem:[#allocation2 + $0x78] sm:$0xff] %vm450_vm1, %v28308_v33  ;;  %v4669_v42 = vld [vmem:[%s32572_s3 + $0x8] sm:$0xff] }
 0x113   : > { %467 = vst.msk [vmem:[#allocation2 + $0x80] sm:$0xff] %vm450_vm1, %v28308_v33  ;;  %468 = vst.msk [vmem:[#allocation2 + $0x88] sm:$0xff] %vm450_vm1, %v28308_v33  ;;  %v4672_v36 = vld [vmem:[#allocation2 + $0x1] sm:$0xff] }
 0x114   : > { %469 = vst.msk [vmem:[#allocation2 + $0x90] sm:$0xff] %vm450_vm1, %v28308_v33  ;;  %470 = vst.msk [vmem:[#allocation2 + $0x98] sm:$0xff] %vm450_vm1, %v28308_v33  ;;  %v4673_v37 = vld [vmem:[#allocation2 + $0x9] sm:$0xff] }
 0x115   : > { %24019 = vmatmul.mubr.msk.f32.gmra.mrb[20].mxu1 %vm612_vm0, %v29048_v4  ;;  %24272 = vmatmul.mubr.msk.f32.gmra.mrb[2].mxu0 %vm612_vm0, %v3878_v46  ;;  %v3883_v4 = vld [vmem:[%s28404_s16 + $0x66] sm:$0xff]  ;;  %471 = vst.msk [vmem:[#allocation2 + $0xa0] sm:$0xff] %vm450_vm1, %v28308_v33  ;;  %472 = vst.msk [vmem:[#allocation2 + $0xa8] sm:$0xff] %vm450_vm1, %v28308_v33  ;;  %v26562_v46 = vpack.c.bf16 %v4669_v42, %v4668_v40 }
 0x116   : > { %24021 = vmatprep.mubr.msk.f32.mxu1 %vm612_vm0, %v29061_v58  ;;  %24274 = vmatprep.mubr.msk.f32.mxu0 %vm612_vm0, %v3879_v51  ;;  %v3884_v58 = vld [vmem:[%s28404_s16 + $0x6e] sm:$0xff]  ;;  %473 = vst.msk [vmem:[#allocation2 + $0xb0] sm:$0xff] %vm450_vm1, %v28308_v33  ;;  %474 = vst.msk [vmem:[#allocation2 + $0xb8] sm:$0xff] %vm450_vm1, %v28308_v33 }
 0x117   : > { %475 = vst.msk [vmem:[#allocation2 + $0xc0] sm:$0xff] %vm450_vm1, %v28308_v33  ;;  %476 = vst.msk [vmem:[#allocation2 + $0xc8] sm:$0xff] %vm450_vm1, %v28308_v33  ;;  %v4670_v51 = vld [vmem:[%s32572_s3 + $0x10] sm:$0xff] }
 0x118   : > { %477 = vst.msk [vmem:[#allocation2 + $0xd0] sm:$0xff] %vm450_vm1, %v28308_v33  ;;  %478 = vst.msk [vmem:[#allocation2 + $0xd8] sm:$0xff] %vm450_vm1, %v28308_v33 }
 0x119   : > { %24022 = vmatmul.mubr.msk.f32.gmra.mrb[22].mxu1 %vm612_vm0, %v29068_v62  ;;  %24275 = vmatmul.mubr.msk.f32.gmra.mrb[4].mxu0 %vm612_vm0, %v3880_v59  ;;  %v3885_v62 = vld [vmem:[%s28404_s16 + $0x76] sm:$0xff]  ;;  %479 = vst.msk [vmem:[#allocation2 + $0xe0] sm:$0xff] %vm450_vm1, %v28308_v33  ;;  %480 = vst.msk [vmem:[#allocation2 + $0xe8] sm:$0xff] %vm450_vm1, %v28308_v33 }
 0x11a   : > { %24024 = vmatprep.mubr.msk.f32.mxu1 %vm612_vm0, %v29081_v7  ;;  %24277 = vmatprep.mubr.msk.f32.mxu0 %vm612_vm0, %v3881_v63  ;;  %v3889_v7 = vld [vmem:[%s28404_s16 + $0x96] sm:$0xff]  ;;  %481 = vst.msk [vmem:[#allocation2 + $0xf0] sm:$0xff] %vm450_vm1, %v28308_v33  ;;  %482 = vst.msk [vmem:[#allocation2 + $0xf8] sm:$0xff] %vm450_vm1, %v28308_v33 }
 0x11b   : > { %483 = vst.msk [vmem:[#allocation2 + $0x100] sm:$0xff] %vm450_vm1, %v28308_v33  ;;  %484 = vst.msk [vmem:[#allocation2 + $0x108] sm:$0xff] %vm450_vm1, %v28308_v33  ;;  %v4671_v59 = vld [vmem:[%s32572_s3 + $0x18] sm:$0xff] }
 0x11c   : > { %485 = vst.msk [vmem:[#allocation2 + $0x110] sm:$0xff] %vm450_vm1, %v28308_v33  ;;  %486 = vst.msk [vmem:[#allocation2 + $0x118] sm:$0xff] %vm450_vm1, %v28308_v33  ;;  %v26566_v63 = vpack.c.bf16 %v4671_v59, %v4670_v51 }
 0x11d   : > { %24025 = vmatmul.mubr.msk.f32.gmra.mrb[24].mxu1 %vm612_vm0, %v29097_v12  ;;  %24278 = vmatmul.mubr.msk.f32.gmra.mrb[6].mxu0 %vm612_vm0, %v3882_v48  ;;  %v1780_v12 = vld [vmem:[%s28404_s16 + $0x12a] sm:$0xff]  ;;  %487 = vst.msk [vmem:[#allocation2 + $0x120] sm:$0xff] %vm450_vm1, %v28308_v33  ;;  %488 = vst.msk [vmem:[#allocation2 + $0x128] sm:$0xff] %vm450_vm1, %v28308_v33  ;;  %v5454_v48 = vld [vmem:[%s32572_s3 + $0x40] sm:$0xff] }
 0x11e   : > { %24027 = vmatprep.mubr.msk.f32.mxu1 %vm612_vm0, %v29101_v16  ;;  %24280 = vmatprep.mubr.msk.f32.mxu0 %vm612_vm0, %v3883_v4  ;;  %v2189_v16 = vld [vmem:[%s28404_s16 + $0xa3] sm:$0xff]  ;;  %489 = vst.msk [vmem:[#allocation2 + $0x130] sm:$0xff] %vm450_vm1, %v28308_v33  ;;  %490 = vst.msk [vmem:[#allocation2 + $0x138] sm:$0xff] %vm450_vm1, %v28308_v33 }
 0x11f   : > { %491 = vst.msk [vmem:[#allocation2 + $0x140] sm:$0xff] %vm450_vm1, %v28308_v33  ;;  %495 = vst.msk [vmem:[#allocation3] sm:$0xff] %vm450_vm1, %v28308_v33  ;;  %v5455_v4 = vld [vmem:[%s32572_s3 + $0x48] sm:$0xff] }
 0x120   : > { %496 = vst.msk [vmem:[#allocation3 + $0x8] sm:$0xff] %vm450_vm1, %v28308_v33  ;;  %497 = vst.msk [vmem:[#allocation3 + $0x10] sm:$0xff] %vm450_vm1, %v28308_v33 }
 0x121   : > { %24028 = vmatmul.mubr.msk.f32.gmra.mrb[26].mxu1 %vm612_vm0, %v29117_v23  ;;  %24281 = vmatmul.mubr.msk.f32.gmra.mrb[8].mxu0 %vm612_vm0, %v3884_v58  ;;  %v2191_v23 = vld [vmem:[%s28404_s16 + $0xb3] sm:$0xff]  ;;  %498 = vst.msk [vmem:[#allocation3 + $0x18] sm:$0xff] %vm450_vm1, %v28308_v33  ;;  %499 = vst.msk [vmem:[#allocation3 + $0x20] sm:$0xff] %vm450_vm1, %v28308_v33  ;;  %v29605_v58 = vpack.c.bf16 %v5455_v4, %v5454_v48 }
 0x122   : > { %24030 = vmatprep.mubr.msk.f32.mxu1 %vm612_vm0, %v29121_v27  ;;  %24283 = vmatprep.mubr.msk.f32.mxu0 %vm612_vm0, %v3885_v62  ;;  %v2192_v27 = vld [vmem:[%s28404_s16 + $0xbb] sm:$0xff]  ;;  %500 = vst.msk [vmem:[#allocation3 + $0x28] sm:$0xff] %vm450_vm1, %v28308_v33  ;;  %501 = vst.msk [vmem:[#allocation3 + $0x30] sm:$0xff] %vm450_vm1, %v28308_v33  ;;  %v29608_v62 = vpop.permute.xlu0 %4382 }
 0x123   : > { %502 = vst.msk [vmem:[#allocation3 + $0x38] sm:$0xff] %vm450_vm1, %v28308_v33  ;;  %503 = vst.msk [vmem:[#allocation3 + $0x40] sm:$0xff] %vm450_vm1, %v28308_v33 }
 0x124   : > { %504 = vst.msk [vmem:[#allocation3 + $0x48] sm:$0xff] %vm450_vm1, %v28308_v33  ;;  %505 = vst.msk [vmem:[#allocation3 + $0x50] sm:$0xff] %vm450_vm1, %v28308_v33 }
 0x125   : > { %24031 = vmatmul.mubr.msk.f32.gmra.mrb[28].mxu1 %vm612_vm0, %v29137_v34  ;;  %24284 = vmatmul.mubr.msk.f32.gmra.mrb[10].mxu0 %vm612_vm0, %v3886_v0  ;;  %v2194_v34 = vld [vmem:[%s28404_s16 + $0xcb] sm:$0xff]  ;;  %506 = vst.msk [vmem:[#allocation3 + $0x58] sm:$0xff] %vm450_vm1, %v28308_v33  ;;  %507 = vst.msk [vmem:[#allocation3 + $0x60] sm:$0xff] %vm450_vm1, %v28308_v33  ;;  %v29610_v0 = vpop.permute.xlu1 %4392 }
 0x126   : > { %24033 = vmatprep.mubr.msk.f32.mxu1 %vm612_vm0, %v29141_v38  ;;  %24286 = vmatprep.mubr.msk.f32.mxu0 %vm612_vm0, %v3887_v3  ;;  %v2195_v38 = vld [vmem:[%s28404_s16 + $0xd3] sm:$0xff]  ;;  %508 = vst.msk [vmem:[#allocation3 + $0x68] sm:$0xff] %vm450_vm1, %v28308_v33  ;;  %509 = vst.msk [vmem:[#allocation3 + $0x70] sm:$0xff] %vm450_vm1, %v28308_v33 }
 0x127   : > { %510 = vst.msk [vmem:[#allocation3 + $0x78] sm:$0xff] %vm450_vm1, %v28308_v33  ;;  %511 = vst.msk [vmem:[#allocation3 + $0x80] sm:$0xff] %vm450_vm1, %v28308_v33 }
 0x128   : > { %512 = vst.msk [vmem:[#allocation3 + $0x88] sm:$0xff] %vm450_vm1, %v28308_v33  ;;  %513 = vst.msk [vmem:[#allocation3 + $0x90] sm:$0xff] %vm450_vm1, %v28308_v33 }
 0x129   : > { %24034 = vmatmul.mubr.msk.f32.gmra.mrb[30].mxu1 %vm612_vm0, %v29157_v44  ;;  %24287 = vmatmul.mubr.msk.f32.gmra.mrb[12].mxu0 %vm612_vm0, %v3888_v5  ;;  %v2197_v44 = vld [vmem:[%s28404_s16 + $0xe3] sm:$0xff]  ;;  %514 = vst.msk [vmem:[#allocation3 + $0x98] sm:$0xff] %vm450_vm1, %v28308_v33  ;;  %515 = vst.msk [vmem:[#allocation3 + $0xa0] sm:$0xff] %vm450_vm1, %v28308_v33 }
 0x12a   : > { %24036 = vmatprep.mubr.msk.f32.mxu1 %vm612_vm0, %v29161_v49  ;;  %24289 = vmatprep.mubr.msk.f32.mxu0 %vm612_vm0, %v3889_v7  ;;  %v2198_v49 = vld [vmem:[%s28404_s16 + $0xeb] sm:$0xff]  ;;  %516 = vst.msk [vmem:[#allocation3 + $0xa8] sm:$0xff] %vm450_vm1, %v28308_v33  ;;  %517 = vst.msk [vmem:[#allocation3 + $0xb0] sm:$0xff] %vm450_vm1, %v28308_v33  ;;  %v29612_v7 = vpop.permute.xlu0 %4387 }
 0x12b   : > { %518 = vst.msk [vmem:[#allocation3 + $0xb8] sm:$0xff] %vm450_vm1, %v28308_v33  ;;  %519 = vst.msk [vmem:[#allocation3 + $0xc0] sm:$0xff] %vm450_vm1, %v28308_v33 }
 0x12c   : > { %520 = vst.msk [vmem:[#allocation3 + $0xc8] sm:$0xff] %vm450_vm1, %v28308_v33  ;;  %521 = vst.msk [vmem:[#allocation3 + $0xd0] sm:$0xff] %vm450_vm1, %v28308_v33 }
 0x12d   : > { %24037 = vmatmul.mubr.msk.f32.gmra.mrb[32].mxu1 %vm612_vm0, %v29177_v61  ;;  %24290 = vmatmul.mubr.msk.f32.gmra.mrb[14].mxu0 %vm612_vm0, %v3890_v8  ;;  %v2200_v61 = vld [vmem:[%s28404_s16 + $0xfb] sm:$0xff]  ;;  %522 = vst.msk [vmem:[#allocation3 + $0xd8] sm:$0xff] %vm450_vm1, %v28308_v33  ;;  %523 = vst.msk [vmem:[#allocation3 + $0xe0] sm:$0xff] %vm450_vm1, %v28308_v33  ;;  %s28285_s16 = smul.u32 288, %s32661_s22 }
 0x12e   : > { %24039 = vmatprep.mubr.msk.f32.mxu1 %vm612_vm0, %v1779_v9  ;;  %24292 = vmatprep.mubr.msk.f32.mxu0 %vm612_vm0, %v3891_v10  ;;  %524 = vst.msk [vmem:[#allocation3 + $0xe8] sm:$0xff] %vm450_vm1, %v28308_v33  ;;  %525 = vst.msk [vmem:[#allocation3 + $0xf0] sm:$0xff] %vm450_vm1, %v28308_v33  ;;  %v29614_v9 = vpop.permute.xlu1 %4397 }
 0x12f   : > { %526 = vst.msk [vmem:[#allocation3 + $0xf8] sm:$0xff] %vm450_vm1, %v28308_v33  ;;  %527 = vst.msk [vmem:[#allocation3 + $0x100] sm:$0xff] %vm450_vm1, %v28308_v33  ;;  %s32457_s25 = scalar_lea.vmem %s32581_s12, %s28285_s16 }
 0x130   : > { %528 = vst.msk [vmem:[#allocation3 + $0x108] sm:$0xff] %vm450_vm1, %v28308_v33  ;;  %529 = vst.msk [vmem:[#allocation3 + $0x110] sm:$0xff] %vm450_vm1, %v28308_v33 }
 0x131   : > { %24040 = vmatmul.mubr.msk.f32.gmra.mrb[34].mxu1 %vm612_vm0, %v1780_v12  ;;  %24293 = vmatmul.mubr.msk.f32.gmra.mrb[16].mxu0 %vm612_vm0, %v3892_v14  ;;  %530 = vst.msk [vmem:[#allocation3 + $0x118] sm:$0xff] %vm450_vm1, %v28308_v33  ;;  %531 = vst.msk [vmem:[#allocation3 + $0x120] sm:$0xff] %vm450_vm1, %v28308_v33 }
 0x132   : > { %24071 = vmatprep.mubr.msk.f32.mxu1 %vm612_vm0, %v2189_v16  ;;  %24295 = vmatprep.mubr.msk.f32.mxu0 %vm612_vm0, %v3893_v17  ;;  %532 = vst.msk [vmem:[#allocation3 + $0x128] sm:$0xff] %vm450_vm1, %v28308_v33  ;;  %533 = vst.msk [vmem:[#allocation3 + $0x130] sm:$0xff] %vm450_vm1, %v28308_v33  ;;  %v29616_v16 = vpop.permute.xlu0 %4402  ;;  %v29618_v17 = vpop.permute.xlu1 %4407 }
 0x133   : > { %534 = vst.msk [vmem:[#allocation3 + $0x138] sm:$0xff] %vm450_vm1, %v28308_v33  ;;  %535 = vst.msk [vmem:[#allocation3 + $0x140] sm:$0xff] %vm450_vm1, %v28308_v33 }
 0x135   : > { %24072 = vmatmul.mubr.msk.f32.vlgmr.msra.gmra.mrb[18].mxu1 %vm612_vm0, %v2190_v1  ;;  %24296 = vmatmul.mubr.msk.f32.gmra.mrb[18].mxu0 %vm612_vm0, %v3894_v20 }
 0x136   : > { %24074 = vmatprep.mubr.msk.f32.mxu1 %vm612_vm0, %v2191_v23  ;;  %24298 = vmatprep.mubr.msk.f32.mxu0 %vm612_vm0, %v3895_v24  ;;  %v29620_v23 = vpop.permute.xlu0 %4412 }
 0x137   : > { %26557 = vmatpush3.bf16.msra.mxu1 %v26554_v19 }
 0x138   : > { %26559 = vmatprep.subr.bf16.mxu1 %v29417_v32 }
 0x139   : > { %24075 = vmatmul.mubr.msk.f32.gmra.mrb[20].mxu1 %vm612_vm0, %v2192_v27  ;;  %24299 = vmatmul.mubr.msk.f32.gmra.mrb[20].mxu0 %vm612_vm0, %v3896_v11  ;;  %v29624_v27 = vpop.permute.xlu1 %4417 }
 0x13a   : > { %24077 = vmatprep.mubr.msk.f32.mxu1 %vm612_vm0, %v2193_v30  ;;  %24301 = vmatprep.mubr.msk.f32.mxu0 %vm612_vm0, %v3897_v31 }
 0x13b   : > { %26561 = vmatpush3.bf16.msra.mxu1 %v29417_v32 }
 0x13c   : > { %26563 = vmatprep.subr.bf16.mxu1 %v26562_v46 }
 0x13d   : > { %24078 = vmatmul.mubr.msk.f32.gmra.mrb[22].mxu1 %vm612_vm0, %v2194_v34  ;;  %24302 = vmatmul.mubr.msk.f32.gmra.mrb[22].mxu0 %vm612_vm0, %v3898_v35  ;;  %v29632_v34 = vpop.permute.xlu0 %4422  ;;  %v29634_v35 = vpop.permute.xlu1 %4427 }
 0x13e   : > { %24080 = vmatprep.mubr.msk.f32.mxu1 %vm612_vm0, %v2195_v38  ;;  %24304 = vmatprep.mubr.msk.f32.mxu0 %vm612_vm0, %v3899_v39 }
 0x141   : > { %24081 = vmatmul.mubr.msk.f32.gmra.mrb[24].mxu1 %vm612_vm0, %v2196_v41  ;;  %24305 = vmatmul.mubr.msk.f32.gmra.mrb[24].mxu0 %vm612_vm0, %v3900_v43  ;;  %v29640_v41 = vpop.permute.xlu0 %4432 }
 0x142   : > { %24083 = vmatprep.mubr.msk.f32.mxu1 %vm612_vm0, %v2197_v44  ;;  %24307 = vmatprep.mubr.msk.f32.mxu0 %vm612_vm0, %v3901_v45  ;;  %v29644_v44 = vpop.permute.xlu1 %4437 }
 0x145   : > { %24084 = vmatmul.mubr.msk.f32.gmra.mrb[26].mxu1 %vm612_vm0, %v2198_v49  ;;  %24308 = vmatmul.mubr.msk.f32.gmra.mrb[26].mxu0 %vm612_vm0, %v3902_v53 }
 0x146   : > { %24086 = vmatprep.mubr.msk.f32.mxu1 %vm612_vm0, %v2199_v55  ;;  %24310 = vmatprep.mubr.msk.f32.mxu0 %vm612_vm0, %v3903_v57  ;;  %v29652_v55 = vpop.permute.xlu0 %4442  ;;  %v29654_v57 = vpop.permute.xlu1 %4447 }
 0x149   : > { %24087 = vmatmul.mubr.msk.f32.gmra.mrb[28].mxu1 %vm612_vm0, %v2200_v61  ;;  %24311 = vmatmul.mubr.msk.f32.gmra.mrb[28].mxu0 %vm612_vm0, %v3904_v2  ;;  %v29659_v2 = vld [vmem:[%s32571_s2] ss:$0 sm:$0xff] }
 0x14a   : > { %24089 = vmatprep.mubr.msk.f32.mxu1 %vm612_vm0, %v2201_v47  ;;  %24313 = vmatprep.mubr.msk.f32.mxu0 %vm612_vm0, %v3905_v6  ;;  %v29665_v15 = vpop.permute.xlu1 %4457 }
 0x14d   : > { %24090 = vmatmul.mubr.msk.f32.gmra.mrb[30].mxu1 %vm612_vm0, %v2202_v50  ;;  %24314 = vmatmul.mubr.msk.f32.gmra.mrb[30].mxu0 %vm612_vm0, %v3906_v52 }
 0x14e   : > { %24092 = vmatprep.mubr.msk.f32.mxu1 %vm612_vm0, %v2203_v54  ;;  %24316 = vmatprep.mubr.msk.f32.mxu0 %vm612_vm0, %v3907_v13  ;;  %v29662_v54 = vpop.permute.xlu0 %4452  ;;  %v29675_v51 = vpop.permute.xlu1 %4467 }
 0x151   : > { %24093 = vmatmul.mubr.msk.f32.gmra.mrb[32].mxu1 %vm612_vm0, %v2204_v60  ;;  %24317 = vmatmul.mubr.msk.f32.gmra.mrb[32].mxu0 %vm612_vm0, %v3908_v18 }
 0x152   : > { %24095 = vmatprep.mubr.msk.f32.mxu1 %vm612_vm0, %v2205_v21  ;;  %24319 = vmatprep.mubr.msk.f32.mxu0 %vm612_vm0, %v3909_v22  ;;  %v29672_v40 = vpop.permute.xlu0 %4462 }
 0x155   : > { %24096 = vmatmul.mubr.msk.f32.gmra.mrb[34].mxu1 %vm612_vm0, %v2206_v25  ;;  %24320 = vmatmul.mubr.msk.f32.gmra.mrb[34].mxu0 %vm612_vm0, %v3910_v26 }
 0x156   : > { %24330 = vmatprep.mubr.msk.f32.mxu1 %vm450_vm1, %v4672_v36 }
 0x159   : > { %24331 = vmatmul.mubr.msk.f32.vlgmr.msra.gmra.mrb[36].mxu1 %vm450_vm1, %v4673_v37 }
 0x15a   : > { %26565 = vmatpush3.bf16.msra.mxu1 %v26562_v46 }
 0x15b   : > { %26567 = vmatprep.subr.bf16.mxu1 %v26566_v63 }
 0x15e   : > { %26569 = vmatpush3.bf16.msra.mxu1 %v26566_v63 }
 0x15f   : > { %26571 = vmatprep.subr.bf16.mxu1 %v29605_v58 }
 0x1c0   : > { %v23990_v3 = vpop.f32.mrb[0].mxu1 }
 0x1c1   : > { %v1956_v5 = vpop.f32.mrb[1].mxu1 }
 0x1c4   : > { %v23993_v8 = vpop.f32.mrb[2].mxu1 }
 0x1c5   : > { %v1966_v10 = vpop.f32.mrb[3].mxu1 }
 0x1c8   : > { %v23996_v12 = vpop.f32.mrb[4].mxu1 }
 0x1c9   : > { %v1976_v14 = vpop.f32.mrb[5].mxu1 }
 0x1cc   : > { %v23999_v1 = vpop.f32.mrb[6].mxu1 }
 0x1cd   : > { %v1986_v20 = vpop.f32.mrb[7].mxu1 }
 0x1d0   : > { %v29622_v24 = vpop.f32.mrb[8].mxu1 }
 0x1d1   : > { %v29626_v11 = vpop.f32.mrb[9].mxu1 }
 0x1d4   : > { %v29628_v30 = vpop.f32.mrb[10].mxu1 }
 0x1d5   : > { %v29630_v31 = vpop.f32.mrb[11].mxu1 }
 0x1d8   : > { %v29636_v38 = vpop.f32.mrb[12].mxu1 }
 0x1d9   : > { %v29638_v39 = vpop.f32.mrb[13].mxu1 }
 0x1dc   : > { %v29642_v43 = vpop.f32.mrb[14].mxu1 }
 0x1dd   : > { %v29646_v45 = vpop.f32.mrb[15].mxu1 }
 0x1e0   : > { %v29648_v49 = vpop.f32.mrb[16].mxu1 }
 0x1e1   : > { %v29650_v53 = vpop.f32.mrb[17].mxu1 }
 0x1e4   : > { %v24270_v61 = vpop.f32.mrb[0].mxu0 }
 0x1e5   : > { %v26844_v47 = vadd.f32 %v24270_v61, %v23990_v3  ;;  %v4086_v6 = vpop.f32.mrb[1].mxu0 }
 0x1e6   : > { %v26845_v50 = vadd.f32 %v4086_v6, %v1956_v5  ;;  %v29685_v6 = vpop.permute.xlu0 %4472 }
 0x1e7   : > { %v4309_v52 = vadd.f32 %v26844_v47, %v29659_v2 }
 0x1e8   : > { %v4308_v13 = vadd.f32 %v26845_v50, %v29659_v2  ;;  %v24273_v56 = vpop.f32.mrb[2].mxu0 }
 0x1e9   : > { %v4345_v60 = vmax.f32 %v4309_v52, 0.0  ;;  %v26846_v18 = vadd.f32 %v24273_v56, %v23993_v8  ;;  %v4096_v19 = vpop.f32.mrb[3].mxu0  ;;  %v29689_v56 = vpop.permute.xlu1 %4477 }
 0x1ea   : > { %v4344_v21 = vmax.f32 %v4308_v13, 0.0  ;;  %v26847_v22 = vadd.f32 %v4096_v19, %v1966_v10 }
 0x1eb   : > { %v4561_v25 = vmul.f32 %v29612_v7, %v4345_v60  ;;  %v4311_v26 = vadd.f32 %v26846_v18, %v29659_v2 }
 0x1ec   : > { %v4560_v28 = vmul.f32 %v29608_v62, %v4344_v21  ;;  %v4310_v29 = vadd.f32 %v26847_v22, %v29659_v2  ;;  %v24276_v32 = vpop.f32.mrb[4].mxu0 }
 0x1ed   : > { %4597 = vst.msk [vmem:[#allocation2 + $0x1b] sm:$0xff] %vm450_vm1, %v4561_v25  ;;  %v4347_v33 = vmax.f32 %v4311_v26, 0.0  ;;  %v26848_v36 = vadd.f32 %v24276_v32, %v23996_v12  ;;  %v4106_v37 = vpop.f32.mrb[5].mxu0 }
 0x1ee   : > { %4596 = vst.msk [vmem:[#allocation2 + $0x13] sm:$0xff] %vm450_vm1, %v4560_v28  ;;  %v4346_v42 = vmax.f32 %v4310_v29, 0.0  ;;  %v26849_v46 = vadd.f32 %v4106_v37, %v1976_v14 }
 0x1ef   : > { %v4563_v59 = vmul.f32 %v29614_v9, %v4347_v33  ;;  %v4313_v63 = vadd.f32 %v26848_v36, %v29659_v2 }
 0x1f0   : > { %v4562_v48 = vmul.f32 %v29610_v0, %v4346_v42  ;;  %v4312_v4 = vadd.f32 %v26849_v46, %v29659_v2  ;;  %v24279_v3 = vpop.f32.mrb[6].mxu0  ;;  %v29703_v42 = vpop.permute.xlu0 %4482 }
 0x1f1   : > { %4599 = vst.msk [vmem:[#allocation2 + $0x2b] sm:$0xff] %vm450_vm1, %v4563_v59  ;;  %v4349_v5 = vmax.f32 %v4313_v63, 0.0  ;;  %v26850_v8 = vadd.f32 %v24279_v3, %v23999_v1  ;;  %v4116_v10 = vpop.f32.mrb[7].mxu0  ;;  %v29708_v63 = vpop.permute.xlu1 %4487 }
 0x1f2   : > { %4598 = vst.msk [vmem:[#allocation2 + $0x23] sm:$0xff] %vm450_vm1, %v4562_v48  ;;  %v4348_v12 = vmax.f32 %v4312_v4, 0.0  ;;  %v26851_v14 = vadd.f32 %v4116_v10, %v1986_v20 }
 0x1f3   : > { %v4565_v61 = vmul.f32 %v29618_v17, %v4349_v5  ;;  %v4315_v47 = vadd.f32 %v26850_v8, %v29659_v2 }
 0x1f4   : > { %v4564_v50 = vmul.f32 %v29616_v16, %v4348_v12  ;;  %v4314_v52 = vadd.f32 %v26851_v14, %v29659_v2  ;;  %v24282_v13 = vpop.f32.mrb[8].mxu0 }
 0x1f5   : > { %4601 = vst.msk [vmem:[#allocation2 + $0x3b] sm:$0xff] %vm450_vm1, %v4565_v61  ;;  %v4351_v1 = vmax.f32 %v4315_v47, 0.0  ;;  %v26852_v60 = vadd.f32 %v24282_v13, %v29622_v24  ;;  %v4126_v18 = vpop.f32.mrb[9].mxu0  ;;  %v4674_v20 = vld [vmem:[#allocation2 + $0x11] sm:$0xff]  ;;  %v4675_v19 = vld [vmem:[#allocation2 + $0x19] sm:$0xff]  ;;  %v29723_v13 = vpop.permute.xlu0 %4492 }
 0x1f6   : > { %4600 = vst.msk [vmem:[#allocation2 + $0x33] sm:$0xff] %vm450_vm1, %v4564_v50  ;;  %v4350_v21 = vmax.f32 %v4314_v52, 0.0  ;;  %v26853_v22 = vadd.f32 %v4126_v18, %v29626_v11  ;;  %24333 = vmatprep.mubr.msk.f32.mxu1 %vm450_vm1, %v4674_v20  ;;  %32608 = vst [vmem:[#allocation4_spill] sm:$0xff] %v29723_v13  ;;  %v29727_v18 = vpop.permute.xlu1 %4497 }
 0x1f7   : > { %v4567_v25 = vmul.f32 %v29624_v27, %v4351_v1  ;;  %v4317_v26 = vadd.f32 %v26852_v60, %v29659_v2  ;;  %24334 = vmatmul.mubr.msk.f32.gmra.mrb[38].mxu1 %vm450_vm1, %v4675_v19 }
 0x1f8   : > { %v4566_v28 = vmul.f32 %v29620_v23, %v4350_v21  ;;  %v4316_v24 = vadd.f32 %v26853_v22, %v29659_v2  ;;  %v24285_v29 = vpop.f32.mrb[10].mxu0 }
 0x1f9   : > { %4603 = vst.msk [vmem:[#allocation2 + $0x4b] sm:$0xff] %vm450_vm1, %v4567_v25  ;;  %v4353_v32 = vmax.f32 %v4317_v26, 0.0  ;;  %v26854_v33 = vadd.f32 %v24285_v29, %v29628_v30  ;;  %v4136_v36 = vpop.f32.mrb[11].mxu0  ;;  %v4676_v11 = vld [vmem:[#allocation2 + $0x21] sm:$0xff]  ;;  %v4677_v37 = vld [vmem:[#allocation2 + $0x29] sm:$0xff] }
 0x1fa   : > { %4602 = vst.msk [vmem:[#allocation2 + $0x43] sm:$0xff] %vm450_vm1, %v4566_v28  ;;  %v4352_v46 = vmax.f32 %v4316_v24, 0.0  ;;  %v26855_v59 = vadd.f32 %v4136_v36, %v29630_v31  ;;  %24336 = vmatprep.mubr.msk.f32.mxu1 %vm450_vm1, %v4676_v11 }
 0x1fb   : > { %v4569_v48 = vmul.f32 %v29634_v35, %v4353_v32  ;;  %v4319_v4 = vadd.f32 %v26854_v33, %v29659_v2  ;;  %24337 = vmatmul.mubr.msk.f32.gmra.mrb[40].mxu1 %vm450_vm1, %v4677_v37 }
 0x1fc   : > { %v4568_v30 = vmul.f32 %v29632_v34, %v4352_v46  ;;  %v4318_v3 = vadd.f32 %v26855_v59, %v29659_v2  ;;  %v24288_v5 = vpop.f32.mrb[12].mxu0 }
 0x1fd   : > { %4605 = vst.msk [vmem:[#allocation2 + $0x5b] sm:$0xff] %vm450_vm1, %v4569_v48  ;;  %v4355_v8 = vmax.f32 %v4319_v4, 0.0  ;;  %v26856_v31 = vadd.f32 %v24288_v5, %v29636_v38  ;;  %v4146_v10 = vpop.f32.mrb[13].mxu0  ;;  %v4678_v12 = vld [vmem:[#allocation2 + $0x31] sm:$0xff]  ;;  %v4679_v14 = vld [vmem:[#allocation2 + $0x39] sm:$0xff]  ;;  %v29744_v48 = vpop.permute.xlu0 %4502 }
 0x1fe   : > { %4604 = vst.msk [vmem:[#allocation2 + $0x53] sm:$0xff] %vm450_vm1, %v4568_v30  ;;  %v4354_v61 = vmax.f32 %v4318_v3, 0.0  ;;  %v26857_v47 = vadd.f32 %v4146_v10, %v29638_v39  ;;  %24339 = vmatprep.mubr.msk.f32.mxu1 %vm450_vm1, %v4678_v12  ;;  %32609 = vst [vmem:[#allocation5_spill] sm:$0xff] %v29744_v48  ;;  %v29746_v4 = vpop.permute.xlu1 %4507 }
 0x1ff   : > { %v4571_v50 = vmul.f32 %v29644_v44, %v4355_v8  ;;  %v4321_v52 = vadd.f32 %v26856_v31, %v29659_v2  ;;  %24340 = vmatmul.mubr.msk.f32.gmra.mrb[42].mxu1 %vm450_vm1, %v4679_v14  ;;  %32610 = vst [vmem:[#allocation6_spill] sm:$0xff] %v29746_v4 }
 0x200   : > { %v4570_v38 = vmul.f32 %v29640_v41, %v4354_v61  ;;  %v4320_v1 = vadd.f32 %v26857_v47, %v29659_v2  ;;  %v24291_v60 = vpop.f32.mrb[14].mxu0 }
 0x201   : > { %4607 = vst.msk [vmem:[#allocation2 + $0x6b] sm:$0xff] %vm450_vm1, %v4571_v50  ;;  %v4357_v39 = vmax.f32 %v4321_v52, 0.0  ;;  %v26858_v20 = vadd.f32 %v24291_v60, %v29642_v43  ;;  %v4156_v19 = vpop.f32.mrb[15].mxu0  ;;  %v4680_v21 = vld [vmem:[#allocation2 + $0x41] sm:$0xff]  ;;  %v4681_v22 = vld [vmem:[#allocation2 + $0x49] sm:$0xff] }
 0x202   : > { %4606 = vst.msk [vmem:[#allocation2 + $0x63] sm:$0xff] %vm450_vm1, %v4570_v38  ;;  %v4356_v25 = vmax.f32 %v4320_v1, 0.0  ;;  %v26859_v26 = vadd.f32 %v4156_v19, %v29646_v45  ;;  %24342 = vmatprep.mubr.msk.f32.mxu1 %vm450_vm1, %v4680_v21 }
 0x203   : > { %v4573_v28 = vmul.f32 %v29654_v57, %v4357_v39  ;;  %v4323_v24 = vadd.f32 %v26858_v20, %v29659_v2  ;;  %24343 = vmatmul.mubr.msk.f32.gmra.mrb[44].mxu1 %vm450_vm1, %v4681_v22 }
 0x204   : > { %v4572_v29 = vmul.f32 %v29652_v55, %v4356_v25  ;;  %v4322_v43 = vadd.f32 %v26859_v26, %v29659_v2  ;;  %v24294_v32 = vpop.f32.mrb[16].mxu0 }
 0x205   : > { %4609 = vst.msk [vmem:[#allocation2 + $0x7b] sm:$0xff] %vm450_vm1, %v4573_v28  ;;  %v4359_v33 = vmax.f32 %v4323_v24, 0.0  ;;  %v26860_v36 = vadd.f32 %v24294_v32, %v29648_v49  ;;  %v4166_v11 = vpop.f32.mrb[17].mxu0  ;;  %v4682_v45 = vld [vmem:[#allocation2 + $0x51] sm:$0xff]  ;;  %v4683_v37 = vld [vmem:[#allocation2 + $0x59] sm:$0xff]  ;;  %v29764_v32 = vpop.permute.xlu0 %4512 }
 0x206   : > { %4608 = vst.msk [vmem:[#allocation2 + $0x73] sm:$0xff] %vm450_vm1, %v4572_v29  ;;  %v4358_v46 = vmax.f32 %v4322_v43, 0.0  ;;  %v26861_v59 = vadd.f32 %v4166_v11, %v29650_v53  ;;  %24345 = vmatprep.mubr.msk.f32.mxu1 %vm450_vm1, %v4682_v45  ;;  %32611 = vst [vmem:[#allocation7_spill] sm:$0xff] %v29764_v32 }
 0x207   : > { %v4575_v30 = vmul.f32 %v29665_v15, %v4359_v33  ;;  %v4325_v3 = vadd.f32 %v26860_v36, %v29659_v2  ;;  %24346 = vmatmul.mubr.msk.f32.gmra.mrb[46].mxu1 %vm450_vm1, %v4683_v37  ;;  %v29766_v33 = vpop.permute.xlu1 %4517 }
 0x208   : > { %v4574_v49 = vmul.f32 %v29662_v54, %v4358_v46  ;;  %v4324_v5 = vadd.f32 %v26861_v59, %v29659_v2  ;;  %v24073_v8 = vpop.f32.mrb[18].mxu1  ;;  %v24297_v31 = vpop.f32.mrb[18].mxu0  ;;  %32612 = vst [vmem:[#allocation8_spill] sm:$0xff] %v29766_v33 }
 0x209   : > { %4611 = vst.msk [vmem:[#allocation2 + $0x8b] sm:$0xff] %vm450_vm1, %v4575_v30  ;;  %v4361_v53 = vmax.f32 %v4325_v3, 0.0  ;;  %v26862_v10 = vadd.f32 %v24297_v31, %v24073_v8  ;;  %v2472_v12 = vpop.f32.mrb[19].mxu1  ;;  %v4176_v14 = vpop.f32.mrb[19].mxu0  ;;  %v4684_v61 = vld [vmem:[#allocation2 + $0x61] sm:$0xff]  ;;  %v4685_v47 = vld [vmem:[#allocation2 + $0x69] sm:$0xff] }
 0x20a   : > { %4610 = vst.msk [vmem:[#allocation2 + $0x83] sm:$0xff] %vm450_vm1, %v4574_v49  ;;  %v4360_v50 = vmax.f32 %v4324_v5, 0.0  ;;  %v26863_v52 = vadd.f32 %v4176_v14, %v2472_v12  ;;  %24348 = vmatprep.mubr.msk.f32.mxu1 %vm450_vm1, %v4684_v61 }
 0x20b   : > { %v4577_v38 = vmul.f32 %v29675_v51, %v4361_v53  ;;  %v4327_v1 = vadd.f32 %v26862_v10, %v29659_v2  ;;  %24349 = vmatmul.mubr.msk.f32.gmra.mrb[48].mxu1 %vm450_vm1, %v4685_v47 }
 0x20c   : > { %v4576_v60 = vmul.f32 %v29672_v40, %v4360_v50  ;;  %v4326_v39 = vadd.f32 %v26863_v52, %v29659_v2  ;;  %v24076_v20 = vpop.f32.mrb[20].mxu1  ;;  %v24300_v19 = vpop.f32.mrb[20].mxu0 }
 0x20d   : > { %4613 = vst.msk [vmem:[#allocation2 + $0x9b] sm:$0xff] %vm450_vm1, %v4577_v38  ;;  %v4363_v21 = vmax.f32 %v4327_v1, 0.0  ;;  %v26864_v22 = vadd.f32 %v24300_v19, %v24076_v20  ;;  %v2482_v25 = vpop.f32.mrb[21].mxu1  ;;  %v4186_v26 = vpop.f32.mrb[21].mxu0  ;;  %v4686_v28 = vld [vmem:[#allocation2 + $0x71] sm:$0xff]  ;;  %v4687_v24 = vld [vmem:[#allocation2 + $0x79] sm:$0xff] }
 0x20e   : > { %4612 = vst.msk [vmem:[#allocation2 + $0x93] sm:$0xff] %vm450_vm1, %v4576_v60  ;;  %v4362_v29 = vmax.f32 %v4326_v39, 0.0  ;;  %v26865_v43 = vadd.f32 %v4186_v26, %v2482_v25  ;;  %24351 = vmatprep.mubr.msk.f32.mxu1 %vm450_vm1, %v4686_v28  ;;  %v29784_v25 = vpop.permute.xlu0 %4522  ;;  %v29786_v26 = vpop.permute.xlu1 %4527 }
 0x20f   : > { %v4579_v36 = vmul.f32 %v29689_v56, %v4363_v21  ;;  %v4329_v11 = vadd.f32 %v26864_v22, %v29659_v2  ;;  %24352 = vmatmul.mubr.msk.f32.gmra.mrb[50].mxu1 %vm450_vm1, %v4687_v24  ;;  %32613 = vst [vmem:[#allocation9_spill] sm:$0xff] %v29784_v25  ;;  %32614 = vst [vmem:[#allocation10_spill] sm:$0xff] %v29786_v26 }
 0x210   : > { %v4578_v45 = vmul.f32 %v29685_v6, %v4362_v29  ;;  %v4328_v37 = vadd.f32 %v26865_v43, %v29659_v2  ;;  %v24079_v46 = vpop.f32.mrb[22].mxu1  ;;  %v24303_v59 = vpop.f32.mrb[22].mxu0 }
 0x211   : > { %4615 = vst.msk [vmem:[#allocation2 + $0xab] sm:$0xff] %vm450_vm1, %v4579_v36  ;;  %v4365_v30 = vmax.f32 %v4329_v11, 0.0  ;;  %v26866_v3 = vadd.f32 %v24303_v59, %v24079_v46  ;;  %v2492_v49 = vpop.f32.mrb[23].mxu1  ;;  %v4196_v5 = vpop.f32.mrb[23].mxu0  ;;  %v4688_v8 = vld [vmem:[#allocation2 + $0x81] sm:$0xff]  ;;  %v4689_v31 = vld [vmem:[#allocation2 + $0x89] sm:$0xff] }
 0x212   : > { %4614 = vst.msk [vmem:[#allocation2 + $0xa3] sm:$0xff] %vm450_vm1, %v4578_v45  ;;  %v4364_v53 = vmax.f32 %v4328_v37, 0.0  ;;  %v26867_v10 = vadd.f32 %v4196_v5, %v2492_v49  ;;  %24354 = vmatprep.mubr.msk.f32.mxu1 %vm450_vm1, %v4688_v8 }
 0x213   : > { %v4581_v12 = vmul.f32 %v29708_v63, %v4365_v30  ;;  %v4331_v14 = vadd.f32 %v26866_v3, %v29659_v2  ;;  %24355 = vmatmul.mubr.msk.f32.gmra.mrb[52].mxu1 %vm450_vm1, %v4689_v31 }
 0x214   : > { %v4580_v61 = vmul.f32 %v29703_v42, %v4364_v53  ;;  %v4330_v47 = vadd.f32 %v26867_v10, %v29659_v2  ;;  %v24082_v50 = vpop.f32.mrb[24].mxu1  ;;  %v24306_v52 = vpop.f32.mrb[24].mxu0 }
 0x215   : > { %4617 = vst.msk [vmem:[#allocation2 + $0xbb] sm:$0xff] %vm450_vm1, %v4581_v12  ;;  %v4367_v38 = vmax.f32 %v4331_v14, 0.0  ;;  %v26868_v1 = vadd.f32 %v24306_v52, %v24082_v50  ;;  %v2502_v60 = vpop.f32.mrb[25].mxu1  ;;  %v4206_v39 = vpop.f32.mrb[25].mxu0  ;;  %v4690_v20 = vld [vmem:[#allocation2 + $0x91] sm:$0xff]  ;;  %v4691_v19 = vld [vmem:[#allocation2 + $0x99] sm:$0xff] }
 0x216   : > { %4616 = vst.msk [vmem:[#allocation2 + $0xb3] sm:$0xff] %vm450_vm1, %v4580_v61  ;;  %v4366_v21 = vmax.f32 %v4330_v47, 0.0  ;;  %v26869_v22 = vadd.f32 %v4206_v39, %v2502_v60  ;;  %24357 = vmatprep.mubr.msk.f32.mxu1 %vm450_vm1, %v4690_v20  ;;  %v29804_v20 = vpop.permute.xlu0 %4532 }
 0x217   : > { %v4583_v28 = vmul.f32 %v29727_v18, %v4367_v38  ;;  %v4333_v24 = vadd.f32 %v26868_v1, %v29659_v2  ;;  %24358 = vmatmul.mubr.msk.f32.gmra.mrb[54].mxu1 %vm450_vm1, %v4691_v19  ;;  %32615 = vst [vmem:[#allocation11_spill] sm:$0xff] %v29804_v20  ;;  %v29806_v19 = vpop.permute.xlu1 %4537 }
 0x218   : > { %v4582_v29 = vmul.f32 %v29723_v13, %v4366_v21  ;;  %v4332_v43 = vadd.f32 %v26869_v22, %v29659_v2  ;;  %v24085_v36 = vpop.f32.mrb[26].mxu1  ;;  %v24309_v11 = vpop.f32.mrb[26].mxu0  ;;  %32616 = vst [vmem:[#allocation12_spill] sm:$0xff] %v29806_v19 }
 0x219   : > { %4619 = vst.msk [vmem:[#allocation2 + $0xcb] sm:$0xff] %vm450_vm1, %v4583_v28  ;;  %v4369_v45 = vmax.f32 %v4333_v24, 0.0  ;;  %v26870_v37 = vadd.f32 %v24309_v11, %v24085_v36  ;;  %v2512_v46 = vpop.f32.mrb[27].mxu1  ;;  %v4216_v59 = vpop.f32.mrb[27].mxu0  ;;  %v4692_v30 = vld [vmem:[#allocation2 + $0xa1] sm:$0xff]  ;;  %v4693_v3 = vld [vmem:[#allocation2 + $0xa9] sm:$0xff] }
 0x21a   : > { %4618 = vst.msk [vmem:[#allocation2 + $0xc3] sm:$0xff] %vm450_vm1, %v4582_v29  ;;  %v4368_v49 = vmax.f32 %v4332_v43, 0.0  ;;  %v26871_v5 = vadd.f32 %v4216_v59, %v2512_v46  ;;  %24360 = vmatprep.mubr.msk.f32.mxu1 %vm450_vm1, %v4692_v30 }
 0x21b   : > { %v4585_v8 = vmul.f32 %v29746_v4, %v4369_v45  ;;  %v4335_v31 = vadd.f32 %v26870_v37, %v29659_v2  ;;  %24361 = vmatmul.mubr.msk.f32.gmra.mrb[56].mxu1 %vm450_vm1, %v4693_v3  ;;  %v6742_v4 = vld [vmem:[%s32572_s3 + $0xa8] sm:$0xff] }
 0x21c   : > { %v4584_v53 = vmul.f32 %v29744_v48, %v4368_v49  ;;  %v4334_v10 = vadd.f32 %v26871_v5, %v29659_v2  ;;  %v24088_v12 = vpop.f32.mrb[28].mxu1  ;;  %v24312_v14 = vpop.f32.mrb[28].mxu0  ;;  %v6741_v48 = vld [vmem:[%s32572_s3 + $0xa0] sm:$0xff] }
 0x21d   : > { %4621 = vst.msk [vmem:[#allocation2 + $0xdb] sm:$0xff] %vm450_vm1, %v4585_v8  ;;  %v4371_v61 = vmax.f32 %v4335_v31, 0.0  ;;  %v26872_v47 = vadd.f32 %v24312_v14, %v24088_v12  ;;  %v2522_v50 = vpop.f32.mrb[29].mxu1  ;;  %v4226_v52 = vpop.f32.mrb[29].mxu0  ;;  %v4694_v38 = vld [vmem:[#allocation2 + $0xb1] sm:$0xff]  ;;  %v4695_v1 = vld [vmem:[#allocation2 + $0xb9] sm:$0xff]  ;;  %v26594_v13 = vpack.c.bf16 %v6742_v4, %v6741_v48 }
 0x21e   : > { %4620 = vst.msk [vmem:[#allocation2 + $0xd3] sm:$0xff] %vm450_vm1, %v4584_v53  ;;  %v4370_v60 = vmax.f32 %v4334_v10, 0.0  ;;  %v26873_v39 = vadd.f32 %v4226_v52, %v2522_v50  ;;  %24363 = vmatprep.mubr.msk.f32.mxu1 %vm450_vm1, %v4694_v38 }
 0x21f   : > { %v4587_v21 = vmul.f32 %v29766_v33, %v4371_v61  ;;  %v4337_v22 = vadd.f32 %v26872_v47, %v29659_v2  ;;  %24364 = vmatmul.mubr.msk.f32.gmra.mrb[58].mxu1 %vm450_vm1, %v4695_v1 }
 0x220   : > { %v4586_v28 = vmul.f32 %v29764_v32, %v4370_v60  ;;  %v4336_v24 = vadd.f32 %v26873_v39, %v29659_v2  ;;  %v24091_v29 = vpop.f32.mrb[30].mxu1  ;;  %v24315_v43 = vpop.f32.mrb[30].mxu0  ;;  %v6315_v32 = vld [vmem:[%s32572_s3 + $0x98] sm:$0xff] }
 0x221   : > { %4623 = vst.msk [vmem:[#allocation2 + $0xeb] sm:$0xff] %vm450_vm1, %v4587_v21  ;;  %v4373_v36 = vmax.f32 %v4337_v22, 0.0  ;;  %v26874_v11 = vadd.f32 %v24315_v43, %v24091_v29  ;;  %v2532_v45 = vpop.f32.mrb[31].mxu1  ;;  %v4236_v37 = vpop.f32.mrb[31].mxu0  ;;  %v4696_v46 = vld [vmem:[#allocation2 + $0xc1] sm:$0xff]  ;;  %v4697_v59 = vld [vmem:[#allocation2 + $0xc9] sm:$0xff] }
 0x222   : > { %4622 = vst.msk [vmem:[#allocation2 + $0xe3] sm:$0xff] %vm450_vm1, %v4586_v28  ;;  %v4372_v30 = vmax.f32 %v4336_v24, 0.0  ;;  %v26875_v3 = vadd.f32 %v4236_v37, %v2532_v45  ;;  %24366 = vmatprep.mubr.msk.f32.mxu1 %vm450_vm1, %v4696_v46  ;;  %v29824_v60 = vpop.permute.xlu0 %4542  ;;  %v29826_v39 = vpop.permute.xlu1 %4547 }
 0x223   : > { %v4589_v49 = vmul.f32 %v29786_v26, %v4373_v36  ;;  %v4339_v5 = vadd.f32 %v26874_v11, %v29659_v2  ;;  %24367 = vmatmul.mubr.msk.f32.gmra.mrb[60].mxu1 %vm450_vm1, %v4697_v59  ;;  %32617 = vst [vmem:[#allocation13_spill] sm:$0xff] %v29824_v60  ;;  %32618 = vst [vmem:[#allocation14_spill] sm:$0xff] %v29826_v39  ;;  %v6314_v26 = vld [vmem:[%s32572_s3 + $0x90] sm:$0xff] }
 0x224   : > { %v4588_v8 = vmul.f32 %v29784_v25, %v4372_v30  ;;  %v4338_v31 = vadd.f32 %v26875_v3, %v29659_v2  ;;  %v24094_v53 = vpop.f32.mrb[32].mxu1  ;;  %v24318_v10 = vpop.f32.mrb[32].mxu0  ;;  %v26590_v33 = vpack.c.bf16 %v6315_v32, %v6314_v26  ;;  %v6743_v32 = vld [vmem:[%s32572_s3 + $0xb0] sm:$0xff] }
 0x225   : > { %4625 = vst.msk [vmem:[#allocation2 + $0xfb] sm:$0xff] %vm450_vm1, %v4589_v49  ;;  %v4375_v12 = vmax.f32 %v4339_v5, 0.0  ;;  %v26876_v14 = vadd.f32 %v24318_v10, %v24094_v53  ;;  %v2542_v61 = vpop.f32.mrb[33].mxu1  ;;  %v4246_v47 = vpop.f32.mrb[33].mxu0  ;;  %v4698_v50 = vld [vmem:[#allocation2 + $0xd1] sm:$0xff]  ;;  %v4699_v52 = vld [vmem:[#allocation2 + $0xd9] sm:$0xff] }
 0x226   : > { %4624 = vst.msk [vmem:[#allocation2 + $0xf3] sm:$0xff] %vm450_vm1, %v4588_v8  ;;  %v4374_v38 = vmax.f32 %v4338_v31, 0.0  ;;  %v26877_v1 = vadd.f32 %v4246_v47, %v2542_v61  ;;  %24369 = vmatprep.mubr.msk.f32.mxu1 %vm450_vm1, %v4698_v50  ;;  %v29846_v47 = vpop.permute.xlu0 %4552  ;;  %v6276_v26 = vld [vmem:[#allocation2 + $0x13] sm:$0xff] }
 0x227   : > { %v4591_v21 = vmul.f32 %v29806_v19, %v4375_v12  ;;  %v4341_v22 = vadd.f32 %v26876_v14, %v29659_v2  ;;  %24370 = vmatmul.mubr.msk.f32.gmra.mrb[62].mxu1 %vm450_vm1, %v4699_v52  ;;  %v29842_v14 = vpop.permute.xlu1 %4557  ;;  %32620 = vst [vmem:[#allocation16_spill] sm:$0xff] %v29846_v47 }
 0x228   : > { %v4590_v28 = vmul.f32 %v29804_v20, %v4374_v38  ;;  %v4340_v24 = vadd.f32 %v26877_v1, %v29659_v2  ;;  %v24097_v29 = vpop.f32.mrb[34].mxu1  ;;  %v24321_v43 = vpop.f32.mrb[34].mxu0  ;;  %32619 = vst [vmem:[#allocation15_spill] sm:$0xff] %v29842_v14 }
 0x229   : > { %4627 = vst.msk [vmem:[#allocation2 + $0x10b] sm:$0xff] %vm450_vm1, %v4591_v21  ;;  %v4377_v36 = vmax.f32 %v4341_v22, 0.0  ;;  %v26878_v11 = vadd.f32 %v24321_v43, %v24097_v29  ;;  %v2552_v45 = vpop.f32.mrb[35].mxu1  ;;  %v4256_v37 = vpop.f32.mrb[35].mxu0  ;;  %v4700_v46 = vld [vmem:[#allocation2 + $0xe1] sm:$0xff]  ;;  %v4701_v59 = vld [vmem:[#allocation2 + $0xe9] sm:$0xff] }
 0x22a   : > { %4626 = vst.msk [vmem:[#allocation2 + $0x103] sm:$0xff] %vm450_vm1, %v4590_v28  ;;  %v4376_v30 = vmax.f32 %v4340_v24, 0.0  ;;  %v26879_v3 = vadd.f32 %v4256_v37, %v2552_v45  ;;  %24372 = vmatprep.mubr.msk.f32.mxu1 %vm450_vm1, %v4700_v46  ;;  %v4632_v22 = vld [vmem:[#allocation2] sm:$0xff]  ;;  %v5456_v28 = vld [vmem:[%s32572_s3 + $0x50] sm:$0xff]  ;;  %v5457_v24 = vld [vmem:[%s32572_s3 + $0x58] sm:$0xff] }
 0x22b   : > { %v4593_v49 = vmul.f32 %v29826_v39, %v4377_v36  ;;  %v4343_v5 = vadd.f32 %v26878_v11, %v29659_v2  ;;  %24373 = vmatmul.mubr.msk.f32.gmra.mrb[64].mxu1 %vm450_vm1, %v4701_v59  ;;  %v4633_v29 = vld [vmem:[#allocation2 + $0x8] sm:$0xff]  ;;  %v26574_v43 = vpack.c.bf16 %v5457_v24, %v5456_v28  ;;  %v5883_v36 = vld [vmem:[%s32572_s3 + $0x60] sm:$0xff]  ;;  %v4634_v45 = vld [vmem:[#allocation2 + $0x10] sm:$0xff] }
 0x22c   : > { %v4592_v8 = vmul.f32 %v29824_v60, %v4376_v30  ;;  %v4342_v31 = vadd.f32 %v26879_v3, %v29659_v2  ;;  %v5884_v11 = vld [vmem:[%s32572_s3 + $0x68] sm:$0xff]  ;;  %v4635_v46 = vld [vmem:[#allocation2 + $0x18] sm:$0xff]  ;;  %v4636_v59 = vld [vmem:[#allocation2 + $0x20] sm:$0xff] }
 0x22d   : > { %4629 = vst.msk [vmem:[#allocation2 + $0x11b] sm:$0xff] %vm450_vm1, %v4593_v49  ;;  %v4379_v53 = vmax.f32 %v4343_v5, 0.0  ;;  %v4702_v10 = vld [vmem:[#allocation2 + $0xf1] sm:$0xff]  ;;  %v4703_v12 = vld [vmem:[#allocation2 + $0xf9] sm:$0xff]  ;;  %v29873_v37 = vpack.c.bf16 %v5884_v11, %v5883_v36  ;;  %v4637_v30 = vld [vmem:[#allocation2 + $0x28] sm:$0xff] }
 0x22e   : > { %4628 = vst.msk [vmem:[#allocation2 + $0x113] sm:$0xff] %vm450_vm1, %v4592_v8  ;;  %v4378_v61 = vmax.f32 %v4342_v31, 0.0  ;;  %24375 = vmatprep.mubr.msk.f32.mxu1 %vm450_vm1, %v4702_v10  ;;  %v4638_v3 = vld [vmem:[#allocation2 + $0x30] sm:$0xff]  ;;  %v4640_v49 = vld [vmem:[#allocation2 + $0x40] sm:$0xff]  ;;  %v4641_v5 = vld [vmem:[#allocation2 + $0x48] sm:$0xff] }
 0x22f   : > { %v4595_v50 = vmul.f32 %v29842_v14, %v4379_v53  ;;  %24376 = vmatmul.mubr.msk.f32.gmra.mrb[66].mxu1 %vm450_vm1, %v4703_v12  ;;  %v4642_v8 = vld [vmem:[#allocation2 + $0x50] sm:$0xff]  ;;  %v4643_v31 = vld [vmem:[#allocation2 + $0x58] sm:$0xff]  ;;  %v4644_v53 = vld [vmem:[#allocation2 + $0x60] sm:$0xff] }
 0x230   : > { %v4594_v2 = vmul.f32 %v29846_v47, %v4378_v61  ;;  %v4645_v10 = vld [vmem:[#allocation2 + $0x68] sm:$0xff]  ;;  %v4646_v12 = vld [vmem:[#allocation2 + $0x70] sm:$0xff]  ;;  %v4647_v61 = vld [vmem:[#allocation2 + $0x78] sm:$0xff] }
 0x231   : > { %4631 = vst.msk [vmem:[#allocation2 + $0x12b] sm:$0xff] %vm450_vm1, %v4595_v50  ;;  %v4704_v52 = vld [vmem:[#allocation2 + $0x101] sm:$0xff]  ;;  %v4705_v38 = vld [vmem:[#allocation2 + $0x109] sm:$0xff]  ;;  %v4655_v28 = vld [vmem:[#allocation2 + $0xb8] sm:$0xff] }
 0x232   : > { %4630 = vst.msk [vmem:[#allocation2 + $0x123] sm:$0xff] %vm450_vm1, %v4594_v2  ;;  %24378 = vmatprep.mubr.msk.f32.mxu1 %vm450_vm1, %v4704_v52  ;;  %v4648_v50 = vld [vmem:[#allocation2 + $0x80] sm:$0xff]  ;;  %v4649_v2 = vld [vmem:[#allocation2 + $0x88] sm:$0xff]  ;;  %v4650_v52 = vld [vmem:[#allocation2 + $0x90] sm:$0xff] }
 0x233   : > { %24379 = vmatmul.mubr.msk.f32.gmra.mrb[68].mxu1 %vm450_vm1, %v4705_v38  ;;  %v4651_v38 = vld [vmem:[#allocation2 + $0x98] sm:$0xff]  ;;  %v4656_v24 = vld [vmem:[#allocation2 + $0xc0] sm:$0xff]  ;;  %v5447_v47 = vld [vmem:[#allocation2 + $0xea] sm:$0xff] }
 0x234   : > { %v4659_v36 = vld [vmem:[#allocation2 + $0xd8] sm:$0xff]  ;;  %v4660_v11 = vld [vmem:[#allocation2 + $0xe0] sm:$0xff]  ;;  %v5451_v20 = vld [vmem:[#allocation2 + $0x10a] sm:$0xff] }
 0x235   : > { %v4706_v1 = vld [vmem:[#allocation2 + $0x111] sm:$0xff]  ;;  %v4707_v21 = vld [vmem:[#allocation2 + $0x119] sm:$0xff]  ;;  %v5450_v39 = vld [vmem:[#allocation2 + $0x102] sm:$0xff] }
 0x236   : > { %24381 = vmatprep.mubr.msk.f32.mxu1 %vm450_vm1, %v4706_v1  ;;  %v4652_v1 = vld [vmem:[#allocation2 + $0xa0] sm:$0xff]  ;;  %v5448_v14 = vld [vmem:[#allocation2 + $0xf2] sm:$0xff] }
 0x237   : > { %24382 = vmatmul.mubr.msk.f32.gmra.mrb[70].mxu1 %vm450_vm1, %v4707_v21  ;;  %v4653_v21 = vld [vmem:[#allocation2 + $0xa8] sm:$0xff]  ;;  %v5449_v60 = vld [vmem:[#allocation2 + $0xfa] sm:$0xff]  ;;  %v5452_v19 = vld [vmem:[#allocation2 + $0x112] sm:$0xff] }
 0x238   : > { %24392 = vmatprep.mubr.msk.f32.mxu1 %vm450_vm1, %v4632_v22  ;;  %v4654_v22 = vld [vmem:[#allocation2 + $0xb0] sm:$0xff]  ;;  %v5453_v25 = vld [vmem:[#allocation2 + $0x11a] sm:$0xff] }
 0x239   : > { %v5881_v48 = vld [vmem:[#allocation2 + $0x122] sm:$0xff]  ;;  %v5882_v4 = vld [vmem:[#allocation2 + $0x12a] sm:$0xff] }
 0x23b   : > { %24393 = vmatmul.mubr.msk.f32.vlgmr.msra.gmra.mrb[36].mxu1 %vm450_vm1, %v4633_v29  ;;  %v4657_v29 = vld [vmem:[#allocation2 + $0xc8] sm:$0xff] }
 0x23c   : > { %26573 = vmatpush3.bf16.msra.mxu1 %v29605_v58  ;;  %24395 = vmatprep.mubr.msk.f32.mxu1 %vm450_vm1, %v4634_v45  ;;  %v4639_v58 = vld [vmem:[#allocation2 + $0x38] sm:$0xff]  ;;  %v4661_v45 = vld [vmem:[#allocation2 + $0xe8] sm:$0xff] }
 0x23d   : > { %26575 = vmatprep.subr.bf16.mxu1 %v26574_v43 }
 0x23f   : > { %24396 = vmatmul.mubr.msk.f32.gmra.mrb[38].mxu1 %vm450_vm1, %v4635_v46  ;;  %v4662_v46 = vld [vmem:[#allocation2 + $0xf0] sm:$0xff] }
 0x240   : > { %24398 = vmatprep.mubr.msk.f32.mxu1 %vm450_vm1, %v4636_v59  ;;  %26577 = vmatpush3.bf16.msra.mxu1 %v26574_v43  ;;  %v4658_v43 = vld [vmem:[#allocation2 + $0xd0] sm:$0xff]  ;;  %v4663_v59 = vld [vmem:[#allocation2 + $0xf8] sm:$0xff] }
 0x241   : > { %26579 = vmatprep.subr.bf16.mxu1 %v29873_v37 }
 0x243   : > { %24399 = vmatmul.mubr.msk.f32.gmra.mrb[40].mxu1 %vm450_vm1, %v4637_v30  ;;  %v4664_v30 = vld [vmem:[#allocation2 + $0x100] sm:$0xff] }
 0x244   : > { %24401 = vmatprep.mubr.msk.f32.mxu1 %vm450_vm1, %v4638_v3  ;;  %v4665_v3 = vld [vmem:[#allocation2 + $0x108] sm:$0xff] }
 0x247   : > { %24402 = vmatmul.mubr.msk.f32.gmra.mrb[42].mxu1 %vm450_vm1, %v4639_v58  ;;  %v4666_v58 = vld [vmem:[#allocation2 + $0x110] sm:$0xff] }
 0x248   : > { %24404 = vmatprep.mubr.msk.f32.mxu1 %vm450_vm1, %v4640_v49  ;;  %v5418_v49 = vld [vmem:[#allocation2 + $0x2] sm:$0xff] }
 0x24b   : > { %24405 = vmatmul.mubr.msk.f32.gmra.mrb[44].mxu1 %vm450_vm1, %v4641_v5  ;;  %v4667_v5 = vld [vmem:[#allocation2 + $0x118] sm:$0xff] }
 0x24c   : > { %24407 = vmatprep.mubr.msk.f32.mxu1 %vm450_vm1, %v4642_v8  ;;  %v5885_v8 = vld [vmem:[%s32572_s3 + $0x70] sm:$0xff] }
 0x24f   : > { %24408 = vmatmul.mubr.msk.f32.gmra.mrb[46].mxu1 %vm450_vm1, %v4643_v31  ;;  %v5886_v31 = vld [vmem:[%s32572_s3 + $0x78] sm:$0xff] }
 0x250   : > { %24410 = vmatprep.mubr.msk.f32.mxu1 %vm450_vm1, %v4644_v53  ;;  %v5419_v53 = vld [vmem:[#allocation2 + $0xa] sm:$0xff] }
 0x253   : > { %24411 = vmatmul.mubr.msk.f32.gmra.mrb[48].mxu1 %vm450_vm1, %v4645_v10  ;;  %v26582_v10 = vpack.c.bf16 %v5886_v31, %v5885_v8  ;;  %v5441_v8 = vld [vmem:[#allocation2 + $0xba] sm:$0xff]  ;;  %v5442_v31 = vld [vmem:[#allocation2 + $0xc2] sm:$0xff] }
 0x254   : > { %24413 = vmatprep.mubr.msk.f32.mxu1 %vm450_vm1, %v4646_v12  ;;  %v6312_v12 = vld [vmem:[%s32572_s3 + $0x80] sm:$0xff] }
 0x257   : > { %24414 = vmatmul.mubr.msk.f32.gmra.mrb[50].mxu1 %vm450_vm1, %v4647_v61  ;;  %v6313_v61 = vld [vmem:[%s32572_s3 + $0x88] sm:$0xff] }
 0x258   : > { %24416 = vmatprep.mubr.msk.f32.mxu1 %vm450_vm1, %v4648_v50  ;;  %v29923_v50 = vld [vmem:[#allocation2 + $0x12] sm:$0xff] }
 0x25b   : > { %24417 = vmatmul.mubr.msk.f32.gmra.mrb[52].mxu1 %vm450_vm1, %v4649_v2  ;;  %v29928_v2 = vpack.c.bf16 %v6313_v61, %v6312_v12  ;;  %v5445_v12 = vld [vmem:[#allocation2 + $0xda] sm:$0xff]  ;;  %v5446_v61 = vld [vmem:[#allocation2 + $0xe2] sm:$0xff] }
 0x25c   : > { %24419 = vmatprep.mubr.msk.f32.mxu1 %vm450_vm1, %v4650_v52  ;;  %v29930_v52 = vld [vmem:[#allocation2 + $0x1a] sm:$0xff] }
 0x25f   : > { %24420 = vmatmul.mubr.msk.f32.gmra.mrb[54].mxu1 %vm450_vm1, %v4651_v38  ;;  %v29934_v38 = vld [vmem:[#allocation2 + $0x22] sm:$0xff] }
 0x260   : > { %24422 = vmatprep.mubr.msk.f32.mxu1 %vm450_vm1, %v4652_v1  ;;  %v29943_v1 = vld [vmem:[#allocation2 + $0x32] sm:$0xff] }
 0x263   : > { %24423 = vmatmul.mubr.msk.f32.gmra.mrb[56].mxu1 %vm450_vm1, %v4653_v21  ;;  %v29947_v21 = vld [vmem:[#allocation2 + $0x3a] sm:$0xff] }
 0x264   : > { %24425 = vmatprep.mubr.msk.f32.mxu1 %vm450_vm1, %v4654_v22  ;;  %v29951_v22 = vld [vmem:[#allocation2 + $0x42] sm:$0xff] }
 0x267   : > { %24426 = vmatmul.mubr.msk.f32.gmra.mrb[58].mxu1 %vm450_vm1, %v4655_v28  ;;  %v29955_v28 = vld [vmem:[#allocation2 + $0x4a] sm:$0xff] }
 0x268   : > { %24428 = vmatprep.mubr.msk.f32.mxu1 %vm450_vm1, %v4656_v24  ;;  %v29959_v24 = vld [vmem:[#allocation2 + $0x52] sm:$0xff] }
 0x26b   : > { %24429 = vmatmul.mubr.msk.f32.gmra.mrb[60].mxu1 %vm450_vm1, %v4657_v29  ;;  %v29963_v29 = vld [vmem:[#allocation2 + $0x5a] sm:$0xff] }
 0x26c   : > { %24431 = vmatprep.mubr.msk.f32.mxu1 %vm450_vm1, %v4658_v43  ;;  %v29967_v43 = vld [vmem:[#allocation2 + $0x62] sm:$0xff] }
 0x26f   : > { %24432 = vmatmul.mubr.msk.f32.gmra.mrb[62].mxu1 %vm450_vm1, %v4659_v36  ;;  %v29971_v36 = vld [vmem:[#allocation2 + $0x6a] sm:$0xff] }
 0x270   : > { %24434 = vmatprep.mubr.msk.f32.mxu1 %vm450_vm1, %v4660_v11  ;;  %v29975_v11 = vld [vmem:[#allocation2 + $0x72] sm:$0xff] }
 0x273   : > { %24435 = vmatmul.mubr.msk.f32.gmra.mrb[64].mxu1 %vm450_vm1, %v4661_v45  ;;  %v29979_v45 = vld [vmem:[#allocation2 + $0x7a] sm:$0xff] }
 0x274   : > { %24437 = vmatprep.mubr.msk.f32.mxu1 %vm450_vm1, %v4662_v46  ;;  %v29983_v46 = vld [vmem:[#allocation2 + $0x82] sm:$0xff] }
 0x277   : > { %24438 = vmatmul.mubr.msk.f32.gmra.mrb[66].mxu1 %vm450_vm1, %v4663_v59  ;;  %v29987_v59 = vld [vmem:[#allocation2 + $0x8a] sm:$0xff] }
 0x278   : > { %24440 = vmatprep.mubr.msk.f32.mxu1 %vm450_vm1, %v4664_v30  ;;  %v5436_v30 = vld [vmem:[#allocation2 + $0x92] sm:$0xff] }
 0x27b   : > { %24441 = vmatmul.mubr.msk.f32.gmra.mrb[68].mxu1 %vm450_vm1, %v4665_v3  ;;  %v5437_v3 = vld [vmem:[#allocation2 + $0x9a] sm:$0xff] }
 0x27c   : > { %24443 = vmatprep.mubr.msk.f32.mxu1 %vm450_vm1, %v4666_v58  ;;  %v5438_v58 = vld [vmem:[#allocation2 + $0xa2] sm:$0xff] }
 0x27f   : > { %24444 = vmatmul.mubr.msk.f32.gmra.mrb[70].mxu1 %vm450_vm1, %v4667_v5  ;;  %v5440_v5 = vld [vmem:[#allocation2 + $0xb2] sm:$0xff] }
 0x280   : > { %24454 = vmatprep.mubr.msk.f32.mxu1 %vm450_vm1, %v5418_v49  ;;  %v5439_v49 = vld [vmem:[#allocation2 + $0xaa] sm:$0xff] }
 0x283   : > { %24455 = vmatmul.mubr.msk.f32.vlgmr.msra.gmra.mrb[36].mxu1 %vm450_vm1, %v5419_v53  ;;  %v5443_v53 = vld [vmem:[#allocation2 + $0xca] sm:$0xff] }
 0x284   : > { %26581 = vmatpush3.bf16.msra.mxu1 %v29873_v37  ;;  %24457 = vmatprep.mubr.msk.f32.mxu1 %vm450_vm1, %v29923_v50  ;;  %v29939_v37 = vld [vmem:[#allocation2 + $0x2a] sm:$0xff] }
 0x285   : > { %26583 = vmatprep.subr.bf16.mxu1 %v26582_v10 }
 0x287   : > { %24458 = vmatmul.mubr.msk.f32.gmra.mrb[38].mxu1 %vm450_vm1, %v29930_v52 }
 0x288   : > { %24460 = vmatprep.mubr.msk.f32.mxu1 %vm450_vm1, %v29934_v38  ;;  %26585 = vmatpush3.bf16.msra.mxu1 %v26582_v10  ;;  %v5444_v10 = vld [vmem:[#allocation2 + $0xd2] sm:$0xff] }
 0x289   : > { %26587 = vmatprep.subr.bf16.mxu1 %v29928_v2 }
 0x28b   : > { %24461 = vmatmul.mubr.msk.f32.gmra.mrb[40].mxu1 %vm450_vm1, %v29939_v37 }
 0x28c   : > { %24463 = vmatprep.mubr.msk.f32.mxu1 %vm450_vm1, %v29943_v1 }
 0x28f   : > { %24464 = vmatmul.mubr.msk.f32.gmra.mrb[42].mxu1 %vm450_vm1, %v29947_v21 }
 0x290   : > { %24466 = vmatprep.mubr.msk.f32.mxu1 %vm450_vm1, %v29951_v22 }
 0x293   : > { %24467 = vmatmul.mubr.msk.f32.gmra.mrb[44].mxu1 %vm450_vm1, %v29955_v28 }
 0x294   : > { %24469 = vmatprep.mubr.msk.f32.mxu1 %vm450_vm1, %v29959_v24 }
 0x297   : > { %24470 = vmatmul.mubr.msk.f32.gmra.mrb[46].mxu1 %vm450_vm1, %v29963_v29 }
 0x298   : > { %24472 = vmatprep.mubr.msk.f32.mxu1 %vm450_vm1, %v29967_v43 }
 0x29b   : > { %24473 = vmatmul.mubr.msk.f32.gmra.mrb[48].mxu1 %vm450_vm1, %v29971_v36 }
 0x29c   : > { %24475 = vmatprep.mubr.msk.f32.mxu1 %vm450_vm1, %v29975_v11 }
 0x29f   : > { %24476 = vmatmul.mubr.msk.f32.gmra.mrb[50].mxu1 %vm450_vm1, %v29979_v45 }
 0x2a0   : > { %24478 = vmatprep.mubr.msk.f32.mxu1 %vm450_vm1, %v29983_v46 }
 0x2a3   : > { %24479 = vmatmul.mubr.msk.f32.gmra.mrb[52].mxu1 %vm450_vm1, %v29987_v59 }
 0x2a4   : > { %24481 = vmatprep.mubr.msk.f32.mxu1 %vm450_vm1, %v5436_v30 }
 0x2a7   : > { %24482 = vmatmul.mubr.msk.f32.gmra.mrb[54].mxu1 %vm450_vm1, %v5437_v3 }
 0x2a8   : > { %24484 = vmatprep.mubr.msk.f32.mxu1 %vm450_vm1, %v5438_v58 }
 0x2ab   : > { %24485 = vmatmul.mubr.msk.f32.gmra.mrb[56].mxu1 %vm450_vm1, %v5439_v49 }
 0x2ac   : > { %24487 = vmatprep.mubr.msk.f32.mxu1 %vm450_vm1, %v5440_v5 }
 0x2af   : > { %24488 = vmatmul.mubr.msk.f32.gmra.mrb[58].mxu1 %vm450_vm1, %v5441_v8 }
 0x2b0   : > { %24490 = vmatprep.mubr.msk.f32.mxu1 %vm450_vm1, %v5442_v31 }
 0x2b3   : > { %24491 = vmatmul.mubr.msk.f32.gmra.mrb[60].mxu1 %vm450_vm1, %v5443_v53 }
 0x2b4   : > { %24493 = vmatprep.mubr.msk.f32.mxu1 %vm450_vm1, %v5444_v10 }
 0x2b7   : > { %24494 = vmatmul.mubr.msk.f32.gmra.mrb[62].mxu1 %vm450_vm1, %v5445_v12 }
 0x2b8   : > { %24496 = vmatprep.mubr.msk.f32.mxu1 %vm450_vm1, %v5446_v61 }
 0x2bb   : > { %24497 = vmatmul.mubr.msk.f32.gmra.mrb[64].mxu1 %vm450_vm1, %v5447_v47 }
 0x2bc   : > { %24499 = vmatprep.mubr.msk.f32.mxu1 %vm450_vm1, %v5448_v14 }
 0x2bf   : > { %24500 = vmatmul.mubr.msk.f32.gmra.mrb[66].mxu1 %vm450_vm1, %v5449_v60 }
 0x2c0   : > { %24502 = vmatprep.mubr.msk.f32.mxu1 %vm450_vm1, %v5450_v39 }
 0x2c3   : > { %24503 = vmatmul.mubr.msk.f32.gmra.mrb[68].mxu1 %vm450_vm1, %v5451_v20 }
 0x2c4   : > { %24505 = vmatprep.mubr.msk.f32.mxu1 %vm450_vm1, %v5452_v19 }
 0x2c7   : > { %24506 = vmatmul.mubr.msk.f32.gmra.mrb[70].mxu1 %vm450_vm1, %v5453_v25 }
 0x2c8   : > { %24516 = vmatprep.mubr.msk.f32.mxu1 %vm450_vm1, %v29923_v50  ;;  %v6280_v50 = vld [vmem:[#allocation2 + $0x33] sm:$0xff] }
 0x2cb   : > { %24517 = vmatmul.mubr.msk.f32.vlgmr.msra.gmra.mrb[36].mxu1 %vm450_vm1, %v29930_v52  ;;  %v6282_v52 = vld [vmem:[#allocation2 + $0x43] sm:$0xff] }
 0x2cc   : > { %26589 = vmatpush3.bf16.msra.mxu1 %v29928_v2  ;;  %24519 = vmatprep.mubr.msk.f32.mxu1 %vm450_vm1, %v29934_v38  ;;  %v6281_v2 = vld [vmem:[#allocation2 + $0x3b] sm:$0xff]  ;;  %v6284_v38 = vld [vmem:[#allocation2 + $0x53] sm:$0xff] }
 0x2cd   : > { %26591 = vmatprep.subr.bf16.mxu1 %v26590_v33 }
 0x2cf   : > { %24520 = vmatmul.mubr.msk.f32.gmra.mrb[38].mxu1 %vm450_vm1, %v29939_v37  ;;  %v6285_v37 = vld [vmem:[#allocation2 + $0x5b] sm:$0xff] }
 0x2d0   : > { %24522 = vmatprep.mubr.msk.f32.mxu1 %vm450_vm1, %v29943_v1  ;;  %26593 = vmatpush3.bf16.msra.mxu1 %v26590_v33  ;;  %v6744_v33 = vld [vmem:[%s32572_s3 + $0xb8] sm:$0xff]  ;;  %v6286_v1 = vld [vmem:[#allocation2 + $0x63] sm:$0xff] }
 0x2d1   : > { %26595 = vmatprep.subr.bf16.mxu1 %v26594_v13 }
 0x2d3   : > { %24523 = vmatmul.mubr.msk.f32.gmra.mrb[40].mxu1 %vm450_vm1, %v29947_v21  ;;  %v6287_v21 = vld [vmem:[#allocation2 + $0x6b] sm:$0xff] }
 0x2d4   : > { %24525 = vmatprep.mubr.msk.f32.mxu1 %vm450_vm1, %v29951_v22  ;;  %v6288_v22 = vld [vmem:[#allocation2 + $0x73] sm:$0xff] }
 0x2d7   : > { %24526 = vmatmul.mubr.msk.f32.gmra.mrb[42].mxu1 %vm450_vm1, %v29955_v28  ;;  %v6289_v28 = vld [vmem:[#allocation2 + $0x7b] sm:$0xff] }
 0x2d8   : > { %24528 = vmatprep.mubr.msk.f32.mxu1 %vm450_vm1, %v29959_v24  ;;  %v6290_v24 = vld [vmem:[#allocation2 + $0x83] sm:$0xff] }
 0x2db   : > { %24529 = vmatmul.mubr.msk.f32.gmra.mrb[44].mxu1 %vm450_vm1, %v29963_v29  ;;  %v6291_v29 = vld [vmem:[#allocation2 + $0x8b] sm:$0xff] }
 0x2dc   : > { %24531 = vmatprep.mubr.msk.f32.mxu1 %vm450_vm1, %v29967_v43  ;;  %v6292_v43 = vld [vmem:[#allocation2 + $0x93] sm:$0xff] }
 0x2df   : > { %24532 = vmatmul.mubr.msk.f32.gmra.mrb[46].mxu1 %vm450_vm1, %v29971_v36  ;;  %v6293_v36 = vld [vmem:[#allocation2 + $0x9b] sm:$0xff] }
 0x2e0   : > { %24534 = vmatprep.mubr.msk.f32.mxu1 %vm450_vm1, %v29975_v11  ;;  %v6294_v11 = vld [vmem:[#allocation2 + $0xa3] sm:$0xff] }
 0x2e3   : > { %24535 = vmatmul.mubr.msk.f32.gmra.mrb[48].mxu1 %vm450_vm1, %v29979_v45  ;;  %v6295_v45 = vld [vmem:[#allocation2 + $0xab] sm:$0xff] }
 0x2e4   : > { %24537 = vmatprep.mubr.msk.f32.mxu1 %vm450_vm1, %v29983_v46  ;;  %v6296_v46 = vld [vmem:[#allocation2 + $0xb3] sm:$0xff] }
 0x2e7   : > { %24538 = vmatmul.mubr.msk.f32.gmra.mrb[50].mxu1 %vm450_vm1, %v29987_v59  ;;  %v6297_v59 = vld [vmem:[#allocation2 + $0xbb] sm:$0xff] }
 0x2e8   : > { %24540 = vmatprep.mubr.msk.f32.mxu1 %vm450_vm1, %v5436_v30  ;;  %v6298_v30 = vld [vmem:[#allocation2 + $0xc3] sm:$0xff] }
 0x2eb   : > { %24541 = vmatmul.mubr.msk.f32.gmra.mrb[52].mxu1 %vm450_vm1, %v5437_v3  ;;  %v6299_v3 = vld [vmem:[#allocation2 + $0xcb] sm:$0xff] }
 0x2ec   : > { %24543 = vmatprep.mubr.msk.f32.mxu1 %vm450_vm1, %v5438_v58  ;;  %v6300_v58 = vld [vmem:[#allocation2 + $0xd3] sm:$0xff] }
 0x2ef   : > { %24544 = vmatmul.mubr.msk.f32.gmra.mrb[54].mxu1 %vm450_vm1, %v5439_v49  ;;  %v6301_v49 = vld [vmem:[#allocation2 + $0xdb] sm:$0xff] }
 0x2f0   : > { %24546 = vmatprep.mubr.msk.f32.mxu1 %vm450_vm1, %v5440_v5  ;;  %v6302_v5 = vld [vmem:[#allocation2 + $0xe3] sm:$0xff] }
 0x2f3   : > { %24547 = vmatmul.mubr.msk.f32.gmra.mrb[56].mxu1 %vm450_vm1, %v5441_v8  ;;  %v6303_v8 = vld [vmem:[#allocation2 + $0xeb] sm:$0xff] }
 0x2f4   : > { %24549 = vmatprep.mubr.msk.f32.mxu1 %vm450_vm1, %v5442_v31  ;;  %v6304_v31 = vld [vmem:[#allocation2 + $0xf3] sm:$0xff] }
 0x2f7   : > { %24550 = vmatmul.mubr.msk.f32.gmra.mrb[58].mxu1 %vm450_vm1, %v5443_v53  ;;  %v6305_v53 = vld [vmem:[#allocation2 + $0xfb] sm:$0xff] }
 0x2f8   : > { %24552 = vmatprep.mubr.msk.f32.mxu1 %vm450_vm1, %v5444_v10  ;;  %v6306_v10 = vld [vmem:[#allocation2 + $0x103] sm:$0xff] }
 0x2fb   : > { %24553 = vmatmul.mubr.msk.f32.gmra.mrb[60].mxu1 %vm450_vm1, %v5445_v12  ;;  %v6307_v12 = vld [vmem:[#allocation2 + $0x10b] sm:$0xff] }
 0x2fc   : > { %24555 = vmatprep.mubr.msk.f32.mxu1 %vm450_vm1, %v5446_v61  ;;  %v6308_v61 = vld [vmem:[#allocation2 + $0x113] sm:$0xff] }
 0x2ff   : > { %24556 = vmatmul.mubr.msk.f32.gmra.mrb[62].mxu1 %vm450_vm1, %v5447_v47  ;;  %v6279_v47 = vld [vmem:[#allocation2 + $0x2b] sm:$0xff] }
 0x300   : > { %24558 = vmatprep.mubr.msk.f32.mxu1 %vm450_vm1, %v5448_v14 }
 0x303   : > { %24559 = vmatmul.mubr.msk.f32.gmra.mrb[64].mxu1 %vm450_vm1, %v5449_v60  ;;  %v7171_v60 = vld [vmem:[%s32572_s3 + $0xc8] sm:$0xff] }
 0x304   : > { %24561 = vmatprep.mubr.msk.f32.mxu1 %vm450_vm1, %v5450_v39  ;;  %v6278_v39 = vld [vmem:[#allocation2 + $0x23] sm:$0xff] }
 0x307   : > { %24562 = vmatmul.mubr.msk.f32.gmra.mrb[66].mxu1 %vm450_vm1, %v5451_v20  ;;  %v26598_v20 = vpack.c.bf16 %v6744_v33, %v6743_v32  ;;  %v6311_v32 = vld [vmem:[#allocation2 + $0x12b] sm:$0xff] }
 0x308   : > { %24564 = vmatprep.mubr.msk.f32.mxu1 %vm450_vm1, %v5452_v19  ;;  %v6277_v19 = vld [vmem:[#allocation2 + $0x1b] sm:$0xff]  ;;  %v7172_v33 = vld [vmem:[%s32572_s3 + $0xd0] sm:$0xff] }
 0x30b   : > { %24565 = vmatmul.mubr.msk.f32.gmra.mrb[68].mxu1 %vm450_vm1, %v5453_v25  ;;  %v7170_v25 = vld [vmem:[%s32572_s3 + $0xc0] sm:$0xff] }
 0x30c   : > { %24567 = vmatprep.mubr.msk.f32.mxu1 %vm450_vm1, %v5881_v48  ;;  %v30089_v14 = vpack.c.bf16 %v7171_v60, %v7170_v25  ;;  %v6309_v48 = vld [vmem:[#allocation2 + $0x11b] sm:$0xff] }
 0x30d   : > { %v6706_v25 = vld [vmem:[#allocation2 + $0x1c] sm:$0xff] }
 0x30e   : > { %v7599_v60 = vld [vmem:[%s32572_s3 + $0xe0] sm:$0xff] }
 0x30f   : > { %24568 = vmatmul.mubr.msk.f32.gmra.mrb[70].mxu1 %vm450_vm1, %v5882_v4  ;;  %v6310_v4 = vld [vmem:[#allocation2 + $0x123] sm:$0xff] }
 0x310   : > { %24578 = vmatprep.mubr.msk.f32.mxu1 %vm450_vm1, %v6276_v26  ;;  %v7173_v26 = vld [vmem:[%s32572_s3 + $0xd8] sm:$0xff] }
 0x313   : > { %24579 = vmatmul.mubr.msk.f32.vlgmr.msra.gmra.mrb[36].mxu1 %vm450_vm1, %v6277_v19  ;;  %v26606_v19 = vpack.c.bf16 %v7173_v26, %v7172_v33  ;;  %v6740_v33 = vld [vmem:[#allocation2 + $0x12c] sm:$0xff] }
 0x314   : > { %26597 = vmatpush3.bf16.msra.mxu1 %v26594_v13  ;;  %24581 = vmatprep.mubr.msk.f32.mxu1 %vm450_vm1, %v6278_v39  ;;  %v6283_v13 = vld [vmem:[#allocation2 + $0x4b] sm:$0xff] }
 0x315   : > { %26599 = vmatprep.subr.bf16.mxu1 %v26598_v20  ;;  %v7600_v39 = vld [vmem:[%s32572_s3 + $0xe8] sm:$0xff]  ;;  %v7601_v26 = vld [vmem:[%s32572_s3 + $0xf0] sm:$0xff] }
 0x317   : > { %24582 = vmatmul.mubr.msk.f32.gmra.mrb[38].mxu1 %vm450_vm1, %v6279_v47  ;;  %v30139_v47 = vld [vmem:[#allocation2 + $0x24] sm:$0xff] }
 0x318   : > { %24584 = vmatprep.mubr.msk.f32.mxu1 %vm450_vm1, %v6280_v50  ;;  %26601 = vmatpush3.bf16.msra.mxu1 %v26598_v20  ;;  %v6705_v20 = vld [vmem:[#allocation2 + $0x14] sm:$0xff]  ;;  %v30144_v50 = vpack.c.bf16 %v7600_v39, %v7599_v60  ;;  %v8029_v60 = vld [vmem:[%s32572_s3 + $0x108] sm:$0xff] }
 0x319   : > { %26603 = vmatprep.subr.bf16.mxu1 %v30089_v14 }
 0x31b   : > { %24585 = vmatmul.mubr.msk.f32.gmra.mrb[40].mxu1 %vm450_vm1, %v6281_v2  ;;  %v30146_v2 = vld [vmem:[#allocation2 + $0x2c] sm:$0xff] }
 0x31c   : > { %24587 = vmatprep.mubr.msk.f32.mxu1 %vm450_vm1, %v6282_v52  ;;  %v30150_v52 = vld [vmem:[#allocation2 + $0x34] sm:$0xff] }
 0x31f   : > { %24588 = vmatmul.mubr.msk.f32.gmra.mrb[42].mxu1 %vm450_vm1, %v6283_v13  ;;  %v30159_v13 = vld [vmem:[#allocation2 + $0x44] sm:$0xff] }
 0x320   : > { %24590 = vmatprep.mubr.msk.f32.mxu1 %vm450_vm1, %v6284_v38  ;;  %v30163_v38 = vld [vmem:[#allocation2 + $0x4c] sm:$0xff] }
 0x323   : > { %24591 = vmatmul.mubr.msk.f32.gmra.mrb[44].mxu1 %vm450_vm1, %v6285_v37  ;;  %v30167_v37 = vld [vmem:[#allocation2 + $0x54] sm:$0xff] }
 0x324   : > { %24593 = vmatprep.mubr.msk.f32.mxu1 %vm450_vm1, %v6286_v1  ;;  %v30171_v1 = vld [vmem:[#allocation2 + $0x5c] sm:$0xff] }
 0x327   : > { %24594 = vmatmul.mubr.msk.f32.gmra.mrb[46].mxu1 %vm450_vm1, %v6287_v21  ;;  %v30175_v21 = vld [vmem:[#allocation2 + $0x64] sm:$0xff] }
 0x328   : > { %24596 = vmatprep.mubr.msk.f32.mxu1 %vm450_vm1, %v6288_v22  ;;  %v30179_v22 = vld [vmem:[#allocation2 + $0x6c] sm:$0xff] }
 0x32b   : > { %24597 = vmatmul.mubr.msk.f32.gmra.mrb[48].mxu1 %vm450_vm1, %v6289_v28  ;;  %v30183_v28 = vld [vmem:[#allocation2 + $0x74] sm:$0xff] }
 0x32c   : > { %24599 = vmatprep.mubr.msk.f32.mxu1 %vm450_vm1, %v6290_v24  ;;  %v30187_v24 = vld [vmem:[#allocation2 + $0x7c] sm:$0xff] }
 0x32f   : > { %24600 = vmatmul.mubr.msk.f32.gmra.mrb[50].mxu1 %vm450_vm1, %v6291_v29  ;;  %v30191_v29 = vld [vmem:[#allocation2 + $0x84] sm:$0xff] }
 0x330   : > { %24602 = vmatprep.mubr.msk.f32.mxu1 %vm450_vm1, %v6292_v43  ;;  %v30195_v43 = vld [vmem:[#allocation2 + $0x8c] sm:$0xff] }
 0x333   : > { %24603 = vmatmul.mubr.msk.f32.gmra.mrb[52].mxu1 %vm450_vm1, %v6293_v36  ;;  %v30199_v36 = vld [vmem:[#allocation2 + $0x94] sm:$0xff] }
 0x334   : > { %24605 = vmatprep.mubr.msk.f32.mxu1 %vm450_vm1, %v6294_v11  ;;  %v30203_v11 = vld [vmem:[#allocation2 + $0x9c] sm:$0xff] }
 0x337   : > { %24606 = vmatmul.mubr.msk.f32.gmra.mrb[54].mxu1 %vm450_vm1, %v6295_v45  ;;  %v6723_v45 = vld [vmem:[#allocation2 + $0xa4] sm:$0xff] }
 0x338   : > { %24608 = vmatprep.mubr.msk.f32.mxu1 %vm450_vm1, %v6296_v46  ;;  %v6724_v46 = vld [vmem:[#allocation2 + $0xac] sm:$0xff] }
 0x33b   : > { %24609 = vmatmul.mubr.msk.f32.gmra.mrb[56].mxu1 %vm450_vm1, %v6297_v59  ;;  %v6725_v59 = vld [vmem:[#allocation2 + $0xb4] sm:$0xff] }
 0x33c   : > { %24611 = vmatprep.mubr.msk.f32.mxu1 %vm450_vm1, %v6298_v30  ;;  %v6726_v30 = vld [vmem:[#allocation2 + $0xbc] sm:$0xff] }
 0x33f   : > { %24612 = vmatmul.mubr.msk.f32.gmra.mrb[58].mxu1 %vm450_vm1, %v6299_v3  ;;  %v6727_v3 = vld [vmem:[#allocation2 + $0xc4] sm:$0xff] }
 0x340   : > { %24614 = vmatprep.mubr.msk.f32.mxu1 %vm450_vm1, %v6300_v58  ;;  %v6728_v58 = vld [vmem:[#allocation2 + $0xcc] sm:$0xff] }
 0x343   : > { %24615 = vmatmul.mubr.msk.f32.gmra.mrb[60].mxu1 %vm450_vm1, %v6301_v49  ;;  %v6729_v49 = vld [vmem:[#allocation2 + $0xd4] sm:$0xff] }
 0x344   : > { %24617 = vmatprep.mubr.msk.f32.mxu1 %vm450_vm1, %v6302_v5  ;;  %v6730_v5 = vld [vmem:[#allocation2 + $0xdc] sm:$0xff] }
 0x347   : > { %24618 = vmatmul.mubr.msk.f32.gmra.mrb[62].mxu1 %vm450_vm1, %v6303_v8  ;;  %v6731_v8 = vld [vmem:[#allocation2 + $0xe4] sm:$0xff] }
 0x348   : > { %24620 = vmatprep.mubr.msk.f32.mxu1 %vm450_vm1, %v6304_v31  ;;  %v6732_v31 = vld [vmem:[#allocation2 + $0xec] sm:$0xff] }
 0x34b   : > { %24621 = vmatmul.mubr.msk.f32.gmra.mrb[64].mxu1 %vm450_vm1, %v6305_v53  ;;  %v6733_v53 = vld [vmem:[#allocation2 + $0xf4] sm:$0xff] }
 0x34c   : > { %24623 = vmatprep.mubr.msk.f32.mxu1 %vm450_vm1, %v6306_v10  ;;  %v6734_v10 = vld [vmem:[#allocation2 + $0xfc] sm:$0xff] }
 0x34f   : > { %24624 = vmatmul.mubr.msk.f32.gmra.mrb[66].mxu1 %vm450_vm1, %v6307_v12  ;;  %v6735_v12 = vld [vmem:[#allocation2 + $0x104] sm:$0xff] }
 0x350   : > { %24626 = vmatprep.mubr.msk.f32.mxu1 %vm450_vm1, %v6308_v61  ;;  %v6736_v61 = vld [vmem:[#allocation2 + $0x10c] sm:$0xff] }
 0x353   : > { %24627 = vmatmul.mubr.msk.f32.gmra.mrb[68].mxu1 %vm450_vm1, %v6309_v48  ;;  %v6737_v48 = vld [vmem:[#allocation2 + $0x114] sm:$0xff] }
 0x354   : > { %24629 = vmatprep.mubr.msk.f32.mxu1 %vm450_vm1, %v6310_v4  ;;  %v6738_v4 = vld [vmem:[#allocation2 + $0x11c] sm:$0xff] }
 0x357   : > { %24630 = vmatmul.mubr.msk.f32.gmra.mrb[70].mxu1 %vm450_vm1, %v6311_v32  ;;  %v6739_v32 = vld [vmem:[#allocation2 + $0x124] sm:$0xff] }
 0x358   : > { %24640 = vmatprep.mubr.msk.f32.mxu1 %vm450_vm1, %v6705_v20  ;;  %v7602_v20 = vld [vmem:[%s32572_s3 + $0xf8] sm:$0xff] }
 0x35b   : > { %24641 = vmatmul.mubr.msk.f32.vlgmr.msra.gmra.mrb[36].mxu1 %vm450_vm1, %v6706_v25  ;;  %v8028_v25 = vld [vmem:[%s32572_s3 + $0x100] sm:$0xff] }
 0x35c   : > { %26605 = vmatpush3.bf16.msra.mxu1 %v30089_v14  ;;  %24643 = vmatprep.mubr.msk.f32.mxu1 %vm450_vm1, %v30139_v47  ;;  %v30155_v14 = vld [vmem:[#allocation2 + $0x3c] sm:$0xff]  ;;  %v26618_v39 = vpack.c.bf16 %v8029_v60, %v8028_v25  ;;  %v7591_v60 = vld [vmem:[#allocation2 + $0x105] sm:$0xff] }
 0x35d   : > { %26607 = vmatprep.subr.bf16.mxu1 %v26606_v19  ;;  %v7590_v25 = vld [vmem:[#allocation2 + $0xfd] sm:$0xff] }
 0x35f   : > { %24644 = vmatmul.mubr.msk.f32.gmra.mrb[38].mxu1 %vm450_vm1, %v30146_v2 }
 0x360   : > { %24646 = vmatprep.mubr.msk.f32.mxu1 %vm450_vm1, %v30150_v52  ;;  %26609 = vmatpush3.bf16.msra.mxu1 %v26606_v19  ;;  %v26614_v19 = vpack.c.bf16 %v7602_v20, %v7601_v26  ;;  %v7587_v26 = vld [vmem:[#allocation2 + $0xe5] sm:$0xff]  ;;  %v7588_v20 = vld [vmem:[#allocation2 + $0xed] sm:$0xff] }
 0x361   : > { %26611 = vmatprep.subr.bf16.mxu1 %v30144_v50 }
 0x363   : > { %24647 = vmatmul.mubr.msk.f32.gmra.mrb[40].mxu1 %vm450_vm1, %v30155_v14 }
 0x364   : > { %24649 = vmatprep.mubr.msk.f32.mxu1 %vm450_vm1, %v30159_v13 }
 0x367   : > { %24650 = vmatmul.mubr.msk.f32.gmra.mrb[42].mxu1 %vm450_vm1, %v30163_v38 }
 0x368   : > { %24652 = vmatprep.mubr.msk.f32.mxu1 %vm450_vm1, %v30167_v37 }
 0x36b   : > { %24653 = vmatmul.mubr.msk.f32.gmra.mrb[44].mxu1 %vm450_vm1, %v30171_v1 }
 0x36c   : > { %24655 = vmatprep.mubr.msk.f32.mxu1 %vm450_vm1, %v30175_v21 }
 0x36f   : > { %24656 = vmatmul.mubr.msk.f32.gmra.mrb[46].mxu1 %vm450_vm1, %v30179_v22 }
 0x370   : > { %24658 = vmatprep.mubr.msk.f32.mxu1 %vm450_vm1, %v30183_v28 }
 0x373   : > { %24659 = vmatmul.mubr.msk.f32.gmra.mrb[48].mxu1 %vm450_vm1, %v30187_v24 }
 0x374   : > { %24661 = vmatprep.mubr.msk.f32.mxu1 %vm450_vm1, %v30191_v29 }
 0x377   : > { %24662 = vmatmul.mubr.msk.f32.gmra.mrb[50].mxu1 %vm450_vm1, %v30195_v43 }
 0x378   : > { %24664 = vmatprep.mubr.msk.f32.mxu1 %vm450_vm1, %v30199_v36 }
 0x37b   : > { %24665 = vmatmul.mubr.msk.f32.gmra.mrb[52].mxu1 %vm450_vm1, %v30203_v11 }
 0x37c   : > { %24667 = vmatprep.mubr.msk.f32.mxu1 %vm450_vm1, %v6723_v45 }
 0x37f   : > { %24668 = vmatmul.mubr.msk.f32.gmra.mrb[54].mxu1 %vm450_vm1, %v6724_v46 }
 0x380   : > { %24670 = vmatprep.mubr.msk.f32.mxu1 %vm450_vm1, %v6725_v59 }
 0x383   : > { %24671 = vmatmul.mubr.msk.f32.gmra.mrb[56].mxu1 %vm450_vm1, %v6726_v30 }
 0x384   : > { %24673 = vmatprep.mubr.msk.f32.mxu1 %vm450_vm1, %v6727_v3 }
 0x387   : > { %24674 = vmatmul.mubr.msk.f32.gmra.mrb[58].mxu1 %vm450_vm1, %v6728_v58 }
 0x388   : > { %24676 = vmatprep.mubr.msk.f32.mxu1 %vm450_vm1, %v6729_v49 }
 0x38b   : > { %24677 = vmatmul.mubr.msk.f32.gmra.mrb[60].mxu1 %vm450_vm1, %v6730_v5 }
 0x38c   : > { %24679 = vmatprep.mubr.msk.f32.mxu1 %vm450_vm1, %v6731_v8 }
 0x38f   : > { %24680 = vmatmul.mubr.msk.f32.gmra.mrb[62].mxu1 %vm450_vm1, %v6732_v31 }
 0x390   : > { %24682 = vmatprep.mubr.msk.f32.mxu1 %vm450_vm1, %v6733_v53 }
 0x393   : > { %24683 = vmatmul.mubr.msk.f32.gmra.mrb[64].mxu1 %vm450_vm1, %v6734_v10 }
 0x394   : > { %24685 = vmatprep.mubr.msk.f32.mxu1 %vm450_vm1, %v6735_v12 }
 0x397   : > { %24686 = vmatmul.mubr.msk.f32.gmra.mrb[66].mxu1 %vm450_vm1, %v6736_v61 }
 0x398   : > { %24688 = vmatprep.mubr.msk.f32.mxu1 %vm450_vm1, %v6737_v48 }
 0x39b   : > { %24689 = vmatmul.mubr.msk.f32.gmra.mrb[68].mxu1 %vm450_vm1, %v6738_v4 }
 0x39c   : > { %24691 = vmatprep.mubr.msk.f32.mxu1 %vm450_vm1, %v6739_v32 }
 0x39f   : > { %24692 = vmatmul.mubr.msk.f32.gmra.mrb[70].mxu1 %vm450_vm1, %v6740_v33 }
 0x3a0   : > { %24702 = vmatprep.mubr.msk.f32.mxu1 %vm450_vm1, %v30139_v47  ;;  %v7168_v47 = vld [vmem:[#allocation2 + $0x134] sm:$0xff] }
 0x3a3   : > { %24703 = vmatmul.mubr.msk.f32.vlgmr.msra.gmra.mrb[36].mxu1 %vm450_vm1, %v30146_v2  ;;  %v8030_v2 = vld [vmem:[%s32572_s3 + $0x110] sm:$0xff] }
 0x3a4   : > { %26613 = vmatpush3.bf16.msra.mxu1 %v30144_v50  ;;  %24705 = vmatprep.mubr.msk.f32.mxu1 %vm450_vm1, %v30150_v52  ;;  %v7169_v50 = vld [vmem:[#allocation2 + $0x13c] sm:$0xff] }
 0x3a5   : > { %26615 = vmatprep.subr.bf16.mxu1 %v26614_v19  ;;  %v8031_v52 = vld [vmem:[%s32572_s3 + $0x118] sm:$0xff] }
 0x3a7   : > { %24706 = vmatmul.mubr.msk.f32.gmra.mrb[38].mxu1 %vm450_vm1, %v30155_v14  ;;  %v7563_v14 = vld [vmem:[#allocation2 + $0x25] sm:$0xff] }
 0x3a8   : > { %24708 = vmatprep.mubr.msk.f32.mxu1 %vm450_vm1, %v30159_v13  ;;  %26617 = vmatpush3.bf16.msra.mxu1 %v26614_v19  ;;  %v26622_v13 = vpack.c.bf16 %v8031_v52, %v8030_v2  ;;  %v7589_v19 = vld [vmem:[#allocation2 + $0xf5] sm:$0xff]  ;;  %v7595_v2 = vld [vmem:[#allocation2 + $0x125] sm:$0xff] }
 0x3a9   : > { %26619 = vmatprep.subr.bf16.mxu1 %v26618_v39  ;;  %v7597_v52 = vld [vmem:[#allocation2 + $0x135] sm:$0xff] }
 0x3ab   : > { %24709 = vmatmul.mubr.msk.f32.gmra.mrb[40].mxu1 %vm450_vm1, %v30163_v38  ;;  %v7564_v38 = vld [vmem:[#allocation2 + $0x2d] sm:$0xff] }
 0x3ac   : > { %24711 = vmatprep.mubr.msk.f32.mxu1 %vm450_vm1, %v30167_v37  ;;  %v7565_v37 = vld [vmem:[#allocation2 + $0x35] sm:$0xff] }
 0x3af   : > { %24712 = vmatmul.mubr.msk.f32.gmra.mrb[42].mxu1 %vm450_vm1, %v30171_v1  ;;  %v7566_v1 = vld [vmem:[#allocation2 + $0x3d] sm:$0xff] }
 0x3b0   : > { %24714 = vmatprep.mubr.msk.f32.mxu1 %vm450_vm1, %v30175_v21  ;;  %v7567_v21 = vld [vmem:[#allocation2 + $0x45] sm:$0xff] }
 0x3b3   : > { %24715 = vmatmul.mubr.msk.f32.gmra.mrb[44].mxu1 %vm450_vm1, %v30179_v22  ;;  %v7568_v22 = vld [vmem:[#allocation2 + $0x4d] sm:$0xff] }
 0x3b4   : > { %24717 = vmatprep.mubr.msk.f32.mxu1 %vm450_vm1, %v30183_v28  ;;  %v7569_v28 = vld [vmem:[#allocation2 + $0x55] sm:$0xff] }
 0x3b7   : > { %24718 = vmatmul.mubr.msk.f32.gmra.mrb[46].mxu1 %vm450_vm1, %v30187_v24  ;;  %v7570_v24 = vld [vmem:[#allocation2 + $0x5d] sm:$0xff] }
 0x3b8   : > { %24720 = vmatprep.mubr.msk.f32.mxu1 %vm450_vm1, %v30191_v29  ;;  %v7571_v29 = vld [vmem:[#allocation2 + $0x65] sm:$0xff] }
 0x3bb   : > { %24721 = vmatmul.mubr.msk.f32.gmra.mrb[48].mxu1 %vm450_vm1, %v30195_v43  ;;  %v8648_v43 = vld [vmem:[%s32574_s5 + $0x20] sm:$0xff] }
 0x3bc   : > { %24723 = vmatprep.mubr.msk.f32.mxu1 %vm450_vm1, %v30199_v36  ;;  %v8649_v36 = vld [vmem:[%s32574_s5 + $0x28] sm:$0xff] }
 0x3bf   : > { %24724 = vmatmul.mubr.msk.f32.gmra.mrb[50].mxu1 %vm450_vm1, %v30203_v11  ;;  %v8650_v11 = vld [vmem:[%s32574_s5 + $0x30] sm:$0xff] }
 0x3c0   : > { %24726 = vmatprep.mubr.msk.f32.mxu1 %vm450_vm1, %v6723_v45  ;;  %v26626_v45 = vpack.c.bf16 %v8649_v36, %v8648_v43  ;;  %v8000_v43 = vld [vmem:[#allocation2 + $0x66] sm:$0xff]  ;;  %v8001_v36 = vld [vmem:[#allocation2 + $0x6e] sm:$0xff] }
 0x3c2   : > { %26627 = vmatprep.subr.bf16.mxu0 %v26626_v45 }
 0x3c3   : > { %24727 = vmatmul.mubr.msk.f32.gmra.mrb[52].mxu1 %vm450_vm1, %v6724_v46  ;;  %v8651_v46 = vld [vmem:[%s32574_s5 + $0x38] sm:$0xff]  ;;  %26629 = vmatpush3.bf16.msra.mxu0 %v26626_v45 }
 0x3c4   : > { %24729 = vmatprep.mubr.msk.f32.mxu1 %vm450_vm1, %v6725_v59  ;;  %v26630_v59 = vpack.c.bf16 %v8651_v46, %v8650_v11  ;;  %v8002_v11 = vld [vmem:[#allocation2 + $0x76] sm:$0xff]  ;;  %v8003_v45 = vld [vmem:[#allocation2 + $0x7e] sm:$0xff]  ;;  %v8004_v46 = vld [vmem:[#allocation2 + $0x86] sm:$0xff] }
 0x3c6   : > { %26631 = vmatprep.subr.bf16.mxu0 %v26630_v59 }
 0x3c7   : > { %24730 = vmatmul.mubr.msk.f32.gmra.mrb[54].mxu1 %vm450_vm1, %v6726_v30  ;;  %v7572_v30 = vld [vmem:[#allocation2 + $0x6d] sm:$0xff]  ;;  %26633 = vmatpush3.bf16.msra.mxu0 %v26630_v59 }
 0x3c8   : > { %24732 = vmatprep.mubr.msk.f32.mxu1 %vm450_vm1, %v6727_v3  ;;  %v7573_v3 = vld [vmem:[#allocation2 + $0x75] sm:$0xff] }
 0x3c9   : > { %v8005_v59 = vld [vmem:[#allocation2 + $0x8e] sm:$0xff] }
 0x3cb   : > { %24733 = vmatmul.mubr.msk.f32.gmra.mrb[56].mxu1 %vm450_vm1, %v6728_v58  ;;  %v7574_v58 = vld [vmem:[#allocation2 + $0x7d] sm:$0xff] }
 0x3cc   : > { %24735 = vmatprep.mubr.msk.f32.mxu1 %vm450_vm1, %v6729_v49  ;;  %v7575_v49 = vld [vmem:[#allocation2 + $0x85] sm:$0xff] }
 0x3cf   : > { %24736 = vmatmul.mubr.msk.f32.gmra.mrb[58].mxu1 %vm450_vm1, %v6730_v5  ;;  %v7576_v5 = vld [vmem:[#allocation2 + $0x8d] sm:$0xff] }
 0x3d0   : > { %24738 = vmatprep.mubr.msk.f32.mxu1 %vm450_vm1, %v6731_v8  ;;  %v7577_v8 = vld [vmem:[#allocation2 + $0x95] sm:$0xff] }
 0x3d3   : > { %24739 = vmatmul.mubr.msk.f32.gmra.mrb[60].mxu1 %vm450_vm1, %v6732_v31  ;;  %v7578_v31 = vld [vmem:[#allocation2 + $0x9d] sm:$0xff] }
 0x3d4   : > { %24741 = vmatprep.mubr.msk.f32.mxu1 %vm450_vm1, %v6733_v53  ;;  %v7579_v53 = vld [vmem:[#allocation2 + $0xa5] sm:$0xff] }
 0x3d7   : > { %24742 = vmatmul.mubr.msk.f32.gmra.mrb[62].mxu1 %vm450_vm1, %v6734_v10  ;;  %v7580_v10 = vld [vmem:[#allocation2 + $0xad] sm:$0xff] }
 0x3d8   : > { %24744 = vmatprep.mubr.msk.f32.mxu1 %vm450_vm1, %v6735_v12  ;;  %v7581_v12 = vld [vmem:[#allocation2 + $0xb5] sm:$0xff] }
 0x3db   : > { %24745 = vmatmul.mubr.msk.f32.gmra.mrb[64].mxu1 %vm450_vm1, %v6736_v61  ;;  %v7582_v61 = vld [vmem:[#allocation2 + $0xbd] sm:$0xff] }
 0x3dc   : > { %24747 = vmatprep.mubr.msk.f32.mxu1 %vm450_vm1, %v6737_v48  ;;  %v7583_v48 = vld [vmem:[#allocation2 + $0xc5] sm:$0xff] }
 0x3df   : > { %24748 = vmatmul.mubr.msk.f32.gmra.mrb[66].mxu1 %vm450_vm1, %v6738_v4  ;;  %v7584_v4 = vld [vmem:[#allocation2 + $0xcd] sm:$0xff] }
 0x3e0   : > { %24750 = vmatprep.mubr.msk.f32.mxu1 %vm450_vm1, %v6739_v32  ;;  %v7585_v32 = vld [vmem:[#allocation2 + $0xd5] sm:$0xff] }
 0x3e3   : > { %24751 = vmatmul.mubr.msk.f32.gmra.mrb[68].mxu1 %vm450_vm1, %v6740_v33  ;;  %v7586_v33 = vld [vmem:[#allocation2 + $0xdd] sm:$0xff] }
 0x3e4   : > { %24753 = vmatprep.mubr.msk.f32.mxu1 %vm450_vm1, %v7168_v47  ;;  %v7593_v47 = vld [vmem:[#allocation2 + $0x115] sm:$0xff] }
 0x3e7   : > { %24754 = vmatmul.mubr.msk.f32.gmra.mrb[70].mxu1 %vm450_vm1, %v7169_v50  ;;  %v7594_v50 = vld [vmem:[#allocation2 + $0x11d] sm:$0xff] }
 0x3e8   : > { %24764 = vmatprep.mubr.msk.f32.mxu1 %vm450_vm1, %v7563_v14  ;;  %v7596_v14 = vld [vmem:[#allocation2 + $0x12d] sm:$0xff] }
 0x3eb   : > { %24765 = vmatmul.mubr.msk.f32.vlgmr.msra.gmra.mrb[36].mxu1 %vm450_vm1, %v7564_v38  ;;  %v7992_v38 = vld [vmem:[#allocation2 + $0x26] sm:$0xff] }
 0x3ec   : > { %26621 = vmatpush3.bf16.msra.mxu1 %v26618_v39  ;;  %24767 = vmatprep.mubr.msk.f32.mxu1 %vm450_vm1, %v7565_v37  ;;  %v7592_v39 = vld [vmem:[#allocation2 + $0x10d] sm:$0xff] }
 0x3ed   : > { %26623 = vmatprep.subr.bf16.mxu1 %v26622_v13  ;;  %v7993_v37 = vld [vmem:[#allocation2 + $0x2e] sm:$0xff] }
 0x3ef   : > { %24768 = vmatmul.mubr.msk.f32.gmra.mrb[38].mxu1 %vm450_vm1, %v7566_v1  ;;  %v7994_v1 = vld [vmem:[#allocation2 + $0x36] sm:$0xff] }
 0x3f0   : > { %24770 = vmatprep.mubr.msk.f32.mxu1 %vm450_vm1, %v7567_v21  ;;  %26625 = vmatpush3.bf16.msra.mxu1 %v26622_v13  ;;  %v7598_v13 = vld [vmem:[#allocation2 + $0x13d] sm:$0xff] }
 0x3f1   : > { %v7995_v21 = vld [vmem:[#allocation2 + $0x3e] sm:$0xff] }
 0x3f3   : > { %24771 = vmatmul.mubr.msk.f32.gmra.mrb[40].mxu1 %vm450_vm1, %v7568_v22  ;;  %v7996_v22 = vld [vmem:[#allocation2 + $0x46] sm:$0xff] }
 0x3f4   : > { %24773 = vmatprep.mubr.msk.f32.mxu1 %vm450_vm1, %v7569_v28  ;;  %v7997_v28 = vld [vmem:[#allocation2 + $0x4e] sm:$0xff] }
 0x3f7   : > { %24774 = vmatmul.mubr.msk.f32.gmra.mrb[42].mxu1 %vm450_vm1, %v7570_v24  ;;  %v7998_v24 = vld [vmem:[#allocation2 + $0x56] sm:$0xff] }
 0x3f8   : > { %24776 = vmatprep.mubr.msk.f32.mxu1 %vm450_vm1, %v7571_v29  ;;  %v7999_v29 = vld [vmem:[#allocation2 + $0x5e] sm:$0xff] }
 0x3fb   : > { %24777 = vmatmul.mubr.msk.f32.gmra.mrb[44].mxu1 %vm450_vm1, %v7572_v30  ;;  %v8006_v30 = vld [vmem:[#allocation2 + $0x96] sm:$0xff] }
 0x3fc   : > { %24779 = vmatprep.mubr.msk.f32.mxu1 %vm450_vm1, %v7573_v3  ;;  %v8007_v3 = vld [vmem:[#allocation2 + $0x9e] sm:$0xff] }
 0x3ff   : > { %24780 = vmatmul.mubr.msk.f32.gmra.mrb[46].mxu1 %vm450_vm1, %v7574_v58  ;;  %v8008_v58 = vld [vmem:[#allocation2 + $0xa6] sm:$0xff] }
 0x400   : > { %24782 = vmatprep.mubr.msk.f32.mxu1 %vm450_vm1, %v7575_v49  ;;  %v8009_v49 = vld [vmem:[#allocation2 + $0xae] sm:$0xff] }
 0x403   : > { %24783 = vmatmul.mubr.msk.f32.gmra.mrb[48].mxu1 %vm450_vm1, %v7576_v5  ;;  %v8010_v5 = vld [vmem:[#allocation2 + $0xb6] sm:$0xff] }
 0x404   : > { %24785 = vmatprep.mubr.msk.f32.mxu1 %vm450_vm1, %v7577_v8  ;;  %v8011_v8 = vld [vmem:[#allocation2 + $0xbe] sm:$0xff] }
 0x407   : > { %24786 = vmatmul.mubr.msk.f32.gmra.mrb[50].mxu1 %vm450_vm1, %v7578_v31  ;;  %v8012_v31 = vld [vmem:[#allocation2 + $0xc6] sm:$0xff] }
 0x408   : > { %24788 = vmatprep.mubr.msk.f32.mxu1 %vm450_vm1, %v7579_v53  ;;  %v8013_v53 = vld [vmem:[#allocation2 + $0xce] sm:$0xff] }
 0x40b   : > { %24789 = vmatmul.mubr.msk.f32.gmra.mrb[52].mxu1 %vm450_vm1, %v7580_v10  ;;  %v8014_v10 = vld [vmem:[#allocation2 + $0xd6] sm:$0xff] }
 0x40c   : > { %24791 = vmatprep.mubr.msk.f32.mxu1 %vm450_vm1, %v7581_v12  ;;  %v8015_v12 = vld [vmem:[#allocation2 + $0xde] sm:$0xff] }
 0x40f   : > { %24792 = vmatmul.mubr.msk.f32.gmra.mrb[54].mxu1 %vm450_vm1, %v7582_v61  ;;  %v8016_v61 = vld [vmem:[#allocation2 + $0xe6] sm:$0xff] }
 0x410   : > { %24794 = vmatprep.mubr.msk.f32.mxu1 %vm450_vm1, %v7583_v48  ;;  %v8017_v48 = vld [vmem:[#allocation2 + $0xee] sm:$0xff] }
 0x413   : > { %24795 = vmatmul.mubr.msk.f32.gmra.mrb[56].mxu1 %vm450_vm1, %v7584_v4  ;;  %v8018_v4 = vld [vmem:[#allocation2 + $0xf6] sm:$0xff] }
 0x414   : > { %24797 = vmatprep.mubr.msk.f32.mxu1 %vm450_vm1, %v7585_v32  ;;  %v8019_v32 = vld [vmem:[#allocation2 + $0xfe] sm:$0xff] }
 0x417   : > { %24798 = vmatmul.mubr.msk.f32.gmra.mrb[58].mxu1 %vm450_vm1, %v7586_v33  ;;  %v8020_v33 = vld [vmem:[#allocation2 + $0x106] sm:$0xff] }
 0x418   : > { %24800 = vmatprep.mubr.msk.f32.mxu1 %vm450_vm1, %v7587_v26  ;;  %v8021_v26 = vld [vmem:[#allocation2 + $0x10e] sm:$0xff] }
 0x41b   : > { %24801 = vmatmul.mubr.msk.f32.gmra.mrb[60].mxu1 %vm450_vm1, %v7588_v20  ;;  %v8022_v20 = vld [vmem:[#allocation2 + $0x116] sm:$0xff] }
 0x41c   : > { %24803 = vmatprep.mubr.msk.f32.mxu1 %vm450_vm1, %v7589_v19  ;;  %v8023_v19 = vld [vmem:[#allocation2 + $0x11e] sm:$0xff] }
 0x41f   : > { %24804 = vmatmul.mubr.msk.f32.gmra.mrb[62].mxu1 %vm450_vm1, %v7590_v25  ;;  %v8024_v25 = vld [vmem:[#allocation2 + $0x126] sm:$0xff] }
 0x420   : > { %24806 = vmatprep.mubr.msk.f32.mxu1 %vm450_vm1, %v7591_v60  ;;  %v8026_v60 = vld [vmem:[#allocation2 + $0x136] sm:$0xff] }
 0x423   : > { %24807 = vmatmul.mubr.msk.f32.gmra.mrb[64].mxu1 %vm450_vm1, %v7592_v39  ;;  %v8025_v39 = vld [vmem:[#allocation2 + $0x12e] sm:$0xff] }
 0x424   : > { %24809 = vmatprep.mubr.msk.f32.mxu1 %vm450_vm1, %v7593_v47  ;;  %v8027_v47 = vld [vmem:[#allocation2 + $0x13e] sm:$0xff] }
 0x427   : > { %24810 = vmatmul.mubr.msk.f32.gmra.mrb[66].mxu1 %vm450_vm1, %v7594_v50  ;;  %v8612_v50 = vld [vmem:[#allocation3 + $0x1] sm:$0xff] }
 0x428   : > { %24812 = vmatprep.mubr.msk.f32.mxu1 %vm450_vm1, %v7595_v2  ;;  %v8608_v2 = vld [vmem:[%s32574_s5] sm:$0xff]  ;;  %24888 = vmatprep.mubr.msk.f32.mxu0 %vm450_vm1, %v8612_v50 }
 0x42b   : > { %24813 = vmatmul.mubr.msk.f32.gmra.mrb[68].mxu1 %vm450_vm1, %v7596_v14 }
 0x42c   : > { %24815 = vmatprep.mubr.msk.f32.mxu1 %vm450_vm1, %v7597_v52  ;;  %v8609_v52 = vld [vmem:[%s32574_s5 + $0x8] sm:$0xff] }
 0x42d   : > { %v26634_v14 = vpack.c.bf16 %v8609_v52, %v8608_v2 }
 0x42f   : > { %24816 = vmatmul.mubr.msk.f32.gmra.mrb[70].mxu1 %vm450_vm1, %v7598_v13  ;;  %v8613_v13 = vld [vmem:[#allocation3 + $0x9] sm:$0xff]  ;;  %26635 = vmatprep.subr.bf16.mxu0 %v26634_v14 }
 0x430   : > { %24826 = vmatprep.mubr.msk.f32.mxu1 %vm450_vm1, %v7992_v38  ;;  %24889 = vmatmul.mubr.msk.f32.vlgmr.msra.gmra.mrb[36].mxu0 %vm450_vm1, %v8613_v13  ;;  %v8610_v38 = vld [vmem:[%s32574_s5 + $0x10] sm:$0xff] }
 0x431   : > { %26637 = vmatpush3.bf16.msra.mxu0 %v26634_v14 }
 0x433   : > { %24827 = vmatmul.mubr.msk.f32.vlgmr.msra.gmra.mrb[36].mxu1 %vm450_vm1, %v7993_v37  ;;  %v8611_v37 = vld [vmem:[%s32574_s5 + $0x18] sm:$0xff] }
 0x434   : > { %24829 = vmatprep.mubr.msk.f32.mxu1 %vm450_vm1, %v7994_v1  ;;  %v26638_v1 = vpack.c.bf16 %v8611_v37, %v8610_v38 }
 0x436   : > { %26639 = vmatprep.subr.bf16.mxu0 %v26638_v1 }
 0x437   : > { %24830 = vmatmul.mubr.msk.f32.gmra.mrb[38].mxu1 %vm450_vm1, %v7995_v21  ;;  %26641 = vmatpush3.bf16.msra.mxu0 %v26638_v1  ;;  %v9394_v21 = vld [vmem:[%s32574_s5 + $0x40] sm:$0xff] }
 0x438   : > { %24832 = vmatprep.mubr.msk.f32.mxu1 %vm450_vm1, %v7996_v22  ;;  %v9395_v22 = vld [vmem:[%s32574_s5 + $0x48] sm:$0xff] }
 0x43b   : > { %24833 = vmatmul.mubr.msk.f32.gmra.mrb[40].mxu1 %vm450_vm1, %v7997_v28  ;;  %v30400_v28 = vpack.c.bf16 %v9395_v22, %v9394_v21 }
 0x43c   : > { %24835 = vmatprep.mubr.msk.f32.mxu1 %vm450_vm1, %v7998_v24  ;;  %v30406_v24 = vld [vmem:[%s32573_s4] ss:$0 sm:$0xff] }
 0x43d   : > { %26643 = vmatprep.subr.bf16.mxu0 %v30400_v28 }
 0x43f   : > { %24836 = vmatmul.mubr.msk.f32.gmra.mrb[42].mxu1 %vm450_vm1, %v7999_v29 }
 0x440   : > { %24838 = vmatprep.mubr.msk.f32.mxu1 %vm450_vm1, %v8000_v43 }
 0x443   : > { %24839 = vmatmul.mubr.msk.f32.gmra.mrb[44].mxu1 %vm450_vm1, %v8001_v36 }
 0x444   : > { %24841 = vmatprep.mubr.msk.f32.mxu1 %vm450_vm1, %v8002_v11 }
 0x447   : > { %24842 = vmatmul.mubr.msk.f32.gmra.mrb[46].mxu1 %vm450_vm1, %v8003_v45 }
 0x448   : > { %24844 = vmatprep.mubr.msk.f32.mxu1 %vm450_vm1, %v8004_v46 }
 0x44b   : > { %24845 = vmatmul.mubr.msk.f32.gmra.mrb[48].mxu1 %vm450_vm1, %v8005_v59 }
 0x44c   : > { %24847 = vmatprep.mubr.msk.f32.mxu1 %vm450_vm1, %v8006_v30 }
 0x44f   : > { %24848 = vmatmul.mubr.msk.f32.gmra.mrb[50].mxu1 %vm450_vm1, %v8007_v3 }
 0x450   : > { %24850 = vmatprep.mubr.msk.f32.mxu1 %vm450_vm1, %v8008_v58 }
 0x453   : > { %24851 = vmatmul.mubr.msk.f32.gmra.mrb[52].mxu1 %vm450_vm1, %v8009_v49 }
 0x454   : > { %24853 = vmatprep.mubr.msk.f32.mxu1 %vm450_vm1, %v8010_v5 }
 0x457   : > { %24854 = vmatmul.mubr.msk.f32.gmra.mrb[54].mxu1 %vm450_vm1, %v8011_v8 }
 0x458   : > { %24856 = vmatprep.mubr.msk.f32.mxu1 %vm450_vm1, %v8012_v31 }
 0x45b   : > { %24857 = vmatmul.mubr.msk.f32.gmra.mrb[56].mxu1 %vm450_vm1, %v8013_v53 }
 0x45c   : > { %24859 = vmatprep.mubr.msk.f32.mxu1 %vm450_vm1, %v8014_v10 }
 0x45f   : > { %24860 = vmatmul.mubr.msk.f32.gmra.mrb[58].mxu1 %vm450_vm1, %v8015_v12 }
 0x460   : > { %24862 = vmatprep.mubr.msk.f32.mxu1 %vm450_vm1, %v8016_v61 }
 0x463   : > { %24863 = vmatmul.mubr.msk.f32.gmra.mrb[60].mxu1 %vm450_vm1, %v8017_v48 }
 0x464   : > { %24865 = vmatprep.mubr.msk.f32.mxu1 %vm450_vm1, %v8018_v4 }
 0x467   : > { %24866 = vmatmul.mubr.msk.f32.gmra.mrb[62].mxu1 %vm450_vm1, %v8019_v32 }
 0x468   : > { %24868 = vmatprep.mubr.msk.f32.mxu1 %vm450_vm1, %v8020_v33 }
 0x46b   : > { %24869 = vmatmul.mubr.msk.f32.gmra.mrb[64].mxu1 %vm450_vm1, %v8021_v26 }
 0x46c   : > { %24871 = vmatprep.mubr.msk.f32.mxu1 %vm450_vm1, %v8022_v20 }
 0x46f   : > { %24872 = vmatmul.mubr.msk.f32.gmra.mrb[66].mxu1 %vm450_vm1, %v8023_v19 }
 0x470   : > { %24874 = vmatprep.mubr.msk.f32.mxu1 %vm450_vm1, %v8024_v25 }
 0x473   : > { %24875 = vmatmul.mubr.msk.f32.gmra.mrb[68].mxu1 %vm450_vm1, %v8025_v39 }
 0x474   : > { %24877 = vmatprep.mubr.msk.f32.mxu1 %vm450_vm1, %v8026_v60 }
 0x477   : > { %24878 = vmatmul.mubr.msk.f32.gmra.mrb[70].mxu1 %vm450_vm1, %v8027_v47 }
 0x506   : > { %v24828_v29 = vpop.f32.mrb[36].mxu1 }
 0x507   : > { %v8429_v43 = vadd.f32 %v24828_v29, %v30406_v24  ;;  %v8206_v36 = vpop.f32.mrb[37].mxu1 }
 0x508   : > { %v8428_v11 = vadd.f32 %v30406_v24, %v8206_v36 }
 0x509   : > { %v8465_v45 = vmax.f32 %v8429_v43, 0.0 }
 0x50a   : > { %v8464_v46 = vmax.f32 %v8428_v11, 0.0  ;;  %v24831_v59 = vpop.f32.mrb[38].mxu1 }
 0x50b   : > { %v8501_v30 = vmul.f32 %v8465_v45, %v29612_v7  ;;  %v8431_v3 = vadd.f32 %v24831_v59, %v30406_v24  ;;  %v8216_v58 = vpop.f32.mrb[39].mxu1 }
 0x50c   : > { %v8500_v49 = vmul.f32 %v8464_v46, %v29608_v62  ;;  %v8430_v5 = vadd.f32 %v30406_v24, %v8216_v58 }
 0x50d   : > { %8537 = vst.msk [vmem:[#allocation3 + $0x1b] sm:$0xff] %vm450_vm1, %v8501_v30  ;;  %v8467_v8 = vmax.f32 %v8431_v3, 0.0 }
 0x50e   : > { %8536 = vst.msk [vmem:[#allocation3 + $0x13] sm:$0xff] %vm450_vm1, %v8500_v49  ;;  %v8466_v31 = vmax.f32 %v8430_v5, 0.0  ;;  %v24834_v53 = vpop.f32.mrb[40].mxu1 }
 0x50f   : > { %v8503_v10 = vmul.f32 %v8467_v8, %v29614_v9  ;;  %v8433_v12 = vadd.f32 %v24834_v53, %v30406_v24  ;;  %v8226_v61 = vpop.f32.mrb[41].mxu1 }
 0x510   : > { %v8502_v48 = vmul.f32 %v8466_v31, %v29610_v0  ;;  %v8432_v4 = vadd.f32 %v30406_v24, %v8226_v61 }
 0x511   : > { %8539 = vst.msk [vmem:[#allocation3 + $0x2b] sm:$0xff] %vm450_vm1, %v8503_v10  ;;  %v8469_v32 = vmax.f32 %v8433_v12, 0.0 }
 0x512   : > { %8538 = vst.msk [vmem:[#allocation3 + $0x23] sm:$0xff] %vm450_vm1, %v8502_v48  ;;  %v8468_v33 = vmax.f32 %v8432_v4, 0.0  ;;  %v24837_v26 = vpop.f32.mrb[42].mxu1 }
 0x513   : > { %v8505_v20 = vmul.f32 %v8469_v32, %v29618_v17  ;;  %v8435_v19 = vadd.f32 %v24837_v26, %v30406_v24  ;;  %v8236_v25 = vpop.f32.mrb[43].mxu1 }
 0x514   : > { %v8504_v60 = vmul.f32 %v8468_v33, %v29616_v16  ;;  %v8434_v39 = vadd.f32 %v30406_v24, %v8236_v25 }
 0x515   : > { %8541 = vst.msk [vmem:[#allocation3 + $0x3b] sm:$0xff] %vm450_vm1, %v8505_v20  ;;  %v8471_v47 = vmax.f32 %v8435_v19, 0.0  ;;  %v8614_v50 = vld [vmem:[#allocation3 + $0x11] sm:$0xff]  ;;  %v8615_v2 = vld [vmem:[#allocation3 + $0x19] sm:$0xff] }
 0x516   : > { %8540 = vst.msk [vmem:[#allocation3 + $0x33] sm:$0xff] %vm450_vm1, %v8504_v60  ;;  %v8470_v52 = vmax.f32 %v8434_v39, 0.0  ;;  %v24840_v14 = vpop.f32.mrb[44].mxu1  ;;  %24891 = vmatprep.mubr.msk.f32.mxu0 %vm450_vm1, %v8614_v50 }
 0x517   : > { %v8507_v13 = vmul.f32 %v8471_v47, %v29624_v27  ;;  %v8437_v38 = vadd.f32 %v24840_v14, %v30406_v24  ;;  %v8246_v37 = vpop.f32.mrb[45].mxu1  ;;  %24892 = vmatmul.mubr.msk.f32.gmra.mrb[38].mxu0 %vm450_vm1, %v8615_v2 }
 0x518   : > { %v8506_v1 = vmul.f32 %v8470_v52, %v29620_v23  ;;  %v8436_v21 = vadd.f32 %v30406_v24, %v8246_v37 }
 0x519   : > { %8543 = vst.msk [vmem:[#allocation3 + $0x4b] sm:$0xff] %vm450_vm1, %v8507_v13  ;;  %v8473_v22 = vmax.f32 %v8437_v38, 0.0  ;;  %v8616_v29 = vld [vmem:[#allocation3 + $0x21] sm:$0xff]  ;;  %v8617_v43 = vld [vmem:[#allocation3 + $0x29] sm:$0xff] }
 0x51a   : > { %8542 = vst.msk [vmem:[#allocation3 + $0x43] sm:$0xff] %vm450_vm1, %v8506_v1  ;;  %v8472_v36 = vmax.f32 %v8436_v21, 0.0  ;;  %v24843_v11 = vpop.f32.mrb[46].mxu1  ;;  %24894 = vmatprep.mubr.msk.f32.mxu0 %vm450_vm1, %v8616_v29 }
 0x51b   : > { %v8509_v45 = vmul.f32 %v8473_v22, %v29634_v35  ;;  %v8439_v46 = vadd.f32 %v24843_v11, %v30406_v24  ;;  %v8256_v59 = vpop.f32.mrb[47].mxu1  ;;  %24895 = vmatmul.mubr.msk.f32.gmra.mrb[40].mxu0 %vm450_vm1, %v8617_v43 }
 0x51c   : > { %v8508_v30 = vmul.f32 %v8472_v36, %v29632_v34  ;;  %v8438_v3 = vadd.f32 %v30406_v24, %v8256_v59 }
 0x51d   : > { %8545 = vst.msk [vmem:[#allocation3 + $0x5b] sm:$0xff] %vm450_vm1, %v8509_v45  ;;  %v8475_v58 = vmax.f32 %v8439_v46, 0.0  ;;  %v8618_v49 = vld [vmem:[#allocation3 + $0x31] sm:$0xff]  ;;  %v8619_v5 = vld [vmem:[#allocation3 + $0x39] sm:$0xff] }
 0x51e   : > { %8544 = vst.msk [vmem:[#allocation3 + $0x53] sm:$0xff] %vm450_vm1, %v8508_v30  ;;  %v8474_v8 = vmax.f32 %v8438_v3, 0.0  ;;  %v24846_v31 = vpop.f32.mrb[48].mxu1  ;;  %24897 = vmatprep.mubr.msk.f32.mxu0 %vm450_vm1, %v8618_v49 }
 0x51f   : > { %v8511_v53 = vmul.f32 %v8475_v58, %v29644_v44  ;;  %v8441_v10 = vadd.f32 %v24846_v31, %v30406_v24  ;;  %v8266_v12 = vpop.f32.mrb[49].mxu1  ;;  %24898 = vmatmul.mubr.msk.f32.gmra.mrb[42].mxu0 %vm450_vm1, %v8619_v5 }
 0x520   : > { %v8510_v61 = vmul.f32 %v8474_v8, %v29640_v41  ;;  %v8440_v48 = vadd.f32 %v30406_v24, %v8266_v12 }
 0x521   : > { %8547 = vst.msk [vmem:[#allocation3 + $0x6b] sm:$0xff] %vm450_vm1, %v8511_v53  ;;  %v8477_v4 = vmax.f32 %v8441_v10, 0.0  ;;  %v8620_v32 = vld [vmem:[#allocation3 + $0x41] sm:$0xff]  ;;  %v8621_v33 = vld [vmem:[#allocation3 + $0x49] sm:$0xff] }
 0x522   : > { %8546 = vst.msk [vmem:[#allocation3 + $0x63] sm:$0xff] %vm450_vm1, %v8510_v61  ;;  %v8476_v26 = vmax.f32 %v8440_v48, 0.0  ;;  %v24849_v20 = vpop.f32.mrb[50].mxu1  ;;  %24900 = vmatprep.mubr.msk.f32.mxu0 %vm450_vm1, %v8620_v32 }
 0x523   : > { %v8513_v19 = vmul.f32 %v8477_v4, %v29654_v57  ;;  %v8443_v25 = vadd.f32 %v24849_v20, %v30406_v24  ;;  %v8276_v60 = vpop.f32.mrb[51].mxu1  ;;  %24901 = vmatmul.mubr.msk.f32.gmra.mrb[44].mxu0 %vm450_vm1, %v8621_v33 }
 0x524   : > { %v8512_v39 = vmul.f32 %v8476_v26, %v29652_v55  ;;  %v8442_v47 = vadd.f32 %v30406_v24, %v8276_v60 }
 0x525   : > { %8549 = vst.msk [vmem:[#allocation3 + $0x7b] sm:$0xff] %vm450_vm1, %v8513_v19  ;;  %v8479_v50 = vmax.f32 %v8443_v25, 0.0  ;;  %v8622_v2 = vld [vmem:[#allocation3 + $0x51] sm:$0xff]  ;;  %v8623_v52 = vld [vmem:[#allocation3 + $0x59] sm:$0xff] }
 0x526   : > { %8548 = vst.msk [vmem:[#allocation3 + $0x73] sm:$0xff] %vm450_vm1, %v8512_v39  ;;  %v8478_v14 = vmax.f32 %v8442_v47, 0.0  ;;  %v24852_v13 = vpop.f32.mrb[52].mxu1  ;;  %24903 = vmatprep.mubr.msk.f32.mxu0 %vm450_vm1, %v8622_v2 }
 0x527   : > { %v8515_v38 = vmul.f32 %v8479_v50, %v29665_v15  ;;  %v8445_v37 = vadd.f32 %v24852_v13, %v30406_v24  ;;  %v8286_v1 = vpop.f32.mrb[53].mxu1  ;;  %24904 = vmatmul.mubr.msk.f32.gmra.mrb[46].mxu0 %vm450_vm1, %v8623_v52 }
 0x528   : > { %v8514_v21 = vmul.f32 %v8478_v14, %v29662_v54  ;;  %v8444_v22 = vadd.f32 %v30406_v24, %v8286_v1 }
 0x529   : > { %8551 = vst.msk [vmem:[#allocation3 + $0x8b] sm:$0xff] %vm450_vm1, %v8515_v38  ;;  %v8481_v29 = vmax.f32 %v8445_v37, 0.0  ;;  %v8624_v43 = vld [vmem:[#allocation3 + $0x61] sm:$0xff]  ;;  %v8625_v36 = vld [vmem:[#allocation3 + $0x69] sm:$0xff] }
 0x52a   : > { %8550 = vst.msk [vmem:[#allocation3 + $0x83] sm:$0xff] %vm450_vm1, %v8514_v21  ;;  %v8480_v11 = vmax.f32 %v8444_v22, 0.0  ;;  %v24855_v45 = vpop.f32.mrb[54].mxu1  ;;  %24906 = vmatprep.mubr.msk.f32.mxu0 %vm450_vm1, %v8624_v43  ;;  %v32621_v22 = vld [vmem:[#allocation4_spill] sm:$0xff] }
 0x52b   : > { %v8517_v46 = vmul.f32 %v8481_v29, %v29675_v51  ;;  %v8447_v59 = vadd.f32 %v24855_v45, %v30406_v24  ;;  %v8296_v30 = vpop.f32.mrb[55].mxu1  ;;  %24907 = vmatmul.mubr.msk.f32.gmra.mrb[48].mxu0 %vm450_vm1, %v8625_v36 }
 0x52c   : > { %v8516_v3 = vmul.f32 %v8480_v11, %v29672_v40  ;;  %v8446_v58 = vadd.f32 %v30406_v24, %v8296_v30  ;;  %v32622_v30 = vld [vmem:[#allocation6_spill] sm:$0xff] }
 0x52d   : > { %8553 = vst.msk [vmem:[#allocation3 + $0x9b] sm:$0xff] %vm450_vm1, %v8517_v46  ;;  %v8483_v49 = vmax.f32 %v8447_v59, 0.0  ;;  %v8626_v5 = vld [vmem:[#allocation3 + $0x71] sm:$0xff]  ;;  %v8627_v8 = vld [vmem:[#allocation3 + $0x79] sm:$0xff] }
 0x52e   : > { %8552 = vst.msk [vmem:[#allocation3 + $0x93] sm:$0xff] %vm450_vm1, %v8516_v3  ;;  %v8482_v31 = vmax.f32 %v8446_v58, 0.0  ;;  %v24858_v53 = vpop.f32.mrb[56].mxu1  ;;  %24909 = vmatprep.mubr.msk.f32.mxu0 %vm450_vm1, %v8626_v5  ;;  %v32623_v5 = vld [vmem:[#allocation5_spill] sm:$0xff] }
 0x52f   : > { %v8519_v10 = vmul.f32 %v8483_v49, %v29689_v56  ;;  %v8449_v12 = vadd.f32 %v24858_v53, %v30406_v24  ;;  %v8306_v61 = vpop.f32.mrb[57].mxu1  ;;  %24910 = vmatmul.mubr.msk.f32.gmra.mrb[50].mxu0 %vm450_vm1, %v8627_v8 }
 0x530   : > { %v8518_v48 = vmul.f32 %v8482_v31, %v29685_v6  ;;  %v8448_v4 = vadd.f32 %v30406_v24, %v8306_v61 }
 0x531   : > { %8555 = vst.msk [vmem:[#allocation3 + $0xab] sm:$0xff] %vm450_vm1, %v8519_v10  ;;  %v8485_v32 = vmax.f32 %v8449_v12, 0.0  ;;  %v8628_v33 = vld [vmem:[#allocation3 + $0x81] sm:$0xff]  ;;  %v8629_v26 = vld [vmem:[#allocation3 + $0x89] sm:$0xff] }
 0x532   : > { %8554 = vst.msk [vmem:[#allocation3 + $0xa3] sm:$0xff] %vm450_vm1, %v8518_v48  ;;  %v8484_v20 = vmax.f32 %v8448_v4, 0.0  ;;  %v24861_v19 = vpop.f32.mrb[58].mxu1  ;;  %24912 = vmatprep.mubr.msk.f32.mxu0 %vm450_vm1, %v8628_v33  ;;  %v32624_v4 = vld [vmem:[#allocation8_spill] sm:$0xff] }
 0x533   : > { %v8521_v25 = vmul.f32 %v8485_v32, %v29708_v63  ;;  %v8451_v60 = vadd.f32 %v24861_v19, %v30406_v24  ;;  %v8316_v39 = vpop.f32.mrb[59].mxu1  ;;  %24913 = vmatmul.mubr.msk.f32.gmra.mrb[52].mxu0 %vm450_vm1, %v8629_v26 }
 0x534   : > { %v8520_v47 = vmul.f32 %v8484_v20, %v29703_v42  ;;  %v8450_v50 = vadd.f32 %v30406_v24, %v8316_v39  ;;  %v32625_v20 = vld [vmem:[#allocation7_spill] sm:$0xff] }
 0x535   : > { %8557 = vst.msk [vmem:[#allocation3 + $0xbb] sm:$0xff] %vm450_vm1, %v8521_v25  ;;  %v8487_v2 = vmax.f32 %v8451_v60, 0.0  ;;  %v8630_v52 = vld [vmem:[#allocation3 + $0x91] sm:$0xff]  ;;  %v8631_v14 = vld [vmem:[#allocation3 + $0x99] sm:$0xff] }
 0x536   : > { %8556 = vst.msk [vmem:[#allocation3 + $0xb3] sm:$0xff] %vm450_vm1, %v8520_v47  ;;  %v8486_v13 = vmax.f32 %v8450_v50, 0.0  ;;  %v24864_v38 = vpop.f32.mrb[60].mxu1  ;;  %24915 = vmatprep.mubr.msk.f32.mxu0 %vm450_vm1, %v8630_v52  ;;  %v32626_v52 = vld [vmem:[#allocation10_spill] sm:$0xff] }
 0x537   : > { %v8523_v37 = vmul.f32 %v8487_v2, %v29727_v18  ;;  %v8453_v1 = vadd.f32 %v24864_v38, %v30406_v24  ;;  %v8326_v21 = vpop.f32.mrb[61].mxu1  ;;  %24916 = vmatmul.mubr.msk.f32.gmra.mrb[54].mxu0 %vm450_vm1, %v8631_v14 }
 0x538   : > { %v8522_v29 = vmul.f32 %v8486_v13, %v32621_v22  ;;  %v8452_v43 = vadd.f32 %v30406_v24, %v8326_v21 }
 0x539   : > { %8559 = vst.msk [vmem:[#allocation3 + $0xcb] sm:$0xff] %vm450_vm1, %v8523_v37  ;;  %v8489_v36 = vmax.f32 %v8453_v1, 0.0  ;;  %v8632_v11 = vld [vmem:[#allocation3 + $0xa1] sm:$0xff]  ;;  %v8633_v45 = vld [vmem:[#allocation3 + $0xa9] sm:$0xff] }
 0x53a   : > { %8558 = vst.msk [vmem:[#allocation3 + $0xc3] sm:$0xff] %vm450_vm1, %v8522_v29  ;;  %v8488_v46 = vmax.f32 %v8452_v43, 0.0  ;;  %v24867_v59 = vpop.f32.mrb[62].mxu1  ;;  %24918 = vmatprep.mubr.msk.f32.mxu0 %vm450_vm1, %v8632_v11  ;;  %v32627_v37 = vld [vmem:[#allocation9_spill] sm:$0xff] }
 0x53b   : > { %v8525_v3 = vmul.f32 %v8489_v36, %v32622_v30  ;;  %v8455_v58 = vadd.f32 %v24867_v59, %v30406_v24  ;;  %v8336_v49 = vpop.f32.mrb[63].mxu1  ;;  %24919 = vmatmul.mubr.msk.f32.gmra.mrb[56].mxu0 %vm450_vm1, %v8633_v45  ;;  %v10682_v30 = vld [vmem:[%s32574_s5 + $0xa8] sm:$0xff] }
 0x53c   : > { %v8524_v8 = vmul.f32 %v8488_v46, %v32623_v5  ;;  %v8454_v31 = vadd.f32 %v30406_v24, %v8336_v49  ;;  %v32628_v46 = vld [vmem:[#allocation12_spill] sm:$0xff]  ;;  %v32629_v49 = vld [vmem:[#allocation11_spill] sm:$0xff]  ;;  %v10681_v5 = vld [vmem:[%s32574_s5 + $0xa0] sm:$0xff] }
 0x53d   : > { %8561 = vst.msk [vmem:[#allocation3 + $0xdb] sm:$0xff] %vm450_vm1, %v8525_v3  ;;  %v8491_v53 = vmax.f32 %v8455_v58, 0.0  ;;  %v8634_v10 = vld [vmem:[#allocation3 + $0xb1] sm:$0xff]  ;;  %v8635_v12 = vld [vmem:[#allocation3 + $0xb9] sm:$0xff]  ;;  %v26666_v22 = vpack.c.bf16 %v10682_v30, %v10681_v5 }
 0x53e   : > { %8560 = vst.msk [vmem:[#allocation3 + $0xd3] sm:$0xff] %vm450_vm1, %v8524_v8  ;;  %v8490_v61 = vmax.f32 %v8454_v31, 0.0  ;;  %v24870_v48 = vpop.f32.mrb[64].mxu1  ;;  %24921 = vmatprep.mubr.msk.f32.mxu0 %vm450_vm1, %v8634_v10 }
 0x53f   : > { %v8527_v32 = vmul.f32 %v8491_v53, %v32624_v4  ;;  %v8457_v33 = vadd.f32 %v24870_v48, %v30406_v24  ;;  %v8346_v26 = vpop.f32.mrb[65].mxu1  ;;  %24922 = vmatmul.mubr.msk.f32.gmra.mrb[58].mxu0 %vm450_vm1, %v8635_v12 }
 0x540   : > { %v8526_v19 = vmul.f32 %v8490_v61, %v32625_v20  ;;  %v8456_v25 = vadd.f32 %v30406_v24, %v8346_v26  ;;  %v10255_v20 = vld [vmem:[%s32574_s5 + $0x98] sm:$0xff] }
 0x541   : > { %8563 = vst.msk [vmem:[#allocation3 + $0xeb] sm:$0xff] %vm450_vm1, %v8527_v32  ;;  %v8493_v60 = vmax.f32 %v8457_v33, 0.0  ;;  %v8636_v39 = vld [vmem:[#allocation3 + $0xc1] sm:$0xff]  ;;  %v8637_v47 = vld [vmem:[#allocation3 + $0xc9] sm:$0xff] }
 0x542   : > { %8562 = vst.msk [vmem:[#allocation3 + $0xe3] sm:$0xff] %vm450_vm1, %v8526_v19  ;;  %v8492_v50 = vmax.f32 %v8456_v25, 0.0  ;;  %v24873_v2 = vpop.f32.mrb[66].mxu1  ;;  %24924 = vmatprep.mubr.msk.f32.mxu0 %vm450_vm1, %v8636_v39  ;;  %v32630_v32 = vld [vmem:[#allocation14_spill] sm:$0xff]  ;;  %v32631_v25 = vld [vmem:[#allocation13_spill] sm:$0xff] }
 0x543   : > { %v8529_v14 = vmul.f32 %v8493_v60, %v32626_v52  ;;  %v8459_v13 = vadd.f32 %v24873_v2, %v30406_v24  ;;  %v8356_v38 = vpop.f32.mrb[67].mxu1  ;;  %24925 = vmatmul.mubr.msk.f32.gmra.mrb[60].mxu0 %vm450_vm1, %v8637_v47  ;;  %v10254_v52 = vld [vmem:[%s32574_s5 + $0x90] sm:$0xff] }
 0x544   : > { %v8528_v1 = vmul.f32 %v8492_v50, %v32627_v37  ;;  %v8458_v21 = vadd.f32 %v30406_v24, %v8356_v38  ;;  %v26662_v4 = vpack.c.bf16 %v10255_v20, %v10254_v52  ;;  %v10684_v20 = vld [vmem:[%s32574_s5 + $0xb8] sm:$0xff]  ;;  %v10216_v52 = vld [vmem:[#allocation3 + $0x13] sm:$0xff] }
 0x545   : > { %8565 = vst.msk [vmem:[#allocation3 + $0xfb] sm:$0xff] %vm450_vm1, %v8529_v14  ;;  %v8495_v29 = vmax.f32 %v8459_v13, 0.0  ;;  %v8638_v43 = vld [vmem:[#allocation3 + $0xd1] sm:$0xff]  ;;  %v8639_v36 = vld [vmem:[#allocation3 + $0xd9] sm:$0xff] }
 0x546   : > { %8564 = vst.msk [vmem:[#allocation3 + $0xf3] sm:$0xff] %vm450_vm1, %v8528_v1  ;;  %v8494_v11 = vmax.f32 %v8458_v21, 0.0  ;;  %v24876_v45 = vpop.f32.mrb[68].mxu1  ;;  %24927 = vmatprep.mubr.msk.f32.mxu0 %vm450_vm1, %v8638_v43  ;;  %v32632_v13 = vld [vmem:[#allocation15_spill] sm:$0xff]  ;;  %v32633_v1 = vld [vmem:[#allocation16_spill] sm:$0xff] }
 0x547   : > { %v8531_v59 = vmul.f32 %v8495_v29, %v32628_v46  ;;  %v8461_v3 = vadd.f32 %v24876_v45, %v30406_v24  ;;  %v8366_v58 = vpop.f32.mrb[69].mxu1  ;;  %24928 = vmatmul.mubr.msk.f32.gmra.mrb[62].mxu0 %vm450_vm1, %v8639_v36  ;;  %v9396_v45 = vld [vmem:[%s32574_s5 + $0x50] sm:$0xff] }
 0x548   : > { %v8530_v8 = vmul.f32 %v8494_v11, %v32629_v49  ;;  %v8460_v31 = vadd.f32 %v30406_v24, %v8366_v58  ;;  %v8572_v11 = vld [vmem:[#allocation3] sm:$0xff] }
 0x549   : > { %8567 = vst.msk [vmem:[#allocation3 + $0x10b] sm:$0xff] %vm450_vm1, %v8531_v59  ;;  %v8497_v53 = vmax.f32 %v8461_v3, 0.0  ;;  %v8640_v10 = vld [vmem:[#allocation3 + $0xe1] sm:$0xff]  ;;  %v8641_v12 = vld [vmem:[#allocation3 + $0xe9] sm:$0xff] }
 0x54a   : > { %8566 = vst.msk [vmem:[#allocation3 + $0x103] sm:$0xff] %vm450_vm1, %v8530_v8  ;;  %v8496_v61 = vmax.f32 %v8460_v31, 0.0  ;;  %v24879_v48 = vpop.f32.mrb[70].mxu1  ;;  %24930 = vmatprep.mubr.msk.f32.mxu0 %vm450_vm1, %v8640_v10  ;;  %v9397_v59 = vld [vmem:[%s32574_s5 + $0x58] sm:$0xff]  ;;  %v8573_v3 = vld [vmem:[#allocation3 + $0x8] sm:$0xff]  ;;  %v9824_v31 = vld [vmem:[%s32574_s5 + $0x68] sm:$0xff] }
 0x54b   : > { %v8533_v33 = vmul.f32 %v8497_v53, %v32630_v32  ;;  %v8463_v26 = vadd.f32 %v24879_v48, %v30406_v24  ;;  %v8376_v19 = vpop.f32.mrb[71].mxu1  ;;  %24931 = vmatmul.mubr.msk.f32.gmra.mrb[64].mxu0 %vm450_vm1, %v8641_v12  ;;  %v26646_v58 = vpack.c.bf16 %v9397_v59, %v9396_v45  ;;  %v9823_v8 = vld [vmem:[%s32574_s5 + $0x60] sm:$0xff]  ;;  %v8574_v53 = vld [vmem:[#allocation3 + $0x10] sm:$0xff]  ;;  %v8575_v12 = vld [vmem:[#allocation3 + $0x18] sm:$0xff] }
 0x54c   : > { %v8532_v60 = vmul.f32 %v8496_v61, %v32631_v25  ;;  %v8462_v39 = vadd.f32 %v30406_v24, %v8376_v19  ;;  %v30566_v10 = vpack.c.bf16 %v9824_v31, %v9823_v8  ;;  %v8576_v61 = vld [vmem:[#allocation3 + $0x20] sm:$0xff]  ;;  %v8577_v48 = vld [vmem:[#allocation3 + $0x28] sm:$0xff]  ;;  %v8595_v45 = vld [vmem:[#allocation3 + $0xb8] sm:$0xff] }
 0x54d   : > { %8569 = vst.msk [vmem:[#allocation3 + $0x11b] sm:$0xff] %vm450_vm1, %v8533_v33  ;;  %v8499_v47 = vmax.f32 %v8463_v26, 0.0  ;;  %v8642_v50 = vld [vmem:[#allocation3 + $0xf1] sm:$0xff]  ;;  %v8643_v2 = vld [vmem:[#allocation3 + $0xf9] sm:$0xff]  ;;  %v8581_v19 = vld [vmem:[#allocation3 + $0x48] sm:$0xff] }
 0x54e   : > { %8568 = vst.msk [vmem:[#allocation3 + $0x113] sm:$0xff] %vm450_vm1, %v8532_v60  ;;  %v8498_v14 = vmax.f32 %v8462_v39, 0.0  ;;  %24933 = vmatprep.mubr.msk.f32.mxu0 %vm450_vm1, %v8642_v50  ;;  %v8578_v33 = vld [vmem:[#allocation3 + $0x30] sm:$0xff]  ;;  %v8580_v26 = vld [vmem:[#allocation3 + $0x40] sm:$0xff]  ;;  %v8583_v39 = vld [vmem:[#allocation3 + $0x58] sm:$0xff] }
 0x54f   : > { %v8535_v38 = vmul.f32 %v8499_v47, %v32632_v13  ;;  %24934 = vmatmul.mubr.msk.f32.gmra.mrb[66].mxu0 %vm450_vm1, %v8643_v2  ;;  %v8582_v60 = vld [vmem:[#allocation3 + $0x50] sm:$0xff]  ;;  %v8584_v47 = vld [vmem:[#allocation3 + $0x60] sm:$0xff]  ;;  %v8585_v50 = vld [vmem:[#allocation3 + $0x68] sm:$0xff] }
 0x550   : > { %v8534_v21 = vmul.f32 %v8498_v14, %v32633_v1  ;;  %v8586_v2 = vld [vmem:[#allocation3 + $0x70] sm:$0xff]  ;;  %v8587_v14 = vld [vmem:[#allocation3 + $0x78] sm:$0xff]  ;;  %v8596_v59 = vld [vmem:[#allocation3 + $0xc0] sm:$0xff] }
 0x551   : > { %8571 = vst.msk [vmem:[#allocation3 + $0x12b] sm:$0xff] %vm450_vm1, %v8535_v38  ;;  %v8644_v29 = vld [vmem:[#allocation3 + $0x101] sm:$0xff]  ;;  %v8645_v24 = vld [vmem:[#allocation3 + $0x109] sm:$0xff]  ;;  %v8599_v8 = vld [vmem:[#allocation3 + $0xd8] sm:$0xff] }
 0x552   : > { %8570 = vst.msk [vmem:[#allocation3 + $0x123] sm:$0xff] %vm450_vm1, %v8534_v21  ;;  %24936 = vmatprep.mubr.msk.f32.mxu0 %vm450_vm1, %v8644_v29  ;;  %v8588_v38 = vld [vmem:[#allocation3 + $0x80] sm:$0xff]  ;;  %v8589_v21 = vld [vmem:[#allocation3 + $0x88] sm:$0xff]  ;;  %v8590_v29 = vld [vmem:[#allocation3 + $0x90] sm:$0xff] }
 0x553   : > { %24937 = vmatmul.mubr.msk.f32.gmra.mrb[68].mxu0 %vm450_vm1, %v8645_v24  ;;  %v8591_v24 = vld [vmem:[#allocation3 + $0x98] sm:$0xff]  ;;  %v8600_v31 = vld [vmem:[#allocation3 + $0xe0] sm:$0xff]  ;;  %v9387_v1 = vld [vmem:[#allocation3 + $0xea] sm:$0xff] }
 0x554   : > { %v9388_v13 = vld [vmem:[#allocation3 + $0xf2] sm:$0xff]  ;;  %v9389_v25 = vld [vmem:[#allocation3 + $0xfa] sm:$0xff]  ;;  %v9390_v32 = vld [vmem:[#allocation3 + $0x102] sm:$0xff] }
 0x555   : > { %v8646_v43 = vld [vmem:[#allocation3 + $0x111] sm:$0xff]  ;;  %v8647_v36 = vld [vmem:[#allocation3 + $0x119] sm:$0xff] }
 0x556   : > { %24939 = vmatprep.mubr.msk.f32.mxu0 %vm450_vm1, %v8646_v43  ;;  %v8592_v43 = vld [vmem:[#allocation3 + $0xa0] sm:$0xff]  ;;  %v9391_v49 = vld [vmem:[#allocation3 + $0x10a] sm:$0xff]  ;;  %v9392_v46 = vld [vmem:[#allocation3 + $0x112] sm:$0xff] }
 0x557   : > { %24940 = vmatmul.mubr.msk.f32.gmra.mrb[70].mxu0 %vm450_vm1, %v8647_v36  ;;  %v8593_v36 = vld [vmem:[#allocation3 + $0xa8] sm:$0xff]  ;;  %v9393_v37 = vld [vmem:[#allocation3 + $0x11a] sm:$0xff] }
 0x558   : > { %24950 = vmatprep.mubr.msk.f32.mxu0 %vm450_vm1, %v8572_v11  ;;  %v8594_v11 = vld [vmem:[#allocation3 + $0xb0] sm:$0xff] }
 0x559   : > { %v9821_v30 = vld [vmem:[#allocation3 + $0x122] sm:$0xff]  ;;  %v9822_v5 = vld [vmem:[#allocation3 + $0x12a] sm:$0xff] }
 0x55b   : > { %24951 = vmatmul.mubr.msk.f32.vlgmr.msra.gmra.mrb[36].mxu0 %vm450_vm1, %v8573_v3  ;;  %v8597_v3 = vld [vmem:[#allocation3 + $0xc8] sm:$0xff] }
 0x55c   : > { %26645 = vmatpush3.bf16.msra.mxu0 %v30400_v28  ;;  %24953 = vmatprep.mubr.msk.f32.mxu0 %vm450_vm1, %v8574_v53  ;;  %v8579_v28 = vld [vmem:[#allocation3 + $0x38] sm:$0xff]  ;;  %v8601_v53 = vld [vmem:[#allocation3 + $0xe8] sm:$0xff] }
 0x55d   : > { %26647 = vmatprep.subr.bf16.mxu0 %v26646_v58 }
 0x55f   : > { %24954 = vmatmul.mubr.msk.f32.gmra.mrb[38].mxu0 %vm450_vm1, %v8575_v12  ;;  %v8602_v12 = vld [vmem:[#allocation3 + $0xf0] sm:$0xff] }
 0x560   : > { %24956 = vmatprep.mubr.msk.f32.mxu0 %vm450_vm1, %v8576_v61  ;;  %26649 = vmatpush3.bf16.msra.mxu0 %v26646_v58  ;;  %v8598_v58 = vld [vmem:[#allocation3 + $0xd0] sm:$0xff]  ;;  %v8603_v61 = vld [vmem:[#allocation3 + $0xf8] sm:$0xff] }
 0x561   : > { %26651 = vmatprep.subr.bf16.mxu0 %v30566_v10 }
 0x563   : > { %24957 = vmatmul.mubr.msk.f32.gmra.mrb[40].mxu0 %vm450_vm1, %v8577_v48  ;;  %v8604_v48 = vld [vmem:[#allocation3 + $0x100] sm:$0xff] }
 0x564   : > { %24959 = vmatprep.mubr.msk.f32.mxu0 %vm450_vm1, %v8578_v33  ;;  %v8605_v33 = vld [vmem:[#allocation3 + $0x108] sm:$0xff] }
 0x567   : > { %24960 = vmatmul.mubr.msk.f32.gmra.mrb[42].mxu0 %vm450_vm1, %v8579_v28  ;;  %v8606_v28 = vld [vmem:[#allocation3 + $0x110] sm:$0xff] }
 0x568   : > { %24962 = vmatprep.mubr.msk.f32.mxu0 %vm450_vm1, %v8580_v26  ;;  %v9358_v26 = vld [vmem:[#allocation3 + $0x2] sm:$0xff] }
 0x56b   : > { %24963 = vmatmul.mubr.msk.f32.gmra.mrb[44].mxu0 %vm450_vm1, %v8581_v19  ;;  %v8607_v19 = vld [vmem:[#allocation3 + $0x118] sm:$0xff] }
 0x56c   : > { %24965 = vmatprep.mubr.msk.f32.mxu0 %vm450_vm1, %v8582_v60  ;;  %v9825_v60 = vld [vmem:[%s32574_s5 + $0x70] sm:$0xff] }
 0x56f   : > { %24966 = vmatmul.mubr.msk.f32.gmra.mrb[46].mxu0 %vm450_vm1, %v8583_v39  ;;  %v9826_v39 = vld [vmem:[%s32574_s5 + $0x78] sm:$0xff] }
 0x570   : > { %24968 = vmatprep.mubr.msk.f32.mxu0 %vm450_vm1, %v8584_v47  ;;  %v9359_v47 = vld [vmem:[#allocation3 + $0xa] sm:$0xff] }
 0x573   : > { %24969 = vmatmul.mubr.msk.f32.gmra.mrb[48].mxu0 %vm450_vm1, %v8585_v50  ;;  %v26654_v50 = vpack.c.bf16 %v9826_v39, %v9825_v60  ;;  %v9381_v60 = vld [vmem:[#allocation3 + $0xba] sm:$0xff]  ;;  %v9382_v39 = vld [vmem:[#allocation3 + $0xc2] sm:$0xff] }
 0x574   : > { %24971 = vmatprep.mubr.msk.f32.mxu0 %vm450_vm1, %v8586_v2  ;;  %v10252_v2 = vld [vmem:[%s32574_s5 + $0x80] sm:$0xff] }
 0x577   : > { %24972 = vmatmul.mubr.msk.f32.gmra.mrb[50].mxu0 %vm450_vm1, %v8587_v14  ;;  %v10253_v14 = vld [vmem:[%s32574_s5 + $0x88] sm:$0xff] }
 0x578   : > { %24974 = vmatprep.mubr.msk.f32.mxu0 %vm450_vm1, %v8588_v38  ;;  %v30616_v38 = vld [vmem:[#allocation3 + $0x12] sm:$0xff] }
 0x57b   : > { %24975 = vmatmul.mubr.msk.f32.gmra.mrb[52].mxu0 %vm450_vm1, %v8589_v21  ;;  %v30621_v21 = vpack.c.bf16 %v10253_v14, %v10252_v2  ;;  %v9385_v2 = vld [vmem:[#allocation3 + $0xda] sm:$0xff]  ;;  %v9386_v14 = vld [vmem:[#allocation3 + $0xe2] sm:$0xff] }
 0x57c   : > { %24977 = vmatprep.mubr.msk.f32.mxu0 %vm450_vm1, %v8590_v29  ;;  %v30623_v29 = vld [vmem:[#allocation3 + $0x1a] sm:$0xff] }
 0x57f   : > { %24978 = vmatmul.mubr.msk.f32.gmra.mrb[54].mxu0 %vm450_vm1, %v8591_v24  ;;  %v30627_v24 = vld [vmem:[#allocation3 + $0x22] sm:$0xff] }
 0x580   : > { %24980 = vmatprep.mubr.msk.f32.mxu0 %vm450_vm1, %v8592_v43  ;;  %v30636_v43 = vld [vmem:[#allocation3 + $0x32] sm:$0xff] }
 0x583   : > { %24981 = vmatmul.mubr.msk.f32.gmra.mrb[56].mxu0 %vm450_vm1, %v8593_v36  ;;  %v30640_v36 = vld [vmem:[#allocation3 + $0x3a] sm:$0xff] }
 0x584   : > { %24983 = vmatprep.mubr.msk.f32.mxu0 %vm450_vm1, %v8594_v11  ;;  %v30644_v11 = vld [vmem:[#allocation3 + $0x42] sm:$0xff] }
 0x587   : > { %24984 = vmatmul.mubr.msk.f32.gmra.mrb[58].mxu0 %vm450_vm1, %v8595_v45  ;;  %v30648_v45 = vld [vmem:[#allocation3 + $0x4a] sm:$0xff] }
 0x588   : > { %24986 = vmatprep.mubr.msk.f32.mxu0 %vm450_vm1, %v8596_v59  ;;  %v30652_v59 = vld [vmem:[#allocation3 + $0x52] sm:$0xff] }
 0x58b   : > { %24987 = vmatmul.mubr.msk.f32.gmra.mrb[60].mxu0 %vm450_vm1, %v8597_v3  ;;  %v30656_v3 = vld [vmem:[#allocation3 + $0x5a] sm:$0xff] }
 0x58c   : > { %24989 = vmatprep.mubr.msk.f32.mxu0 %vm450_vm1, %v8598_v58  ;;  %v30660_v58 = vld [vmem:[#allocation3 + $0x62] sm:$0xff] }
 0x58f   : > { %24990 = vmatmul.mubr.msk.f32.gmra.mrb[62].mxu0 %vm450_vm1, %v8599_v8  ;;  %v30664_v8 = vld [vmem:[#allocation3 + $0x6a] sm:$0xff] }
 0x590   : > { %24992 = vmatprep.mubr.msk.f32.mxu0 %vm450_vm1, %v8600_v31  ;;  %v30668_v31 = vld [vmem:[#allocation3 + $0x72] sm:$0xff] }
 0x593   : > { %24993 = vmatmul.mubr.msk.f32.gmra.mrb[64].mxu0 %vm450_vm1, %v8601_v53  ;;  %v30672_v53 = vld [vmem:[#allocation3 + $0x7a] sm:$0xff] }
 0x594   : > { %24995 = vmatprep.mubr.msk.f32.mxu0 %vm450_vm1, %v8602_v12  ;;  %v30676_v12 = vld [vmem:[#allocation3 + $0x82] sm:$0xff] }
 0x597   : > { %24996 = vmatmul.mubr.msk.f32.gmra.mrb[66].mxu0 %vm450_vm1, %v8603_v61  ;;  %v30680_v61 = vld [vmem:[#allocation3 + $0x8a] sm:$0xff] }
 0x598   : > { %24998 = vmatprep.mubr.msk.f32.mxu0 %vm450_vm1, %v8604_v48  ;;  %v9376_v48 = vld [vmem:[#allocation3 + $0x92] sm:$0xff] }
 0x59b   : > { %24999 = vmatmul.mubr.msk.f32.gmra.mrb[68].mxu0 %vm450_vm1, %v8605_v33  ;;  %v9377_v33 = vld [vmem:[#allocation3 + $0x9a] sm:$0xff] }
 0x59c   : > { %25001 = vmatprep.mubr.msk.f32.mxu0 %vm450_vm1, %v8606_v28  ;;  %v9378_v28 = vld [vmem:[#allocation3 + $0xa2] sm:$0xff] }
 0x59f   : > { %25002 = vmatmul.mubr.msk.f32.gmra.mrb[70].mxu0 %vm450_vm1, %v8607_v19  ;;  %v9380_v19 = vld [vmem:[#allocation3 + $0xb2] sm:$0xff] }
 0x5a0   : > { %25012 = vmatprep.mubr.msk.f32.mxu0 %vm450_vm1, %v9358_v26  ;;  %v9379_v26 = vld [vmem:[#allocation3 + $0xaa] sm:$0xff] }
 0x5a3   : > { %25013 = vmatmul.mubr.msk.f32.vlgmr.msra.gmra.mrb[36].mxu0 %vm450_vm1, %v9359_v47  ;;  %v9383_v47 = vld [vmem:[#allocation3 + $0xca] sm:$0xff] }
 0x5a4   : > { %26653 = vmatpush3.bf16.msra.mxu0 %v30566_v10  ;;  %25015 = vmatprep.mubr.msk.f32.mxu0 %vm450_vm1, %v30616_v38  ;;  %v30632_v10 = vld [vmem:[#allocation3 + $0x2a] sm:$0xff] }
 0x5a5   : > { %26655 = vmatprep.subr.bf16.mxu0 %v26654_v50 }
 0x5a7   : > { %25016 = vmatmul.mubr.msk.f32.gmra.mrb[38].mxu0 %vm450_vm1, %v30623_v29 }
 0x5a8   : > { %25018 = vmatprep.mubr.msk.f32.mxu0 %vm450_vm1, %v30627_v24  ;;  %26657 = vmatpush3.bf16.msra.mxu0 %v26654_v50  ;;  %v9384_v50 = vld [vmem:[#allocation3 + $0xd2] sm:$0xff] }
 0x5a9   : > { %26659 = vmatprep.subr.bf16.mxu0 %v30621_v21 }
 0x5ab   : > { %25019 = vmatmul.mubr.msk.f32.gmra.mrb[40].mxu0 %vm450_vm1, %v30632_v10 }
 0x5ac   : > { %25021 = vmatprep.mubr.msk.f32.mxu0 %vm450_vm1, %v30636_v43 }
 0x5af   : > { %25022 = vmatmul.mubr.msk.f32.gmra.mrb[42].mxu0 %vm450_vm1, %v30640_v36 }
 0x5b0   : > { %25024 = vmatprep.mubr.msk.f32.mxu0 %vm450_vm1, %v30644_v11 }
 0x5b3   : > { %25025 = vmatmul.mubr.msk.f32.gmra.mrb[44].mxu0 %vm450_vm1, %v30648_v45 }
 0x5b4   : > { %25027 = vmatprep.mubr.msk.f32.mxu0 %vm450_vm1, %v30652_v59 }
 0x5b7   : > { %25028 = vmatmul.mubr.msk.f32.gmra.mrb[46].mxu0 %vm450_vm1, %v30656_v3 }
 0x5b8   : > { %25030 = vmatprep.mubr.msk.f32.mxu0 %vm450_vm1, %v30660_v58 }
 0x5bb   : > { %25031 = vmatmul.mubr.msk.f32.gmra.mrb[48].mxu0 %vm450_vm1, %v30664_v8 }
 0x5bc   : > { %25033 = vmatprep.mubr.msk.f32.mxu0 %vm450_vm1, %v30668_v31 }
 0x5bf   : > { %25034 = vmatmul.mubr.msk.f32.gmra.mrb[50].mxu0 %vm450_vm1, %v30672_v53 }
 0x5c0   : > { %25036 = vmatprep.mubr.msk.f32.mxu0 %vm450_vm1, %v30676_v12 }
 0x5c3   : > { %25037 = vmatmul.mubr.msk.f32.gmra.mrb[52].mxu0 %vm450_vm1, %v30680_v61 }
 0x5c4   : > { %25039 = vmatprep.mubr.msk.f32.mxu0 %vm450_vm1, %v9376_v48 }
 0x5c7   : > { %25040 = vmatmul.mubr.msk.f32.gmra.mrb[54].mxu0 %vm450_vm1, %v9377_v33 }
 0x5c8   : > { %25042 = vmatprep.mubr.msk.f32.mxu0 %vm450_vm1, %v9378_v28 }
 0x5cb   : > { %25043 = vmatmul.mubr.msk.f32.gmra.mrb[56].mxu0 %vm450_vm1, %v9379_v26 }
 0x5cc   : > { %25045 = vmatprep.mubr.msk.f32.mxu0 %vm450_vm1, %v9380_v19 }
 0x5cf   : > { %25046 = vmatmul.mubr.msk.f32.gmra.mrb[58].mxu0 %vm450_vm1, %v9381_v60 }
 0x5d0   : > { %25048 = vmatprep.mubr.msk.f32.mxu0 %vm450_vm1, %v9382_v39 }
 0x5d3   : > { %25049 = vmatmul.mubr.msk.f32.gmra.mrb[60].mxu0 %vm450_vm1, %v9383_v47 }
 0x5d4   : > { %25051 = vmatprep.mubr.msk.f32.mxu0 %vm450_vm1, %v9384_v50 }
 0x5d7   : > { %25052 = vmatmul.mubr.msk.f32.gmra.mrb[62].mxu0 %vm450_vm1, %v9385_v2 }
 0x5d8   : > { %25054 = vmatprep.mubr.msk.f32.mxu0 %vm450_vm1, %v9386_v14 }
 0x5db   : > { %25055 = vmatmul.mubr.msk.f32.gmra.mrb[64].mxu0 %vm450_vm1, %v9387_v1 }
 0x5dc   : > { %25057 = vmatprep.mubr.msk.f32.mxu0 %vm450_vm1, %v9388_v13 }
 0x5df   : > { %25058 = vmatmul.mubr.msk.f32.gmra.mrb[66].mxu0 %vm450_vm1, %v9389_v25 }
 0x5e0   : > { %25060 = vmatprep.mubr.msk.f32.mxu0 %vm450_vm1, %v9390_v32 }
 0x5e3   : > { %25061 = vmatmul.mubr.msk.f32.gmra.mrb[68].mxu0 %vm450_vm1, %v9391_v49 }
 0x5e4   : > { %25063 = vmatprep.mubr.msk.f32.mxu0 %vm450_vm1, %v9392_v46 }
 0x5e7   : > { %25064 = vmatmul.mubr.msk.f32.gmra.mrb[70].mxu0 %vm450_vm1, %v9393_v37 }
 0x5e8   : > { %25074 = vmatprep.mubr.msk.f32.mxu0 %vm450_vm1, %v30616_v38  ;;  %v10220_v38 = vld [vmem:[#allocation3 + $0x33] sm:$0xff] }
 0x5eb   : > { %25075 = vmatmul.mubr.msk.f32.vlgmr.msra.gmra.mrb[36].mxu0 %vm450_vm1, %v30623_v29  ;;  %v10222_v29 = vld [vmem:[#allocation3 + $0x43] sm:$0xff] }
 0x5ec   : > { %26661 = vmatpush3.bf16.msra.mxu0 %v30621_v21  ;;  %25077 = vmatprep.mubr.msk.f32.mxu0 %vm450_vm1, %v30627_v24  ;;  %v10221_v21 = vld [vmem:[#allocation3 + $0x3b] sm:$0xff]  ;;  %v10224_v24 = vld [vmem:[#allocation3 + $0x53] sm:$0xff] }
 0x5ed   : > { %26663 = vmatprep.subr.bf16.mxu0 %v26662_v4 }
 0x5ef   : > { %25078 = vmatmul.mubr.msk.f32.gmra.mrb[38].mxu0 %vm450_vm1, %v30632_v10  ;;  %v10225_v10 = vld [vmem:[#allocation3 + $0x5b] sm:$0xff] }
 0x5f0   : > { %25080 = vmatprep.mubr.msk.f32.mxu0 %vm450_vm1, %v30636_v43  ;;  %26665 = vmatpush3.bf16.msra.mxu0 %v26662_v4  ;;  %v10683_v4 = vld [vmem:[%s32574_s5 + $0xb0] sm:$0xff]  ;;  %v10226_v43 = vld [vmem:[#allocation3 + $0x63] sm:$0xff] }
 0x5f1   : > { %26667 = vmatprep.subr.bf16.mxu0 %v26666_v22 }
 0x5f3   : > { %25081 = vmatmul.mubr.msk.f32.gmra.mrb[40].mxu0 %vm450_vm1, %v30640_v36  ;;  %v10227_v36 = vld [vmem:[#allocation3 + $0x6b] sm:$0xff] }
 0x5f4   : > { %25083 = vmatprep.mubr.msk.f32.mxu0 %vm450_vm1, %v30644_v11  ;;  %v10228_v11 = vld [vmem:[#allocation3 + $0x73] sm:$0xff] }
 0x5f7   : > { %25084 = vmatmul.mubr.msk.f32.gmra.mrb[42].mxu0 %vm450_vm1, %v30648_v45  ;;  %v10229_v45 = vld [vmem:[#allocation3 + $0x7b] sm:$0xff] }
 0x5f8   : > { %25086 = vmatprep.mubr.msk.f32.mxu0 %vm450_vm1, %v30652_v59  ;;  %v10230_v59 = vld [vmem:[#allocation3 + $0x83] sm:$0xff] }
 0x5fb   : > { %25087 = vmatmul.mubr.msk.f32.gmra.mrb[44].mxu0 %vm450_vm1, %v30656_v3  ;;  %v10231_v3 = vld [vmem:[#allocation3 + $0x8b] sm:$0xff] }
 0x5fc   : > { %25089 = vmatprep.mubr.msk.f32.mxu0 %vm450_vm1, %v30660_v58  ;;  %v10232_v58 = vld [vmem:[#allocation3 + $0x93] sm:$0xff] }
 0x5ff   : > { %25090 = vmatmul.mubr.msk.f32.gmra.mrb[46].mxu0 %vm450_vm1, %v30664_v8  ;;  %v10233_v8 = vld [vmem:[#allocation3 + $0x9b] sm:$0xff] }
 0x600   : > { %25092 = vmatprep.mubr.msk.f32.mxu0 %vm450_vm1, %v30668_v31  ;;  %v10234_v31 = vld [vmem:[#allocation3 + $0xa3] sm:$0xff] }
 0x603   : > { %25093 = vmatmul.mubr.msk.f32.gmra.mrb[48].mxu0 %vm450_vm1, %v30672_v53  ;;  %v10235_v53 = vld [vmem:[#allocation3 + $0xab] sm:$0xff] }
 0x604   : > { %25095 = vmatprep.mubr.msk.f32.mxu0 %vm450_vm1, %v30676_v12  ;;  %v10236_v12 = vld [vmem:[#allocation3 + $0xb3] sm:$0xff] }
 0x607   : > { %25096 = vmatmul.mubr.msk.f32.gmra.mrb[50].mxu0 %vm450_vm1, %v30680_v61  ;;  %v10237_v61 = vld [vmem:[#allocation3 + $0xbb] sm:$0xff] }
 0x608   : > { %25098 = vmatprep.mubr.msk.f32.mxu0 %vm450_vm1, %v9376_v48  ;;  %v10238_v48 = vld [vmem:[#allocation3 + $0xc3] sm:$0xff] }
 0x60b   : > { %25099 = vmatmul.mubr.msk.f32.gmra.mrb[52].mxu0 %vm450_vm1, %v9377_v33  ;;  %v10239_v33 = vld [vmem:[#allocation3 + $0xcb] sm:$0xff] }
 0x60c   : > { %25101 = vmatprep.mubr.msk.f32.mxu0 %vm450_vm1, %v9378_v28  ;;  %v10240_v28 = vld [vmem:[#allocation3 + $0xd3] sm:$0xff] }
 0x60f   : > { %25102 = vmatmul.mubr.msk.f32.gmra.mrb[54].mxu0 %vm450_vm1, %v9379_v26  ;;  %v10241_v26 = vld [vmem:[#allocation3 + $0xdb] sm:$0xff] }
 0x610   : > { %25104 = vmatprep.mubr.msk.f32.mxu0 %vm450_vm1, %v9380_v19  ;;  %v10242_v19 = vld [vmem:[#allocation3 + $0xe3] sm:$0xff] }
 0x613   : > { %25105 = vmatmul.mubr.msk.f32.gmra.mrb[56].mxu0 %vm450_vm1, %v9381_v60  ;;  %v10243_v60 = vld [vmem:[#allocation3 + $0xeb] sm:$0xff] }
 0x614   : > { %25107 = vmatprep.mubr.msk.f32.mxu0 %vm450_vm1, %v9382_v39  ;;  %v10244_v39 = vld [vmem:[#allocation3 + $0xf3] sm:$0xff] }
 0x617   : > { %25108 = vmatmul.mubr.msk.f32.gmra.mrb[58].mxu0 %vm450_vm1, %v9383_v47  ;;  %v10245_v47 = vld [vmem:[#allocation3 + $0xfb] sm:$0xff] }
 0x618   : > { %25110 = vmatprep.mubr.msk.f32.mxu0 %vm450_vm1, %v9384_v50  ;;  %v10246_v50 = vld [vmem:[#allocation3 + $0x103] sm:$0xff] }
 0x61b   : > { %25111 = vmatmul.mubr.msk.f32.gmra.mrb[60].mxu0 %vm450_vm1, %v9385_v2  ;;  %v10247_v2 = vld [vmem:[#allocation3 + $0x10b] sm:$0xff] }
 0x61c   : > { %25113 = vmatprep.mubr.msk.f32.mxu0 %vm450_vm1, %v9386_v14  ;;  %v10248_v14 = vld [vmem:[#allocation3 + $0x113] sm:$0xff] }
 0x61f   : > { %25114 = vmatmul.mubr.msk.f32.gmra.mrb[62].mxu0 %vm450_vm1, %v9387_v1  ;;  %v10219_v1 = vld [vmem:[#allocation3 + $0x2b] sm:$0xff] }
 0x620   : > { %25116 = vmatprep.mubr.msk.f32.mxu0 %vm450_vm1, %v9388_v13 }
 0x623   : > { %25117 = vmatmul.mubr.msk.f32.gmra.mrb[64].mxu0 %vm450_vm1, %v9389_v25  ;;  %v10218_v25 = vld [vmem:[#allocation3 + $0x23] sm:$0xff] }
 0x624   : > { %25119 = vmatprep.mubr.msk.f32.mxu0 %vm450_vm1, %v9390_v32  ;;  %v11111_v32 = vld [vmem:[%s32574_s5 + $0xc8] sm:$0xff] }
 0x627   : > { %25120 = vmatmul.mubr.msk.f32.gmra.mrb[66].mxu0 %vm450_vm1, %v9391_v49  ;;  %v10217_v49 = vld [vmem:[#allocation3 + $0x1b] sm:$0xff] }
 0x628   : > { %25122 = vmatprep.mubr.msk.f32.mxu0 %vm450_vm1, %v9392_v46  ;;  %v26670_v46 = vpack.c.bf16 %v10684_v20, %v10683_v4  ;;  %v10251_v4 = vld [vmem:[#allocation3 + $0x12b] sm:$0xff]  ;;  %v11112_v20 = vld [vmem:[%s32574_s5 + $0xd0] sm:$0xff] }
 0x62b   : > { %25123 = vmatmul.mubr.msk.f32.gmra.mrb[68].mxu0 %vm450_vm1, %v9393_v37  ;;  %v11110_v37 = vld [vmem:[%s32574_s5 + $0xc0] sm:$0xff] }
 0x62c   : > { %25125 = vmatprep.mubr.msk.f32.mxu0 %vm450_vm1, %v9821_v30  ;;  %v30782_v13 = vpack.c.bf16 %v11111_v32, %v11110_v37  ;;  %v10249_v30 = vld [vmem:[#allocation3 + $0x11b] sm:$0xff]  ;;  %v11539_v32 = vld [vmem:[%s32574_s5 + $0xe0] sm:$0xff] }
 0x62d   : > { %v10646_v37 = vld [vmem:[#allocation3 + $0x1c] sm:$0xff] }
 0x62f   : > { %25126 = vmatmul.mubr.msk.f32.gmra.mrb[70].mxu0 %vm450_vm1, %v9822_v5  ;;  %v10250_v5 = vld [vmem:[#allocation3 + $0x123] sm:$0xff] }
 0x630   : > { %25136 = vmatprep.mubr.msk.f32.mxu0 %vm450_vm1, %v10216_v52  ;;  %v11113_v52 = vld [vmem:[%s32574_s5 + $0xd8] sm:$0xff] }
 0x633   : > { %25137 = vmatmul.mubr.msk.f32.vlgmr.msra.gmra.mrb[36].mxu0 %vm450_vm1, %v10217_v49  ;;  %v26678_v49 = vpack.c.bf16 %v11113_v52, %v11112_v20  ;;  %v10680_v20 = vld [vmem:[#allocation3 + $0x12c] sm:$0xff]  ;;  %v11541_v52 = vld [vmem:[%s32574_s5 + $0xf0] sm:$0xff] }
 0x634   : > { %26669 = vmatpush3.bf16.msra.mxu0 %v26666_v22  ;;  %25139 = vmatprep.mubr.msk.f32.mxu0 %vm450_vm1, %v10218_v25  ;;  %v10223_v22 = vld [vmem:[#allocation3 + $0x4b] sm:$0xff] }
 0x635   : > { %26671 = vmatprep.subr.bf16.mxu0 %v26670_v46  ;;  %v11540_v25 = vld [vmem:[%s32574_s5 + $0xe8] sm:$0xff] }
 0x637   : > { %25140 = vmatmul.mubr.msk.f32.gmra.mrb[38].mxu0 %vm450_vm1, %v10219_v1  ;;  %v30832_v1 = vld [vmem:[#allocation3 + $0x24] sm:$0xff] }
 0x638   : > { %25142 = vmatprep.mubr.msk.f32.mxu0 %vm450_vm1, %v10220_v38  ;;  %26673 = vmatpush3.bf16.msra.mxu0 %v26670_v46  ;;  %v10645_v46 = vld [vmem:[#allocation3 + $0x14] sm:$0xff]  ;;  %v30837_v38 = vpack.c.bf16 %v11540_v25, %v11539_v32 }
 0x639   : > { %26675 = vmatprep.subr.bf16.mxu0 %v30782_v13  ;;  %v11969_v32 = vld [vmem:[%s32574_s5 + $0x108] sm:$0xff] }
 0x63b   : > { %25143 = vmatmul.mubr.msk.f32.gmra.mrb[40].mxu0 %vm450_vm1, %v10221_v21  ;;  %v30839_v21 = vld [vmem:[#allocation3 + $0x2c] sm:$0xff] }
 0x63c   : > { %25145 = vmatprep.mubr.msk.f32.mxu0 %vm450_vm1, %v10222_v29  ;;  %v30843_v29 = vld [vmem:[#allocation3 + $0x34] sm:$0xff] }
 0x63f   : > { %25146 = vmatmul.mubr.msk.f32.gmra.mrb[42].mxu0 %vm450_vm1, %v10223_v22  ;;  %v30852_v22 = vld [vmem:[#allocation3 + $0x44] sm:$0xff] }
 0x640   : > { %25148 = vmatprep.mubr.msk.f32.mxu0 %vm450_vm1, %v10224_v24  ;;  %v30856_v24 = vld [vmem:[#allocation3 + $0x4c] sm:$0xff] }
 0x643   : > { %25149 = vmatmul.mubr.msk.f32.gmra.mrb[44].mxu0 %vm450_vm1, %v10225_v10  ;;  %v30860_v10 = vld [vmem:[#allocation3 + $0x54] sm:$0xff] }
 0x644   : > { %25151 = vmatprep.mubr.msk.f32.mxu0 %vm450_vm1, %v10226_v43  ;;  %v30864_v43 = vld [vmem:[#allocation3 + $0x5c] sm:$0xff] }
 0x647   : > { %25152 = vmatmul.mubr.msk.f32.gmra.mrb[46].mxu0 %vm450_vm1, %v10227_v36  ;;  %v30868_v36 = vld [vmem:[#allocation3 + $0x64] sm:$0xff] }
 0x648   : > { %25154 = vmatprep.mubr.msk.f32.mxu0 %vm450_vm1, %v10228_v11  ;;  %v30872_v11 = vld [vmem:[#allocation3 + $0x6c] sm:$0xff] }
 0x64b   : > { %25155 = vmatmul.mubr.msk.f32.gmra.mrb[48].mxu0 %vm450_vm1, %v10229_v45  ;;  %v30876_v45 = vld [vmem:[#allocation3 + $0x74] sm:$0xff] }
 0x64c   : > { %25157 = vmatprep.mubr.msk.f32.mxu0 %vm450_vm1, %v10230_v59  ;;  %v30880_v59 = vld [vmem:[#allocation3 + $0x7c] sm:$0xff] }
 0x64f   : > { %25158 = vmatmul.mubr.msk.f32.gmra.mrb[50].mxu0 %vm450_vm1, %v10231_v3  ;;  %v30884_v3 = vld [vmem:[#allocation3 + $0x84] sm:$0xff] }
 0x650   : > { %25160 = vmatprep.mubr.msk.f32.mxu0 %vm450_vm1, %v10232_v58  ;;  %v30888_v58 = vld [vmem:[#allocation3 + $0x8c] sm:$0xff] }
 0x653   : > { %25161 = vmatmul.mubr.msk.f32.gmra.mrb[52].mxu0 %vm450_vm1, %v10233_v8  ;;  %v30892_v8 = vld [vmem:[#allocation3 + $0x94] sm:$0xff] }
 0x654   : > { %25163 = vmatprep.mubr.msk.f32.mxu0 %vm450_vm1, %v10234_v31  ;;  %v30896_v31 = vld [vmem:[#allocation3 + $0x9c] sm:$0xff] }
 0x657   : > { %25164 = vmatmul.mubr.msk.f32.gmra.mrb[54].mxu0 %vm450_vm1, %v10235_v53  ;;  %v10663_v53 = vld [vmem:[#allocation3 + $0xa4] sm:$0xff] }
 0x658   : > { %25166 = vmatprep.mubr.msk.f32.mxu0 %vm450_vm1, %v10236_v12  ;;  %v10664_v12 = vld [vmem:[#allocation3 + $0xac] sm:$0xff] }
 0x65b   : > { %25167 = vmatmul.mubr.msk.f32.gmra.mrb[56].mxu0 %vm450_vm1, %v10237_v61  ;;  %v10665_v61 = vld [vmem:[#allocation3 + $0xb4] sm:$0xff] }
 0x65c   : > { %25169 = vmatprep.mubr.msk.f32.mxu0 %vm450_vm1, %v10238_v48  ;;  %v10666_v48 = vld [vmem:[#allocation3 + $0xbc] sm:$0xff] }
 0x65f   : > { %25170 = vmatmul.mubr.msk.f32.gmra.mrb[58].mxu0 %vm450_vm1, %v10239_v33  ;;  %v10667_v33 = vld [vmem:[#allocation3 + $0xc4] sm:$0xff] }
 0x660   : > { %25172 = vmatprep.mubr.msk.f32.mxu0 %vm450_vm1, %v10240_v28  ;;  %v10668_v28 = vld [vmem:[#allocation3 + $0xcc] sm:$0xff] }
 0x663   : > { %25173 = vmatmul.mubr.msk.f32.gmra.mrb[60].mxu0 %vm450_vm1, %v10241_v26  ;;  %v10669_v26 = vld [vmem:[#allocation3 + $0xd4] sm:$0xff] }
 0x664   : > { %25175 = vmatprep.mubr.msk.f32.mxu0 %vm450_vm1, %v10242_v19  ;;  %v10670_v19 = vld [vmem:[#allocation3 + $0xdc] sm:$0xff] }
 0x667   : > { %25176 = vmatmul.mubr.msk.f32.gmra.mrb[62].mxu0 %vm450_vm1, %v10243_v60  ;;  %v10671_v60 = vld [vmem:[#allocation3 + $0xe4] sm:$0xff] }
 0x668   : > { %25178 = vmatprep.mubr.msk.f32.mxu0 %vm450_vm1, %v10244_v39  ;;  %v10672_v39 = vld [vmem:[#allocation3 + $0xec] sm:$0xff] }
 0x66b   : > { %25179 = vmatmul.mubr.msk.f32.gmra.mrb[64].mxu0 %vm450_vm1, %v10245_v47  ;;  %v10673_v47 = vld [vmem:[#allocation3 + $0xf4] sm:$0xff] }
 0x66c   : > { %25181 = vmatprep.mubr.msk.f32.mxu0 %vm450_vm1, %v10246_v50  ;;  %v10674_v50 = vld [vmem:[#allocation3 + $0xfc] sm:$0xff] }
 0x66f   : > { %25182 = vmatmul.mubr.msk.f32.gmra.mrb[66].mxu0 %vm450_vm1, %v10247_v2  ;;  %v10675_v2 = vld [vmem:[#allocation3 + $0x104] sm:$0xff] }
 0x670   : > { %25184 = vmatprep.mubr.msk.f32.mxu0 %vm450_vm1, %v10248_v14  ;;  %v10676_v14 = vld [vmem:[#allocation3 + $0x10c] sm:$0xff] }
 0x673   : > { %25185 = vmatmul.mubr.msk.f32.gmra.mrb[68].mxu0 %vm450_vm1, %v10249_v30  ;;  %v10677_v30 = vld [vmem:[#allocation3 + $0x114] sm:$0xff] }
 0x674   : > { %25187 = vmatprep.mubr.msk.f32.mxu0 %vm450_vm1, %v10250_v5  ;;  %v10678_v5 = vld [vmem:[#allocation3 + $0x11c] sm:$0xff] }
 0x677   : > { %25188 = vmatmul.mubr.msk.f32.gmra.mrb[70].mxu0 %vm450_vm1, %v10251_v4  ;;  %v10679_v4 = vld [vmem:[#allocation3 + $0x124] sm:$0xff] }
 0x678   : > { %25198 = vmatprep.mubr.msk.f32.mxu0 %vm450_vm1, %v10645_v46  ;;  %v11542_v46 = vld [vmem:[%s32574_s5 + $0xf8] sm:$0xff] }
 0x67b   : > { %25199 = vmatmul.mubr.msk.f32.vlgmr.msra.gmra.mrb[36].mxu0 %vm450_vm1, %v10646_v37  ;;  %v11968_v37 = vld [vmem:[%s32574_s5 + $0x100] sm:$0xff] }
 0x67c   : > { %26677 = vmatpush3.bf16.msra.mxu0 %v30782_v13  ;;  %25201 = vmatprep.mubr.msk.f32.mxu0 %vm450_vm1, %v30832_v1  ;;  %v30848_v13 = vld [vmem:[#allocation3 + $0x3c] sm:$0xff]  ;;  %v26690_v25 = vpack.c.bf16 %v11969_v32, %v11968_v37  ;;  %v11531_v32 = vld [vmem:[#allocation3 + $0x105] sm:$0xff] }
 0x67d   : > { %26679 = vmatprep.subr.bf16.mxu0 %v26678_v49  ;;  %v11530_v37 = vld [vmem:[#allocation3 + $0xfd] sm:$0xff] }
 0x67f   : > { %25202 = vmatmul.mubr.msk.f32.gmra.mrb[38].mxu0 %vm450_vm1, %v30839_v21 }
 0x680   : > { %25204 = vmatprep.mubr.msk.f32.mxu0 %vm450_vm1, %v30843_v29  ;;  %26681 = vmatpush3.bf16.msra.mxu0 %v26678_v49  ;;  %v26686_v49 = vpack.c.bf16 %v11542_v46, %v11541_v52  ;;  %v11527_v52 = vld [vmem:[#allocation3 + $0xe5] sm:$0xff]  ;;  %v11528_v46 = vld [vmem:[#allocation3 + $0xed] sm:$0xff] }
 0x681   : > { %26683 = vmatprep.subr.bf16.mxu0 %v30837_v38 }
 0x683   : > { %25205 = vmatmul.mubr.msk.f32.gmra.mrb[40].mxu0 %vm450_vm1, %v30848_v13 }
 0x684   : > { %25207 = vmatprep.mubr.msk.f32.mxu0 %vm450_vm1, %v30852_v22 }
 0x687   : > { %25208 = vmatmul.mubr.msk.f32.gmra.mrb[42].mxu0 %vm450_vm1, %v30856_v24 }
 0x688   : > { %25210 = vmatprep.mubr.msk.f32.mxu0 %vm450_vm1, %v30860_v10 }
 0x68b   : > { %25211 = vmatmul.mubr.msk.f32.gmra.mrb[44].mxu0 %vm450_vm1, %v30864_v43 }
 0x68c   : > { %25213 = vmatprep.mubr.msk.f32.mxu0 %vm450_vm1, %v30868_v36 }
 0x68f   : > { %25214 = vmatmul.mubr.msk.f32.gmra.mrb[46].mxu0 %vm450_vm1, %v30872_v11 }
 0x690   : > { %25216 = vmatprep.mubr.msk.f32.mxu0 %vm450_vm1, %v30876_v45 }
 0x693   : > { %25217 = vmatmul.mubr.msk.f32.gmra.mrb[48].mxu0 %vm450_vm1, %v30880_v59 }
 0x694   : > { %25219 = vmatprep.mubr.msk.f32.mxu0 %vm450_vm1, %v30884_v3 }
 0x697   : > { %25220 = vmatmul.mubr.msk.f32.gmra.mrb[50].mxu0 %vm450_vm1, %v30888_v58 }
 0x698   : > { %25222 = vmatprep.mubr.msk.f32.mxu0 %vm450_vm1, %v30892_v8 }
 0x69b   : > { %25223 = vmatmul.mubr.msk.f32.gmra.mrb[52].mxu0 %vm450_vm1, %v30896_v31 }
 0x69c   : > { %25225 = vmatprep.mubr.msk.f32.mxu0 %vm450_vm1, %v10663_v53 }
 0x69f   : > { %25226 = vmatmul.mubr.msk.f32.gmra.mrb[54].mxu0 %vm450_vm1, %v10664_v12 }
 0x6a0   : > { %25228 = vmatprep.mubr.msk.f32.mxu0 %vm450_vm1, %v10665_v61 }
 0x6a3   : > { %25229 = vmatmul.mubr.msk.f32.gmra.mrb[56].mxu0 %vm450_vm1, %v10666_v48 }
 0x6a4   : > { %25231 = vmatprep.mubr.msk.f32.mxu0 %vm450_vm1, %v10667_v33 }
 0x6a7   : > { %25232 = vmatmul.mubr.msk.f32.gmra.mrb[58].mxu0 %vm450_vm1, %v10668_v28 }
 0x6a8   : > { %25234 = vmatprep.mubr.msk.f32.mxu0 %vm450_vm1, %v10669_v26 }
 0x6ab   : > { %25235 = vmatmul.mubr.msk.f32.gmra.mrb[60].mxu0 %vm450_vm1, %v10670_v19 }
 0x6ac   : > { %25237 = vmatprep.mubr.msk.f32.mxu0 %vm450_vm1, %v10671_v60 }
 0x6af   : > { %25238 = vmatmul.mubr.msk.f32.gmra.mrb[62].mxu0 %vm450_vm1, %v10672_v39 }
 0x6b0   : > { %25240 = vmatprep.mubr.msk.f32.mxu0 %vm450_vm1, %v10673_v47 }
 0x6b3   : > { %25241 = vmatmul.mubr.msk.f32.gmra.mrb[64].mxu0 %vm450_vm1, %v10674_v50 }
 0x6b4   : > { %25243 = vmatprep.mubr.msk.f32.mxu0 %vm450_vm1, %v10675_v2 }
 0x6b7   : > { %25244 = vmatmul.mubr.msk.f32.gmra.mrb[66].mxu0 %vm450_vm1, %v10676_v14 }
 0x6b8   : > { %25246 = vmatprep.mubr.msk.f32.mxu0 %vm450_vm1, %v10677_v30 }
 0x6bb   : > { %25247 = vmatmul.mubr.msk.f32.gmra.mrb[68].mxu0 %vm450_vm1, %v10678_v5 }
 0x6bc   : > { %25249 = vmatprep.mubr.msk.f32.mxu0 %vm450_vm1, %v10679_v4 }
 0x6bf   : > { %25250 = vmatmul.mubr.msk.f32.gmra.mrb[70].mxu0 %vm450_vm1, %v10680_v20 }
 0x6c0   : > { %25260 = vmatprep.mubr.msk.f32.mxu0 %vm450_vm1, %v30832_v1  ;;  %v11108_v1 = vld [vmem:[#allocation3 + $0x134] sm:$0xff] }
 0x6c3   : > { %25261 = vmatmul.mubr.msk.f32.vlgmr.msra.gmra.mrb[36].mxu0 %vm450_vm1, %v30839_v21  ;;  %v11970_v21 = vld [vmem:[%s32574_s5 + $0x110] sm:$0xff] }
 0x6c4   : > { %26685 = vmatpush3.bf16.msra.mxu0 %v30837_v38  ;;  %25263 = vmatprep.mubr.msk.f32.mxu0 %vm450_vm1, %v30843_v29  ;;  %v11109_v38 = vld [vmem:[#allocation3 + $0x13c] sm:$0xff] }
 0x6c5   : > { %26687 = vmatprep.subr.bf16.mxu0 %v26686_v49  ;;  %v11971_v29 = vld [vmem:[%s32574_s5 + $0x118] sm:$0xff] }
 0x6c7   : > { %25264 = vmatmul.mubr.msk.f32.gmra.mrb[38].mxu0 %vm450_vm1, %v30848_v13  ;;  %v11503_v13 = vld [vmem:[#allocation3 + $0x25] sm:$0xff] }
 0x6c8   : > { %25266 = vmatprep.mubr.msk.f32.mxu0 %vm450_vm1, %v30852_v22  ;;  %26689 = vmatpush3.bf16.msra.mxu0 %v26686_v49  ;;  %v26694_v22 = vpack.c.bf16 %v11971_v29, %v11970_v21  ;;  %v11529_v49 = vld [vmem:[#allocation3 + $0xf5] sm:$0xff]  ;;  %v11535_v21 = vld [vmem:[#allocation3 + $0x125] sm:$0xff] }
 0x6c9   : > { %26691 = vmatprep.subr.bf16.mxu0 %v26690_v25  ;;  %v11537_v29 = vld [vmem:[#allocation3 + $0x135] sm:$0xff] }
 0x6cb   : > { %25267 = vmatmul.mubr.msk.f32.gmra.mrb[40].mxu0 %vm450_vm1, %v30856_v24  ;;  %v11504_v24 = vld [vmem:[#allocation3 + $0x2d] sm:$0xff] }
 0x6cc   : > { %25269 = vmatprep.mubr.msk.f32.mxu0 %vm450_vm1, %v30860_v10  ;;  %v11505_v10 = vld [vmem:[#allocation3 + $0x35] sm:$0xff] }
 0x6cf   : > { %25270 = vmatmul.mubr.msk.f32.gmra.mrb[42].mxu0 %vm450_vm1, %v30864_v43  ;;  %v11506_v43 = vld [vmem:[#allocation3 + $0x3d] sm:$0xff] }
 0x6d0   : > { %25272 = vmatprep.mubr.msk.f32.mxu0 %vm450_vm1, %v30868_v36  ;;  %v11507_v36 = vld [vmem:[#allocation3 + $0x45] sm:$0xff] }
 0x6d3   : > { %25273 = vmatmul.mubr.msk.f32.gmra.mrb[44].mxu0 %vm450_vm1, %v30872_v11  ;;  %v11508_v11 = vld [vmem:[#allocation3 + $0x4d] sm:$0xff] }
 0x6d4   : > { %25275 = vmatprep.mubr.msk.f32.mxu0 %vm450_vm1, %v30876_v45  ;;  %v11509_v45 = vld [vmem:[#allocation3 + $0x55] sm:$0xff] }
 0x6d7   : > { %25276 = vmatmul.mubr.msk.f32.gmra.mrb[46].mxu0 %vm450_vm1, %v30880_v59  ;;  %v11510_v59 = vld [vmem:[#allocation3 + $0x5d] sm:$0xff] }
 0x6d8   : > { %25278 = vmatprep.mubr.msk.f32.mxu0 %vm450_vm1, %v30884_v3  ;;  %v11511_v3 = vld [vmem:[#allocation3 + $0x65] sm:$0xff] }
 0x6db   : > { %25279 = vmatmul.mubr.msk.f32.gmra.mrb[48].mxu0 %vm450_vm1, %v30888_v58  ;;  %v12588_v58 = vld [vmem:[%s32576_s7 + $0x20] sm:$0xff] }
 0x6dc   : > { %25281 = vmatprep.mubr.msk.f32.mxu0 %vm450_vm1, %v30892_v8  ;;  %v12589_v8 = vld [vmem:[%s32576_s7 + $0x28] sm:$0xff] }
 0x6df   : > { %25282 = vmatmul.mubr.msk.f32.gmra.mrb[50].mxu0 %vm450_vm1, %v30896_v31  ;;  %v12590_v31 = vld [vmem:[%s32576_s7 + $0x30] sm:$0xff] }
 0x6e0   : > { %25284 = vmatprep.mubr.msk.f32.mxu0 %vm450_vm1, %v10663_v53  ;;  %v26698_v53 = vpack.c.bf16 %v12589_v8, %v12588_v58  ;;  %v11940_v58 = vld [vmem:[#allocation3 + $0x66] sm:$0xff]  ;;  %v11941_v8 = vld [vmem:[#allocation3 + $0x6e] sm:$0xff] }
 0x6e2   : > { %26699 = vmatprep.subr.bf16.mxu1 %v26698_v53 }
 0x6e3   : > { %25285 = vmatmul.mubr.msk.f32.gmra.mrb[52].mxu0 %vm450_vm1, %v10664_v12  ;;  %v12591_v12 = vld [vmem:[%s32576_s7 + $0x38] sm:$0xff]  ;;  %26701 = vmatpush3.bf16.msra.mxu1 %v26698_v53 }
 0x6e4   : > { %25287 = vmatprep.mubr.msk.f32.mxu0 %vm450_vm1, %v10665_v61  ;;  %v26702_v61 = vpack.c.bf16 %v12591_v12, %v12590_v31  ;;  %v11942_v31 = vld [vmem:[#allocation3 + $0x76] sm:$0xff]  ;;  %v11943_v53 = vld [vmem:[#allocation3 + $0x7e] sm:$0xff]  ;;  %v11944_v12 = vld [vmem:[#allocation3 + $0x86] sm:$0xff] }
 0x6e6   : > { %26703 = vmatprep.subr.bf16.mxu1 %v26702_v61 }
 0x6e7   : > { %25288 = vmatmul.mubr.msk.f32.gmra.mrb[54].mxu0 %vm450_vm1, %v10666_v48  ;;  %v11512_v48 = vld [vmem:[#allocation3 + $0x6d] sm:$0xff]  ;;  %26705 = vmatpush3.bf16.msra.mxu1 %v26702_v61 }
 0x6e8   : > { %25290 = vmatprep.mubr.msk.f32.mxu0 %vm450_vm1, %v10667_v33  ;;  %v11513_v33 = vld [vmem:[#allocation3 + $0x75] sm:$0xff] }
 0x6e9   : > { %v11945_v61 = vld [vmem:[#allocation3 + $0x8e] sm:$0xff] }
 0x6eb   : > { %25291 = vmatmul.mubr.msk.f32.gmra.mrb[56].mxu0 %vm450_vm1, %v10668_v28  ;;  %v11514_v28 = vld [vmem:[#allocation3 + $0x7d] sm:$0xff] }
 0x6ec   : > { %25293 = vmatprep.mubr.msk.f32.mxu0 %vm450_vm1, %v10669_v26  ;;  %v11515_v26 = vld [vmem:[#allocation3 + $0x85] sm:$0xff] }
 0x6ef   : > { %25294 = vmatmul.mubr.msk.f32.gmra.mrb[58].mxu0 %vm450_vm1, %v10670_v19  ;;  %v11516_v19 = vld [vmem:[#allocation3 + $0x8d] sm:$0xff] }
 0x6f0   : > { %25296 = vmatprep.mubr.msk.f32.mxu0 %vm450_vm1, %v10671_v60  ;;  %v11517_v60 = vld [vmem:[#allocation3 + $0x95] sm:$0xff] }
 0x6f3   : > { %25297 = vmatmul.mubr.msk.f32.gmra.mrb[60].mxu0 %vm450_vm1, %v10672_v39  ;;  %v11518_v39 = vld [vmem:[#allocation3 + $0x9d] sm:$0xff] }
 0x6f4   : > { %25299 = vmatprep.mubr.msk.f32.mxu0 %vm450_vm1, %v10673_v47  ;;  %v11519_v47 = vld [vmem:[#allocation3 + $0xa5] sm:$0xff] }
 0x6f7   : > { %25300 = vmatmul.mubr.msk.f32.gmra.mrb[62].mxu0 %vm450_vm1, %v10674_v50  ;;  %v11520_v50 = vld [vmem:[#allocation3 + $0xad] sm:$0xff] }
 0x6f8   : > { %25302 = vmatprep.mubr.msk.f32.mxu0 %vm450_vm1, %v10675_v2  ;;  %v11521_v2 = vld [vmem:[#allocation3 + $0xb5] sm:$0xff] }
 0x6fb   : > { %25303 = vmatmul.mubr.msk.f32.gmra.mrb[64].mxu0 %vm450_vm1, %v10676_v14  ;;  %v11522_v14 = vld [vmem:[#allocation3 + $0xbd] sm:$0xff] }
 0x6fc   : > { %25305 = vmatprep.mubr.msk.f32.mxu0 %vm450_vm1, %v10677_v30  ;;  %v11523_v30 = vld [vmem:[#allocation3 + $0xc5] sm:$0xff] }
 0x6ff   : > { %25306 = vmatmul.mubr.msk.f32.gmra.mrb[66].mxu0 %vm450_vm1, %v10678_v5  ;;  %v11524_v5 = vld [vmem:[#allocation3 + $0xcd] sm:$0xff] }
 0x700   : > { %25308 = vmatprep.mubr.msk.f32.mxu0 %vm450_vm1, %v10679_v4  ;;  %v11525_v4 = vld [vmem:[#allocation3 + $0xd5] sm:$0xff] }
 0x703   : > { %25309 = vmatmul.mubr.msk.f32.gmra.mrb[68].mxu0 %vm450_vm1, %v10680_v20  ;;  %v11526_v20 = vld [vmem:[#allocation3 + $0xdd] sm:$0xff] }
 0x704   : > { %25311 = vmatprep.mubr.msk.f32.mxu0 %vm450_vm1, %v11108_v1  ;;  %v11533_v1 = vld [vmem:[#allocation3 + $0x115] sm:$0xff] }
 0x707   : > { %25312 = vmatmul.mubr.msk.f32.gmra.mrb[70].mxu0 %vm450_vm1, %v11109_v38  ;;  %v11534_v38 = vld [vmem:[#allocation3 + $0x11d] sm:$0xff] }
 0x708   : > { %25322 = vmatprep.mubr.msk.f32.mxu0 %vm450_vm1, %v11503_v13  ;;  %v11536_v13 = vld [vmem:[#allocation3 + $0x12d] sm:$0xff] }
 0x70b   : > { %25323 = vmatmul.mubr.msk.f32.vlgmr.msra.gmra.mrb[36].mxu0 %vm450_vm1, %v11504_v24  ;;  %v11932_v24 = vld [vmem:[#allocation3 + $0x26] sm:$0xff] }
 0x70c   : > { %26693 = vmatpush3.bf16.msra.mxu0 %v26690_v25  ;;  %25325 = vmatprep.mubr.msk.f32.mxu0 %vm450_vm1, %v11505_v10  ;;  %v11532_v25 = vld [vmem:[#allocation3 + $0x10d] sm:$0xff] }
 0x70d   : > { %26695 = vmatprep.subr.bf16.mxu0 %v26694_v22  ;;  %v11933_v10 = vld [vmem:[#allocation3 + $0x2e] sm:$0xff] }
 0x70f   : > { %25326 = vmatmul.mubr.msk.f32.gmra.mrb[38].mxu0 %vm450_vm1, %v11506_v43  ;;  %v11934_v43 = vld [vmem:[#allocation3 + $0x36] sm:$0xff] }
 0x710   : > { %25328 = vmatprep.mubr.msk.f32.mxu0 %vm450_vm1, %v11507_v36  ;;  %26697 = vmatpush3.bf16.msra.mxu0 %v26694_v22  ;;  %v11538_v22 = vld [vmem:[#allocation3 + $0x13d] sm:$0xff] }
 0x711   : > { %v11935_v36 = vld [vmem:[#allocation3 + $0x3e] sm:$0xff] }
 0x713   : > { %25329 = vmatmul.mubr.msk.f32.gmra.mrb[40].mxu0 %vm450_vm1, %v11508_v11  ;;  %v11936_v11 = vld [vmem:[#allocation3 + $0x46] sm:$0xff] }
 0x714   : > { %25331 = vmatprep.mubr.msk.f32.mxu0 %vm450_vm1, %v11509_v45  ;;  %v11937_v45 = vld [vmem:[#allocation3 + $0x4e] sm:$0xff] }
 0x717   : > { %25332 = vmatmul.mubr.msk.f32.gmra.mrb[42].mxu0 %vm450_vm1, %v11510_v59  ;;  %v11938_v59 = vld [vmem:[#allocation3 + $0x56] sm:$0xff] }
 0x718   : > { %25334 = vmatprep.mubr.msk.f32.mxu0 %vm450_vm1, %v11511_v3  ;;  %v11939_v3 = vld [vmem:[#allocation3 + $0x5e] sm:$0xff] }
 0x71b   : > { %25335 = vmatmul.mubr.msk.f32.gmra.mrb[44].mxu0 %vm450_vm1, %v11512_v48  ;;  %v11946_v48 = vld [vmem:[#allocation3 + $0x96] sm:$0xff] }
 0x71c   : > { %25337 = vmatprep.mubr.msk.f32.mxu0 %vm450_vm1, %v11513_v33  ;;  %v11947_v33 = vld [vmem:[#allocation3 + $0x9e] sm:$0xff] }
 0x71f   : > { %25338 = vmatmul.mubr.msk.f32.gmra.mrb[46].mxu0 %vm450_vm1, %v11514_v28  ;;  %v11948_v28 = vld [vmem:[#allocation3 + $0xa6] sm:$0xff] }
 0x720   : > { %25340 = vmatprep.mubr.msk.f32.mxu0 %vm450_vm1, %v11515_v26  ;;  %v11949_v26 = vld [vmem:[#allocation3 + $0xae] sm:$0xff] }
 0x723   : > { %25341 = vmatmul.mubr.msk.f32.gmra.mrb[48].mxu0 %vm450_vm1, %v11516_v19  ;;  %v11950_v19 = vld [vmem:[#allocation3 + $0xb6] sm:$0xff] }
 0x724   : > { %25343 = vmatprep.mubr.msk.f32.mxu0 %vm450_vm1, %v11517_v60  ;;  %v11951_v60 = vld [vmem:[#allocation3 + $0xbe] sm:$0xff] }
 0x727   : > { %25344 = vmatmul.mubr.msk.f32.gmra.mrb[50].mxu0 %vm450_vm1, %v11518_v39  ;;  %v11952_v39 = vld [vmem:[#allocation3 + $0xc6] sm:$0xff] }
 0x728   : > { %25346 = vmatprep.mubr.msk.f32.mxu0 %vm450_vm1, %v11519_v47  ;;  %v11953_v47 = vld [vmem:[#allocation3 + $0xce] sm:$0xff] }
 0x72b   : > { %25347 = vmatmul.mubr.msk.f32.gmra.mrb[52].mxu0 %vm450_vm1, %v11520_v50  ;;  %v11954_v50 = vld [vmem:[#allocation3 + $0xd6] sm:$0xff] }
 0x72c   : > { %25349 = vmatprep.mubr.msk.f32.mxu0 %vm450_vm1, %v11521_v2  ;;  %v11955_v2 = vld [vmem:[#allocation3 + $0xde] sm:$0xff] }
 0x72f   : > { %25350 = vmatmul.mubr.msk.f32.gmra.mrb[54].mxu0 %vm450_vm1, %v11522_v14  ;;  %v11956_v14 = vld [vmem:[#allocation3 + $0xe6] sm:$0xff] }
 0x730   : > { %25352 = vmatprep.mubr.msk.f32.mxu0 %vm450_vm1, %v11523_v30  ;;  %v11957_v30 = vld [vmem:[#allocation3 + $0xee] sm:$0xff] }
 0x733   : > { %25353 = vmatmul.mubr.msk.f32.gmra.mrb[56].mxu0 %vm450_vm1, %v11524_v5  ;;  %v11958_v5 = vld [vmem:[#allocation3 + $0xf6] sm:$0xff] }
 0x734   : > { %25355 = vmatprep.mubr.msk.f32.mxu0 %vm450_vm1, %v11525_v4  ;;  %v11959_v4 = vld [vmem:[#allocation3 + $0xfe] sm:$0xff] }
 0x737   : > { %25356 = vmatmul.mubr.msk.f32.gmra.mrb[58].mxu0 %vm450_vm1, %v11526_v20  ;;  %v11960_v20 = vld [vmem:[#allocation3 + $0x106] sm:$0xff] }
 0x738   : > { %25358 = vmatprep.mubr.msk.f32.mxu0 %vm450_vm1, %v11527_v52  ;;  %v11961_v52 = vld [vmem:[#allocation3 + $0x10e] sm:$0xff] }
 0x73b   : > { %25359 = vmatmul.mubr.msk.f32.gmra.mrb[60].mxu0 %vm450_vm1, %v11528_v46  ;;  %v11962_v46 = vld [vmem:[#allocation3 + $0x116] sm:$0xff] }
 0x73c   : > { %25361 = vmatprep.mubr.msk.f32.mxu0 %vm450_vm1, %v11529_v49  ;;  %v11963_v49 = vld [vmem:[#allocation3 + $0x11e] sm:$0xff] }
 0x73f   : > { %25362 = vmatmul.mubr.msk.f32.gmra.mrb[62].mxu0 %vm450_vm1, %v11530_v37  ;;  %v11964_v37 = vld [vmem:[#allocation3 + $0x126] sm:$0xff] }
 0x740   : > { %25364 = vmatprep.mubr.msk.f32.mxu0 %vm450_vm1, %v11531_v32  ;;  %v11966_v32 = vld [vmem:[#allocation3 + $0x136] sm:$0xff] }
 0x743   : > { %25365 = vmatmul.mubr.msk.f32.gmra.mrb[64].mxu0 %vm450_vm1, %v11532_v25  ;;  %v11965_v25 = vld [vmem:[#allocation3 + $0x12e] sm:$0xff] }
 0x744   : > { %25367 = vmatprep.mubr.msk.f32.mxu0 %vm450_vm1, %v11533_v1  ;;  %v11967_v1 = vld [vmem:[#allocation3 + $0x13e] sm:$0xff] }
 0x747   : > { %25368 = vmatmul.mubr.msk.f32.gmra.mrb[66].mxu0 %vm450_vm1, %v11534_v38  ;;  %v12552_v38 = vld [vmem:[#allocation2 + $0x1] sm:$0xff] }
 0x748   : > { %25370 = vmatprep.mubr.msk.f32.mxu0 %vm450_vm1, %v11535_v21  ;;  %v12548_v21 = vld [vmem:[%s32576_s7] sm:$0xff]  ;;  %25446 = vmatprep.mubr.msk.f32.mxu1 %vm450_vm1, %v12552_v38 }
 0x74b   : > { %25371 = vmatmul.mubr.msk.f32.gmra.mrb[68].mxu0 %vm450_vm1, %v11536_v13 }
 0x74c   : > { %25373 = vmatprep.mubr.msk.f32.mxu0 %vm450_vm1, %v11537_v29  ;;  %v12549_v29 = vld [vmem:[%s32576_s7 + $0x8] sm:$0xff] }
 0x74d   : > { %v26706_v13 = vpack.c.bf16 %v12549_v29, %v12548_v21 }
 0x74f   : > { %25374 = vmatmul.mubr.msk.f32.gmra.mrb[70].mxu0 %vm450_vm1, %v11538_v22  ;;  %v12553_v22 = vld [vmem:[#allocation2 + $0x9] sm:$0xff]  ;;  %26707 = vmatprep.subr.bf16.mxu1 %v26706_v13 }
 0x750   : > { %25384 = vmatprep.mubr.msk.f32.mxu0 %vm450_vm1, %v11932_v24  ;;  %25447 = vmatmul.mubr.msk.f32.vlgmr.msra.gmra.mrb[72].mxu1 %vm450_vm1, %v12553_v22  ;;  %v12550_v24 = vld [vmem:[%s32576_s7 + $0x10] sm:$0xff] }
 0x751   : > { %26709 = vmatpush3.bf16.msra.mxu1 %v26706_v13 }
 0x753   : > { %25385 = vmatmul.mubr.msk.f32.vlgmr.msra.gmra.mrb[36].mxu0 %vm450_vm1, %v11933_v10  ;;  %v12551_v10 = vld [vmem:[%s32576_s7 + $0x18] sm:$0xff] }
 0x754   : > { %25387 = vmatprep.mubr.msk.f32.mxu0 %vm450_vm1, %v11934_v43  ;;  %v26710_v43 = vpack.c.bf16 %v12551_v10, %v12550_v24 }
 0x756   : > { %26711 = vmatprep.subr.bf16.mxu1 %v26710_v43 }
 0x757   : > { %25388 = vmatmul.mubr.msk.f32.gmra.mrb[38].mxu0 %vm450_vm1, %v11935_v36  ;;  %26713 = vmatpush3.bf16.msra.mxu1 %v26710_v43  ;;  %v13334_v36 = vld [vmem:[%s32576_s7 + $0x40] sm:$0xff] }
 0x758   : > { %25390 = vmatprep.mubr.msk.f32.mxu0 %vm450_vm1, %v11936_v11  ;;  %v13335_v11 = vld [vmem:[%s32576_s7 + $0x48] sm:$0xff] }
 0x75b   : > { %25391 = vmatmul.mubr.msk.f32.gmra.mrb[40].mxu0 %vm450_vm1, %v11937_v45  ;;  %v31093_v45 = vpack.c.bf16 %v13335_v11, %v13334_v36 }
 0x75c   : > { %25393 = vmatprep.mubr.msk.f32.mxu0 %vm450_vm1, %v11938_v59  ;;  %v31099_v59 = vld [vmem:[%s32575_s6] ss:$0 sm:$0xff] }
 0x75d   : > { %26715 = vmatprep.subr.bf16.mxu1 %v31093_v45 }
 0x75f   : > { %25394 = vmatmul.mubr.msk.f32.gmra.mrb[42].mxu0 %vm450_vm1, %v11939_v3 }
 0x760   : > { %25396 = vmatprep.mubr.msk.f32.mxu0 %vm450_vm1, %v11940_v58 }
 0x763   : > { %25397 = vmatmul.mubr.msk.f32.gmra.mrb[44].mxu0 %vm450_vm1, %v11941_v8 }
 0x764   : > { %25399 = vmatprep.mubr.msk.f32.mxu0 %vm450_vm1, %v11942_v31 }
 0x767   : > { %25400 = vmatmul.mubr.msk.f32.gmra.mrb[46].mxu0 %vm450_vm1, %v11943_v53 }
 0x768   : > { %25402 = vmatprep.mubr.msk.f32.mxu0 %vm450_vm1, %v11944_v12 }
 0x76b   : > { %25403 = vmatmul.mubr.msk.f32.gmra.mrb[48].mxu0 %vm450_vm1, %v11945_v61 }
 0x76c   : > { %25405 = vmatprep.mubr.msk.f32.mxu0 %vm450_vm1, %v11946_v48 }
 0x76f   : > { %25406 = vmatmul.mubr.msk.f32.gmra.mrb[50].mxu0 %vm450_vm1, %v11947_v33 }
 0x770   : > { %25408 = vmatprep.mubr.msk.f32.mxu0 %vm450_vm1, %v11948_v28 }
 0x773   : > { %25409 = vmatmul.mubr.msk.f32.gmra.mrb[52].mxu0 %vm450_vm1, %v11949_v26 }
 0x774   : > { %25411 = vmatprep.mubr.msk.f32.mxu0 %vm450_vm1, %v11950_v19 }
 0x777   : > { %25412 = vmatmul.mubr.msk.f32.gmra.mrb[54].mxu0 %vm450_vm1, %v11951_v60 }
 0x778   : > { %25414 = vmatprep.mubr.msk.f32.mxu0 %vm450_vm1, %v11952_v39 }
 0x77b   : > { %25415 = vmatmul.mubr.msk.f32.gmra.mrb[56].mxu0 %vm450_vm1, %v11953_v47 }
 0x77c   : > { %25417 = vmatprep.mubr.msk.f32.mxu0 %vm450_vm1, %v11954_v50 }
 0x77f   : > { %25418 = vmatmul.mubr.msk.f32.gmra.mrb[58].mxu0 %vm450_vm1, %v11955_v2 }
 0x780   : > { %25420 = vmatprep.mubr.msk.f32.mxu0 %vm450_vm1, %v11956_v14 }
 0x783   : > { %25421 = vmatmul.mubr.msk.f32.gmra.mrb[60].mxu0 %vm450_vm1, %v11957_v30 }
 0x784   : > { %25423 = vmatprep.mubr.msk.f32.mxu0 %vm450_vm1, %v11958_v5 }
 0x787   : > { %25424 = vmatmul.mubr.msk.f32.gmra.mrb[62].mxu0 %vm450_vm1, %v11959_v4 }
 0x788   : > { %25426 = vmatprep.mubr.msk.f32.mxu0 %vm450_vm1, %v11960_v20 }
 0x78b   : > { %25427 = vmatmul.mubr.msk.f32.gmra.mrb[64].mxu0 %vm450_vm1, %v11961_v52 }
 0x78c   : > { %25429 = vmatprep.mubr.msk.f32.mxu0 %vm450_vm1, %v11962_v46 }
 0x78f   : > { %25430 = vmatmul.mubr.msk.f32.gmra.mrb[66].mxu0 %vm450_vm1, %v11963_v49 }
 0x790   : > { %25432 = vmatprep.mubr.msk.f32.mxu0 %vm450_vm1, %v11964_v37 }
 0x793   : > { %25433 = vmatmul.mubr.msk.f32.gmra.mrb[68].mxu0 %vm450_vm1, %v11965_v25 }
 0x794   : > { %25435 = vmatprep.mubr.msk.f32.mxu0 %vm450_vm1, %v11966_v32 }
 0x797   : > { %25436 = vmatmul.mubr.msk.f32.gmra.mrb[70].mxu0 %vm450_vm1, %v11967_v1 }
 0x826   : > { %v25386_v3 = vpop.f32.mrb[36].mxu0 }
 0x827   : > { %v12369_v58 = vadd.f32 %v25386_v3, %v31099_v59  ;;  %v12146_v8 = vpop.f32.mrb[37].mxu0 }
 0x828   : > { %v12368_v31 = vadd.f32 %v31099_v59, %v12146_v8 }
 0x829   : > { %v12405_v53 = vmax.f32 %v12369_v58, 0.0 }
 0x82a   : > { %v12404_v12 = vmax.f32 %v12368_v31, 0.0  ;;  %v25389_v61 = vpop.f32.mrb[38].mxu0 }
 0x82b   : > { %v12441_v48 = vmul.f32 %v12405_v53, %v29612_v7  ;;  %v12371_v33 = vadd.f32 %v25389_v61, %v31099_v59  ;;  %v12156_v28 = vpop.f32.mrb[39].mxu0 }
 0x82c   : > { %v12440_v26 = vmul.f32 %v12404_v12, %v29608_v62  ;;  %v12370_v19 = vadd.f32 %v31099_v59, %v12156_v28 }
 0x82d   : > { %12477 = vst.msk [vmem:[#allocation2 + $0x1b] sm:$0xff] %vm450_vm1, %v12441_v48  ;;  %v12407_v60 = vmax.f32 %v12371_v33, 0.0 }
 0x82e   : > { %12476 = vst.msk [vmem:[#allocation2 + $0x13] sm:$0xff] %vm450_vm1, %v12440_v26  ;;  %v12406_v39 = vmax.f32 %v12370_v19, 0.0  ;;  %v25392_v47 = vpop.f32.mrb[40].mxu0 }
 0x82f   : > { %v12443_v50 = vmul.f32 %v12407_v60, %v29614_v9  ;;  %v12373_v2 = vadd.f32 %v25392_v47, %v31099_v59  ;;  %v12166_v14 = vpop.f32.mrb[41].mxu0 }
 0x830   : > { %v12442_v30 = vmul.f32 %v12406_v39, %v29610_v0  ;;  %v12372_v5 = vadd.f32 %v31099_v59, %v12166_v14 }
 0x831   : > { %12479 = vst.msk [vmem:[#allocation2 + $0x2b] sm:$0xff] %vm450_vm1, %v12443_v50  ;;  %v12409_v4 = vmax.f32 %v12373_v2, 0.0 }
 0x832   : > { %12478 = vst.msk [vmem:[#allocation2 + $0x23] sm:$0xff] %vm450_vm1, %v12442_v30  ;;  %v12408_v20 = vmax.f32 %v12372_v5, 0.0  ;;  %v25395_v52 = vpop.f32.mrb[42].mxu0 }
 0x833   : > { %v12445_v46 = vmul.f32 %v12409_v4, %v29618_v17  ;;  %v12375_v49 = vadd.f32 %v25395_v52, %v31099_v59  ;;  %v12176_v37 = vpop.f32.mrb[43].mxu0 }
 0x834   : > { %v12444_v32 = vmul.f32 %v12408_v20, %v29616_v16  ;;  %v12374_v25 = vadd.f32 %v31099_v59, %v12176_v37 }
 0x835   : > { %12481 = vst.msk [vmem:[#allocation2 + $0x3b] sm:$0xff] %vm450_vm1, %v12445_v46  ;;  %v12411_v1 = vmax.f32 %v12375_v49, 0.0  ;;  %v12554_v38 = vld [vmem:[#allocation2 + $0x11] sm:$0xff]  ;;  %v12555_v21 = vld [vmem:[#allocation2 + $0x19] sm:$0xff] }
 0x836   : > { %12480 = vst.msk [vmem:[#allocation2 + $0x33] sm:$0xff] %vm450_vm1, %v12444_v32  ;;  %v12410_v29 = vmax.f32 %v12374_v25, 0.0  ;;  %v25398_v13 = vpop.f32.mrb[44].mxu0  ;;  %25449 = vmatprep.mubr.msk.f32.mxu1 %vm450_vm1, %v12554_v38 }
 0x837   : > { %v12447_v22 = vmul.f32 %v12411_v1, %v29624_v27  ;;  %v12377_v24 = vadd.f32 %v25398_v13, %v31099_v59  ;;  %v12186_v10 = vpop.f32.mrb[45].mxu0  ;;  %25450 = vmatmul.mubr.msk.f32.gmra.mrb[74].mxu1 %vm450_vm1, %v12555_v21 }
 0x838   : > { %v12446_v43 = vmul.f32 %v12410_v29, %v29620_v23  ;;  %v12376_v36 = vadd.f32 %v31099_v59, %v12186_v10 }
 0x839   : > { %12483 = vst.msk [vmem:[#allocation2 + $0x4b] sm:$0xff] %vm450_vm1, %v12447_v22  ;;  %v12413_v11 = vmax.f32 %v12377_v24, 0.0  ;;  %v12556_v3 = vld [vmem:[#allocation2 + $0x21] sm:$0xff]  ;;  %v12557_v58 = vld [vmem:[#allocation2 + $0x29] sm:$0xff] }
 0x83a   : > { %12482 = vst.msk [vmem:[#allocation2 + $0x43] sm:$0xff] %vm450_vm1, %v12446_v43  ;;  %v12412_v8 = vmax.f32 %v12376_v36, 0.0  ;;  %v25401_v31 = vpop.f32.mrb[46].mxu0  ;;  %25452 = vmatprep.mubr.msk.f32.mxu1 %vm450_vm1, %v12556_v3 }
 0x83b   : > { %v12449_v53 = vmul.f32 %v12413_v11, %v29634_v35  ;;  %v12379_v12 = vadd.f32 %v25401_v31, %v31099_v59  ;;  %v12196_v61 = vpop.f32.mrb[47].mxu0  ;;  %25453 = vmatmul.mubr.msk.f32.gmra.mrb[76].mxu1 %vm450_vm1, %v12557_v58 }
 0x83c   : > { %v12448_v48 = vmul.f32 %v12412_v8, %v29632_v34  ;;  %v12378_v33 = vadd.f32 %v31099_v59, %v12196_v61 }
 0x83d   : > { %12485 = vst.msk [vmem:[#allocation2 + $0x5b] sm:$0xff] %vm450_vm1, %v12449_v53  ;;  %v12415_v28 = vmax.f32 %v12379_v12, 0.0  ;;  %v12558_v26 = vld [vmem:[#allocation2 + $0x31] sm:$0xff]  ;;  %v12559_v19 = vld [vmem:[#allocation2 + $0x39] sm:$0xff] }
 0x83e   : > { %12484 = vst.msk [vmem:[#allocation2 + $0x53] sm:$0xff] %vm450_vm1, %v12448_v48  ;;  %v12414_v60 = vmax.f32 %v12378_v33, 0.0  ;;  %v25404_v39 = vpop.f32.mrb[48].mxu0  ;;  %25455 = vmatprep.mubr.msk.f32.mxu1 %vm450_vm1, %v12558_v26 }
 0x83f   : > { %v12451_v47 = vmul.f32 %v12415_v28, %v29644_v44  ;;  %v12381_v50 = vadd.f32 %v25404_v39, %v31099_v59  ;;  %v12206_v2 = vpop.f32.mrb[49].mxu0  ;;  %25456 = vmatmul.mubr.msk.f32.gmra.mrb[78].mxu1 %vm450_vm1, %v12559_v19 }
 0x840   : > { %v12450_v14 = vmul.f32 %v12414_v60, %v29640_v41  ;;  %v12380_v30 = vadd.f32 %v31099_v59, %v12206_v2 }
 0x841   : > { %12487 = vst.msk [vmem:[#allocation2 + $0x6b] sm:$0xff] %vm450_vm1, %v12451_v47  ;;  %v12417_v5 = vmax.f32 %v12381_v50, 0.0  ;;  %v12560_v4 = vld [vmem:[#allocation2 + $0x41] sm:$0xff]  ;;  %v12561_v20 = vld [vmem:[#allocation2 + $0x49] sm:$0xff] }
 0x842   : > { %12486 = vst.msk [vmem:[#allocation2 + $0x63] sm:$0xff] %vm450_vm1, %v12450_v14  ;;  %v12416_v52 = vmax.f32 %v12380_v30, 0.0  ;;  %v25407_v46 = vpop.f32.mrb[50].mxu0  ;;  %25458 = vmatprep.mubr.msk.f32.mxu1 %vm450_vm1, %v12560_v4 }
 0x843   : > { %v12453_v49 = vmul.f32 %v12417_v5, %v29654_v57  ;;  %v12383_v37 = vadd.f32 %v25407_v46, %v31099_v59  ;;  %v12216_v32 = vpop.f32.mrb[51].mxu0  ;;  %25459 = vmatmul.mubr.msk.f32.gmra.mrb[80].mxu1 %vm450_vm1, %v12561_v20 }
 0x844   : > { %v12452_v25 = vmul.f32 %v12416_v52, %v29652_v55  ;;  %v12382_v1 = vadd.f32 %v31099_v59, %v12216_v32 }
 0x845   : > { %12489 = vst.msk [vmem:[#allocation2 + $0x7b] sm:$0xff] %vm450_vm1, %v12453_v49  ;;  %v12419_v38 = vmax.f32 %v12383_v37, 0.0  ;;  %v12562_v21 = vld [vmem:[#allocation2 + $0x51] sm:$0xff]  ;;  %v12563_v29 = vld [vmem:[#allocation2 + $0x59] sm:$0xff] }
 0x846   : > { %12488 = vst.msk [vmem:[#allocation2 + $0x73] sm:$0xff] %vm450_vm1, %v12452_v25  ;;  %v12418_v13 = vmax.f32 %v12382_v1, 0.0  ;;  %v25410_v22 = vpop.f32.mrb[52].mxu0  ;;  %25461 = vmatprep.mubr.msk.f32.mxu1 %vm450_vm1, %v12562_v21 }
 0x847   : > { %v12455_v24 = vmul.f32 %v12419_v38, %v29665_v15  ;;  %v12385_v10 = vadd.f32 %v25410_v22, %v31099_v59  ;;  %v12226_v43 = vpop.f32.mrb[53].mxu0  ;;  %25462 = vmatmul.mubr.msk.f32.gmra.mrb[82].mxu1 %vm450_vm1, %v12563_v29 }
 0x848   : > { %v12454_v36 = vmul.f32 %v12418_v13, %v29662_v54  ;;  %v12384_v11 = vadd.f32 %v31099_v59, %v12226_v43 }
 0x849   : > { %12491 = vst.msk [vmem:[#allocation2 + $0x8b] sm:$0xff] %vm450_vm1, %v12455_v24  ;;  %v12421_v3 = vmax.f32 %v12385_v10, 0.0  ;;  %v12564_v58 = vld [vmem:[#allocation2 + $0x61] sm:$0xff]  ;;  %v12565_v8 = vld [vmem:[#allocation2 + $0x69] sm:$0xff] }
 0x84a   : > { %12490 = vst.msk [vmem:[#allocation2 + $0x83] sm:$0xff] %vm450_vm1, %v12454_v36  ;;  %v12420_v31 = vmax.f32 %v12384_v11, 0.0  ;;  %v25413_v53 = vpop.f32.mrb[54].mxu0  ;;  %25464 = vmatprep.mubr.msk.f32.mxu1 %vm450_vm1, %v12564_v58  ;;  %v32634_v11 = vld [vmem:[#allocation4_spill] sm:$0xff] }
 0x84b   : > { %v12457_v12 = vmul.f32 %v12421_v3, %v29675_v51  ;;  %v12387_v61 = vadd.f32 %v25413_v53, %v31099_v59  ;;  %v12236_v48 = vpop.f32.mrb[55].mxu0  ;;  %25465 = vmatmul.mubr.msk.f32.gmra.mrb[84].mxu1 %vm450_vm1, %v12565_v8 }
 0x84c   : > { %v12456_v33 = vmul.f32 %v12420_v31, %v29672_v40  ;;  %v12386_v28 = vadd.f32 %v31099_v59, %v12236_v48  ;;  %v32635_v48 = vld [vmem:[#allocation6_spill] sm:$0xff] }
 0x84d   : > { %12493 = vst.msk [vmem:[#allocation2 + $0x9b] sm:$0xff] %vm450_vm1, %v12457_v12  ;;  %v12423_v26 = vmax.f32 %v12387_v61, 0.0  ;;  %v12566_v19 = vld [vmem:[#allocation2 + $0x71] sm:$0xff]  ;;  %v12567_v60 = vld [vmem:[#allocation2 + $0x79] sm:$0xff] }
 0x84e   : > { %12492 = vst.msk [vmem:[#allocation2 + $0x93] sm:$0xff] %vm450_vm1, %v12456_v33  ;;  %v12422_v39 = vmax.f32 %v12386_v28, 0.0  ;;  %v25416_v47 = vpop.f32.mrb[56].mxu0  ;;  %25467 = vmatprep.mubr.msk.f32.mxu1 %vm450_vm1, %v12566_v19  ;;  %v32636_v19 = vld [vmem:[#allocation5_spill] sm:$0xff] }
 0x84f   : > { %v12459_v50 = vmul.f32 %v12423_v26, %v29689_v56  ;;  %v12389_v2 = vadd.f32 %v25416_v47, %v31099_v59  ;;  %v12246_v14 = vpop.f32.mrb[57].mxu0  ;;  %25468 = vmatmul.mubr.msk.f32.gmra.mrb[86].mxu1 %vm450_vm1, %v12567_v60 }
 0x850   : > { %v12458_v30 = vmul.f32 %v12422_v39, %v29685_v6  ;;  %v12388_v5 = vadd.f32 %v31099_v59, %v12246_v14 }
 0x851   : > { %12495 = vst.msk [vmem:[#allocation2 + $0xab] sm:$0xff] %vm450_vm1, %v12459_v50  ;;  %v12425_v4 = vmax.f32 %v12389_v2, 0.0  ;;  %v12568_v20 = vld [vmem:[#allocation2 + $0x81] sm:$0xff]  ;;  %v12569_v52 = vld [vmem:[#allocation2 + $0x89] sm:$0xff] }
 0x852   : > { %12494 = vst.msk [vmem:[#allocation2 + $0xa3] sm:$0xff] %vm450_vm1, %v12458_v30  ;;  %v12424_v46 = vmax.f32 %v12388_v5, 0.0  ;;  %v25419_v49 = vpop.f32.mrb[58].mxu0  ;;  %25470 = vmatprep.mubr.msk.f32.mxu1 %vm450_vm1, %v12568_v20  ;;  %v32637_v5 = vld [vmem:[#allocation8_spill] sm:$0xff] }
 0x853   : > { %v12461_v37 = vmul.f32 %v12425_v4, %v29708_v63  ;;  %v12391_v32 = vadd.f32 %v25419_v49, %v31099_v59  ;;  %v12256_v25 = vpop.f32.mrb[59].mxu0  ;;  %25471 = vmatmul.mubr.msk.f32.gmra.mrb[88].mxu1 %vm450_vm1, %v12569_v52 }
 0x854   : > { %v12460_v1 = vmul.f32 %v12424_v46, %v29703_v42  ;;  %v12390_v38 = vadd.f32 %v31099_v59, %v12256_v25  ;;  %v32638_v46 = vld [vmem:[#allocation7_spill] sm:$0xff] }
 0x855   : > { %12497 = vst.msk [vmem:[#allocation2 + $0xbb] sm:$0xff] %vm450_vm1, %v12461_v37  ;;  %v12427_v21 = vmax.f32 %v12391_v32, 0.0  ;;  %v12570_v29 = vld [vmem:[#allocation2 + $0x91] sm:$0xff]  ;;  %v12571_v13 = vld [vmem:[#allocation2 + $0x99] sm:$0xff] }
 0x856   : > { %12496 = vst.msk [vmem:[#allocation2 + $0xb3] sm:$0xff] %vm450_vm1, %v12460_v1  ;;  %v12426_v22 = vmax.f32 %v12390_v38, 0.0  ;;  %v25422_v24 = vpop.f32.mrb[60].mxu0  ;;  %25473 = vmatprep.mubr.msk.f32.mxu1 %vm450_vm1, %v12570_v29  ;;  %v32639_v29 = vld [vmem:[#allocation10_spill] sm:$0xff] }
 0x857   : > { %v12463_v10 = vmul.f32 %v12427_v21, %v29727_v18  ;;  %v12393_v43 = vadd.f32 %v25422_v24, %v31099_v59  ;;  %v12266_v36 = vpop.f32.mrb[61].mxu0  ;;  %25474 = vmatmul.mubr.msk.f32.gmra.mrb[90].mxu1 %vm450_vm1, %v12571_v13 }
 0x858   : > { %v12462_v3 = vmul.f32 %v12426_v22, %v32634_v11  ;;  %v12392_v58 = vadd.f32 %v31099_v59, %v12266_v36 }
 0x859   : > { %12499 = vst.msk [vmem:[#allocation2 + $0xcb] sm:$0xff] %vm450_vm1, %v12463_v10  ;;  %v12429_v8 = vmax.f32 %v12393_v43, 0.0  ;;  %v12572_v31 = vld [vmem:[#allocation2 + $0xa1] sm:$0xff]  ;;  %v12573_v53 = vld [vmem:[#allocation2 + $0xa9] sm:$0xff]  ;;  %v32640_v10 = vld [vmem:[#allocation9_spill] sm:$0xff] }
 0x85a   : > { %12498 = vst.msk [vmem:[#allocation2 + $0xc3] sm:$0xff] %vm450_vm1, %v12462_v3  ;;  %v12428_v12 = vmax.f32 %v12392_v58, 0.0  ;;  %v25425_v61 = vpop.f32.mrb[62].mxu0  ;;  %25476 = vmatprep.mubr.msk.f32.mxu1 %vm450_vm1, %v12572_v31 }
 0x85b   : > { %v12465_v33 = vmul.f32 %v12429_v8, %v32635_v48  ;;  %v12395_v28 = vadd.f32 %v25425_v61, %v31099_v59  ;;  %v12276_v26 = vpop.f32.mrb[63].mxu0  ;;  %25477 = vmatmul.mubr.msk.f32.gmra.mrb[92].mxu1 %vm450_vm1, %v12573_v53  ;;  %v14622_v48 = vld [vmem:[%s32576_s7 + $0xa8] sm:$0xff] }
 0x85c   : > { %v12464_v60 = vmul.f32 %v12428_v12, %v32636_v19  ;;  %v12394_v39 = vadd.f32 %v31099_v59, %v12276_v26  ;;  %v32641_v12 = vld [vmem:[#allocation12_spill] sm:$0xff]  ;;  %v32642_v26 = vld [vmem:[#allocation11_spill] sm:$0xff]  ;;  %v14621_v19 = vld [vmem:[%s32576_s7 + $0xa0] sm:$0xff] }
 0x85d   : > { %12501 = vst.msk [vmem:[#allocation2 + $0xdb] sm:$0xff] %vm450_vm1, %v12465_v33  ;;  %v12431_v47 = vmax.f32 %v12395_v28, 0.0  ;;  %v12574_v50 = vld [vmem:[#allocation2 + $0xb1] sm:$0xff]  ;;  %v12575_v2 = vld [vmem:[#allocation2 + $0xb9] sm:$0xff]  ;;  %v26738_v11 = vpack.c.bf16 %v14622_v48, %v14621_v19 }
 0x85e   : > { %12500 = vst.msk [vmem:[#allocation2 + $0xd3] sm:$0xff] %vm450_vm1, %v12464_v60  ;;  %v12430_v14 = vmax.f32 %v12394_v39, 0.0  ;;  %v25428_v30 = vpop.f32.mrb[64].mxu0  ;;  %25479 = vmatprep.mubr.msk.f32.mxu1 %vm450_vm1, %v12574_v50 }
 0x85f   : > { %v12467_v4 = vmul.f32 %v12431_v47, %v32637_v5  ;;  %v12397_v20 = vadd.f32 %v25428_v30, %v31099_v59  ;;  %v12286_v52 = vpop.f32.mrb[65].mxu0  ;;  %25480 = vmatmul.mubr.msk.f32.gmra.mrb[94].mxu1 %vm450_vm1, %v12575_v2 }
 0x860   : > { %v12466_v49 = vmul.f32 %v12430_v14, %v32638_v46  ;;  %v12396_v37 = vadd.f32 %v31099_v59, %v12286_v52  ;;  %v14195_v46 = vld [vmem:[%s32576_s7 + $0x98] sm:$0xff] }
 0x861   : > { %12503 = vst.msk [vmem:[#allocation2 + $0xeb] sm:$0xff] %vm450_vm1, %v12467_v4  ;;  %v12433_v32 = vmax.f32 %v12397_v20, 0.0  ;;  %v12576_v25 = vld [vmem:[#allocation2 + $0xc1] sm:$0xff]  ;;  %v12577_v1 = vld [vmem:[#allocation2 + $0xc9] sm:$0xff] }
 0x862   : > { %12502 = vst.msk [vmem:[#allocation2 + $0xe3] sm:$0xff] %vm450_vm1, %v12466_v49  ;;  %v12432_v38 = vmax.f32 %v12396_v37, 0.0  ;;  %v25431_v21 = vpop.f32.mrb[66].mxu0  ;;  %25482 = vmatprep.mubr.msk.f32.mxu1 %vm450_vm1, %v12576_v25  ;;  %v32643_v4 = vld [vmem:[#allocation14_spill] sm:$0xff]  ;;  %v32644_v37 = vld [vmem:[#allocation13_spill] sm:$0xff] }
 0x863   : > { %v12469_v13 = vmul.f32 %v12433_v32, %v32639_v29  ;;  %v12399_v22 = vadd.f32 %v25431_v21, %v31099_v59  ;;  %v12296_v24 = vpop.f32.mrb[67].mxu0  ;;  %25483 = vmatmul.mubr.msk.f32.gmra.mrb[96].mxu1 %vm450_vm1, %v12577_v1  ;;  %v14194_v29 = vld [vmem:[%s32576_s7 + $0x90] sm:$0xff] }
 0x864   : > { %v12468_v43 = vmul.f32 %v12432_v38, %v32640_v10  ;;  %v12398_v36 = vadd.f32 %v31099_v59, %v12296_v24  ;;  %v26734_v5 = vpack.c.bf16 %v14195_v46, %v14194_v29  ;;  %v14624_v46 = vld [vmem:[%s32576_s7 + $0xb8] sm:$0xff] }
 0x865   : > { %12505 = vst.msk [vmem:[#allocation2 + $0xfb] sm:$0xff] %vm450_vm1, %v12469_v13  ;;  %v12435_v3 = vmax.f32 %v12399_v22, 0.0  ;;  %v12578_v58 = vld [vmem:[#allocation2 + $0xd1] sm:$0xff]  ;;  %v12579_v8 = vld [vmem:[#allocation2 + $0xd9] sm:$0xff]  ;;  %v32645_v22 = vld [vmem:[#allocation15_spill] sm:$0xff] }
 0x866   : > { %12504 = vst.msk [vmem:[#allocation2 + $0xf3] sm:$0xff] %vm450_vm1, %v12468_v43  ;;  %v12434_v31 = vmax.f32 %v12398_v36, 0.0  ;;  %v25434_v53 = vpop.f32.mrb[68].mxu0  ;;  %25485 = vmatprep.mubr.msk.f32.mxu1 %vm450_vm1, %v12578_v58  ;;  %v32646_v43 = vld [vmem:[#allocation16_spill] sm:$0xff] }
 0x867   : > { %v12471_v61 = vmul.f32 %v12435_v3, %v32641_v12  ;;  %v12401_v33 = vadd.f32 %v25434_v53, %v31099_v59  ;;  %v12306_v28 = vpop.f32.mrb[69].mxu0  ;;  %25486 = vmatmul.mubr.msk.f32.gmra.mrb[98].mxu1 %vm450_vm1, %v12579_v8  ;;  %v13336_v53 = vld [vmem:[%s32576_s7 + $0x50] sm:$0xff] }
 0x868   : > { %v12470_v60 = vmul.f32 %v12434_v31, %v32642_v26  ;;  %v12400_v39 = vadd.f32 %v31099_v59, %v12306_v28  ;;  %v12512_v31 = vld [vmem:[#allocation2] sm:$0xff]  ;;  %v14156_v29 = vld [vmem:[#allocation2 + $0x13] sm:$0xff] }
 0x869   : > { %12507 = vst.msk [vmem:[#allocation2 + $0x10b] sm:$0xff] %vm450_vm1, %v12471_v61  ;;  %v12437_v47 = vmax.f32 %v12401_v33, 0.0  ;;  %v12580_v50 = vld [vmem:[#allocation2 + $0xe1] sm:$0xff]  ;;  %v12581_v2 = vld [vmem:[#allocation2 + $0xe9] sm:$0xff]  ;;  %v13337_v61 = vld [vmem:[%s32576_s7 + $0x58] sm:$0xff] }
 0x86a   : > { %12506 = vst.msk [vmem:[#allocation2 + $0x103] sm:$0xff] %vm450_vm1, %v12470_v60  ;;  %v12436_v14 = vmax.f32 %v12400_v39, 0.0  ;;  %v25437_v30 = vpop.f32.mrb[70].mxu0  ;;  %25488 = vmatprep.mubr.msk.f32.mxu1 %vm450_vm1, %v12580_v50  ;;  %v12513_v33 = vld [vmem:[#allocation2 + $0x8] sm:$0xff]  ;;  %v26718_v28 = vpack.c.bf16 %v13337_v61, %v13336_v53  ;;  %v13763_v60 = vld [vmem:[%s32576_s7 + $0x60] sm:$0xff]  ;;  %v12535_v53 = vld [vmem:[#allocation2 + $0xb8] sm:$0xff] }
 0x86b   : > { %v12473_v20 = vmul.f32 %v12437_v47, %v32643_v4  ;;  %v12403_v52 = vadd.f32 %v25437_v30, %v31099_v59  ;;  %v12316_v49 = vpop.f32.mrb[71].mxu0  ;;  %25489 = vmatmul.mubr.msk.f32.gmra.mrb[100].mxu1 %vm450_vm1, %v12581_v2  ;;  %v13764_v39 = vld [vmem:[%s32576_s7 + $0x68] sm:$0xff]  ;;  %v12514_v47 = vld [vmem:[#allocation2 + $0x10] sm:$0xff]  ;;  %v12515_v2 = vld [vmem:[#allocation2 + $0x18] sm:$0xff] }
 0x86c   : > { %v12472_v32 = vmul.f32 %v12436_v14, %v32644_v37  ;;  %v12402_v25 = vadd.f32 %v31099_v59, %v12316_v49  ;;  %v31259_v50 = vpack.c.bf16 %v13764_v39, %v13763_v60  ;;  %v12516_v14 = vld [vmem:[#allocation2 + $0x20] sm:$0xff]  ;;  %v12517_v30 = vld [vmem:[#allocation2 + $0x28] sm:$0xff]  ;;  %v12539_v60 = vld [vmem:[#allocation2 + $0xd8] sm:$0xff] }
 0x86d   : > { %12509 = vst.msk [vmem:[#allocation2 + $0x11b] sm:$0xff] %vm450_vm1, %v12473_v20  ;;  %v12439_v1 = vmax.f32 %v12403_v52, 0.0  ;;  %v12582_v38 = vld [vmem:[#allocation2 + $0xf1] sm:$0xff]  ;;  %v12583_v21 = vld [vmem:[#allocation2 + $0xf9] sm:$0xff]  ;;  %v12521_v49 = vld [vmem:[#allocation2 + $0x48] sm:$0xff] }
 0x86e   : > { %12508 = vst.msk [vmem:[#allocation2 + $0x113] sm:$0xff] %vm450_vm1, %v12472_v32  ;;  %v12438_v13 = vmax.f32 %v12402_v25, 0.0  ;;  %25491 = vmatprep.mubr.msk.f32.mxu1 %vm450_vm1, %v12582_v38  ;;  %v12518_v20 = vld [vmem:[#allocation2 + $0x30] sm:$0xff]  ;;  %v12520_v52 = vld [vmem:[#allocation2 + $0x40] sm:$0xff]  ;;  %v12523_v25 = vld [vmem:[#allocation2 + $0x58] sm:$0xff] }
 0x86f   : > { %v12475_v24 = vmul.f32 %v12439_v1, %v32645_v22  ;;  %25492 = vmatmul.mubr.msk.f32.gmra.mrb[102].mxu1 %vm450_vm1, %v12583_v21  ;;  %v12522_v32 = vld [vmem:[#allocation2 + $0x50] sm:$0xff]  ;;  %v12524_v1 = vld [vmem:[#allocation2 + $0x60] sm:$0xff]  ;;  %v12525_v38 = vld [vmem:[#allocation2 + $0x68] sm:$0xff] }
 0x870   : > { %v12474_v36 = vmul.f32 %v12438_v13, %v32646_v43  ;;  %v12526_v21 = vld [vmem:[#allocation2 + $0x70] sm:$0xff]  ;;  %v12527_v13 = vld [vmem:[#allocation2 + $0x78] sm:$0xff]  ;;  %v12536_v61 = vld [vmem:[#allocation2 + $0xc0] sm:$0xff] }
 0x871   : > { %12511 = vst.msk [vmem:[#allocation2 + $0x12b] sm:$0xff] %vm450_vm1, %v12475_v24  ;;  %v12584_v3 = vld [vmem:[#allocation2 + $0x101] sm:$0xff]  ;;  %v12585_v59 = vld [vmem:[#allocation2 + $0x109] sm:$0xff]  ;;  %v13328_v22 = vld [vmem:[#allocation2 + $0xf2] sm:$0xff] }
 0x872   : > { %12510 = vst.msk [vmem:[#allocation2 + $0x123] sm:$0xff] %vm450_vm1, %v12474_v36  ;;  %25494 = vmatprep.mubr.msk.f32.mxu1 %vm450_vm1, %v12584_v3  ;;  %v12528_v24 = vld [vmem:[#allocation2 + $0x80] sm:$0xff]  ;;  %v12529_v36 = vld [vmem:[#allocation2 + $0x88] sm:$0xff]  ;;  %v12530_v3 = vld [vmem:[#allocation2 + $0x90] sm:$0xff] }
 0x873   : > { %25495 = vmatmul.mubr.msk.f32.gmra.mrb[104].mxu1 %vm450_vm1, %v12585_v59  ;;  %v12531_v59 = vld [vmem:[#allocation2 + $0x98] sm:$0xff]  ;;  %v12540_v39 = vld [vmem:[#allocation2 + $0xe0] sm:$0xff]  ;;  %v13327_v43 = vld [vmem:[#allocation2 + $0xea] sm:$0xff] }
 0x874   : > { %v13329_v37 = vld [vmem:[#allocation2 + $0xfa] sm:$0xff]  ;;  %v13330_v4 = vld [vmem:[#allocation2 + $0x102] sm:$0xff]  ;;  %v13331_v26 = vld [vmem:[#allocation2 + $0x10a] sm:$0xff] }
 0x875   : > { %v12586_v58 = vld [vmem:[#allocation2 + $0x111] sm:$0xff]  ;;  %v12587_v8 = vld [vmem:[#allocation2 + $0x119] sm:$0xff] }
 0x876   : > { %25497 = vmatprep.mubr.msk.f32.mxu1 %vm450_vm1, %v12586_v58  ;;  %v12532_v58 = vld [vmem:[#allocation2 + $0xa0] sm:$0xff]  ;;  %v13332_v12 = vld [vmem:[#allocation2 + $0x112] sm:$0xff] }
 0x877   : > { %25498 = vmatmul.mubr.msk.f32.gmra.mrb[106].mxu1 %vm450_vm1, %v12587_v8  ;;  %v12533_v8 = vld [vmem:[#allocation2 + $0xa8] sm:$0xff]  ;;  %v13333_v10 = vld [vmem:[#allocation2 + $0x11a] sm:$0xff] }
 0x878   : > { %25508 = vmatprep.mubr.msk.f32.mxu1 %vm450_vm1, %v12512_v31  ;;  %v12534_v31 = vld [vmem:[#allocation2 + $0xb0] sm:$0xff] }
 0x879   : > { %v13761_v48 = vld [vmem:[#allocation2 + $0x122] sm:$0xff]  ;;  %v13762_v19 = vld [vmem:[#allocation2 + $0x12a] sm:$0xff] }
 0x87b   : > { %25509 = vmatmul.mubr.msk.f32.vlgmr.msra.gmra.mrb[72].mxu1 %vm450_vm1, %v12513_v33  ;;  %v12537_v33 = vld [vmem:[#allocation2 + $0xc8] sm:$0xff] }
 0x87c   : > { %26717 = vmatpush3.bf16.msra.mxu1 %v31093_v45  ;;  %25511 = vmatprep.mubr.msk.f32.mxu1 %vm450_vm1, %v12514_v47  ;;  %v12519_v45 = vld [vmem:[#allocation2 + $0x38] sm:$0xff]  ;;  %v12541_v47 = vld [vmem:[#allocation2 + $0xe8] sm:$0xff] }
 0x87d   : > { %26719 = vmatprep.subr.bf16.mxu1 %v26718_v28 }
 0x87f   : > { %25512 = vmatmul.mubr.msk.f32.gmra.mrb[74].mxu1 %vm450_vm1, %v12515_v2  ;;  %v12542_v2 = vld [vmem:[#allocation2 + $0xf0] sm:$0xff] }
 0x880   : > { %25514 = vmatprep.mubr.msk.f32.mxu1 %vm450_vm1, %v12516_v14  ;;  %26721 = vmatpush3.bf16.msra.mxu1 %v26718_v28  ;;  %v12538_v28 = vld [vmem:[#allocation2 + $0xd0] sm:$0xff]  ;;  %v12543_v14 = vld [vmem:[#allocation2 + $0xf8] sm:$0xff] }
 0x881   : > { %26723 = vmatprep.subr.bf16.mxu1 %v31259_v50 }
 0x883   : > { %25515 = vmatmul.mubr.msk.f32.gmra.mrb[76].mxu1 %vm450_vm1, %v12517_v30  ;;  %v12544_v30 = vld [vmem:[#allocation2 + $0x100] sm:$0xff] }
 0x884   : > { %25517 = vmatprep.mubr.msk.f32.mxu1 %vm450_vm1, %v12518_v20  ;;  %v12545_v20 = vld [vmem:[#allocation2 + $0x108] sm:$0xff] }
 0x887   : > { %25518 = vmatmul.mubr.msk.f32.gmra.mrb[78].mxu1 %vm450_vm1, %v12519_v45  ;;  %v12546_v45 = vld [vmem:[#allocation2 + $0x110] sm:$0xff] }
 0x888   : > { %25520 = vmatprep.mubr.msk.f32.mxu1 %vm450_vm1, %v12520_v52  ;;  %v13298_v52 = vld [vmem:[#allocation2 + $0x2] sm:$0xff] }
 0x88b   : > { %25521 = vmatmul.mubr.msk.f32.gmra.mrb[80].mxu1 %vm450_vm1, %v12521_v49  ;;  %v12547_v49 = vld [vmem:[#allocation2 + $0x118] sm:$0xff] }
 0x88c   : > { %25523 = vmatprep.mubr.msk.f32.mxu1 %vm450_vm1, %v12522_v32  ;;  %v13765_v32 = vld [vmem:[%s32576_s7 + $0x70] sm:$0xff] }
 0x88f   : > { %25524 = vmatmul.mubr.msk.f32.gmra.mrb[82].mxu1 %vm450_vm1, %v12523_v25  ;;  %v13766_v25 = vld [vmem:[%s32576_s7 + $0x78] sm:$0xff] }
 0x890   : > { %25526 = vmatprep.mubr.msk.f32.mxu1 %vm450_vm1, %v12524_v1  ;;  %v13299_v1 = vld [vmem:[#allocation2 + $0xa] sm:$0xff] }
 0x893   : > { %25527 = vmatmul.mubr.msk.f32.gmra.mrb[84].mxu1 %vm450_vm1, %v12525_v38  ;;  %v26726_v38 = vpack.c.bf16 %v13766_v25, %v13765_v32  ;;  %v13321_v32 = vld [vmem:[#allocation2 + $0xba] sm:$0xff]  ;;  %v13322_v25 = vld [vmem:[#allocation2 + $0xc2] sm:$0xff] }
 0x894   : > { %25529 = vmatprep.mubr.msk.f32.mxu1 %vm450_vm1, %v12526_v21  ;;  %v14192_v21 = vld [vmem:[%s32576_s7 + $0x80] sm:$0xff] }
 0x897   : > { %25530 = vmatmul.mubr.msk.f32.gmra.mrb[86].mxu1 %vm450_vm1, %v12527_v13  ;;  %v14193_v13 = vld [vmem:[%s32576_s7 + $0x88] sm:$0xff] }
 0x898   : > { %25532 = vmatprep.mubr.msk.f32.mxu1 %vm450_vm1, %v12528_v24  ;;  %v31309_v24 = vld [vmem:[#allocation2 + $0x12] sm:$0xff] }
 0x89b   : > { %25533 = vmatmul.mubr.msk.f32.gmra.mrb[88].mxu1 %vm450_vm1, %v12529_v36  ;;  %v31314_v36 = vpack.c.bf16 %v14193_v13, %v14192_v21  ;;  %v13325_v21 = vld [vmem:[#allocation2 + $0xda] sm:$0xff]  ;;  %v13326_v13 = vld [vmem:[#allocation2 + $0xe2] sm:$0xff] }
 0x89c   : > { %25535 = vmatprep.mubr.msk.f32.mxu1 %vm450_vm1, %v12530_v3  ;;  %v31316_v3 = vld [vmem:[#allocation2 + $0x1a] sm:$0xff] }
 0x89f   : > { %25536 = vmatmul.mubr.msk.f32.gmra.mrb[90].mxu1 %vm450_vm1, %v12531_v59  ;;  %v31320_v59 = vld [vmem:[#allocation2 + $0x22] sm:$0xff] }
 0x8a0   : > { %25538 = vmatprep.mubr.msk.f32.mxu1 %vm450_vm1, %v12532_v58  ;;  %v31329_v58 = vld [vmem:[#allocation2 + $0x32] sm:$0xff] }
 0x8a3   : > { %25539 = vmatmul.mubr.msk.f32.gmra.mrb[92].mxu1 %vm450_vm1, %v12533_v8  ;;  %v31333_v8 = vld [vmem:[#allocation2 + $0x3a] sm:$0xff] }
 0x8a4   : > { %25541 = vmatprep.mubr.msk.f32.mxu1 %vm450_vm1, %v12534_v31  ;;  %v31337_v31 = vld [vmem:[#allocation2 + $0x42] sm:$0xff] }
 0x8a7   : > { %25542 = vmatmul.mubr.msk.f32.gmra.mrb[94].mxu1 %vm450_vm1, %v12535_v53  ;;  %v31341_v53 = vld [vmem:[#allocation2 + $0x4a] sm:$0xff] }
 0x8a8   : > { %25544 = vmatprep.mubr.msk.f32.mxu1 %vm450_vm1, %v12536_v61  ;;  %v31345_v61 = vld [vmem:[#allocation2 + $0x52] sm:$0xff] }
 0x8ab   : > { %25545 = vmatmul.mubr.msk.f32.gmra.mrb[96].mxu1 %vm450_vm1, %v12537_v33  ;;  %v31349_v33 = vld [vmem:[#allocation2 + $0x5a] sm:$0xff] }
 0x8ac   : > { %25547 = vmatprep.mubr.msk.f32.mxu1 %vm450_vm1, %v12538_v28  ;;  %v31353_v28 = vld [vmem:[#allocation2 + $0x62] sm:$0xff] }
 0x8af   : > { %25548 = vmatmul.mubr.msk.f32.gmra.mrb[98].mxu1 %vm450_vm1, %v12539_v60  ;;  %v31357_v60 = vld [vmem:[#allocation2 + $0x6a] sm:$0xff] }
 0x8b0   : > { %25550 = vmatprep.mubr.msk.f32.mxu1 %vm450_vm1, %v12540_v39  ;;  %v31361_v39 = vld [vmem:[#allocation2 + $0x72] sm:$0xff] }
 0x8b3   : > { %25551 = vmatmul.mubr.msk.f32.gmra.mrb[100].mxu1 %vm450_vm1, %v12541_v47  ;;  %v31365_v47 = vld [vmem:[#allocation2 + $0x7a] sm:$0xff] }
 0x8b4   : > { %25553 = vmatprep.mubr.msk.f32.mxu1 %vm450_vm1, %v12542_v2  ;;  %v31369_v2 = vld [vmem:[#allocation2 + $0x82] sm:$0xff] }
 0x8b7   : > { %25554 = vmatmul.mubr.msk.f32.gmra.mrb[102].mxu1 %vm450_vm1, %v12543_v14  ;;  %v31373_v14 = vld [vmem:[#allocation2 + $0x8a] sm:$0xff] }
 0x8b8   : > { %25556 = vmatprep.mubr.msk.f32.mxu1 %vm450_vm1, %v12544_v30  ;;  %v13316_v30 = vld [vmem:[#allocation2 + $0x92] sm:$0xff] }
 0x8bb   : > { %25557 = vmatmul.mubr.msk.f32.gmra.mrb[104].mxu1 %vm450_vm1, %v12545_v20  ;;  %v13317_v20 = vld [vmem:[#allocation2 + $0x9a] sm:$0xff] }
 0x8bc   : > { %25559 = vmatprep.mubr.msk.f32.mxu1 %vm450_vm1, %v12546_v45  ;;  %v13318_v45 = vld [vmem:[#allocation2 + $0xa2] sm:$0xff] }
 0x8bf   : > { %25560 = vmatmul.mubr.msk.f32.gmra.mrb[106].mxu1 %vm450_vm1, %v12547_v49  ;;  %v13320_v49 = vld [vmem:[#allocation2 + $0xb2] sm:$0xff] }
 0x8c0   : > { %25570 = vmatprep.mubr.msk.f32.mxu1 %vm450_vm1, %v13298_v52  ;;  %v13319_v52 = vld [vmem:[#allocation2 + $0xaa] sm:$0xff] }
 0x8c3   : > { %25571 = vmatmul.mubr.msk.f32.vlgmr.msra.gmra.mrb[72].mxu1 %vm450_vm1, %v13299_v1  ;;  %v13323_v1 = vld [vmem:[#allocation2 + $0xca] sm:$0xff] }
 0x8c4   : > { %26725 = vmatpush3.bf16.msra.mxu1 %v31259_v50  ;;  %25573 = vmatprep.mubr.msk.f32.mxu1 %vm450_vm1, %v31309_v24  ;;  %v31325_v50 = vld [vmem:[#allocation2 + $0x2a] sm:$0xff] }
 0x8c5   : > { %26727 = vmatprep.subr.bf16.mxu1 %v26726_v38 }
 0x8c7   : > { %25574 = vmatmul.mubr.msk.f32.gmra.mrb[74].mxu1 %vm450_vm1, %v31316_v3 }
 0x8c8   : > { %25576 = vmatprep.mubr.msk.f32.mxu1 %vm450_vm1, %v31320_v59  ;;  %26729 = vmatpush3.bf16.msra.mxu1 %v26726_v38  ;;  %v13324_v38 = vld [vmem:[#allocation2 + $0xd2] sm:$0xff] }
 0x8c9   : > { %26731 = vmatprep.subr.bf16.mxu1 %v31314_v36 }
 0x8cb   : > { %25577 = vmatmul.mubr.msk.f32.gmra.mrb[76].mxu1 %vm450_vm1, %v31325_v50 }
 0x8cc   : > { %25579 = vmatprep.mubr.msk.f32.mxu1 %vm450_vm1, %v31329_v58 }
 0x8cf   : > { %25580 = vmatmul.mubr.msk.f32.gmra.mrb[78].mxu1 %vm450_vm1, %v31333_v8 }
 0x8d0   : > { %25582 = vmatprep.mubr.msk.f32.mxu1 %vm450_vm1, %v31337_v31 }
 0x8d3   : > { %25583 = vmatmul.mubr.msk.f32.gmra.mrb[80].mxu1 %vm450_vm1, %v31341_v53 }
 0x8d4   : > { %25585 = vmatprep.mubr.msk.f32.mxu1 %vm450_vm1, %v31345_v61 }
 0x8d7   : > { %25586 = vmatmul.mubr.msk.f32.gmra.mrb[82].mxu1 %vm450_vm1, %v31349_v33 }
 0x8d8   : > { %25588 = vmatprep.mubr.msk.f32.mxu1 %vm450_vm1, %v31353_v28 }
 0x8db   : > { %25589 = vmatmul.mubr.msk.f32.gmra.mrb[84].mxu1 %vm450_vm1, %v31357_v60 }
 0x8dc   : > { %25591 = vmatprep.mubr.msk.f32.mxu1 %vm450_vm1, %v31361_v39 }
 0x8df   : > { %25592 = vmatmul.mubr.msk.f32.gmra.mrb[86].mxu1 %vm450_vm1, %v31365_v47 }
 0x8e0   : > { %25594 = vmatprep.mubr.msk.f32.mxu1 %vm450_vm1, %v31369_v2 }
 0x8e3   : > { %25595 = vmatmul.mubr.msk.f32.gmra.mrb[88].mxu1 %vm450_vm1, %v31373_v14 }
 0x8e4   : > { %25597 = vmatprep.mubr.msk.f32.mxu1 %vm450_vm1, %v13316_v30 }
 0x8e7   : > { %25598 = vmatmul.mubr.msk.f32.gmra.mrb[90].mxu1 %vm450_vm1, %v13317_v20 }
 0x8e8   : > { %25600 = vmatprep.mubr.msk.f32.mxu1 %vm450_vm1, %v13318_v45 }
 0x8eb   : > { %25601 = vmatmul.mubr.msk.f32.gmra.mrb[92].mxu1 %vm450_vm1, %v13319_v52 }
 0x8ec   : > { %25603 = vmatprep.mubr.msk.f32.mxu1 %vm450_vm1, %v13320_v49 }
 0x8ef   : > { %25604 = vmatmul.mubr.msk.f32.gmra.mrb[94].mxu1 %vm450_vm1, %v13321_v32 }
 0x8f0   : > { %25606 = vmatprep.mubr.msk.f32.mxu1 %vm450_vm1, %v13322_v25 }
 0x8f3   : > { %25607 = vmatmul.mubr.msk.f32.gmra.mrb[96].mxu1 %vm450_vm1, %v13323_v1 }
 0x8f4   : > { %25609 = vmatprep.mubr.msk.f32.mxu1 %vm450_vm1, %v13324_v38 }
 0x8f7   : > { %25610 = vmatmul.mubr.msk.f32.gmra.mrb[98].mxu1 %vm450_vm1, %v13325_v21 }
 0x8f8   : > { %25612 = vmatprep.mubr.msk.f32.mxu1 %vm450_vm1, %v13326_v13 }
 0x8fb   : > { %25613 = vmatmul.mubr.msk.f32.gmra.mrb[100].mxu1 %vm450_vm1, %v13327_v43 }
 0x8fc   : > { %25615 = vmatprep.mubr.msk.f32.mxu1 %vm450_vm1, %v13328_v22 }
 0x8ff   : > { %25616 = vmatmul.mubr.msk.f32.gmra.mrb[102].mxu1 %vm450_vm1, %v13329_v37 }
 0x900   : > { %25618 = vmatprep.mubr.msk.f32.mxu1 %vm450_vm1, %v13330_v4 }
 0x903   : > { %25619 = vmatmul.mubr.msk.f32.gmra.mrb[104].mxu1 %vm450_vm1, %v13331_v26 }
 0x904   : > { %25621 = vmatprep.mubr.msk.f32.mxu1 %vm450_vm1, %v13332_v12 }
 0x907   : > { %25622 = vmatmul.mubr.msk.f32.gmra.mrb[106].mxu1 %vm450_vm1, %v13333_v10 }
 0x908   : > { %25632 = vmatprep.mubr.msk.f32.mxu1 %vm450_vm1, %v31309_v24  ;;  %v14160_v24 = vld [vmem:[#allocation2 + $0x33] sm:$0xff] }
 0x90b   : > { %25633 = vmatmul.mubr.msk.f32.vlgmr.msra.gmra.mrb[72].mxu1 %vm450_vm1, %v31316_v3  ;;  %v14162_v3 = vld [vmem:[#allocation2 + $0x43] sm:$0xff] }
 0x90c   : > { %26733 = vmatpush3.bf16.msra.mxu1 %v31314_v36  ;;  %25635 = vmatprep.mubr.msk.f32.mxu1 %vm450_vm1, %v31320_v59  ;;  %v14161_v36 = vld [vmem:[#allocation2 + $0x3b] sm:$0xff]  ;;  %v14164_v59 = vld [vmem:[#allocation2 + $0x53] sm:$0xff] }
 0x90d   : > { %26735 = vmatprep.subr.bf16.mxu1 %v26734_v5 }
 0x90f   : > { %25636 = vmatmul.mubr.msk.f32.gmra.mrb[74].mxu1 %vm450_vm1, %v31325_v50  ;;  %v14165_v50 = vld [vmem:[#allocation2 + $0x5b] sm:$0xff] }
 0x910   : > { %25638 = vmatprep.mubr.msk.f32.mxu1 %vm450_vm1, %v31329_v58  ;;  %26737 = vmatpush3.bf16.msra.mxu1 %v26734_v5  ;;  %v14623_v5 = vld [vmem:[%s32576_s7 + $0xb0] sm:$0xff]  ;;  %v14166_v58 = vld [vmem:[#allocation2 + $0x63] sm:$0xff] }
 0x911   : > { %26739 = vmatprep.subr.bf16.mxu1 %v26738_v11 }
 0x913   : > { %25639 = vmatmul.mubr.msk.f32.gmra.mrb[76].mxu1 %vm450_vm1, %v31333_v8  ;;  %v14167_v8 = vld [vmem:[#allocation2 + $0x6b] sm:$0xff] }
 0x914   : > { %25641 = vmatprep.mubr.msk.f32.mxu1 %vm450_vm1, %v31337_v31  ;;  %v14168_v31 = vld [vmem:[#allocation2 + $0x73] sm:$0xff] }
 0x917   : > { %25642 = vmatmul.mubr.msk.f32.gmra.mrb[78].mxu1 %vm450_vm1, %v31341_v53  ;;  %v14169_v53 = vld [vmem:[#allocation2 + $0x7b] sm:$0xff] }
 0x918   : > { %25644 = vmatprep.mubr.msk.f32.mxu1 %vm450_vm1, %v31345_v61  ;;  %v14170_v61 = vld [vmem:[#allocation2 + $0x83] sm:$0xff] }
 0x91b   : > { %25645 = vmatmul.mubr.msk.f32.gmra.mrb[80].mxu1 %vm450_vm1, %v31349_v33  ;;  %v14171_v33 = vld [vmem:[#allocation2 + $0x8b] sm:$0xff] }
 0x91c   : > { %25647 = vmatprep.mubr.msk.f32.mxu1 %vm450_vm1, %v31353_v28  ;;  %v14172_v28 = vld [vmem:[#allocation2 + $0x93] sm:$0xff] }
 0x91f   : > { %25648 = vmatmul.mubr.msk.f32.gmra.mrb[82].mxu1 %vm450_vm1, %v31357_v60  ;;  %v14173_v60 = vld [vmem:[#allocation2 + $0x9b] sm:$0xff] }
 0x920   : > { %25650 = vmatprep.mubr.msk.f32.mxu1 %vm450_vm1, %v31361_v39  ;;  %v14174_v39 = vld [vmem:[#allocation2 + $0xa3] sm:$0xff] }
 0x923   : > { %25651 = vmatmul.mubr.msk.f32.gmra.mrb[84].mxu1 %vm450_vm1, %v31365_v47  ;;  %v14175_v47 = vld [vmem:[#allocation2 + $0xab] sm:$0xff] }
 0x924   : > { %25653 = vmatprep.mubr.msk.f32.mxu1 %vm450_vm1, %v31369_v2  ;;  %v14176_v2 = vld [vmem:[#allocation2 + $0xb3] sm:$0xff] }
 0x927   : > { %25654 = vmatmul.mubr.msk.f32.gmra.mrb[86].mxu1 %vm450_vm1, %v31373_v14  ;;  %v14177_v14 = vld [vmem:[#allocation2 + $0xbb] sm:$0xff] }
 0x928   : > { %25656 = vmatprep.mubr.msk.f32.mxu1 %vm450_vm1, %v13316_v30  ;;  %v14178_v30 = vld [vmem:[#allocation2 + $0xc3] sm:$0xff] }
 0x92b   : > { %25657 = vmatmul.mubr.msk.f32.gmra.mrb[88].mxu1 %vm450_vm1, %v13317_v20  ;;  %v14179_v20 = vld [vmem:[#allocation2 + $0xcb] sm:$0xff] }
 0x92c   : > { %25659 = vmatprep.mubr.msk.f32.mxu1 %vm450_vm1, %v13318_v45  ;;  %v14180_v45 = vld [vmem:[#allocation2 + $0xd3] sm:$0xff] }
 0x92f   : > { %25660 = vmatmul.mubr.msk.f32.gmra.mrb[90].mxu1 %vm450_vm1, %v13319_v52  ;;  %v14181_v52 = vld [vmem:[#allocation2 + $0xdb] sm:$0xff] }
 0x930   : > { %25662 = vmatprep.mubr.msk.f32.mxu1 %vm450_vm1, %v13320_v49  ;;  %v14182_v49 = vld [vmem:[#allocation2 + $0xe3] sm:$0xff] }
 0x933   : > { %25663 = vmatmul.mubr.msk.f32.gmra.mrb[92].mxu1 %vm450_vm1, %v13321_v32  ;;  %v14183_v32 = vld [vmem:[#allocation2 + $0xeb] sm:$0xff] }
 0x934   : > { %25665 = vmatprep.mubr.msk.f32.mxu1 %vm450_vm1, %v13322_v25  ;;  %v14184_v25 = vld [vmem:[#allocation2 + $0xf3] sm:$0xff] }
 0x937   : > { %25666 = vmatmul.mubr.msk.f32.gmra.mrb[94].mxu1 %vm450_vm1, %v13323_v1  ;;  %v14185_v1 = vld [vmem:[#allocation2 + $0xfb] sm:$0xff] }
 0x938   : > { %25668 = vmatprep.mubr.msk.f32.mxu1 %vm450_vm1, %v13324_v38  ;;  %v14186_v38 = vld [vmem:[#allocation2 + $0x103] sm:$0xff] }
 0x93b   : > { %25669 = vmatmul.mubr.msk.f32.gmra.mrb[96].mxu1 %vm450_vm1, %v13325_v21  ;;  %v14187_v21 = vld [vmem:[#allocation2 + $0x10b] sm:$0xff] }
 0x93c   : > { %25671 = vmatprep.mubr.msk.f32.mxu1 %vm450_vm1, %v13326_v13  ;;  %v14188_v13 = vld [vmem:[#allocation2 + $0x113] sm:$0xff] }
 0x93f   : > { %25672 = vmatmul.mubr.msk.f32.gmra.mrb[98].mxu1 %vm450_vm1, %v13327_v43  ;;  %v14159_v43 = vld [vmem:[#allocation2 + $0x2b] sm:$0xff] }
 0x940   : > { %25674 = vmatprep.mubr.msk.f32.mxu1 %vm450_vm1, %v13328_v22 }
 0x943   : > { %25675 = vmatmul.mubr.msk.f32.gmra.mrb[100].mxu1 %vm450_vm1, %v13329_v37  ;;  %v14158_v37 = vld [vmem:[#allocation2 + $0x23] sm:$0xff] }
 0x944   : > { %25677 = vmatprep.mubr.msk.f32.mxu1 %vm450_vm1, %v13330_v4  ;;  %v15051_v4 = vld [vmem:[%s32576_s7 + $0xc8] sm:$0xff] }
 0x947   : > { %25678 = vmatmul.mubr.msk.f32.gmra.mrb[102].mxu1 %vm450_vm1, %v13331_v26  ;;  %v14157_v26 = vld [vmem:[#allocation2 + $0x1b] sm:$0xff] }
 0x948   : > { %25680 = vmatprep.mubr.msk.f32.mxu1 %vm450_vm1, %v13332_v12  ;;  %v26742_v12 = vpack.c.bf16 %v14624_v46, %v14623_v5  ;;  %v14191_v5 = vld [vmem:[#allocation2 + $0x12b] sm:$0xff] }
 0x949   : > { %v15052_v46 = vld [vmem:[%s32576_s7 + $0xd0] sm:$0xff] }
 0x94b   : > { %25681 = vmatmul.mubr.msk.f32.gmra.mrb[104].mxu1 %vm450_vm1, %v13333_v10  ;;  %v15050_v10 = vld [vmem:[%s32576_s7 + $0xc0] sm:$0xff] }
 0x94c   : > { %25683 = vmatprep.mubr.msk.f32.mxu1 %vm450_vm1, %v13761_v48  ;;  %v31475_v22 = vpack.c.bf16 %v15051_v4, %v15050_v10  ;;  %v14189_v48 = vld [vmem:[#allocation2 + $0x11b] sm:$0xff] }
 0x94d   : > { %v14586_v10 = vld [vmem:[#allocation2 + $0x1c] sm:$0xff] }
 0x94e   : > { %v15479_v4 = vld [vmem:[%s32576_s7 + $0xe0] sm:$0xff] }
 0x94f   : > { %25684 = vmatmul.mubr.msk.f32.gmra.mrb[106].mxu1 %vm450_vm1, %v13762_v19  ;;  %v14190_v19 = vld [vmem:[#allocation2 + $0x123] sm:$0xff] }
 0x950   : > { %25694 = vmatprep.mubr.msk.f32.mxu1 %vm450_vm1, %v14156_v29  ;;  %v15053_v29 = vld [vmem:[%s32576_s7 + $0xd8] sm:$0xff] }
 0x953   : > { %25695 = vmatmul.mubr.msk.f32.vlgmr.msra.gmra.mrb[72].mxu1 %vm450_vm1, %v14157_v26  ;;  %v26750_v26 = vpack.c.bf16 %v15053_v29, %v15052_v46  ;;  %v14620_v46 = vld [vmem:[#allocation2 + $0x12c] sm:$0xff] }
 0x954   : > { %26741 = vmatpush3.bf16.msra.mxu1 %v26738_v11  ;;  %25697 = vmatprep.mubr.msk.f32.mxu1 %vm450_vm1, %v14158_v37  ;;  %v14163_v11 = vld [vmem:[#allocation2 + $0x4b] sm:$0xff] }
 0x955   : > { %26743 = vmatprep.subr.bf16.mxu1 %v26742_v12  ;;  %v15480_v37 = vld [vmem:[%s32576_s7 + $0xe8] sm:$0xff]  ;;  %v15481_v29 = vld [vmem:[%s32576_s7 + $0xf0] sm:$0xff] }
 0x957   : > { %25698 = vmatmul.mubr.msk.f32.gmra.mrb[74].mxu1 %vm450_vm1, %v14159_v43  ;;  %v31525_v43 = vld [vmem:[#allocation2 + $0x24] sm:$0xff] }
 0x958   : > { %25700 = vmatprep.mubr.msk.f32.mxu1 %vm450_vm1, %v14160_v24  ;;  %26745 = vmatpush3.bf16.msra.mxu1 %v26742_v12  ;;  %v14585_v12 = vld [vmem:[#allocation2 + $0x14] sm:$0xff]  ;;  %v31530_v24 = vpack.c.bf16 %v15480_v37, %v15479_v4  ;;  %v15909_v4 = vld [vmem:[%s32576_s7 + $0x108] sm:$0xff] }
 0x959   : > { %26747 = vmatprep.subr.bf16.mxu1 %v31475_v22 }
 0x95b   : > { %25701 = vmatmul.mubr.msk.f32.gmra.mrb[76].mxu1 %vm450_vm1, %v14161_v36  ;;  %v31532_v36 = vld [vmem:[#allocation2 + $0x2c] sm:$0xff] }
 0x95c   : > { %25703 = vmatprep.mubr.msk.f32.mxu1 %vm450_vm1, %v14162_v3  ;;  %v31536_v3 = vld [vmem:[#allocation2 + $0x34] sm:$0xff] }
 0x95f   : > { %25704 = vmatmul.mubr.msk.f32.gmra.mrb[78].mxu1 %vm450_vm1, %v14163_v11  ;;  %v31545_v11 = vld [vmem:[#allocation2 + $0x44] sm:$0xff] }
 0x960   : > { %25706 = vmatprep.mubr.msk.f32.mxu1 %vm450_vm1, %v14164_v59  ;;  %v31549_v59 = vld [vmem:[#allocation2 + $0x4c] sm:$0xff] }
 0x963   : > { %25707 = vmatmul.mubr.msk.f32.gmra.mrb[80].mxu1 %vm450_vm1, %v14165_v50  ;;  %v31553_v50 = vld [vmem:[#allocation2 + $0x54] sm:$0xff] }
 0x964   : > { %25709 = vmatprep.mubr.msk.f32.mxu1 %vm450_vm1, %v14166_v58  ;;  %v31557_v58 = vld [vmem:[#allocation2 + $0x5c] sm:$0xff] }
 0x967   : > { %25710 = vmatmul.mubr.msk.f32.gmra.mrb[82].mxu1 %vm450_vm1, %v14167_v8  ;;  %v31561_v8 = vld [vmem:[#allocation2 + $0x64] sm:$0xff] }
 0x968   : > { %25712 = vmatprep.mubr.msk.f32.mxu1 %vm450_vm1, %v14168_v31  ;;  %v31565_v31 = vld [vmem:[#allocation2 + $0x6c] sm:$0xff] }
 0x96b   : > { %25713 = vmatmul.mubr.msk.f32.gmra.mrb[84].mxu1 %vm450_vm1, %v14169_v53  ;;  %v31569_v53 = vld [vmem:[#allocation2 + $0x74] sm:$0xff] }
 0x96c   : > { %25715 = vmatprep.mubr.msk.f32.mxu1 %vm450_vm1, %v14170_v61  ;;  %v31573_v61 = vld [vmem:[#allocation2 + $0x7c] sm:$0xff] }
 0x96f   : > { %25716 = vmatmul.mubr.msk.f32.gmra.mrb[86].mxu1 %vm450_vm1, %v14171_v33  ;;  %v31577_v33 = vld [vmem:[#allocation2 + $0x84] sm:$0xff] }
 0x970   : > { %25718 = vmatprep.mubr.msk.f32.mxu1 %vm450_vm1, %v14172_v28  ;;  %v31581_v28 = vld [vmem:[#allocation2 + $0x8c] sm:$0xff] }
 0x973   : > { %25719 = vmatmul.mubr.msk.f32.gmra.mrb[88].mxu1 %vm450_vm1, %v14173_v60  ;;  %v31585_v60 = vld [vmem:[#allocation2 + $0x94] sm:$0xff] }
 0x974   : > { %25721 = vmatprep.mubr.msk.f32.mxu1 %vm450_vm1, %v14174_v39  ;;  %v31589_v39 = vld [vmem:[#allocation2 + $0x9c] sm:$0xff] }
 0x977   : > { %25722 = vmatmul.mubr.msk.f32.gmra.mrb[90].mxu1 %vm450_vm1, %v14175_v47  ;;  %v14603_v47 = vld [vmem:[#allocation2 + $0xa4] sm:$0xff] }
 0x978   : > { %25724 = vmatprep.mubr.msk.f32.mxu1 %vm450_vm1, %v14176_v2  ;;  %v14604_v2 = vld [vmem:[#allocation2 + $0xac] sm:$0xff] }
 0x97b   : > { %25725 = vmatmul.mubr.msk.f32.gmra.mrb[92].mxu1 %vm450_vm1, %v14177_v14  ;;  %v14605_v14 = vld [vmem:[#allocation2 + $0xb4] sm:$0xff] }
 0x97c   : > { %25727 = vmatprep.mubr.msk.f32.mxu1 %vm450_vm1, %v14178_v30  ;;  %v14606_v30 = vld [vmem:[#allocation2 + $0xbc] sm:$0xff] }
 0x97f   : > { %25728 = vmatmul.mubr.msk.f32.gmra.mrb[94].mxu1 %vm450_vm1, %v14179_v20  ;;  %v14607_v20 = vld [vmem:[#allocation2 + $0xc4] sm:$0xff] }
 0x980   : > { %25730 = vmatprep.mubr.msk.f32.mxu1 %vm450_vm1, %v14180_v45  ;;  %v14608_v45 = vld [vmem:[#allocation2 + $0xcc] sm:$0xff] }
 0x983   : > { %25731 = vmatmul.mubr.msk.f32.gmra.mrb[96].mxu1 %vm450_vm1, %v14181_v52  ;;  %v14609_v52 = vld [vmem:[#allocation2 + $0xd4] sm:$0xff] }
 0x984   : > { %25733 = vmatprep.mubr.msk.f32.mxu1 %vm450_vm1, %v14182_v49  ;;  %v14610_v49 = vld [vmem:[#allocation2 + $0xdc] sm:$0xff] }
 0x987   : > { %25734 = vmatmul.mubr.msk.f32.gmra.mrb[98].mxu1 %vm450_vm1, %v14183_v32  ;;  %v14611_v32 = vld [vmem:[#allocation2 + $0xe4] sm:$0xff] }
 0x988   : > { %25736 = vmatprep.mubr.msk.f32.mxu1 %vm450_vm1, %v14184_v25  ;;  %v14612_v25 = vld [vmem:[#allocation2 + $0xec] sm:$0xff] }
 0x98b   : > { %25737 = vmatmul.mubr.msk.f32.gmra.mrb[100].mxu1 %vm450_vm1, %v14185_v1  ;;  %v14613_v1 = vld [vmem:[#allocation2 + $0xf4] sm:$0xff] }
 0x98c   : > { %25739 = vmatprep.mubr.msk.f32.mxu1 %vm450_vm1, %v14186_v38  ;;  %v14614_v38 = vld [vmem:[#allocation2 + $0xfc] sm:$0xff] }
 0x98f   : > { %25740 = vmatmul.mubr.msk.f32.gmra.mrb[102].mxu1 %vm450_vm1, %v14187_v21  ;;  %v14615_v21 = vld [vmem:[#allocation2 + $0x104] sm:$0xff] }
 0x990   : > { %25742 = vmatprep.mubr.msk.f32.mxu1 %vm450_vm1, %v14188_v13  ;;  %v14616_v13 = vld [vmem:[#allocation2 + $0x10c] sm:$0xff] }
 0x993   : > { %25743 = vmatmul.mubr.msk.f32.gmra.mrb[104].mxu1 %vm450_vm1, %v14189_v48  ;;  %v14617_v48 = vld [vmem:[#allocation2 + $0x114] sm:$0xff] }
 0x994   : > { %25745 = vmatprep.mubr.msk.f32.mxu1 %vm450_vm1, %v14190_v19  ;;  %v14618_v19 = vld [vmem:[#allocation2 + $0x11c] sm:$0xff] }
 0x997   : > { %25746 = vmatmul.mubr.msk.f32.gmra.mrb[106].mxu1 %vm450_vm1, %v14191_v5  ;;  %v14619_v5 = vld [vmem:[#allocation2 + $0x124] sm:$0xff] }
 0x998   : > { %25756 = vmatprep.mubr.msk.f32.mxu1 %vm450_vm1, %v14585_v12  ;;  %v15482_v12 = vld [vmem:[%s32576_s7 + $0xf8] sm:$0xff] }
 0x99b   : > { %25757 = vmatmul.mubr.msk.f32.vlgmr.msra.gmra.mrb[72].mxu1 %vm450_vm1, %v14586_v10  ;;  %v15908_v10 = vld [vmem:[%s32576_s7 + $0x100] sm:$0xff] }
 0x99c   : > { %26749 = vmatpush3.bf16.msra.mxu1 %v31475_v22  ;;  %25759 = vmatprep.mubr.msk.f32.mxu1 %vm450_vm1, %v31525_v43  ;;  %v31541_v22 = vld [vmem:[#allocation2 + $0x3c] sm:$0xff]  ;;  %v26762_v37 = vpack.c.bf16 %v15909_v4, %v15908_v10  ;;  %v15471_v4 = vld [vmem:[#allocation2 + $0x105] sm:$0xff] }
 0x99d   : > { %26751 = vmatprep.subr.bf16.mxu1 %v26750_v26  ;;  %v15470_v10 = vld [vmem:[#allocation2 + $0xfd] sm:$0xff] }
 0x99f   : > { %25760 = vmatmul.mubr.msk.f32.gmra.mrb[74].mxu1 %vm450_vm1, %v31532_v36 }
 0x9a0   : > { %25762 = vmatprep.mubr.msk.f32.mxu1 %vm450_vm1, %v31536_v3  ;;  %26753 = vmatpush3.bf16.msra.mxu1 %v26750_v26  ;;  %v26758_v26 = vpack.c.bf16 %v15482_v12, %v15481_v29  ;;  %v15467_v29 = vld [vmem:[#allocation2 + $0xe5] sm:$0xff]  ;;  %v15468_v12 = vld [vmem:[#allocation2 + $0xed] sm:$0xff] }
 0x9a1   : > { %26755 = vmatprep.subr.bf16.mxu1 %v31530_v24 }
 0x9a3   : > { %25763 = vmatmul.mubr.msk.f32.gmra.mrb[76].mxu1 %vm450_vm1, %v31541_v22 }
 0x9a4   : > { %25765 = vmatprep.mubr.msk.f32.mxu1 %vm450_vm1, %v31545_v11 }
 0x9a7   : > { %25766 = vmatmul.mubr.msk.f32.gmra.mrb[78].mxu1 %vm450_vm1, %v31549_v59 }
 0x9a8   : > { %25768 = vmatprep.mubr.msk.f32.mxu1 %vm450_vm1, %v31553_v50 }
 0x9ab   : > { %25769 = vmatmul.mubr.msk.f32.gmra.mrb[80].mxu1 %vm450_vm1, %v31557_v58 }
 0x9ac   : > { %25771 = vmatprep.mubr.msk.f32.mxu1 %vm450_vm1, %v31561_v8 }
 0x9af   : > { %25772 = vmatmul.mubr.msk.f32.gmra.mrb[82].mxu1 %vm450_vm1, %v31565_v31 }
 0x9b0   : > { %25774 = vmatprep.mubr.msk.f32.mxu1 %vm450_vm1, %v31569_v53 }
 0x9b3   : > { %25775 = vmatmul.mubr.msk.f32.gmra.mrb[84].mxu1 %vm450_vm1, %v31573_v61 }
 0x9b4   : > { %25777 = vmatprep.mubr.msk.f32.mxu1 %vm450_vm1, %v31577_v33 }
 0x9b7   : > { %25778 = vmatmul.mubr.msk.f32.gmra.mrb[86].mxu1 %vm450_vm1, %v31581_v28 }
 0x9b8   : > { %25780 = vmatprep.mubr.msk.f32.mxu1 %vm450_vm1, %v31585_v60 }
 0x9bb   : > { %25781 = vmatmul.mubr.msk.f32.gmra.mrb[88].mxu1 %vm450_vm1, %v31589_v39 }
 0x9bc   : > { %25783 = vmatprep.mubr.msk.f32.mxu1 %vm450_vm1, %v14603_v47 }
 0x9bf   : > { %25784 = vmatmul.mubr.msk.f32.gmra.mrb[90].mxu1 %vm450_vm1, %v14604_v2 }
 0x9c0   : > { %25786 = vmatprep.mubr.msk.f32.mxu1 %vm450_vm1, %v14605_v14 }
 0x9c3   : > { %25787 = vmatmul.mubr.msk.f32.gmra.mrb[92].mxu1 %vm450_vm1, %v14606_v30 }
 0x9c4   : > { %25789 = vmatprep.mubr.msk.f32.mxu1 %vm450_vm1, %v14607_v20 }
 0x9c7   : > { %25790 = vmatmul.mubr.msk.f32.gmra.mrb[94].mxu1 %vm450_vm1, %v14608_v45 }
 0x9c8   : > { %25792 = vmatprep.mubr.msk.f32.mxu1 %vm450_vm1, %v14609_v52 }
 0x9cb   : > { %25793 = vmatmul.mubr.msk.f32.gmra.mrb[96].mxu1 %vm450_vm1, %v14610_v49 }
 0x9cc   : > { %25795 = vmatprep.mubr.msk.f32.mxu1 %vm450_vm1, %v14611_v32 }
 0x9cf   : > { %25796 = vmatmul.mubr.msk.f32.gmra.mrb[98].mxu1 %vm450_vm1, %v14612_v25 }
 0x9d0   : > { %25798 = vmatprep.mubr.msk.f32.mxu1 %vm450_vm1, %v14613_v1 }
 0x9d3   : > { %25799 = vmatmul.mubr.msk.f32.gmra.mrb[100].mxu1 %vm450_vm1, %v14614_v38 }
 0x9d4   : > { %25801 = vmatprep.mubr.msk.f32.mxu1 %vm450_vm1, %v14615_v21 }
 0x9d7   : > { %25802 = vmatmul.mubr.msk.f32.gmra.mrb[102].mxu1 %vm450_vm1, %v14616_v13 }
 0x9d8   : > { %25804 = vmatprep.mubr.msk.f32.mxu1 %vm450_vm1, %v14617_v48 }
 0x9db   : > { %25805 = vmatmul.mubr.msk.f32.gmra.mrb[104].mxu1 %vm450_vm1, %v14618_v19 }
 0x9dc   : > { %25807 = vmatprep.mubr.msk.f32.mxu1 %vm450_vm1, %v14619_v5 }
 0x9df   : > { %25808 = vmatmul.mubr.msk.f32.gmra.mrb[106].mxu1 %vm450_vm1, %v14620_v46 }
 0x9e0   : > { %25818 = vmatprep.mubr.msk.f32.mxu1 %vm450_vm1, %v31525_v43  ;;  %v15048_v43 = vld [vmem:[#allocation2 + $0x134] sm:$0xff] }
 0x9e3   : > { %25819 = vmatmul.mubr.msk.f32.vlgmr.msra.gmra.mrb[72].mxu1 %vm450_vm1, %v31532_v36  ;;  %v15910_v36 = vld [vmem:[%s32576_s7 + $0x110] sm:$0xff] }
 0x9e4   : > { %26757 = vmatpush3.bf16.msra.mxu1 %v31530_v24  ;;  %25821 = vmatprep.mubr.msk.f32.mxu1 %vm450_vm1, %v31536_v3  ;;  %v15049_v24 = vld [vmem:[#allocation2 + $0x13c] sm:$0xff] }
 0x9e5   : > { %26759 = vmatprep.subr.bf16.mxu1 %v26758_v26  ;;  %v15911_v3 = vld [vmem:[%s32576_s7 + $0x118] sm:$0xff] }
 0x9e7   : > { %25822 = vmatmul.mubr.msk.f32.gmra.mrb[74].mxu1 %vm450_vm1, %v31541_v22  ;;  %v15443_v22 = vld [vmem:[#allocation2 + $0x25] sm:$0xff] }
 0x9e8   : > { %25824 = vmatprep.mubr.msk.f32.mxu1 %vm450_vm1, %v31545_v11  ;;  %26761 = vmatpush3.bf16.msra.mxu1 %v26758_v26  ;;  %v26766_v11 = vpack.c.bf16 %v15911_v3, %v15910_v36  ;;  %v15469_v26 = vld [vmem:[#allocation2 + $0xf5] sm:$0xff]  ;;  %v15475_v36 = vld [vmem:[#allocation2 + $0x125] sm:$0xff] }
 0x9e9   : > { %26763 = vmatprep.subr.bf16.mxu1 %v26762_v37  ;;  %v15477_v3 = vld [vmem:[#allocation2 + $0x135] sm:$0xff] }
 0x9eb   : > { %25825 = vmatmul.mubr.msk.f32.gmra.mrb[76].mxu1 %vm450_vm1, %v31549_v59  ;;  %v15444_v59 = vld [vmem:[#allocation2 + $0x2d] sm:$0xff] }
 0x9ec   : > { %25827 = vmatprep.mubr.msk.f32.mxu1 %vm450_vm1, %v31553_v50  ;;  %v15445_v50 = vld [vmem:[#allocation2 + $0x35] sm:$0xff] }
 0x9ef   : > { %25828 = vmatmul.mubr.msk.f32.gmra.mrb[78].mxu1 %vm450_vm1, %v31557_v58  ;;  %v15446_v58 = vld [vmem:[#allocation2 + $0x3d] sm:$0xff] }
 0x9f0   : > { %25830 = vmatprep.mubr.msk.f32.mxu1 %vm450_vm1, %v31561_v8  ;;  %v15447_v8 = vld [vmem:[#allocation2 + $0x45] sm:$0xff] }
 0x9f3   : > { %25831 = vmatmul.mubr.msk.f32.gmra.mrb[80].mxu1 %vm450_vm1, %v31565_v31  ;;  %v15448_v31 = vld [vmem:[#allocation2 + $0x4d] sm:$0xff] }
 0x9f4   : > { %25833 = vmatprep.mubr.msk.f32.mxu1 %vm450_vm1, %v31569_v53  ;;  %v15449_v53 = vld [vmem:[#allocation2 + $0x55] sm:$0xff] }
 0x9f7   : > { %25834 = vmatmul.mubr.msk.f32.gmra.mrb[82].mxu1 %vm450_vm1, %v31573_v61  ;;  %v15450_v61 = vld [vmem:[#allocation2 + $0x5d] sm:$0xff] }
 0x9f8   : > { %25836 = vmatprep.mubr.msk.f32.mxu1 %vm450_vm1, %v31577_v33  ;;  %v15451_v33 = vld [vmem:[#allocation2 + $0x65] sm:$0xff] }
 0x9fb   : > { %25837 = vmatmul.mubr.msk.f32.gmra.mrb[84].mxu1 %vm450_vm1, %v31581_v28  ;;  %v16528_v28 = vld [vmem:[%s32578_s9 + $0x20] sm:$0xff] }
 0x9fc   : > { %25839 = vmatprep.mubr.msk.f32.mxu1 %vm450_vm1, %v31585_v60  ;;  %v16529_v60 = vld [vmem:[%s32578_s9 + $0x28] sm:$0xff] }
 0x9ff   : > { %25840 = vmatmul.mubr.msk.f32.gmra.mrb[86].mxu1 %vm450_vm1, %v31589_v39  ;;  %v16530_v39 = vld [vmem:[%s32578_s9 + $0x30] sm:$0xff] }
 0xa00   : > { %25842 = vmatprep.mubr.msk.f32.mxu1 %vm450_vm1, %v14603_v47  ;;  %v26770_v47 = vpack.c.bf16 %v16529_v60, %v16528_v28  ;;  %v15880_v28 = vld [vmem:[#allocation2 + $0x66] sm:$0xff]  ;;  %v15881_v60 = vld [vmem:[#allocation2 + $0x6e] sm:$0xff] }
 0xa02   : > { %26771 = vmatprep.subr.bf16.mxu0 %v26770_v47 }
 0xa03   : > { %25843 = vmatmul.mubr.msk.f32.gmra.mrb[88].mxu1 %vm450_vm1, %v14604_v2  ;;  %v16531_v2 = vld [vmem:[%s32578_s9 + $0x38] sm:$0xff]  ;;  %26773 = vmatpush3.bf16.msra.mxu0 %v26770_v47 }
 0xa04   : > { %25845 = vmatprep.mubr.msk.f32.mxu1 %vm450_vm1, %v14605_v14  ;;  %v26774_v14 = vpack.c.bf16 %v16531_v2, %v16530_v39  ;;  %v15882_v39 = vld [vmem:[#allocation2 + $0x76] sm:$0xff]  ;;  %v15883_v47 = vld [vmem:[#allocation2 + $0x7e] sm:$0xff]  ;;  %v15884_v2 = vld [vmem:[#allocation2 + $0x86] sm:$0xff] }
 0xa06   : > { %26775 = vmatprep.subr.bf16.mxu0 %v26774_v14 }
 0xa07   : > { %25846 = vmatmul.mubr.msk.f32.gmra.mrb[90].mxu1 %vm450_vm1, %v14606_v30  ;;  %v15452_v30 = vld [vmem:[#allocation2 + $0x6d] sm:$0xff]  ;;  %26777 = vmatpush3.bf16.msra.mxu0 %v26774_v14 }
 0xa08   : > { %25848 = vmatprep.mubr.msk.f32.mxu1 %vm450_vm1, %v14607_v20  ;;  %v15453_v20 = vld [vmem:[#allocation2 + $0x75] sm:$0xff] }
 0xa09   : > { %v15885_v14 = vld [vmem:[#allocation2 + $0x8e] sm:$0xff] }
 0xa0b   : > { %25849 = vmatmul.mubr.msk.f32.gmra.mrb[92].mxu1 %vm450_vm1, %v14608_v45  ;;  %v15454_v45 = vld [vmem:[#allocation2 + $0x7d] sm:$0xff] }
 0xa0c   : > { %25851 = vmatprep.mubr.msk.f32.mxu1 %vm450_vm1, %v14609_v52  ;;  %v15455_v52 = vld [vmem:[#allocation2 + $0x85] sm:$0xff] }
 0xa0f   : > { %25852 = vmatmul.mubr.msk.f32.gmra.mrb[94].mxu1 %vm450_vm1, %v14610_v49  ;;  %v15456_v49 = vld [vmem:[#allocation2 + $0x8d] sm:$0xff] }
 0xa10   : > { %25854 = vmatprep.mubr.msk.f32.mxu1 %vm450_vm1, %v14611_v32  ;;  %v15457_v32 = vld [vmem:[#allocation2 + $0x95] sm:$0xff] }
 0xa13   : > { %25855 = vmatmul.mubr.msk.f32.gmra.mrb[96].mxu1 %vm450_vm1, %v14612_v25  ;;  %v15458_v25 = vld [vmem:[#allocation2 + $0x9d] sm:$0xff] }
 0xa14   : > { %25857 = vmatprep.mubr.msk.f32.mxu1 %vm450_vm1, %v14613_v1  ;;  %v15459_v1 = vld [vmem:[#allocation2 + $0xa5] sm:$0xff] }
 0xa17   : > { %25858 = vmatmul.mubr.msk.f32.gmra.mrb[98].mxu1 %vm450_vm1, %v14614_v38  ;;  %v15460_v38 = vld [vmem:[#allocation2 + $0xad] sm:$0xff] }
 0xa18   : > { %25860 = vmatprep.mubr.msk.f32.mxu1 %vm450_vm1, %v14615_v21  ;;  %v15461_v21 = vld [vmem:[#allocation2 + $0xb5] sm:$0xff] }
 0xa1b   : > { %25861 = vmatmul.mubr.msk.f32.gmra.mrb[100].mxu1 %vm450_vm1, %v14616_v13  ;;  %v15462_v13 = vld [vmem:[#allocation2 + $0xbd] sm:$0xff] }
 0xa1c   : > { %25863 = vmatprep.mubr.msk.f32.mxu1 %vm450_vm1, %v14617_v48  ;;  %v15463_v48 = vld [vmem:[#allocation2 + $0xc5] sm:$0xff] }
 0xa1f   : > { %25864 = vmatmul.mubr.msk.f32.gmra.mrb[102].mxu1 %vm450_vm1, %v14618_v19  ;;  %v15464_v19 = vld [vmem:[#allocation2 + $0xcd] sm:$0xff] }
 0xa20   : > { %25866 = vmatprep.mubr.msk.f32.mxu1 %vm450_vm1, %v14619_v5  ;;  %v15465_v5 = vld [vmem:[#allocation2 + $0xd5] sm:$0xff] }
 0xa23   : > { %25867 = vmatmul.mubr.msk.f32.gmra.mrb[104].mxu1 %vm450_vm1, %v14620_v46  ;;  %v15466_v46 = vld [vmem:[#allocation2 + $0xdd] sm:$0xff] }
 0xa24   : > { %25869 = vmatprep.mubr.msk.f32.mxu1 %vm450_vm1, %v15048_v43  ;;  %v15473_v43 = vld [vmem:[#allocation2 + $0x115] sm:$0xff] }
 0xa27   : > { %25870 = vmatmul.mubr.msk.f32.gmra.mrb[106].mxu1 %vm450_vm1, %v15049_v24  ;;  %v15474_v24 = vld [vmem:[#allocation2 + $0x11d] sm:$0xff] }
 0xa28   : > { %25880 = vmatprep.mubr.msk.f32.mxu1 %vm450_vm1, %v15443_v22  ;;  %v15476_v22 = vld [vmem:[#allocation2 + $0x12d] sm:$0xff] }
 0xa2b   : > { %25881 = vmatmul.mubr.msk.f32.vlgmr.msra.gmra.mrb[72].mxu1 %vm450_vm1, %v15444_v59  ;;  %v15872_v59 = vld [vmem:[#allocation2 + $0x26] sm:$0xff] }
 0xa2c   : > { %26765 = vmatpush3.bf16.msra.mxu1 %v26762_v37  ;;  %25883 = vmatprep.mubr.msk.f32.mxu1 %vm450_vm1, %v15445_v50  ;;  %v15472_v37 = vld [vmem:[#allocation2 + $0x10d] sm:$0xff] }
 0xa2d   : > { %26767 = vmatprep.subr.bf16.mxu1 %v26766_v11  ;;  %v15873_v50 = vld [vmem:[#allocation2 + $0x2e] sm:$0xff] }
 0xa2f   : > { %25884 = vmatmul.mubr.msk.f32.gmra.mrb[74].mxu1 %vm450_vm1, %v15446_v58  ;;  %v15874_v58 = vld [vmem:[#allocation2 + $0x36] sm:$0xff] }
 0xa30   : > { %25886 = vmatprep.mubr.msk.f32.mxu1 %vm450_vm1, %v15447_v8  ;;  %26769 = vmatpush3.bf16.msra.mxu1 %v26766_v11  ;;  %v15478_v11 = vld [vmem:[#allocation2 + $0x13d] sm:$0xff] }
 0xa31   : > { %v15875_v8 = vld [vmem:[#allocation2 + $0x3e] sm:$0xff] }
 0xa33   : > { %25887 = vmatmul.mubr.msk.f32.gmra.mrb[76].mxu1 %vm450_vm1, %v15448_v31  ;;  %v15876_v31 = vld [vmem:[#allocation2 + $0x46] sm:$0xff] }
 0xa34   : > { %25889 = vmatprep.mubr.msk.f32.mxu1 %vm450_vm1, %v15449_v53  ;;  %v15877_v53 = vld [vmem:[#allocation2 + $0x4e] sm:$0xff] }
 0xa37   : > { %25890 = vmatmul.mubr.msk.f32.gmra.mrb[78].mxu1 %vm450_vm1, %v15450_v61  ;;  %v15878_v61 = vld [vmem:[#allocation2 + $0x56] sm:$0xff] }
 0xa38   : > { %25892 = vmatprep.mubr.msk.f32.mxu1 %vm450_vm1, %v15451_v33  ;;  %v15879_v33 = vld [vmem:[#allocation2 + $0x5e] sm:$0xff] }
 0xa3b   : > { %25893 = vmatmul.mubr.msk.f32.gmra.mrb[80].mxu1 %vm450_vm1, %v15452_v30  ;;  %v15886_v30 = vld [vmem:[#allocation2 + $0x96] sm:$0xff] }
 0xa3c   : > { %25895 = vmatprep.mubr.msk.f32.mxu1 %vm450_vm1, %v15453_v20  ;;  %v15887_v20 = vld [vmem:[#allocation2 + $0x9e] sm:$0xff] }
 0xa3f   : > { %25896 = vmatmul.mubr.msk.f32.gmra.mrb[82].mxu1 %vm450_vm1, %v15454_v45  ;;  %v15888_v45 = vld [vmem:[#allocation2 + $0xa6] sm:$0xff] }
 0xa40   : > { %25898 = vmatprep.mubr.msk.f32.mxu1 %vm450_vm1, %v15455_v52  ;;  %v15889_v52 = vld [vmem:[#allocation2 + $0xae] sm:$0xff] }
 0xa43   : > { %25899 = vmatmul.mubr.msk.f32.gmra.mrb[84].mxu1 %vm450_vm1, %v15456_v49  ;;  %v15890_v49 = vld [vmem:[#allocation2 + $0xb6] sm:$0xff] }
 0xa44   : > { %25901 = vmatprep.mubr.msk.f32.mxu1 %vm450_vm1, %v15457_v32  ;;  %v15891_v32 = vld [vmem:[#allocation2 + $0xbe] sm:$0xff] }
 0xa47   : > { %25902 = vmatmul.mubr.msk.f32.gmra.mrb[86].mxu1 %vm450_vm1, %v15458_v25  ;;  %v15892_v25 = vld [vmem:[#allocation2 + $0xc6] sm:$0xff] }
 0xa48   : > { %25904 = vmatprep.mubr.msk.f32.mxu1 %vm450_vm1, %v15459_v1  ;;  %v15893_v1 = vld [vmem:[#allocation2 + $0xce] sm:$0xff] }
 0xa4b   : > { %25905 = vmatmul.mubr.msk.f32.gmra.mrb[88].mxu1 %vm450_vm1, %v15460_v38  ;;  %v15894_v38 = vld [vmem:[#allocation2 + $0xd6] sm:$0xff] }
 0xa4c   : > { %25907 = vmatprep.mubr.msk.f32.mxu1 %vm450_vm1, %v15461_v21  ;;  %v15895_v21 = vld [vmem:[#allocation2 + $0xde] sm:$0xff] }
 0xa4f   : > { %25908 = vmatmul.mubr.msk.f32.gmra.mrb[90].mxu1 %vm450_vm1, %v15462_v13  ;;  %v15896_v13 = vld [vmem:[#allocation2 + $0xe6] sm:$0xff] }
 0xa50   : > { %25910 = vmatprep.mubr.msk.f32.mxu1 %vm450_vm1, %v15463_v48  ;;  %v15897_v48 = vld [vmem:[#allocation2 + $0xee] sm:$0xff] }
 0xa53   : > { %25911 = vmatmul.mubr.msk.f32.gmra.mrb[92].mxu1 %vm450_vm1, %v15464_v19  ;;  %v15898_v19 = vld [vmem:[#allocation2 + $0xf6] sm:$0xff] }
 0xa54   : > { %25913 = vmatprep.mubr.msk.f32.mxu1 %vm450_vm1, %v15465_v5  ;;  %v15899_v5 = vld [vmem:[#allocation2 + $0xfe] sm:$0xff] }
 0xa57   : > { %25914 = vmatmul.mubr.msk.f32.gmra.mrb[94].mxu1 %vm450_vm1, %v15466_v46  ;;  %v15900_v46 = vld [vmem:[#allocation2 + $0x106] sm:$0xff] }
 0xa58   : > { %25916 = vmatprep.mubr.msk.f32.mxu1 %vm450_vm1, %v15467_v29  ;;  %v15901_v29 = vld [vmem:[#allocation2 + $0x10e] sm:$0xff] }
 0xa5b   : > { %25917 = vmatmul.mubr.msk.f32.gmra.mrb[96].mxu1 %vm450_vm1, %v15468_v12  ;;  %v15902_v12 = vld [vmem:[#allocation2 + $0x116] sm:$0xff] }
 0xa5c   : > { %25919 = vmatprep.mubr.msk.f32.mxu1 %vm450_vm1, %v15469_v26  ;;  %v15903_v26 = vld [vmem:[#allocation2 + $0x11e] sm:$0xff] }
 0xa5f   : > { %25920 = vmatmul.mubr.msk.f32.gmra.mrb[98].mxu1 %vm450_vm1, %v15470_v10  ;;  %v15904_v10 = vld [vmem:[#allocation2 + $0x126] sm:$0xff] }
 0xa60   : > { %25922 = vmatprep.mubr.msk.f32.mxu1 %vm450_vm1, %v15471_v4  ;;  %v15906_v4 = vld [vmem:[#allocation2 + $0x136] sm:$0xff] }
 0xa63   : > { %25923 = vmatmul.mubr.msk.f32.gmra.mrb[100].mxu1 %vm450_vm1, %v15472_v37  ;;  %v15905_v37 = vld [vmem:[#allocation2 + $0x12e] sm:$0xff] }
 0xa64   : > { %25925 = vmatprep.mubr.msk.f32.mxu1 %vm450_vm1, %v15473_v43  ;;  %v15907_v43 = vld [vmem:[#allocation2 + $0x13e] sm:$0xff] }
 0xa67   : > { %25926 = vmatmul.mubr.msk.f32.gmra.mrb[102].mxu1 %vm450_vm1, %v15474_v24  ;;  %v16492_v24 = vld [vmem:[#allocation3 + $0x1] sm:$0xff] }
 0xa68   : > { %25928 = vmatprep.mubr.msk.f32.mxu1 %vm450_vm1, %v15475_v36  ;;  %v16488_v36 = vld [vmem:[%s32578_s9] sm:$0xff]  ;;  %26004 = vmatprep.mubr.msk.f32.mxu0 %vm450_vm1, %v16492_v24 }
 0xa6b   : > { %25929 = vmatmul.mubr.msk.f32.gmra.mrb[104].mxu1 %vm450_vm1, %v15476_v22 }
 0xa6c   : > { %25931 = vmatprep.mubr.msk.f32.mxu1 %vm450_vm1, %v15477_v3  ;;  %v16489_v3 = vld [vmem:[%s32578_s9 + $0x8] sm:$0xff] }
 0xa6d   : > { %v26778_v22 = vpack.c.bf16 %v16489_v3, %v16488_v36 }
 0xa6f   : > { %25932 = vmatmul.mubr.msk.f32.gmra.mrb[106].mxu1 %vm450_vm1, %v15478_v11  ;;  %v16493_v11 = vld [vmem:[#allocation3 + $0x9] sm:$0xff]  ;;  %26779 = vmatprep.subr.bf16.mxu0 %v26778_v22 }
 0xa70   : > { %25942 = vmatprep.mubr.msk.f32.mxu1 %vm450_vm1, %v15872_v59  ;;  %26005 = vmatmul.mubr.msk.f32.vlgmr.msra.gmra.mrb[72].mxu0 %vm450_vm1, %v16493_v11  ;;  %v16490_v59 = vld [vmem:[%s32578_s9 + $0x10] sm:$0xff] }
 0xa71   : > { %26781 = vmatpush3.bf16.msra.mxu0 %v26778_v22 }
 0xa73   : > { %25943 = vmatmul.mubr.msk.f32.vlgmr.msra.gmra.mrb[72].mxu1 %vm450_vm1, %v15873_v50  ;;  %v16491_v50 = vld [vmem:[%s32578_s9 + $0x18] sm:$0xff] }
 0xa74   : > { %25945 = vmatprep.mubr.msk.f32.mxu1 %vm450_vm1, %v15874_v58  ;;  %v26782_v58 = vpack.c.bf16 %v16491_v50, %v16490_v59 }
 0xa76   : > { %26783 = vmatprep.subr.bf16.mxu0 %v26782_v58 }
 0xa77   : > { %25946 = vmatmul.mubr.msk.f32.gmra.mrb[74].mxu1 %vm450_vm1, %v15875_v8  ;;  %26785 = vmatpush3.bf16.msra.mxu0 %v26782_v58  ;;  %v17274_v8 = vld [vmem:[%s32578_s9 + $0x40] sm:$0xff] }
 0xa78   : > { %25948 = vmatprep.mubr.msk.f32.mxu1 %vm450_vm1, %v15876_v31  ;;  %v17275_v31 = vld [vmem:[%s32578_s9 + $0x48] sm:$0xff] }
 0xa7b   : > { %25949 = vmatmul.mubr.msk.f32.gmra.mrb[76].mxu1 %vm450_vm1, %v15877_v53  ;;  %v31786_v53 = vpack.c.bf16 %v17275_v31, %v17274_v8 }
 0xa7c   : > { %25951 = vmatprep.mubr.msk.f32.mxu1 %vm450_vm1, %v15878_v61  ;;  %v31792_v61 = vld [vmem:[%s32577_s8] ss:$0 sm:$0xff] }
 0xa7d   : > { %26787 = vmatprep.subr.bf16.mxu0 %v31786_v53 }
 0xa7f   : > { %25952 = vmatmul.mubr.msk.f32.gmra.mrb[78].mxu1 %vm450_vm1, %v15879_v33 }
 0xa80   : > { %25954 = vmatprep.mubr.msk.f32.mxu1 %vm450_vm1, %v15880_v28 }
 0xa83   : > { %25955 = vmatmul.mubr.msk.f32.gmra.mrb[80].mxu1 %vm450_vm1, %v15881_v60 }
 0xa84   : > { %25957 = vmatprep.mubr.msk.f32.mxu1 %vm450_vm1, %v15882_v39 }
 0xa87   : > { %25958 = vmatmul.mubr.msk.f32.gmra.mrb[82].mxu1 %vm450_vm1, %v15883_v47 }
 0xa88   : > { %25960 = vmatprep.mubr.msk.f32.mxu1 %vm450_vm1, %v15884_v2 }
 0xa8b   : > { %25961 = vmatmul.mubr.msk.f32.gmra.mrb[84].mxu1 %vm450_vm1, %v15885_v14 }
 0xa8c   : > { %25963 = vmatprep.mubr.msk.f32.mxu1 %vm450_vm1, %v15886_v30 }
 0xa8f   : > { %25964 = vmatmul.mubr.msk.f32.gmra.mrb[86].mxu1 %vm450_vm1, %v15887_v20 }
 0xa90   : > { %25966 = vmatprep.mubr.msk.f32.mxu1 %vm450_vm1, %v15888_v45 }
 0xa93   : > { %25967 = vmatmul.mubr.msk.f32.gmra.mrb[88].mxu1 %vm450_vm1, %v15889_v52 }
 0xa94   : > { %25969 = vmatprep.mubr.msk.f32.mxu1 %vm450_vm1, %v15890_v49 }
 0xa97   : > { %25970 = vmatmul.mubr.msk.f32.gmra.mrb[90].mxu1 %vm450_vm1, %v15891_v32 }
 0xa98   : > { %25972 = vmatprep.mubr.msk.f32.mxu1 %vm450_vm1, %v15892_v25 }
 0xa9b   : > { %25973 = vmatmul.mubr.msk.f32.gmra.mrb[92].mxu1 %vm450_vm1, %v15893_v1 }
 0xa9c   : > { %25975 = vmatprep.mubr.msk.f32.mxu1 %vm450_vm1, %v15894_v38 }
 0xa9f   : > { %25976 = vmatmul.mubr.msk.f32.gmra.mrb[94].mxu1 %vm450_vm1, %v15895_v21 }
 0xaa0   : > { %25978 = vmatprep.mubr.msk.f32.mxu1 %vm450_vm1, %v15896_v13 }
 0xaa3   : > { %25979 = vmatmul.mubr.msk.f32.gmra.mrb[96].mxu1 %vm450_vm1, %v15897_v48 }
 0xaa4   : > { %25981 = vmatprep.mubr.msk.f32.mxu1 %vm450_vm1, %v15898_v19 }
 0xaa7   : > { %25982 = vmatmul.mubr.msk.f32.gmra.mrb[98].mxu1 %vm450_vm1, %v15899_v5 }
 0xaa8   : > { %25984 = vmatprep.mubr.msk.f32.mxu1 %vm450_vm1, %v15900_v46 }
 0xaab   : > { %25985 = vmatmul.mubr.msk.f32.gmra.mrb[100].mxu1 %vm450_vm1, %v15901_v29 }
 0xaac   : > { %25987 = vmatprep.mubr.msk.f32.mxu1 %vm450_vm1, %v15902_v12 }
 0xaaf   : > { %25988 = vmatmul.mubr.msk.f32.gmra.mrb[102].mxu1 %vm450_vm1, %v15903_v26 }
 0xab0   : > { %25990 = vmatprep.mubr.msk.f32.mxu1 %vm450_vm1, %v15904_v10 }
 0xab3   : > { %25991 = vmatmul.mubr.msk.f32.gmra.mrb[104].mxu1 %vm450_vm1, %v15905_v37 }
 0xab4   : > { %25993 = vmatprep.mubr.msk.f32.mxu1 %vm450_vm1, %v15906_v4 }
 0xab7   : > { %25994 = vmatmul.mubr.msk.f32.gmra.mrb[106].mxu1 %vm450_vm1, %v15907_v43 }
 0xb46   : > { %v25944_v33 = vpop.f32.mrb[72].mxu1 }
 0xb47   : > { %v16309_v28 = vadd.f32 %v25944_v33, %v31792_v61  ;;  %v16086_v60 = vpop.f32.mrb[73].mxu1 }
 0xb48   : > { %v16308_v39 = vadd.f32 %v31792_v61, %v16086_v60 }
 0xb49   : > { %v16345_v47 = vmax.f32 %v16309_v28, 0.0 }
 0xb4a   : > { %v16344_v2 = vmax.f32 %v16308_v39, 0.0  ;;  %v25947_v14 = vpop.f32.mrb[74].mxu1 }
 0xb4b   : > { %v16381_v30 = vmul.f32 %v16345_v47, %v29612_v7  ;;  %v16311_v20 = vadd.f32 %v25947_v14, %v31792_v61  ;;  %v16096_v45 = vpop.f32.mrb[75].mxu1 }
 0xb4c   : > { %v16380_v52 = vmul.f32 %v16344_v2, %v29608_v62  ;;  %v16310_v49 = vadd.f32 %v31792_v61, %v16096_v45 }
 0xb4d   : > { %16417 = vst.msk [vmem:[#allocation3 + $0x1b] sm:$0xff] %vm450_vm1, %v16381_v30  ;;  %v16347_v32 = vmax.f32 %v16311_v20, 0.0 }
 0xb4e   : > { %16416 = vst.msk [vmem:[#allocation3 + $0x13] sm:$0xff] %vm450_vm1, %v16380_v52  ;;  %v16346_v25 = vmax.f32 %v16310_v49, 0.0  ;;  %v25950_v1 = vpop.f32.mrb[76].mxu1 }
 0xb4f   : > { %v16383_v38 = vmul.f32 %v16347_v32, %v29614_v9  ;;  %v16313_v21 = vadd.f32 %v25950_v1, %v31792_v61  ;;  %v16106_v13 = vpop.f32.mrb[77].mxu1 }
 0xb50   : > { %v16382_v7 = vmul.f32 %v16346_v25, %v29610_v0  ;;  %v16312_v48 = vadd.f32 %v31792_v61, %v16106_v13 }
 0xb51   : > { %16419 = vst.msk [vmem:[#allocation3 + $0x2b] sm:$0xff] %vm450_vm1, %v16383_v38  ;;  %v16349_v62 = vmax.f32 %v16313_v21, 0.0 }
 0xb52   : > { %16418 = vst.msk [vmem:[#allocation3 + $0x23] sm:$0xff] %vm450_vm1, %v16382_v7  ;;  %v16348_v19 = vmax.f32 %v16312_v48, 0.0  ;;  %v25953_v5 = vpop.f32.mrb[78].mxu1 }
 0xb53   : > { %v16385_v46 = vmul.f32 %v16349_v62, %v29618_v17  ;;  %v16315_v29 = vadd.f32 %v25953_v5, %v31792_v61  ;;  %v16116_v12 = vpop.f32.mrb[79].mxu1 }
 0xb54   : > { %v16384_v9 = vmul.f32 %v16348_v19, %v29616_v16  ;;  %v16314_v26 = vadd.f32 %v31792_v61, %v16116_v12 }
 0xb55   : > { %16421 = vst.msk [vmem:[#allocation3 + $0x3b] sm:$0xff] %vm450_vm1, %v16385_v46  ;;  %v16351_v0 = vmax.f32 %v16315_v29, 0.0  ;;  %v16494_v10 = vld [vmem:[#allocation3 + $0x11] sm:$0xff]  ;;  %v16495_v4 = vld [vmem:[#allocation3 + $0x19] sm:$0xff] }
 0xb56   : > { %16420 = vst.msk [vmem:[#allocation3 + $0x33] sm:$0xff] %vm450_vm1, %v16384_v9  ;;  %v16350_v37 = vmax.f32 %v16314_v26, 0.0  ;;  %v25956_v43 = vpop.f32.mrb[80].mxu1  ;;  %26007 = vmatprep.mubr.msk.f32.mxu0 %vm450_vm1, %v16494_v10 }
 0xb57   : > { %v16387_v17 = vmul.f32 %v16351_v0, %v29624_v27  ;;  %v16317_v24 = vadd.f32 %v25956_v43, %v31792_v61  ;;  %v16126_v36 = vpop.f32.mrb[81].mxu1  ;;  %26008 = vmatmul.mubr.msk.f32.gmra.mrb[74].mxu0 %vm450_vm1, %v16495_v4 }
 0xb58   : > { %v16386_v16 = vmul.f32 %v16350_v37, %v29620_v23  ;;  %v16316_v3 = vadd.f32 %v31792_v61, %v16126_v36 }
 0xb59   : > { %16423 = vst.msk [vmem:[#allocation3 + $0x4b] sm:$0xff] %vm450_vm1, %v16387_v17  ;;  %v16353_v22 = vmax.f32 %v16317_v24, 0.0  ;;  %v16496_v11 = vld [vmem:[#allocation3 + $0x21] sm:$0xff]  ;;  %v16497_v59 = vld [vmem:[#allocation3 + $0x29] sm:$0xff] }
 0xb5a   : > { %16422 = vst.msk [vmem:[#allocation3 + $0x43] sm:$0xff] %vm450_vm1, %v16386_v16  ;;  %v16352_v50 = vmax.f32 %v16316_v3, 0.0  ;;  %v25959_v58 = vpop.f32.mrb[82].mxu1  ;;  %26010 = vmatprep.mubr.msk.f32.mxu0 %vm450_vm1, %v16496_v11 }
 0xb5b   : > { %v16389_v27 = vmul.f32 %v16353_v22, %v29634_v35  ;;  %v16319_v8 = vadd.f32 %v25959_v58, %v31792_v61  ;;  %v16136_v31 = vpop.f32.mrb[83].mxu1  ;;  %26011 = vmatmul.mubr.msk.f32.gmra.mrb[76].mxu0 %vm450_vm1, %v16497_v59 }
 0xb5c   : > { %v16388_v23 = vmul.f32 %v16352_v50, %v29632_v34  ;;  %v16318_v33 = vadd.f32 %v31792_v61, %v16136_v31 }
 0xb5d   : > { %16425 = vst.msk [vmem:[#allocation3 + $0x5b] sm:$0xff] %vm450_vm1, %v16389_v27  ;;  %v16355_v28 = vmax.f32 %v16319_v8, 0.0  ;;  %v16498_v60 = vld [vmem:[#allocation3 + $0x31] sm:$0xff]  ;;  %v16499_v39 = vld [vmem:[#allocation3 + $0x39] sm:$0xff] }
 0xb5e   : > { %16424 = vst.msk [vmem:[#allocation3 + $0x53] sm:$0xff] %vm450_vm1, %v16388_v23  ;;  %v16354_v47 = vmax.f32 %v16318_v33, 0.0  ;;  %v25962_v2 = vpop.f32.mrb[84].mxu1  ;;  %26013 = vmatprep.mubr.msk.f32.mxu0 %vm450_vm1, %v16498_v60 }
 0xb5f   : > { %v16391_v35 = vmul.f32 %v16355_v28, %v29644_v44  ;;  %v16321_v14 = vadd.f32 %v25962_v2, %v31792_v61  ;;  %v16146_v30 = vpop.f32.mrb[85].mxu1  ;;  %26014 = vmatmul.mubr.msk.f32.gmra.mrb[78].mxu0 %vm450_vm1, %v16499_v39 }
 0xb60   : > { %v16390_v34 = vmul.f32 %v16354_v47, %v29640_v41  ;;  %v16320_v20 = vadd.f32 %v31792_v61, %v16146_v30 }
 0xb61   : > { %16427 = vst.msk [vmem:[#allocation3 + $0x6b] sm:$0xff] %vm450_vm1, %v16391_v35  ;;  %v16357_v45 = vmax.f32 %v16321_v14, 0.0  ;;  %v16500_v52 = vld [vmem:[#allocation3 + $0x41] sm:$0xff]  ;;  %v16501_v49 = vld [vmem:[#allocation3 + $0x49] sm:$0xff] }
 0xb62   : > { %16426 = vst.msk [vmem:[#allocation3 + $0x63] sm:$0xff] %vm450_vm1, %v16390_v34  ;;  %v16356_v32 = vmax.f32 %v16320_v20, 0.0  ;;  %v25965_v25 = vpop.f32.mrb[86].mxu1  ;;  %26016 = vmatprep.mubr.msk.f32.mxu0 %vm450_vm1, %v16500_v52 }
 0xb63   : > { %v16393_v44 = vmul.f32 %v16357_v45, %v29654_v57  ;;  %v16323_v1 = vadd.f32 %v25965_v25, %v31792_v61  ;;  %v16156_v38 = vpop.f32.mrb[87].mxu1  ;;  %26017 = vmatmul.mubr.msk.f32.gmra.mrb[80].mxu0 %vm450_vm1, %v16501_v49 }
 0xb64   : > { %v16392_v41 = vmul.f32 %v16356_v32, %v29652_v55  ;;  %v16322_v21 = vadd.f32 %v31792_v61, %v16156_v38 }
 0xb65   : > { %16429 = vst.msk [vmem:[#allocation3 + $0x7b] sm:$0xff] %vm450_vm1, %v16393_v44  ;;  %v16359_v13 = vmax.f32 %v16323_v1, 0.0  ;;  %v16502_v7 = vld [vmem:[#allocation3 + $0x51] sm:$0xff]  ;;  %v16503_v48 = vld [vmem:[#allocation3 + $0x59] sm:$0xff] }
 0xb66   : > { %16428 = vst.msk [vmem:[#allocation3 + $0x73] sm:$0xff] %vm450_vm1, %v16392_v41  ;;  %v16358_v62 = vmax.f32 %v16322_v21, 0.0  ;;  %v25968_v19 = vpop.f32.mrb[88].mxu1  ;;  %26019 = vmatprep.mubr.msk.f32.mxu0 %vm450_vm1, %v16502_v7  ;;  %v32649_v41 = vld [vmem:[#allocation5_spill] sm:$0xff] }
 0xb67   : > { %v16395_v57 = vmul.f32 %v16359_v13, %v29665_v15  ;;  %v16325_v5 = vadd.f32 %v25968_v19, %v31792_v61  ;;  %v16166_v46 = vpop.f32.mrb[89].mxu1  ;;  %26020 = vmatmul.mubr.msk.f32.gmra.mrb[82].mxu0 %vm450_vm1, %v16503_v48 }
 0xb68   : > { %v16394_v55 = vmul.f32 %v16358_v62, %v29662_v54  ;;  %v16324_v29 = vadd.f32 %v31792_v61, %v16166_v46 }
 0xb69   : > { %16431 = vst.msk [vmem:[#allocation3 + $0x8b] sm:$0xff] %vm450_vm1, %v16395_v57  ;;  %v16361_v12 = vmax.f32 %v16325_v5, 0.0  ;;  %v16504_v9 = vld [vmem:[#allocation3 + $0x61] sm:$0xff]  ;;  %v16505_v26 = vld [vmem:[#allocation3 + $0x69] sm:$0xff]  ;;  %v32650_v5 = vld [vmem:[#allocation8_spill] sm:$0xff] }
 0xb6a   : > { %16430 = vst.msk [vmem:[#allocation3 + $0x83] sm:$0xff] %vm450_vm1, %v16394_v55  ;;  %v16360_v0 = vmax.f32 %v16324_v29, 0.0  ;;  %v25971_v10 = vpop.f32.mrb[90].mxu1  ;;  %26022 = vmatprep.mubr.msk.f32.mxu0 %vm450_vm1, %v16504_v9 }
 0xb6b   : > { %v16397_v15 = vmul.f32 %v16361_v12, %v29675_v51  ;;  %v16327_v4 = vadd.f32 %v25971_v10, %v31792_v61  ;;  %v16176_v37 = vpop.f32.mrb[91].mxu1  ;;  %26023 = vmatmul.mubr.msk.f32.gmra.mrb[84].mxu0 %vm450_vm1, %v16505_v26  ;;  %v32651_v12 = vld [vmem:[#allocation7_spill] sm:$0xff] }
 0xb6c   : > { %v16396_v54 = vmul.f32 %v16360_v0, %v29672_v40  ;;  %v16326_v43 = vadd.f32 %v31792_v61, %v16176_v37 }
 0xb6d   : > { %16433 = vst.msk [vmem:[#allocation3 + $0x9b] sm:$0xff] %vm450_vm1, %v16397_v15  ;;  %v16363_v17 = vmax.f32 %v16327_v4, 0.0  ;;  %v16506_v24 = vld [vmem:[#allocation3 + $0x71] sm:$0xff]  ;;  %v16507_v36 = vld [vmem:[#allocation3 + $0x79] sm:$0xff] }
 0xb6e   : > { %16432 = vst.msk [vmem:[#allocation3 + $0x93] sm:$0xff] %vm450_vm1, %v16396_v54  ;;  %v16362_v16 = vmax.f32 %v16326_v43, 0.0  ;;  %v25974_v3 = vpop.f32.mrb[92].mxu1  ;;  %26025 = vmatprep.mubr.msk.f32.mxu0 %vm450_vm1, %v16506_v24  ;;  %v32652_v54 = vld [vmem:[#allocation10_spill] sm:$0xff] }
 0xb6f   : > { %v16399_v51 = vmul.f32 %v16363_v17, %v29689_v56  ;;  %v16329_v22 = vadd.f32 %v25974_v3, %v31792_v61  ;;  %v16186_v11 = vpop.f32.mrb[93].mxu1  ;;  %26026 = vmatmul.mubr.msk.f32.gmra.mrb[86].mxu0 %vm450_vm1, %v16507_v36  ;;  %v32653_v36 = vld [vmem:[#allocation9_spill] sm:$0xff] }
 0xb70   : > { %v16398_v40 = vmul.f32 %v16362_v16, %v29685_v6  ;;  %v16328_v59 = vadd.f32 %v31792_v61, %v16186_v11 }
 0xb71   : > { %16435 = vst.msk [vmem:[#allocation3 + $0xab] sm:$0xff] %vm450_vm1, %v16399_v51  ;;  %v16365_v50 = vmax.f32 %v16329_v22, 0.0  ;;  %v16508_v58 = vld [vmem:[#allocation3 + $0x81] sm:$0xff]  ;;  %v16509_v27 = vld [vmem:[#allocation3 + $0x89] sm:$0xff] }
 0xb72   : > { %16434 = vst.msk [vmem:[#allocation3 + $0xa3] sm:$0xff] %vm450_vm1, %v16398_v40  ;;  %v16364_v8 = vmax.f32 %v16328_v59, 0.0  ;;  %v25977_v31 = vpop.f32.mrb[94].mxu1  ;;  %26028 = vmatprep.mubr.msk.f32.mxu0 %vm450_vm1, %v16508_v58 }
 0xb73   : > { %v16401_v56 = vmul.f32 %v16365_v50, %v29708_v63  ;;  %v16331_v23 = vadd.f32 %v25977_v31, %v31792_v61  ;;  %v16196_v33 = vpop.f32.mrb[95].mxu1  ;;  %26029 = vmatmul.mubr.msk.f32.gmra.mrb[88].mxu0 %vm450_vm1, %v16509_v27  ;;  %v32654_v50 = vld [vmem:[#allocation12_spill] sm:$0xff]  ;;  %v32655_v31 = vld [vmem:[#allocation11_spill] sm:$0xff] }
 0xb74   : > { %v16400_v6 = vmul.f32 %v16364_v8, %v29703_v42  ;;  %v16330_v28 = vadd.f32 %v31792_v61, %v16196_v33  ;;  %v32647_v42 = vld [vmem:[#allocation4_spill] sm:$0xff] }
 0xb75   : > { %16437 = vst.msk [vmem:[#allocation3 + $0xbb] sm:$0xff] %vm450_vm1, %v16401_v56  ;;  %v16367_v60 = vmax.f32 %v16331_v23, 0.0  ;;  %v16510_v39 = vld [vmem:[#allocation3 + $0x91] sm:$0xff]  ;;  %v16511_v47 = vld [vmem:[#allocation3 + $0x99] sm:$0xff] }
 0xb76   : > { %16436 = vst.msk [vmem:[#allocation3 + $0xb3] sm:$0xff] %vm450_vm1, %v16400_v6  ;;  %v16366_v2 = vmax.f32 %v16330_v28, 0.0  ;;  %v25980_v35 = vpop.f32.mrb[96].mxu1  ;;  %26031 = vmatprep.mubr.msk.f32.mxu0 %vm450_vm1, %v16510_v39 }
 0xb77   : > { %v16403_v63 = vmul.f32 %v16367_v60, %v29727_v18  ;;  %v16333_v14 = vadd.f32 %v25980_v35, %v31792_v61  ;;  %v16206_v30 = vpop.f32.mrb[97].mxu1  ;;  %26032 = vmatmul.mubr.msk.f32.gmra.mrb[90].mxu0 %vm450_vm1, %v16511_v47  ;;  %v32648_v18 = vld [vmem:[#allocation6_spill] sm:$0xff] }
 0xb78   : > { %v16402_v34 = vmul.f32 %v16366_v2, %v32647_v42  ;;  %v16332_v20 = vadd.f32 %v31792_v61, %v16206_v30  ;;  %v32656_v47 = vld [vmem:[#allocation14_spill] sm:$0xff] }
 0xb79   : > { %16439 = vst.msk [vmem:[#allocation3 + $0xcb] sm:$0xff] %vm450_vm1, %v16403_v63  ;;  %v16369_v45 = vmax.f32 %v16333_v14, 0.0  ;;  %v16512_v52 = vld [vmem:[#allocation3 + $0xa1] sm:$0xff]  ;;  %v16513_v49 = vld [vmem:[#allocation3 + $0xa9] sm:$0xff] }
 0xb7a   : > { %16438 = vst.msk [vmem:[#allocation3 + $0xc3] sm:$0xff] %vm450_vm1, %v16402_v34  ;;  %v16368_v32 = vmax.f32 %v16332_v20, 0.0  ;;  %v25983_v25 = vpop.f32.mrb[98].mxu1  ;;  %26034 = vmatprep.mubr.msk.f32.mxu0 %vm450_vm1, %v16512_v52  ;;  %v32657_v14 = vld [vmem:[#allocation13_spill] sm:$0xff] }
 0xb7b   : > { %v16405_v44 = vmul.f32 %v16369_v45, %v32648_v18  ;;  %v16335_v1 = vadd.f32 %v25983_v25, %v31792_v61  ;;  %v16216_v38 = vpop.f32.mrb[99].mxu1  ;;  %26035 = vmatmul.mubr.msk.f32.gmra.mrb[92].mxu0 %vm450_vm1, %v16513_v49  ;;  %v32658_v49 = vld [vmem:[#allocation15_spill] sm:$0xff]  ;;  %v32659_v25 = vld [vmem:[#allocation16_spill] sm:$0xff] }
 0xb7c   : > { %v16404_v21 = vmul.f32 %v16368_v32, %v32649_v41  ;;  %v16334_v13 = vadd.f32 %v31792_v61, %v16216_v38  ;;  %v16452_v41 = vld [vmem:[#allocation3] sm:$0xff] }
 0xb7d   : > { %16441 = vst.msk [vmem:[#allocation3 + $0xdb] sm:$0xff] %vm450_vm1, %v16405_v44  ;;  %v16371_v7 = vmax.f32 %v16335_v1, 0.0  ;;  %v16514_v48 = vld [vmem:[#allocation3 + $0xb1] sm:$0xff]  ;;  %v16515_v62 = vld [vmem:[#allocation3 + $0xb9] sm:$0xff] }
 0xb7e   : > { %16440 = vst.msk [vmem:[#allocation3 + $0xd3] sm:$0xff] %vm450_vm1, %v16404_v21  ;;  %v16370_v19 = vmax.f32 %v16334_v13, 0.0  ;;  %v25986_v57 = vpop.f32.mrb[100].mxu1  ;;  %26037 = vmatprep.mubr.msk.f32.mxu0 %vm450_vm1, %v16514_v48  ;;  %v17276_v21 = vld [vmem:[%s32578_s9 + $0x50] sm:$0xff]  ;;  %v17277_v13 = vld [vmem:[%s32578_s9 + $0x58] sm:$0xff] }
 0xb7f   : > { %v16407_v46 = vmul.f32 %v16371_v7, %v32650_v5  ;;  %v16337_v55 = vadd.f32 %v25986_v57, %v31792_v61  ;;  %v16226_v29 = vpop.f32.mrb[101].mxu1  ;;  %26038 = vmatmul.mubr.msk.f32.gmra.mrb[94].mxu0 %vm450_vm1, %v16515_v62  ;;  %v16453_v7 = vld [vmem:[#allocation3 + $0x8] sm:$0xff]  ;;  %v26790_v48 = vpack.c.bf16 %v17277_v13, %v17276_v21  ;;  %v16454_v57 = vld [vmem:[#allocation3 + $0x10] sm:$0xff] }
 0xb80   : > { %v16406_v9 = vmul.f32 %v16370_v19, %v32651_v12  ;;  %v16336_v26 = vadd.f32 %v31792_v61, %v16226_v29  ;;  %v17703_v62 = vld [vmem:[%s32578_s9 + $0x60] sm:$0xff]  ;;  %v17704_v19 = vld [vmem:[%s32578_s9 + $0x68] sm:$0xff] }
 0xb81   : > { %16443 = vst.msk [vmem:[#allocation3 + $0xeb] sm:$0xff] %vm450_vm1, %v16407_v46  ;;  %v16373_v0 = vmax.f32 %v16337_v55, 0.0  ;;  %v16516_v10 = vld [vmem:[#allocation3 + $0xc1] sm:$0xff]  ;;  %v16517_v15 = vld [vmem:[#allocation3 + $0xc9] sm:$0xff]  ;;  %v31952_v5 = vpack.c.bf16 %v17704_v19, %v17703_v62  ;;  %v16455_v46 = vld [vmem:[#allocation3 + $0x18] sm:$0xff] }
 0xb82   : > { %16442 = vst.msk [vmem:[#allocation3 + $0xe3] sm:$0xff] %vm450_vm1, %v16406_v9  ;;  %v16372_v4 = vmax.f32 %v16336_v26, 0.0  ;;  %v25989_v37 = vpop.f32.mrb[102].mxu1  ;;  %26040 = vmatprep.mubr.msk.f32.mxu0 %vm450_vm1, %v16516_v10  ;;  %v16456_v55 = vld [vmem:[#allocation3 + $0x20] sm:$0xff]  ;;  %v16457_v29 = vld [vmem:[#allocation3 + $0x28] sm:$0xff]  ;;  %v16458_v12 = vld [vmem:[#allocation3 + $0x30] sm:$0xff] }
 0xb83   : > { %v16409_v43 = vmul.f32 %v16373_v0, %v32652_v54  ;;  %v16339_v17 = vadd.f32 %v25989_v37, %v31792_v61  ;;  %v16236_v24 = vpop.f32.mrb[103].mxu1  ;;  %26041 = vmatmul.mubr.msk.f32.gmra.mrb[96].mxu0 %vm450_vm1, %v16517_v15  ;;  %v16460_v9 = vld [vmem:[#allocation3 + $0x40] sm:$0xff]  ;;  %v16461_v26 = vld [vmem:[#allocation3 + $0x48] sm:$0xff]  ;;  %v16462_v0 = vld [vmem:[#allocation3 + $0x50] sm:$0xff] }
 0xb84   : > { %v16408_v16 = vmul.f32 %v16372_v4, %v32653_v36  ;;  %v16338_v3 = vadd.f32 %v31792_v61, %v16236_v24  ;;  %v16463_v10 = vld [vmem:[#allocation3 + $0x58] sm:$0xff]  ;;  %v16464_v15 = vld [vmem:[#allocation3 + $0x60] sm:$0xff]  ;;  %v16465_v4 = vld [vmem:[#allocation3 + $0x68] sm:$0xff] }
 0xb85   : > { %16445 = vst.msk [vmem:[#allocation3 + $0xfb] sm:$0xff] %vm450_vm1, %v16409_v43  ;;  %v16375_v51 = vmax.f32 %v16339_v17, 0.0  ;;  %v16518_v22 = vld [vmem:[#allocation3 + $0xd1] sm:$0xff]  ;;  %v16519_v11 = vld [vmem:[#allocation3 + $0xd9] sm:$0xff]  ;;  %v16469_v17 = vld [vmem:[#allocation3 + $0x88] sm:$0xff] }
 0xb86   : > { %16444 = vst.msk [vmem:[#allocation3 + $0xf3] sm:$0xff] %vm450_vm1, %v16408_v16  ;;  %v16374_v40 = vmax.f32 %v16338_v3, 0.0  ;;  %v25992_v59 = vpop.f32.mrb[104].mxu1  ;;  %26043 = vmatprep.mubr.msk.f32.mxu0 %vm450_vm1, %v16518_v22  ;;  %v16466_v37 = vld [vmem:[#allocation3 + $0x70] sm:$0xff]  ;;  %v16467_v54 = vld [vmem:[#allocation3 + $0x78] sm:$0xff]  ;;  %v16468_v43 = vld [vmem:[#allocation3 + $0x80] sm:$0xff] }
 0xb87   : > { %v16411_v58 = vmul.f32 %v16375_v51, %v32654_v50  ;;  %v16341_v27 = vadd.f32 %v25992_v59, %v31792_v61  ;;  %v16246_v8 = vpop.f32.mrb[105].mxu1  ;;  %26044 = vmatmul.mubr.msk.f32.gmra.mrb[98].mxu0 %vm450_vm1, %v16519_v11  ;;  %v16470_v24 = vld [vmem:[#allocation3 + $0x90] sm:$0xff]  ;;  %v16471_v36 = vld [vmem:[#allocation3 + $0x98] sm:$0xff]  ;;  %v16472_v16 = vld [vmem:[#allocation3 + $0xa0] sm:$0xff] }
 0xb88   : > { %v16410_v56 = vmul.f32 %v16374_v40, %v32655_v31  ;;  %v16340_v23 = vadd.f32 %v31792_v61, %v16246_v8  ;;  %v16473_v3 = vld [vmem:[#allocation3 + $0xa8] sm:$0xff]  ;;  %v16474_v51 = vld [vmem:[#allocation3 + $0xb0] sm:$0xff]  ;;  %v16475_v22 = vld [vmem:[#allocation3 + $0xb8] sm:$0xff] }
 0xb89   : > { %16447 = vst.msk [vmem:[#allocation3 + $0x10b] sm:$0xff] %vm450_vm1, %v16411_v58  ;;  %v16377_v33 = vmax.f32 %v16341_v27, 0.0  ;;  %v16520_v6 = vld [vmem:[#allocation3 + $0xe1] sm:$0xff]  ;;  %v16521_v28 = vld [vmem:[#allocation3 + $0xe9] sm:$0xff]  ;;  %v16479_v50 = vld [vmem:[#allocation3 + $0xd8] sm:$0xff] }
 0xb8a   : > { %16446 = vst.msk [vmem:[#allocation3 + $0x103] sm:$0xff] %vm450_vm1, %v16410_v56  ;;  %v16376_v60 = vmax.f32 %v16340_v23, 0.0  ;;  %v25995_v39 = vpop.f32.mrb[106].mxu1  ;;  %26046 = vmatprep.mubr.msk.f32.mxu0 %vm450_vm1, %v16520_v6  ;;  %v16476_v11 = vld [vmem:[#allocation3 + $0xc0] sm:$0xff]  ;;  %v16477_v40 = vld [vmem:[#allocation3 + $0xc8] sm:$0xff]  ;;  %v16478_v59 = vld [vmem:[#allocation3 + $0xd0] sm:$0xff] }
 0xb8b   : > { %v16413_v2 = vmul.f32 %v16377_v33, %v32656_v47  ;;  %v16343_v35 = vadd.f32 %v25995_v39, %v31792_v61  ;;  %v16256_v63 = vpop.f32.mrb[107].mxu1  ;;  %26047 = vmatmul.mubr.msk.f32.gmra.mrb[100].mxu0 %vm450_vm1, %v16521_v28  ;;  %v16480_v58 = vld [vmem:[#allocation3 + $0xe0] sm:$0xff]  ;;  %v16481_v27 = vld [vmem:[#allocation3 + $0xe8] sm:$0xff]  ;;  %v17256_v13 = vld [vmem:[#allocation3 + $0x92] sm:$0xff] }
 0xb8c   : > { %v16412_v30 = vmul.f32 %v16376_v60, %v32657_v14  ;;  %v16342_v42 = vadd.f32 %v31792_v61, %v16256_v63  ;;  %v17238_v6 = vld [vmem:[#allocation3 + $0x2] sm:$0xff]  ;;  %v17705_v60 = vld [vmem:[%s32578_s9 + $0x70] sm:$0xff]  ;;  %v17239_v47 = vld [vmem:[#allocation3 + $0xa] sm:$0xff] }
 0xb8d   : > { %16449 = vst.msk [vmem:[#allocation3 + $0x11b] sm:$0xff] %vm450_vm1, %v16413_v2  ;;  %v16379_v34 = vmax.f32 %v16343_v35, 0.0  ;;  %v16522_v20 = vld [vmem:[#allocation3 + $0xf1] sm:$0xff]  ;;  %v16523_v45 = vld [vmem:[#allocation3 + $0xf9] sm:$0xff]  ;;  %v18132_v35 = vld [vmem:[%s32578_s9 + $0x80] sm:$0xff] }
 0xb8e   : > { %16448 = vst.msk [vmem:[#allocation3 + $0x113] sm:$0xff] %vm450_vm1, %v16412_v30  ;;  %v16378_v52 = vmax.f32 %v16342_v42, 0.0  ;;  %26049 = vmatprep.mubr.msk.f32.mxu0 %vm450_vm1, %v16522_v20  ;;  %v16482_v8 = vld [vmem:[#allocation3 + $0xf0] sm:$0xff]  ;;  %v16483_v31 = vld [vmem:[#allocation3 + $0xf8] sm:$0xff]  ;;  %v17706_v39 = vld [vmem:[%s32578_s9 + $0x78] sm:$0xff] }
 0xb8f   : > { %v16415_v32 = vmul.f32 %v16379_v34, %v32658_v49  ;;  %26050 = vmatmul.mubr.msk.f32.gmra.mrb[102].mxu0 %vm450_vm1, %v16523_v45  ;;  %v26798_v2 = vpack.c.bf16 %v17706_v39, %v17705_v60  ;;  %v18133_v63 = vld [vmem:[%s32578_s9 + $0x88] sm:$0xff]  ;;  %v32009_v42 = vld [vmem:[#allocation3 + $0x1a] sm:$0xff]  ;;  %v32013_v34 = vld [vmem:[#allocation3 + $0x22] sm:$0xff] }
 0xb90   : > { %v16414_v18 = vmul.f32 %v16378_v52, %v32659_v25  ;;  %v32002_v14 = vld [vmem:[#allocation3 + $0x12] sm:$0xff]  ;;  %v32007_v30 = vpack.c.bf16 %v18133_v63, %v18132_v35  ;;  %v32018_v20 = vld [vmem:[#allocation3 + $0x2a] sm:$0xff]  ;;  %v32026_v52 = vld [vmem:[#allocation3 + $0x3a] sm:$0xff] }
 0xb91   : > { %16451 = vst.msk [vmem:[#allocation3 + $0x12b] sm:$0xff] %vm450_vm1, %v16415_v32  ;;  %v16524_v44 = vld [vmem:[#allocation3 + $0x101] sm:$0xff]  ;;  %v16525_v61 = vld [vmem:[#allocation3 + $0x109] sm:$0xff]  ;;  %v32022_v45 = vld [vmem:[#allocation3 + $0x32] sm:$0xff] }
 0xb92   : > { %16450 = vst.msk [vmem:[#allocation3 + $0x123] sm:$0xff] %vm450_vm1, %v16414_v18  ;;  %26052 = vmatprep.mubr.msk.f32.mxu0 %vm450_vm1, %v16524_v44  ;;  %v16484_v56 = vld [vmem:[#allocation3 + $0x100] sm:$0xff]  ;;  %v16485_v23 = vld [vmem:[#allocation3 + $0x108] sm:$0xff]  ;;  %v32038_v25 = vld [vmem:[#allocation3 + $0x52] sm:$0xff] }
 0xb93   : > { %26053 = vmatmul.mubr.msk.f32.gmra.mrb[104].mxu0 %vm450_vm1, %v16525_v61  ;;  %v32030_v49 = vld [vmem:[#allocation3 + $0x42] sm:$0xff]  ;;  %v32034_v32 = vld [vmem:[#allocation3 + $0x4a] sm:$0xff]  ;;  %v32042_v18 = vld [vmem:[#allocation3 + $0x5a] sm:$0xff] }
 0xb94   : > { %v32046_v44 = vld [vmem:[#allocation3 + $0x62] sm:$0xff]  ;;  %v32050_v61 = vld [vmem:[#allocation3 + $0x6a] sm:$0xff]  ;;  %v17260_v19 = vld [vmem:[#allocation3 + $0xb2] sm:$0xff] }
 0xb95   : > { %v16526_v1 = vld [vmem:[#allocation3 + $0x111] sm:$0xff]  ;;  %v16527_v38 = vld [vmem:[#allocation3 + $0x119] sm:$0xff]  ;;  %v18106_v39 = vld [vmem:[#allocation3 + $0x63] sm:$0xff] }
 0xb96   : > { %26055 = vmatprep.mubr.msk.f32.mxu0 %vm450_vm1, %v16526_v1  ;;  %v16486_v33 = vld [vmem:[#allocation3 + $0x110] sm:$0xff]  ;;  %v16487_v28 = vld [vmem:[#allocation3 + $0x118] sm:$0xff]  ;;  %v18110_v63 = vld [vmem:[#allocation3 + $0x83] sm:$0xff] }
 0xb97   : > { %26056 = vmatmul.mubr.msk.f32.gmra.mrb[106].mxu0 %vm450_vm1, %v16527_v38  ;;  %v32054_v1 = vld [vmem:[#allocation3 + $0x72] sm:$0xff]  ;;  %v32058_v38 = vld [vmem:[#allocation3 + $0x7a] sm:$0xff]  ;;  %v32066_v21 = vld [vmem:[#allocation3 + $0x8a] sm:$0xff] }
 0xb98   : > { %26066 = vmatprep.mubr.msk.f32.mxu0 %vm450_vm1, %v16452_v41  ;;  %v32062_v41 = vld [vmem:[#allocation3 + $0x82] sm:$0xff]  ;;  %v17259_v62 = vld [vmem:[#allocation3 + $0xaa] sm:$0xff] }
 0xb99   : > { %v18105_v60 = vld [vmem:[#allocation3 + $0x5b] sm:$0xff] }
 0xb9a   : > { %v18109_v35 = vld [vmem:[#allocation3 + $0x7b] sm:$0xff] }
 0xb9b   : > { %26067 = vmatmul.mubr.msk.f32.vlgmr.msra.gmra.mrb[72].mxu0 %vm450_vm1, %v16453_v7  ;;  %v17257_v7 = vld [vmem:[#allocation3 + $0x9a] sm:$0xff] }
 0xb9c   : > { %26789 = vmatpush3.bf16.msra.mxu0 %v31786_v53  ;;  %26069 = vmatprep.mubr.msk.f32.mxu0 %vm450_vm1, %v16454_v57  ;;  %v16459_v53 = vld [vmem:[#allocation3 + $0x38] sm:$0xff] }
 0xb9d   : > { %26791 = vmatprep.subr.bf16.mxu0 %v26790_v48  ;;  %v17261_v57 = vld [vmem:[#allocation3 + $0xba] sm:$0xff] }
 0xb9f   : > { %26070 = vmatmul.mubr.msk.f32.gmra.mrb[74].mxu0 %vm450_vm1, %v16455_v46  ;;  %v17263_v46 = vld [vmem:[#allocation3 + $0xca] sm:$0xff] }
 0xba0   : > { %26072 = vmatprep.mubr.msk.f32.mxu0 %vm450_vm1, %v16456_v55  ;;  %26793 = vmatpush3.bf16.msra.mxu0 %v26790_v48  ;;  %v17258_v48 = vld [vmem:[#allocation3 + $0xa2] sm:$0xff]  ;;  %v17264_v55 = vld [vmem:[#allocation3 + $0xd2] sm:$0xff] }
 0xba1   : > { %26795 = vmatprep.subr.bf16.mxu0 %v31952_v5 }
 0xba3   : > { %26073 = vmatmul.mubr.msk.f32.gmra.mrb[76].mxu0 %vm450_vm1, %v16457_v29  ;;  %v17265_v29 = vld [vmem:[#allocation3 + $0xda] sm:$0xff] }
 0xba4   : > { %26075 = vmatprep.mubr.msk.f32.mxu0 %vm450_vm1, %v16458_v12  ;;  %v17266_v12 = vld [vmem:[#allocation3 + $0xe2] sm:$0xff] }
 0xba7   : > { %26076 = vmatmul.mubr.msk.f32.gmra.mrb[78].mxu0 %vm450_vm1, %v16459_v53  ;;  %v17267_v53 = vld [vmem:[#allocation3 + $0xea] sm:$0xff] }
 0xba8   : > { %26078 = vmatprep.mubr.msk.f32.mxu0 %vm450_vm1, %v16460_v9  ;;  %v17268_v9 = vld [vmem:[#allocation3 + $0xf2] sm:$0xff] }
 0xbab   : > { %26079 = vmatmul.mubr.msk.f32.gmra.mrb[80].mxu0 %vm450_vm1, %v16461_v26  ;;  %v17269_v26 = vld [vmem:[#allocation3 + $0xfa] sm:$0xff] }
 0xbac   : > { %26081 = vmatprep.mubr.msk.f32.mxu0 %vm450_vm1, %v16462_v0  ;;  %v17270_v0 = vld [vmem:[#allocation3 + $0x102] sm:$0xff] }
 0xbaf   : > { %26082 = vmatmul.mubr.msk.f32.gmra.mrb[82].mxu0 %vm450_vm1, %v16463_v10  ;;  %v17271_v10 = vld [vmem:[#allocation3 + $0x10a] sm:$0xff] }
 0xbb0   : > { %26084 = vmatprep.mubr.msk.f32.mxu0 %vm450_vm1, %v16464_v15  ;;  %v17272_v15 = vld [vmem:[#allocation3 + $0x112] sm:$0xff] }
 0xbb3   : > { %26085 = vmatmul.mubr.msk.f32.gmra.mrb[84].mxu0 %vm450_vm1, %v16465_v4  ;;  %v17273_v4 = vld [vmem:[#allocation3 + $0x11a] sm:$0xff] }
 0xbb4   : > { %26087 = vmatprep.mubr.msk.f32.mxu0 %vm450_vm1, %v16466_v37  ;;  %v18134_v37 = vld [vmem:[%s32578_s9 + $0x90] sm:$0xff] }
 0xbb7   : > { %26088 = vmatmul.mubr.msk.f32.gmra.mrb[86].mxu0 %vm450_vm1, %v16467_v54  ;;  %v18135_v54 = vld [vmem:[%s32578_s9 + $0x98] sm:$0xff] }
 0xbb8   : > { %26090 = vmatprep.mubr.msk.f32.mxu0 %vm450_vm1, %v16468_v43  ;;  %v26806_v43 = vpack.c.bf16 %v18135_v54, %v18134_v37  ;;  %v32246_v37 = vld [vmem:[#allocation3 + $0x54] sm:$0xff]  ;;  %v32250_v54 = vld [vmem:[#allocation3 + $0x5c] sm:$0xff] }
 0xbbb   : > { %26091 = vmatmul.mubr.msk.f32.gmra.mrb[88].mxu0 %vm450_vm1, %v16469_v17  ;;  %v18561_v17 = vld [vmem:[%s32578_s9 + $0xa0] sm:$0xff] }
 0xbbc   : > { %26093 = vmatprep.mubr.msk.f32.mxu0 %vm450_vm1, %v16470_v24  ;;  %v18562_v24 = vld [vmem:[%s32578_s9 + $0xa8] sm:$0xff] }
 0xbbf   : > { %26094 = vmatmul.mubr.msk.f32.gmra.mrb[90].mxu0 %vm450_vm1, %v16471_v36  ;;  %v26810_v36 = vpack.c.bf16 %v18562_v24, %v18561_v17  ;;  %v32258_v17 = vld [vmem:[#allocation3 + $0x6c] sm:$0xff]  ;;  %v32262_v24 = vld [vmem:[#allocation3 + $0x74] sm:$0xff] }
 0xbc0   : > { %26096 = vmatprep.mubr.msk.f32.mxu0 %vm450_vm1, %v16472_v16  ;;  %v17701_v16 = vld [vmem:[#allocation3 + $0x122] sm:$0xff] }
 0xbc3   : > { %26097 = vmatmul.mubr.msk.f32.gmra.mrb[92].mxu0 %vm450_vm1, %v16473_v3  ;;  %v17702_v3 = vld [vmem:[#allocation3 + $0x12a] sm:$0xff] }
 0xbc4   : > { %26099 = vmatprep.mubr.msk.f32.mxu0 %vm450_vm1, %v16474_v51  ;;  %v18563_v51 = vld [vmem:[%s32578_s9 + $0xb0] sm:$0xff] }
 0xbc7   : > { %26100 = vmatmul.mubr.msk.f32.gmra.mrb[94].mxu0 %vm450_vm1, %v16475_v22  ;;  %v18564_v22 = vld [vmem:[%s32578_s9 + $0xb8] sm:$0xff] }
 0xbc8   : > { %26102 = vmatprep.mubr.msk.f32.mxu0 %vm450_vm1, %v16476_v11  ;;  %v18096_v11 = vld [vmem:[#allocation3 + $0x13] sm:$0xff] }
 0xbcb   : > { %26103 = vmatmul.mubr.msk.f32.gmra.mrb[96].mxu0 %vm450_vm1, %v16477_v40  ;;  %v26814_v40 = vpack.c.bf16 %v18564_v22, %v18563_v51  ;;  %v32278_v51 = vld [vmem:[#allocation3 + $0x94] sm:$0xff]  ;;  %v32282_v22 = vld [vmem:[#allocation3 + $0x9c] sm:$0xff] }
 0xbcc   : > { %26105 = vmatprep.mubr.msk.f32.mxu0 %vm450_vm1, %v16478_v59  ;;  %v18097_v59 = vld [vmem:[#allocation3 + $0x1b] sm:$0xff] }
 0xbcf   : > { %26106 = vmatmul.mubr.msk.f32.gmra.mrb[98].mxu0 %vm450_vm1, %v16479_v50  ;;  %v18990_v50 = vld [vmem:[%s32578_s9 + $0xc0] sm:$0xff] }
 0xbd0   : > { %26108 = vmatprep.mubr.msk.f32.mxu0 %vm450_vm1, %v16480_v58  ;;  %v18991_v58 = vld [vmem:[%s32578_s9 + $0xc8] sm:$0xff] }
 0xbd3   : > { %26109 = vmatmul.mubr.msk.f32.gmra.mrb[100].mxu0 %vm450_vm1, %v16481_v27  ;;  %v18098_v27 = vld [vmem:[#allocation3 + $0x23] sm:$0xff] }
 0xbd4   : > { %26111 = vmatprep.mubr.msk.f32.mxu0 %vm450_vm1, %v16482_v8  ;;  %v32168_v8 = vpack.c.bf16 %v18991_v58, %v18990_v50  ;;  %v18546_v50 = vld [vmem:[#allocation3 + $0xbc] sm:$0xff]  ;;  %v18547_v58 = vld [vmem:[#allocation3 + $0xc4] sm:$0xff] }
 0xbd7   : > { %26112 = vmatmul.mubr.msk.f32.gmra.mrb[102].mxu0 %vm450_vm1, %v16483_v31  ;;  %v18099_v31 = vld [vmem:[#allocation3 + $0x2b] sm:$0xff] }
 0xbd8   : > { %26114 = vmatprep.mubr.msk.f32.mxu0 %vm450_vm1, %v16484_v56  ;;  %v18100_v56 = vld [vmem:[#allocation3 + $0x33] sm:$0xff] }
 0xbdb   : > { %26115 = vmatmul.mubr.msk.f32.gmra.mrb[104].mxu0 %vm450_vm1, %v16485_v23  ;;  %v18101_v23 = vld [vmem:[#allocation3 + $0x3b] sm:$0xff] }
 0xbdc   : > { %26117 = vmatprep.mubr.msk.f32.mxu0 %vm450_vm1, %v16486_v33  ;;  %v18102_v33 = vld [vmem:[#allocation3 + $0x43] sm:$0xff] }
 0xbdf   : > { %26118 = vmatmul.mubr.msk.f32.gmra.mrb[106].mxu0 %vm450_vm1, %v16487_v28  ;;  %v18104_v28 = vld [vmem:[#allocation3 + $0x53] sm:$0xff] }
 0xbe0   : > { %26128 = vmatprep.mubr.msk.f32.mxu0 %vm450_vm1, %v17238_v6  ;;  %v18103_v6 = vld [vmem:[#allocation3 + $0x4b] sm:$0xff] }
 0xbe3   : > { %26129 = vmatmul.mubr.msk.f32.vlgmr.msra.gmra.mrb[72].mxu0 %vm450_vm1, %v17239_v47  ;;  %v18107_v47 = vld [vmem:[#allocation3 + $0x6b] sm:$0xff] }
 0xbe4   : > { %26797 = vmatpush3.bf16.msra.mxu0 %v31952_v5  ;;  %26131 = vmatprep.mubr.msk.f32.mxu0 %vm450_vm1, %v32002_v14  ;;  %v17262_v5 = vld [vmem:[#allocation3 + $0xc2] sm:$0xff] }
 0xbe5   : > { %26799 = vmatprep.subr.bf16.mxu0 %v26798_v2 }
 0xbe7   : > { %26132 = vmatmul.mubr.msk.f32.gmra.mrb[74].mxu0 %vm450_vm1, %v32009_v42 }
 0xbe8   : > { %26134 = vmatprep.mubr.msk.f32.mxu0 %vm450_vm1, %v32013_v34  ;;  %26801 = vmatpush3.bf16.msra.mxu0 %v26798_v2  ;;  %v18108_v2 = vld [vmem:[#allocation3 + $0x73] sm:$0xff] }
 0xbe9   : > { %26803 = vmatprep.subr.bf16.mxu0 %v32007_v30 }
 0xbeb   : > { %26135 = vmatmul.mubr.msk.f32.gmra.mrb[76].mxu0 %vm450_vm1, %v32018_v20 }
 0xbec   : > { %26137 = vmatprep.mubr.msk.f32.mxu0 %vm450_vm1, %v32022_v45 }
 0xbef   : > { %26138 = vmatmul.mubr.msk.f32.gmra.mrb[78].mxu0 %vm450_vm1, %v32026_v52 }
 0xbf0   : > { %26140 = vmatprep.mubr.msk.f32.mxu0 %vm450_vm1, %v32030_v49 }
 0xbf3   : > { %26141 = vmatmul.mubr.msk.f32.gmra.mrb[80].mxu0 %vm450_vm1, %v32034_v32 }
 0xbf4   : > { %26143 = vmatprep.mubr.msk.f32.mxu0 %vm450_vm1, %v32038_v25 }
 0xbf7   : > { %26144 = vmatmul.mubr.msk.f32.gmra.mrb[82].mxu0 %vm450_vm1, %v32042_v18 }
 0xbf8   : > { %26146 = vmatprep.mubr.msk.f32.mxu0 %vm450_vm1, %v32046_v44 }
 0xbfb   : > { %26147 = vmatmul.mubr.msk.f32.gmra.mrb[84].mxu0 %vm450_vm1, %v32050_v61 }
 0xbfc   : > { %26149 = vmatprep.mubr.msk.f32.mxu0 %vm450_vm1, %v32054_v1 }
 0xbff   : > { %26150 = vmatmul.mubr.msk.f32.gmra.mrb[86].mxu0 %vm450_vm1, %v32058_v38 }
 0xc00   : > { %26152 = vmatprep.mubr.msk.f32.mxu0 %vm450_vm1, %v32062_v41 }
 0xc03   : > { %26153 = vmatmul.mubr.msk.f32.gmra.mrb[88].mxu0 %vm450_vm1, %v32066_v21 }
 0xc04   : > { %26155 = vmatprep.mubr.msk.f32.mxu0 %vm450_vm1, %v17256_v13 }
 0xc07   : > { %26156 = vmatmul.mubr.msk.f32.gmra.mrb[90].mxu0 %vm450_vm1, %v17257_v7 }
 0xc08   : > { %26158 = vmatprep.mubr.msk.f32.mxu0 %vm450_vm1, %v17258_v48 }
 0xc0b   : > { %26159 = vmatmul.mubr.msk.f32.gmra.mrb[92].mxu0 %vm450_vm1, %v17259_v62 }
 0xc0c   : > { %26161 = vmatprep.mubr.msk.f32.mxu0 %vm450_vm1, %v17260_v19 }
 0xc0f   : > { %26162 = vmatmul.mubr.msk.f32.gmra.mrb[94].mxu0 %vm450_vm1, %v17261_v57 }
 0xc10   : > { %26164 = vmatprep.mubr.msk.f32.mxu0 %vm450_vm1, %v17262_v5 }
 0xc13   : > { %26165 = vmatmul.mubr.msk.f32.gmra.mrb[96].mxu0 %vm450_vm1, %v17263_v46 }
 0xc14   : > { %26167 = vmatprep.mubr.msk.f32.mxu0 %vm450_vm1, %v17264_v55 }
 0xc17   : > { %26168 = vmatmul.mubr.msk.f32.gmra.mrb[98].mxu0 %vm450_vm1, %v17265_v29 }
 0xc18   : > { %26170 = vmatprep.mubr.msk.f32.mxu0 %vm450_vm1, %v17266_v12 }
 0xc1b   : > { %26171 = vmatmul.mubr.msk.f32.gmra.mrb[100].mxu0 %vm450_vm1, %v17267_v53 }
 0xc1c   : > { %26173 = vmatprep.mubr.msk.f32.mxu0 %vm450_vm1, %v17268_v9 }
 0xc1f   : > { %26174 = vmatmul.mubr.msk.f32.gmra.mrb[102].mxu0 %vm450_vm1, %v17269_v26 }
 0xc20   : > { %26176 = vmatprep.mubr.msk.f32.mxu0 %vm450_vm1, %v17270_v0 }
 0xc23   : > { %26177 = vmatmul.mubr.msk.f32.gmra.mrb[104].mxu0 %vm450_vm1, %v17271_v10 }
 0xc24   : > { %26179 = vmatprep.mubr.msk.f32.mxu0 %vm450_vm1, %v17272_v15 }
 0xc27   : > { %26180 = vmatmul.mubr.msk.f32.gmra.mrb[106].mxu0 %vm450_vm1, %v17273_v4 }
 0xc28   : > { %26190 = vmatprep.mubr.msk.f32.mxu0 %vm450_vm1, %v32002_v14  ;;  %v18111_v14 = vld [vmem:[#allocation3 + $0x8b] sm:$0xff] }
 0xc2b   : > { %26191 = vmatmul.mubr.msk.f32.vlgmr.msra.gmra.mrb[72].mxu0 %vm450_vm1, %v32009_v42  ;;  %v18113_v42 = vld [vmem:[#allocation3 + $0x9b] sm:$0xff] }
 0xc2c   : > { %26805 = vmatpush3.bf16.msra.mxu0 %v32007_v30  ;;  %26193 = vmatprep.mubr.msk.f32.mxu0 %vm450_vm1, %v32013_v34  ;;  %v18112_v30 = vld [vmem:[#allocation3 + $0x93] sm:$0xff]  ;;  %v18114_v34 = vld [vmem:[#allocation3 + $0xa3] sm:$0xff] }
 0xc2d   : > { %26807 = vmatprep.subr.bf16.mxu0 %v26806_v43 }
 0xc2f   : > { %26194 = vmatmul.mubr.msk.f32.gmra.mrb[74].mxu0 %vm450_vm1, %v32018_v20  ;;  %v18115_v20 = vld [vmem:[#allocation3 + $0xab] sm:$0xff] }
 0xc30   : > { %26196 = vmatprep.mubr.msk.f32.mxu0 %vm450_vm1, %v32022_v45  ;;  %26809 = vmatpush3.bf16.msra.mxu0 %v26806_v43  ;;  %v18116_v45 = vld [vmem:[#allocation3 + $0xb3] sm:$0xff]  ;;  %v32254_v43 = vld [vmem:[#allocation3 + $0x64] sm:$0xff] }
 0xc31   : > { %26811 = vmatprep.subr.bf16.mxu0 %v26810_v36 }
 0xc33   : > { %26197 = vmatmul.mubr.msk.f32.gmra.mrb[76].mxu0 %vm450_vm1, %v32026_v52  ;;  %v18117_v52 = vld [vmem:[#allocation3 + $0xbb] sm:$0xff] }
 0xc34   : > { %26199 = vmatprep.mubr.msk.f32.mxu0 %vm450_vm1, %v32030_v49  ;;  %v18118_v49 = vld [vmem:[#allocation3 + $0xc3] sm:$0xff] }
 0xc37   : > { %26200 = vmatmul.mubr.msk.f32.gmra.mrb[78].mxu0 %vm450_vm1, %v32034_v32  ;;  %v18119_v32 = vld [vmem:[#allocation3 + $0xcb] sm:$0xff] }
 0xc38   : > { %26202 = vmatprep.mubr.msk.f32.mxu0 %vm450_vm1, %v32038_v25  ;;  %v18120_v25 = vld [vmem:[#allocation3 + $0xd3] sm:$0xff] }
 0xc3b   : > { %26203 = vmatmul.mubr.msk.f32.gmra.mrb[80].mxu0 %vm450_vm1, %v32042_v18  ;;  %v18121_v18 = vld [vmem:[#allocation3 + $0xdb] sm:$0xff] }
 0xc3c   : > { %26205 = vmatprep.mubr.msk.f32.mxu0 %vm450_vm1, %v32046_v44  ;;  %v18122_v44 = vld [vmem:[#allocation3 + $0xe3] sm:$0xff] }
 0xc3f   : > { %26206 = vmatmul.mubr.msk.f32.gmra.mrb[82].mxu0 %vm450_vm1, %v32050_v61  ;;  %v18123_v61 = vld [vmem:[#allocation3 + $0xeb] sm:$0xff] }
 0xc40   : > { %26208 = vmatprep.mubr.msk.f32.mxu0 %vm450_vm1, %v32054_v1  ;;  %v18124_v1 = vld [vmem:[#allocation3 + $0xf3] sm:$0xff] }
 0xc43   : > { %26209 = vmatmul.mubr.msk.f32.gmra.mrb[84].mxu0 %vm450_vm1, %v32058_v38  ;;  %v18125_v38 = vld [vmem:[#allocation3 + $0xfb] sm:$0xff] }
 0xc44   : > { %26211 = vmatprep.mubr.msk.f32.mxu0 %vm450_vm1, %v32062_v41  ;;  %v18126_v41 = vld [vmem:[#allocation3 + $0x103] sm:$0xff] }
 0xc47   : > { %26212 = vmatmul.mubr.msk.f32.gmra.mrb[86].mxu0 %vm450_vm1, %v32066_v21  ;;  %v18127_v21 = vld [vmem:[#allocation3 + $0x10b] sm:$0xff] }
 0xc48   : > { %26214 = vmatprep.mubr.msk.f32.mxu0 %vm450_vm1, %v17256_v13  ;;  %v18128_v13 = vld [vmem:[#allocation3 + $0x113] sm:$0xff] }
 0xc4b   : > { %26215 = vmatmul.mubr.msk.f32.gmra.mrb[88].mxu0 %vm450_vm1, %v17257_v7  ;;  %v18129_v7 = vld [vmem:[#allocation3 + $0x11b] sm:$0xff] }
 0xc4c   : > { %26217 = vmatprep.mubr.msk.f32.mxu0 %vm450_vm1, %v17258_v48  ;;  %v18130_v48 = vld [vmem:[#allocation3 + $0x123] sm:$0xff] }
 0xc4f   : > { %26218 = vmatmul.mubr.msk.f32.gmra.mrb[90].mxu0 %vm450_vm1, %v17259_v62  ;;  %v18131_v62 = vld [vmem:[#allocation3 + $0x12b] sm:$0xff] }
 0xc50   : > { %26220 = vmatprep.mubr.msk.f32.mxu0 %vm450_vm1, %v17260_v19  ;;  %v18992_v19 = vld [vmem:[%s32578_s9 + $0xd0] sm:$0xff] }
 0xc53   : > { %26221 = vmatmul.mubr.msk.f32.gmra.mrb[92].mxu0 %vm450_vm1, %v17261_v57  ;;  %v18993_v57 = vld [vmem:[%s32578_s9 + $0xd8] sm:$0xff] }
 0xc54   : > { %26223 = vmatprep.mubr.msk.f32.mxu0 %vm450_vm1, %v17262_v5  ;;  %v18525_v5 = vld [vmem:[#allocation3 + $0x14] sm:$0xff] }
 0xc57   : > { %26224 = vmatmul.mubr.msk.f32.gmra.mrb[94].mxu0 %vm450_vm1, %v17263_v46  ;;  %v26822_v46 = vpack.c.bf16 %v18993_v57, %v18992_v19  ;;  %v19394_v19 = vld [vmem:[#allocation3 + $0x7d] sm:$0xff]  ;;  %v19395_v57 = vld [vmem:[#allocation3 + $0x85] sm:$0xff] }
 0xc58   : > { %26226 = vmatprep.mubr.msk.f32.mxu0 %vm450_vm1, %v17264_v55  ;;  %v18526_v55 = vld [vmem:[#allocation3 + $0x1c] sm:$0xff] }
 0xc5b   : > { %26227 = vmatmul.mubr.msk.f32.gmra.mrb[96].mxu0 %vm450_vm1, %v17265_v29  ;;  %v19419_v29 = vld [vmem:[%s32578_s9 + $0xe0] sm:$0xff] }
 0xc5c   : > { %26229 = vmatprep.mubr.msk.f32.mxu0 %vm450_vm1, %v17266_v12  ;;  %v19420_v12 = vld [vmem:[%s32578_s9 + $0xe8] sm:$0xff] }
 0xc5f   : > { %26230 = vmatmul.mubr.msk.f32.gmra.mrb[98].mxu0 %vm450_vm1, %v17267_v53  ;;  %v32218_v53 = vld [vmem:[#allocation3 + $0x24] sm:$0xff] }
 0xc60   : > { %26232 = vmatprep.mubr.msk.f32.mxu0 %vm450_vm1, %v17268_v9  ;;  %v32223_v9 = vpack.c.bf16 %v19420_v12, %v19419_v29  ;;  %v19399_v29 = vld [vmem:[#allocation3 + $0xa5] sm:$0xff]  ;;  %v19400_v12 = vld [vmem:[#allocation3 + $0xad] sm:$0xff] }
 0xc63   : > { %26233 = vmatmul.mubr.msk.f32.gmra.mrb[100].mxu0 %vm450_vm1, %v17269_v26  ;;  %v32225_v26 = vld [vmem:[#allocation3 + $0x2c] sm:$0xff] }
 0xc64   : > { %26235 = vmatprep.mubr.msk.f32.mxu0 %vm450_vm1, %v17270_v0  ;;  %v32229_v0 = vld [vmem:[#allocation3 + $0x34] sm:$0xff] }
 0xc67   : > { %26236 = vmatmul.mubr.msk.f32.gmra.mrb[102].mxu0 %vm450_vm1, %v17271_v10  ;;  %v32234_v10 = vld [vmem:[#allocation3 + $0x3c] sm:$0xff] }
 0xc68   : > { %26238 = vmatprep.mubr.msk.f32.mxu0 %vm450_vm1, %v17272_v15  ;;  %v32238_v15 = vld [vmem:[#allocation3 + $0x44] sm:$0xff] }
 0xc6b   : > { %26239 = vmatmul.mubr.msk.f32.gmra.mrb[104].mxu0 %vm450_vm1, %v17273_v4  ;;  %v32242_v4 = vld [vmem:[#allocation3 + $0x4c] sm:$0xff] }
 0xc6c   : > { %26241 = vmatprep.mubr.msk.f32.mxu0 %vm450_vm1, %v17701_v16  ;;  %v32270_v16 = vld [vmem:[#allocation3 + $0x84] sm:$0xff] }
 0xc6f   : > { %26242 = vmatmul.mubr.msk.f32.gmra.mrb[106].mxu0 %vm450_vm1, %v17702_v3  ;;  %v32274_v3 = vld [vmem:[#allocation3 + $0x8c] sm:$0xff] }
 0xc70   : > { %26252 = vmatprep.mubr.msk.f32.mxu0 %vm450_vm1, %v18096_v11  ;;  %v18543_v11 = vld [vmem:[#allocation3 + $0xa4] sm:$0xff] }
 0xc73   : > { %26253 = vmatmul.mubr.msk.f32.vlgmr.msra.gmra.mrb[72].mxu0 %vm450_vm1, %v18097_v59  ;;  %v18545_v59 = vld [vmem:[#allocation3 + $0xb4] sm:$0xff] }
 0xc74   : > { %26813 = vmatpush3.bf16.msra.mxu0 %v26810_v36  ;;  %26255 = vmatprep.mubr.msk.f32.mxu0 %vm450_vm1, %v18098_v27  ;;  %v32266_v36 = vld [vmem:[#allocation3 + $0x7c] sm:$0xff]  ;;  %v18548_v27 = vld [vmem:[#allocation3 + $0xcc] sm:$0xff] }
 0xc75   : > { %26815 = vmatprep.subr.bf16.mxu0 %v26814_v40 }
 0xc77   : > { %26256 = vmatmul.mubr.msk.f32.gmra.mrb[74].mxu0 %vm450_vm1, %v18099_v31  ;;  %v18550_v31 = vld [vmem:[#allocation3 + $0xdc] sm:$0xff] }
 0xc78   : > { %26258 = vmatprep.mubr.msk.f32.mxu0 %vm450_vm1, %v18100_v56  ;;  %26817 = vmatpush3.bf16.msra.mxu0 %v26814_v40  ;;  %v18544_v40 = vld [vmem:[#allocation3 + $0xac] sm:$0xff]  ;;  %v18551_v56 = vld [vmem:[#allocation3 + $0xe4] sm:$0xff] }
 0xc79   : > { %26819 = vmatprep.subr.bf16.mxu0 %v32168_v8 }
 0xc7b   : > { %26259 = vmatmul.mubr.msk.f32.gmra.mrb[76].mxu0 %vm450_vm1, %v18101_v23  ;;  %v18552_v23 = vld [vmem:[#allocation3 + $0xec] sm:$0xff] }
 0xc7c   : > { %26261 = vmatprep.mubr.msk.f32.mxu0 %vm450_vm1, %v18102_v33  ;;  %v18553_v33 = vld [vmem:[#allocation3 + $0xf4] sm:$0xff] }
 0xc7f   : > { %26262 = vmatmul.mubr.msk.f32.gmra.mrb[78].mxu0 %vm450_vm1, %v18103_v6  ;;  %v18554_v6 = vld [vmem:[#allocation3 + $0xfc] sm:$0xff] }
 0xc80   : > { %26264 = vmatprep.mubr.msk.f32.mxu0 %vm450_vm1, %v18104_v28  ;;  %v18555_v28 = vld [vmem:[#allocation3 + $0x104] sm:$0xff] }
 0xc83   : > { %26265 = vmatmul.mubr.msk.f32.gmra.mrb[80].mxu0 %vm450_vm1, %v18105_v60  ;;  %v18556_v60 = vld [vmem:[#allocation3 + $0x10c] sm:$0xff] }
 0xc84   : > { %26267 = vmatprep.mubr.msk.f32.mxu0 %vm450_vm1, %v18106_v39  ;;  %v18557_v39 = vld [vmem:[#allocation3 + $0x114] sm:$0xff] }
 0xc87   : > { %26268 = vmatmul.mubr.msk.f32.gmra.mrb[82].mxu0 %vm450_vm1, %v18107_v47  ;;  %v18558_v47 = vld [vmem:[#allocation3 + $0x11c] sm:$0xff] }
 0xc88   : > { %26270 = vmatprep.mubr.msk.f32.mxu0 %vm450_vm1, %v18108_v2  ;;  %v18559_v2 = vld [vmem:[#allocation3 + $0x124] sm:$0xff] }
 0xc8b   : > { %26271 = vmatmul.mubr.msk.f32.gmra.mrb[84].mxu0 %vm450_vm1, %v18109_v35  ;;  %v18560_v35 = vld [vmem:[#allocation3 + $0x12c] sm:$0xff] }
 0xc8c   : > { %26273 = vmatprep.mubr.msk.f32.mxu0 %vm450_vm1, %v18110_v63  ;;  %v19421_v63 = vld [vmem:[%s32578_s9 + $0xf0] sm:$0xff] }
 0xc8f   : > { %26274 = vmatmul.mubr.msk.f32.gmra.mrb[86].mxu0 %vm450_vm1, %v18111_v14  ;;  %v19422_v14 = vld [vmem:[%s32578_s9 + $0xf8] sm:$0xff] }
 0xc90   : > { %26276 = vmatprep.mubr.msk.f32.mxu0 %vm450_vm1, %v18112_v30  ;;  %v26830_v30 = vpack.c.bf16 %v19422_v14, %v19421_v63  ;;  %v19829_v63 = vld [vmem:[#allocation3 + $0xae] sm:$0xff]  ;;  %v19830_v14 = vld [vmem:[#allocation3 + $0xb6] sm:$0xff] }
 0xc93   : > { %26277 = vmatmul.mubr.msk.f32.gmra.mrb[88].mxu0 %vm450_vm1, %v18113_v42  ;;  %v19848_v42 = vld [vmem:[%s32578_s9 + $0x100] sm:$0xff] }
 0xc94   : > { %26279 = vmatprep.mubr.msk.f32.mxu0 %vm450_vm1, %v18114_v34  ;;  %v19849_v34 = vld [vmem:[%s32578_s9 + $0x108] sm:$0xff] }
 0xc97   : > { %26280 = vmatmul.mubr.msk.f32.gmra.mrb[90].mxu0 %vm450_vm1, %v18115_v20  ;;  %v26834_v20 = vpack.c.bf16 %v19849_v34, %v19848_v42  ;;  %v19832_v42 = vld [vmem:[#allocation3 + $0xc6] sm:$0xff]  ;;  %v19833_v34 = vld [vmem:[#allocation3 + $0xce] sm:$0xff] }
 0xc98   : > { %26282 = vmatprep.mubr.msk.f32.mxu0 %vm450_vm1, %v18116_v45  ;;  %v18988_v45 = vld [vmem:[#allocation3 + $0x134] sm:$0xff] }
 0xc9b   : > { %26283 = vmatmul.mubr.msk.f32.gmra.mrb[92].mxu0 %vm450_vm1, %v18117_v52  ;;  %v18989_v52 = vld [vmem:[#allocation3 + $0x13c] sm:$0xff] }
 0xc9c   : > { %26285 = vmatprep.mubr.msk.f32.mxu0 %vm450_vm1, %v18118_v49  ;;  %v19850_v49 = vld [vmem:[%s32578_s9 + $0x110] sm:$0xff] }
 0xc9f   : > { %26286 = vmatmul.mubr.msk.f32.gmra.mrb[94].mxu0 %vm450_vm1, %v18119_v32  ;;  %v19851_v32 = vld [vmem:[%s32578_s9 + $0x118] sm:$0xff] }
 0xca0   : > { %26288 = vmatprep.mubr.msk.f32.mxu0 %vm450_vm1, %v18120_v25  ;;  %v19383_v25 = vld [vmem:[#allocation3 + $0x25] sm:$0xff] }
 0xca3   : > { %26289 = vmatmul.mubr.msk.f32.gmra.mrb[96].mxu0 %vm450_vm1, %v18121_v18  ;;  %v26838_v18 = vpack.c.bf16 %v19851_v32, %v19850_v49  ;;  %v19837_v49 = vld [vmem:[#allocation3 + $0xee] sm:$0xff]  ;;  %v19838_v32 = vld [vmem:[#allocation3 + $0xf6] sm:$0xff] }
 0xca4   : > { %26291 = vmatprep.mubr.msk.f32.mxu0 %vm450_vm1, %v18122_v44  ;;  %v19384_v44 = vld [vmem:[#allocation3 + $0x2d] sm:$0xff] }
 0xca7   : > { %26292 = vmatmul.mubr.msk.f32.gmra.mrb[98].mxu0 %vm450_vm1, %v18123_v61  ;;  %v19385_v61 = vld [vmem:[#allocation3 + $0x35] sm:$0xff] }
 0xca8   : > { %26294 = vmatprep.mubr.msk.f32.mxu0 %vm450_vm1, %v18124_v1  ;;  %v19386_v1 = vld [vmem:[#allocation3 + $0x3d] sm:$0xff] }
 0xcab   : > { %26295 = vmatmul.mubr.msk.f32.gmra.mrb[100].mxu0 %vm450_vm1, %v18125_v38  ;;  %v19387_v38 = vld [vmem:[#allocation3 + $0x45] sm:$0xff] }
 0xcac   : > { %26297 = vmatprep.mubr.msk.f32.mxu0 %vm450_vm1, %v18126_v41  ;;  %v19388_v41 = vld [vmem:[#allocation3 + $0x4d] sm:$0xff] }
 0xcaf   : > { %26298 = vmatmul.mubr.msk.f32.gmra.mrb[102].mxu0 %vm450_vm1, %v18127_v21  ;;  %v19389_v21 = vld [vmem:[#allocation3 + $0x55] sm:$0xff] }
 0xcb0   : > { %26300 = vmatprep.mubr.msk.f32.mxu0 %vm450_vm1, %v18128_v13  ;;  %v19390_v13 = vld [vmem:[#allocation3 + $0x5d] sm:$0xff] }
 0xcb3   : > { %26301 = vmatmul.mubr.msk.f32.gmra.mrb[104].mxu0 %vm450_vm1, %v18129_v7  ;;  %v19391_v7 = vld [vmem:[#allocation3 + $0x65] sm:$0xff] }
 0xcb4   : > { %26303 = vmatprep.mubr.msk.f32.mxu0 %vm450_vm1, %v18130_v48  ;;  %v19392_v48 = vld [vmem:[#allocation3 + $0x6d] sm:$0xff] }
 0xcb7   : > { %26304 = vmatmul.mubr.msk.f32.gmra.mrb[106].mxu0 %vm450_vm1, %v18131_v62  ;;  %v19393_v62 = vld [vmem:[#allocation3 + $0x75] sm:$0xff] }
 0xcb8   : > { %26314 = vmatprep.mubr.msk.f32.mxu0 %vm450_vm1, %v18525_v5  ;;  %v19396_v5 = vld [vmem:[#allocation3 + $0x8d] sm:$0xff] }
 0xcbb   : > { %26315 = vmatmul.mubr.msk.f32.vlgmr.msra.gmra.mrb[72].mxu0 %vm450_vm1, %v18526_v55  ;;  %v19398_v55 = vld [vmem:[#allocation3 + $0x9d] sm:$0xff] }
 0xcbc   : > { %26821 = vmatpush3.bf16.msra.mxu0 %v32168_v8  ;;  %26317 = vmatprep.mubr.msk.f32.mxu0 %vm450_vm1, %v32218_v53  ;;  %v18549_v8 = vld [vmem:[#allocation3 + $0xd4] sm:$0xff] }
 0xcbd   : > { %26823 = vmatprep.subr.bf16.mxu0 %v26822_v46 }
 0xcbf   : > { %26318 = vmatmul.mubr.msk.f32.gmra.mrb[74].mxu0 %vm450_vm1, %v32225_v26 }
 0xcc0   : > { %26320 = vmatprep.mubr.msk.f32.mxu0 %vm450_vm1, %v32229_v0  ;;  %26825 = vmatpush3.bf16.msra.mxu0 %v26822_v46  ;;  %v19397_v46 = vld [vmem:[#allocation3 + $0x95] sm:$0xff] }
 0xcc1   : > { %26827 = vmatprep.subr.bf16.mxu0 %v32223_v9 }
 0xcc3   : > { %26321 = vmatmul.mubr.msk.f32.gmra.mrb[76].mxu0 %vm450_vm1, %v32234_v10 }
 0xcc4   : > { %26323 = vmatprep.mubr.msk.f32.mxu0 %vm450_vm1, %v32238_v15 }
 0xcc7   : > { %26324 = vmatmul.mubr.msk.f32.gmra.mrb[78].mxu0 %vm450_vm1, %v32242_v4 }
 0xcc8   : > { %26326 = vmatprep.mubr.msk.f32.mxu0 %vm450_vm1, %v32246_v37 }
 0xccb   : > { %26327 = vmatmul.mubr.msk.f32.gmra.mrb[80].mxu0 %vm450_vm1, %v32250_v54 }
 0xccc   : > { %26329 = vmatprep.mubr.msk.f32.mxu0 %vm450_vm1, %v32254_v43 }
 0xccf   : > { %26330 = vmatmul.mubr.msk.f32.gmra.mrb[82].mxu0 %vm450_vm1, %v32258_v17 }
 0xcd0   : > { %26332 = vmatprep.mubr.msk.f32.mxu0 %vm450_vm1, %v32262_v24 }
 0xcd3   : > { %26333 = vmatmul.mubr.msk.f32.gmra.mrb[84].mxu0 %vm450_vm1, %v32266_v36 }
 0xcd4   : > { %26335 = vmatprep.mubr.msk.f32.mxu0 %vm450_vm1, %v32270_v16 }
 0xcd7   : > { %26336 = vmatmul.mubr.msk.f32.gmra.mrb[86].mxu0 %vm450_vm1, %v32274_v3 }
 0xcd8   : > { %26338 = vmatprep.mubr.msk.f32.mxu0 %vm450_vm1, %v32278_v51 }
 0xcdb   : > { %26339 = vmatmul.mubr.msk.f32.gmra.mrb[88].mxu0 %vm450_vm1, %v32282_v22 }
 0xcdc   : > { %26341 = vmatprep.mubr.msk.f32.mxu0 %vm450_vm1, %v18543_v11 }
 0xcdf   : > { %26342 = vmatmul.mubr.msk.f32.gmra.mrb[90].mxu0 %vm450_vm1, %v18544_v40 }
 0xce0   : > { %26344 = vmatprep.mubr.msk.f32.mxu0 %vm450_vm1, %v18545_v59 }
 0xce3   : > { %26345 = vmatmul.mubr.msk.f32.gmra.mrb[92].mxu0 %vm450_vm1, %v18546_v50 }
 0xce4   : > { %26347 = vmatprep.mubr.msk.f32.mxu0 %vm450_vm1, %v18547_v58 }
 0xce7   : > { %26348 = vmatmul.mubr.msk.f32.gmra.mrb[94].mxu0 %vm450_vm1, %v18548_v27 }
 0xce8   : > { %26350 = vmatprep.mubr.msk.f32.mxu0 %vm450_vm1, %v18549_v8 }
 0xceb   : > { %26351 = vmatmul.mubr.msk.f32.gmra.mrb[96].mxu0 %vm450_vm1, %v18550_v31 }
 0xcec   : > { %26353 = vmatprep.mubr.msk.f32.mxu0 %vm450_vm1, %v18551_v56 }
 0xcef   : > { %26354 = vmatmul.mubr.msk.f32.gmra.mrb[98].mxu0 %vm450_vm1, %v18552_v23 }
 0xcf0   : > { %26356 = vmatprep.mubr.msk.f32.mxu0 %vm450_vm1, %v18553_v33 }
 0xcf3   : > { %26357 = vmatmul.mubr.msk.f32.gmra.mrb[100].mxu0 %vm450_vm1, %v18554_v6 }
 0xcf4   : > { %26359 = vmatprep.mubr.msk.f32.mxu0 %vm450_vm1, %v18555_v28 }
 0xcf7   : > { %26360 = vmatmul.mubr.msk.f32.gmra.mrb[102].mxu0 %vm450_vm1, %v18556_v60 }
 0xcf8   : > { %26362 = vmatprep.mubr.msk.f32.mxu0 %vm450_vm1, %v18557_v39 }
 0xcfb   : > { %26363 = vmatmul.mubr.msk.f32.gmra.mrb[104].mxu0 %vm450_vm1, %v18558_v47 }
 0xcfc   : > { %26365 = vmatprep.mubr.msk.f32.mxu0 %vm450_vm1, %v18559_v2 }
 0xcff   : > { %26366 = vmatmul.mubr.msk.f32.gmra.mrb[106].mxu0 %vm450_vm1, %v18560_v35 }
 0xd00   : > { %26376 = vmatprep.mubr.msk.f32.mxu0 %vm450_vm1, %v32218_v53  ;;  %v19401_v53 = vld [vmem:[#allocation3 + $0xb5] sm:$0xff] }
 0xd03   : > { %26377 = vmatmul.mubr.msk.f32.vlgmr.msra.gmra.mrb[72].mxu0 %vm450_vm1, %v32225_v26  ;;  %v19403_v26 = vld [vmem:[#allocation3 + $0xc5] sm:$0xff] }
 0xd04   : > { %26829 = vmatpush3.bf16.msra.mxu0 %v32223_v9  ;;  %26379 = vmatprep.mubr.msk.f32.mxu0 %vm450_vm1, %v32229_v0  ;;  %v19402_v9 = vld [vmem:[#allocation3 + $0xbd] sm:$0xff]  ;;  %v19404_v0 = vld [vmem:[#allocation3 + $0xcd] sm:$0xff] }
 0xd05   : > { %26831 = vmatprep.subr.bf16.mxu0 %v26830_v30 }
 0xd07   : > { %26380 = vmatmul.mubr.msk.f32.gmra.mrb[74].mxu0 %vm450_vm1, %v32234_v10  ;;  %v19405_v10 = vld [vmem:[#allocation3 + $0xd5] sm:$0xff] }
 0xd08   : > { %26382 = vmatprep.mubr.msk.f32.mxu0 %vm450_vm1, %v32238_v15  ;;  %26833 = vmatpush3.bf16.msra.mxu0 %v26830_v30  ;;  %v19406_v15 = vld [vmem:[#allocation3 + $0xdd] sm:$0xff] }
 0xd09   : > { %26835 = vmatprep.subr.bf16.mxu0 %v26834_v20  ;;  %v19831_v30 = vld [vmem:[#allocation3 + $0xbe] sm:$0xff] }
 0xd0b   : > { %26383 = vmatmul.mubr.msk.f32.gmra.mrb[76].mxu0 %vm450_vm1, %v32242_v4  ;;  %v19407_v4 = vld [vmem:[#allocation3 + $0xe5] sm:$0xff] }
 0xd0c   : > { %26385 = vmatprep.mubr.msk.f32.mxu0 %vm450_vm1, %v32246_v37  ;;  %v19408_v37 = vld [vmem:[#allocation3 + $0xed] sm:$0xff] }
 0xd0f   : > { %26386 = vmatmul.mubr.msk.f32.gmra.mrb[78].mxu0 %vm450_vm1, %v32250_v54  ;;  %v19409_v54 = vld [vmem:[#allocation3 + $0xf5] sm:$0xff] }
 0xd10   : > { %26388 = vmatprep.mubr.msk.f32.mxu0 %vm450_vm1, %v32254_v43  ;;  %v19410_v43 = vld [vmem:[#allocation3 + $0xfd] sm:$0xff] }
 0xd13   : > { %26389 = vmatmul.mubr.msk.f32.gmra.mrb[80].mxu0 %vm450_vm1, %v32258_v17  ;;  %v19411_v17 = vld [vmem:[#allocation3 + $0x105] sm:$0xff] }
 0xd14   : > { %26391 = vmatprep.mubr.msk.f32.mxu0 %vm450_vm1, %v32262_v24  ;;  %v19412_v24 = vld [vmem:[#allocation3 + $0x10d] sm:$0xff] }
 0xd17   : > { %26392 = vmatmul.mubr.msk.f32.gmra.mrb[82].mxu0 %vm450_vm1, %v32266_v36  ;;  %v19413_v36 = vld [vmem:[#allocation3 + $0x115] sm:$0xff] }
 0xd18   : > { %26394 = vmatprep.mubr.msk.f32.mxu0 %vm450_vm1, %v32270_v16  ;;  %v19414_v16 = vld [vmem:[#allocation3 + $0x11d] sm:$0xff] }
 0xd1b   : > { %26395 = vmatmul.mubr.msk.f32.gmra.mrb[84].mxu0 %vm450_vm1, %v32274_v3  ;;  %v19415_v3 = vld [vmem:[#allocation3 + $0x125] sm:$0xff] }
 0xd1c   : > { %26397 = vmatprep.mubr.msk.f32.mxu0 %vm450_vm1, %v32278_v51  ;;  %v19417_v51 = vld [vmem:[#allocation3 + $0x135] sm:$0xff] }
 0xd1f   : > { %26398 = vmatmul.mubr.msk.f32.gmra.mrb[86].mxu0 %vm450_vm1, %v32282_v22  ;;  %v19416_v22 = vld [vmem:[#allocation3 + $0x12d] sm:$0xff] }
 0xd20   : > { %26400 = vmatprep.mubr.msk.f32.mxu0 %vm450_vm1, %v18543_v11  ;;  %v19418_v11 = vld [vmem:[#allocation3 + $0x13d] sm:$0xff] }
 0xd23   : > { %26401 = vmatmul.mubr.msk.f32.gmra.mrb[88].mxu0 %vm450_vm1, %v18544_v40  ;;  %v19812_v40 = vld [vmem:[#allocation3 + $0x26] sm:$0xff] }
 0xd24   : > { %26403 = vmatprep.mubr.msk.f32.mxu0 %vm450_vm1, %v18545_v59  ;;  %v19813_v59 = vld [vmem:[#allocation3 + $0x2e] sm:$0xff] }
 0xd27   : > { %26404 = vmatmul.mubr.msk.f32.gmra.mrb[90].mxu0 %vm450_vm1, %v18546_v50  ;;  %v19814_v50 = vld [vmem:[#allocation3 + $0x36] sm:$0xff] }
 0xd28   : > { %26406 = vmatprep.mubr.msk.f32.mxu0 %vm450_vm1, %v18547_v58  ;;  %v19815_v58 = vld [vmem:[#allocation3 + $0x3e] sm:$0xff] }
 0xd2b   : > { %26407 = vmatmul.mubr.msk.f32.gmra.mrb[92].mxu0 %vm450_vm1, %v18548_v27  ;;  %v19816_v27 = vld [vmem:[#allocation3 + $0x46] sm:$0xff] }
 0xd2c   : > { %26409 = vmatprep.mubr.msk.f32.mxu0 %vm450_vm1, %v18549_v8  ;;  %v19817_v8 = vld [vmem:[#allocation3 + $0x4e] sm:$0xff] }
 0xd2f   : > { %26410 = vmatmul.mubr.msk.f32.gmra.mrb[94].mxu0 %vm450_vm1, %v18550_v31  ;;  %v19818_v31 = vld [vmem:[#allocation3 + $0x56] sm:$0xff] }
 0xd30   : > { %26412 = vmatprep.mubr.msk.f32.mxu0 %vm450_vm1, %v18551_v56  ;;  %v19819_v56 = vld [vmem:[#allocation3 + $0x5e] sm:$0xff] }
 0xd33   : > { %26413 = vmatmul.mubr.msk.f32.gmra.mrb[96].mxu0 %vm450_vm1, %v18552_v23  ;;  %v19820_v23 = vld [vmem:[#allocation3 + $0x66] sm:$0xff] }
 0xd34   : > { %26415 = vmatprep.mubr.msk.f32.mxu0 %vm450_vm1, %v18553_v33  ;;  %v19821_v33 = vld [vmem:[#allocation3 + $0x6e] sm:$0xff] }
 0xd37   : > { %26416 = vmatmul.mubr.msk.f32.gmra.mrb[98].mxu0 %vm450_vm1, %v18554_v6  ;;  %v19822_v6 = vld [vmem:[#allocation3 + $0x76] sm:$0xff] }
 0xd38   : > { %26418 = vmatprep.mubr.msk.f32.mxu0 %vm450_vm1, %v18555_v28  ;;  %v19823_v28 = vld [vmem:[#allocation3 + $0x7e] sm:$0xff] }
 0xd3b   : > { %26419 = vmatmul.mubr.msk.f32.gmra.mrb[100].mxu0 %vm450_vm1, %v18556_v60  ;;  %v19824_v60 = vld [vmem:[#allocation3 + $0x86] sm:$0xff] }
 0xd3c   : > { %26421 = vmatprep.mubr.msk.f32.mxu0 %vm450_vm1, %v18557_v39  ;;  %v19825_v39 = vld [vmem:[#allocation3 + $0x8e] sm:$0xff] }
 0xd3f   : > { %26422 = vmatmul.mubr.msk.f32.gmra.mrb[102].mxu0 %vm450_vm1, %v18558_v47  ;;  %v19826_v47 = vld [vmem:[#allocation3 + $0x96] sm:$0xff] }
 0xd40   : > { %26424 = vmatprep.mubr.msk.f32.mxu0 %vm450_vm1, %v18559_v2  ;;  %v19827_v2 = vld [vmem:[#allocation3 + $0x9e] sm:$0xff] }
 0xd43   : > { %26425 = vmatmul.mubr.msk.f32.gmra.mrb[104].mxu0 %vm450_vm1, %v18560_v35  ;;  %v19828_v35 = vld [vmem:[#allocation3 + $0xa6] sm:$0xff] }
 0xd44   : > { %26427 = vmatprep.mubr.msk.f32.mxu0 %vm450_vm1, %v18988_v45  ;;  %v19835_v45 = vld [vmem:[#allocation3 + $0xde] sm:$0xff] }
 0xd47   : > { %26428 = vmatmul.mubr.msk.f32.gmra.mrb[106].mxu0 %vm450_vm1, %v18989_v52  ;;  %v19836_v52 = vld [vmem:[#allocation3 + $0xe6] sm:$0xff] }
 0xd48   : > { %26438 = vmatprep.mubr.msk.f32.mxu0 %vm450_vm1, %v19383_v25  ;;  %v19839_v25 = vld [vmem:[#allocation3 + $0xfe] sm:$0xff] }
 0xd4b   : > { %26439 = vmatmul.mubr.msk.f32.vlgmr.msra.gmra.mrb[72].mxu0 %vm450_vm1, %v19384_v44  ;;  %v19841_v44 = vld [vmem:[#allocation3 + $0x10e] sm:$0xff] }
 0xd4c   : > { %26837 = vmatpush3.bf16.msra.mxu0 %v26834_v20  ;;  %26441 = vmatprep.mubr.msk.f32.mxu0 %vm450_vm1, %v19385_v61  ;;  %v19834_v20 = vld [vmem:[#allocation3 + $0xd6] sm:$0xff] }
 0xd4d   : > { %26839 = vmatprep.subr.bf16.mxu0 %v26838_v18  ;;  %v19842_v61 = vld [vmem:[#allocation3 + $0x116] sm:$0xff] }
 0xd4f   : > { %26442 = vmatmul.mubr.msk.f32.gmra.mrb[74].mxu0 %vm450_vm1, %v19386_v1  ;;  %v19843_v1 = vld [vmem:[#allocation3 + $0x11e] sm:$0xff] }
 0xd50   : > { %26444 = vmatprep.mubr.msk.f32.mxu0 %vm450_vm1, %v19387_v38  ;;  %26841 = vmatpush3.bf16.msra.mxu0 %v26838_v18  ;;  %v19840_v18 = vld [vmem:[#allocation3 + $0x106] sm:$0xff] }
 0xd51   : > { %v19844_v38 = vld [vmem:[#allocation3 + $0x126] sm:$0xff] }
 0xd53   : > { %26445 = vmatmul.mubr.msk.f32.gmra.mrb[76].mxu0 %vm450_vm1, %v19388_v41  ;;  %v19846_v41 = vld [vmem:[#allocation3 + $0x136] sm:$0xff] }
 0xd54   : > { %26447 = vmatprep.mubr.msk.f32.mxu0 %vm450_vm1, %v19389_v21  ;;  %v19845_v21 = vld [vmem:[#allocation3 + $0x12e] sm:$0xff] }
 0xd57   : > { %26448 = vmatmul.mubr.msk.f32.gmra.mrb[78].mxu0 %vm450_vm1, %v19390_v13  ;;  %v19847_v13 = vld [vmem:[#allocation3 + $0x13e] sm:$0xff] }
 0xd58   : > { %26450 = vmatprep.mubr.msk.f32.mxu0 %vm450_vm1, %v19391_v7  ;;  %v32451_v7 = vld [vmem:[%s32579_s10] ss:$0 sm:$0xff] }
 0xd5b   : > { %26451 = vmatmul.mubr.msk.f32.gmra.mrb[80].mxu0 %vm450_vm1, %v19392_v48 }
 0xd5c   : > { %26453 = vmatprep.mubr.msk.f32.mxu0 %vm450_vm1, %v19393_v62 }
 0xd5f   : > { %26454 = vmatmul.mubr.msk.f32.gmra.mrb[82].mxu0 %vm450_vm1, %v19394_v19 }
 0xd60   : > { %26456 = vmatprep.mubr.msk.f32.mxu0 %vm450_vm1, %v19395_v57 }
 0xd63   : > { %26457 = vmatmul.mubr.msk.f32.gmra.mrb[84].mxu0 %vm450_vm1, %v19396_v5 }
 0xd64   : > { %26459 = vmatprep.mubr.msk.f32.mxu0 %vm450_vm1, %v19397_v46 }
 0xd67   : > { %26460 = vmatmul.mubr.msk.f32.gmra.mrb[86].mxu0 %vm450_vm1, %v19398_v55 }
 0xd68   : > { %26462 = vmatprep.mubr.msk.f32.mxu0 %vm450_vm1, %v19399_v29 }
 0xd6b   : > { %26463 = vmatmul.mubr.msk.f32.gmra.mrb[88].mxu0 %vm450_vm1, %v19400_v12 }
 0xd6c   : > { %26465 = vmatprep.mubr.msk.f32.mxu0 %vm450_vm1, %v19401_v53 }
 0xd6f   : > { %26466 = vmatmul.mubr.msk.f32.gmra.mrb[90].mxu0 %vm450_vm1, %v19402_v9 }
 0xd70   : > { %26468 = vmatprep.mubr.msk.f32.mxu0 %vm450_vm1, %v19403_v26 }
 0xd73   : > { %26469 = vmatmul.mubr.msk.f32.gmra.mrb[92].mxu0 %vm450_vm1, %v19404_v0 }
 0xd74   : > { %26471 = vmatprep.mubr.msk.f32.mxu0 %vm450_vm1, %v19405_v10 }
 0xd77   : > { %26472 = vmatmul.mubr.msk.f32.gmra.mrb[94].mxu0 %vm450_vm1, %v19406_v15 }
 0xd78   : > { %26474 = vmatprep.mubr.msk.f32.mxu0 %vm450_vm1, %v19407_v4 }
 0xd7b   : > { %26475 = vmatmul.mubr.msk.f32.gmra.mrb[96].mxu0 %vm450_vm1, %v19408_v37 }
 0xd7c   : > { %26477 = vmatprep.mubr.msk.f32.mxu0 %vm450_vm1, %v19409_v54 }
 0xd7f   : > { %26478 = vmatmul.mubr.msk.f32.gmra.mrb[98].mxu0 %vm450_vm1, %v19410_v43 }
 0xd80   : > { %26480 = vmatprep.mubr.msk.f32.mxu0 %vm450_vm1, %v19411_v17 }
 0xd83   : > { %26481 = vmatmul.mubr.msk.f32.gmra.mrb[100].mxu0 %vm450_vm1, %v19412_v24 }
 0xd84   : > { %26483 = vmatprep.mubr.msk.f32.mxu0 %vm450_vm1, %v19413_v36 }
 0xd87   : > { %26484 = vmatmul.mubr.msk.f32.gmra.mrb[102].mxu0 %vm450_vm1, %v19414_v16 }
 0xd88   : > { %26486 = vmatprep.mubr.msk.f32.mxu0 %vm450_vm1, %v19415_v3 }
 0xd8b   : > { %26487 = vmatmul.mubr.msk.f32.gmra.mrb[104].mxu0 %vm450_vm1, %v19416_v22 }
 0xd8c   : > { %26489 = vmatprep.mubr.msk.f32.mxu0 %vm450_vm1, %v19417_v51 }
 0xd8f   : > { %26490 = vmatmul.mubr.msk.f32.gmra.mrb[106].mxu0 %vm450_vm1, %v19418_v11 }
 0xd90   : > { %26500 = vmatprep.mubr.msk.f32.mxu0 %vm450_vm1, %v19812_v40 }
 0xd93   : > { %26501 = vmatmul.mubr.msk.f32.vlgmr.msra.gmra.mrb[72].mxu0 %vm450_vm1, %v19813_v59 }
 0xd94   : > { %26503 = vmatprep.mubr.msk.f32.mxu0 %vm450_vm1, %v19814_v50 }
 0xd97   : > { %26504 = vmatmul.mubr.msk.f32.gmra.mrb[74].mxu0 %vm450_vm1, %v19815_v58 }
 0xd98   : > { %26506 = vmatprep.mubr.msk.f32.mxu0 %vm450_vm1, %v19816_v27 }
 0xd9b   : > { %26507 = vmatmul.mubr.msk.f32.gmra.mrb[76].mxu0 %vm450_vm1, %v19817_v8 }
 0xd9c   : > { %26509 = vmatprep.mubr.msk.f32.mxu0 %vm450_vm1, %v19818_v31 }
 0xd9f   : > { %26510 = vmatmul.mubr.msk.f32.gmra.mrb[78].mxu0 %vm450_vm1, %v19819_v56 }
 0xda0   : > { %26512 = vmatprep.mubr.msk.f32.mxu0 %vm450_vm1, %v19820_v23 }
 0xda3   : > { %26513 = vmatmul.mubr.msk.f32.gmra.mrb[80].mxu0 %vm450_vm1, %v19821_v33 }
 0xda4   : > { %26515 = vmatprep.mubr.msk.f32.mxu0 %vm450_vm1, %v19822_v6 }
 0xda7   : > { %26516 = vmatmul.mubr.msk.f32.gmra.mrb[82].mxu0 %vm450_vm1, %v19823_v28 }
 0xda8   : > { %26518 = vmatprep.mubr.msk.f32.mxu0 %vm450_vm1, %v19824_v60 }
 0xdab   : > { %26519 = vmatmul.mubr.msk.f32.gmra.mrb[84].mxu0 %vm450_vm1, %v19825_v39 }
 0xdac   : > { %26521 = vmatprep.mubr.msk.f32.mxu0 %vm450_vm1, %v19826_v47 }
 0xdaf   : > { %26522 = vmatmul.mubr.msk.f32.gmra.mrb[86].mxu0 %vm450_vm1, %v19827_v2 }
 0xdb0   : > { %26524 = vmatprep.mubr.msk.f32.mxu0 %vm450_vm1, %v19828_v35 }
 0xdb3   : > { %26525 = vmatmul.mubr.msk.f32.gmra.mrb[88].mxu0 %vm450_vm1, %v19829_v63 }
 0xdb4   : > { %26527 = vmatprep.mubr.msk.f32.mxu0 %vm450_vm1, %v19830_v14 }
 0xdb7   : > { %26528 = vmatmul.mubr.msk.f32.gmra.mrb[90].mxu0 %vm450_vm1, %v19831_v30 }
 0xdb8   : > { %26530 = vmatprep.mubr.msk.f32.mxu0 %vm450_vm1, %v19832_v42 }
 0xdbb   : > { %26531 = vmatmul.mubr.msk.f32.gmra.mrb[92].mxu0 %vm450_vm1, %v19833_v34 }
 0xdbc   : > { %26533 = vmatprep.mubr.msk.f32.mxu0 %vm450_vm1, %v19834_v20 }
 0xdbf   : > { %26534 = vmatmul.mubr.msk.f32.gmra.mrb[94].mxu0 %vm450_vm1, %v19835_v45 }
 0xdc0   : > { %26536 = vmatprep.mubr.msk.f32.mxu0 %vm450_vm1, %v19836_v52 }
 0xdc3   : > { %26537 = vmatmul.mubr.msk.f32.gmra.mrb[96].mxu0 %vm450_vm1, %v19837_v49 }
 0xdc4   : > { %26539 = vmatprep.mubr.msk.f32.mxu0 %vm450_vm1, %v19838_v32 }
 0xdc7   : > { %26540 = vmatmul.mubr.msk.f32.gmra.mrb[98].mxu0 %vm450_vm1, %v19839_v25 }
 0xdc8   : > { %26542 = vmatprep.mubr.msk.f32.mxu0 %vm450_vm1, %v19840_v18 }
 0xdcb   : > { %26543 = vmatmul.mubr.msk.f32.gmra.mrb[100].mxu0 %vm450_vm1, %v19841_v44 }
 0xdcc   : > { %26545 = vmatprep.mubr.msk.f32.mxu0 %vm450_vm1, %v19842_v61 }
 0xdcf   : > { %26546 = vmatmul.mubr.msk.f32.gmra.mrb[102].mxu0 %vm450_vm1, %v19843_v1 }
 0xdd0   : > { %26548 = vmatprep.mubr.msk.f32.mxu0 %vm450_vm1, %v19844_v38 }
 0xdd3   : > { %26549 = vmatmul.mubr.msk.f32.gmra.mrb[104].mxu0 %vm450_vm1, %v19845_v21 }
 0xdd4   : > { %26551 = vmatprep.mubr.msk.f32.mxu0 %vm450_vm1, %v19846_v41 }
 0xdd7   : > { %26552 = vmatmul.mubr.msk.f32.gmra.mrb[106].mxu0 %vm450_vm1, %v19847_v13 }
 0xe66   : > { %v26502_v48 = vpop.f32.mrb[72].mxu0 }
 0xe67   : > { %v20249_v62 = vadd.f32 %v26502_v48, %v32451_v7  ;;  %v20026_v19 = vpop.f32.mrb[73].mxu0 }
 0xe68   : > { %v20248_v57 = vadd.f32 %v32451_v7, %v20026_v19 }
 0xe69   : > { %v20285_v5 = vmax.f32 %v20249_v62, 0.0 }
 0xe6a   : > { %v20284_v46 = vmax.f32 %v20248_v57, 0.0  ;;  %v26505_v55 = vpop.f32.mrb[74].mxu0 }
 0xe6b   : > { %20321 = vst.msk [vmem:[%s32457_s25 + $0x8] sm:$0xff] %vm612_vm0, %v20285_v5  ;;  %v20251_v29 = vadd.f32 %v26505_v55, %v32451_v7  ;;  %v20036_v12 = vpop.f32.mrb[75].mxu0 }
 0xe6c   : > { %20320 = vst.msk [vmem:[%s32457_s25] sm:$0xff] %vm612_vm0, %v20284_v46  ;;  %v20250_v53 = vadd.f32 %v32451_v7, %v20036_v12 }
 0xe6d   : > { %v20287_v9 = vmax.f32 %v20251_v29, 0.0 }
 0xe6e   : > { %v20286_v26 = vmax.f32 %v20250_v53, 0.0  ;;  %v26508_v0 = vpop.f32.mrb[76].mxu0 }
 0xe6f   : > { %20323 = vst.msk [vmem:[%s32457_s25 + $0x18] sm:$0xff] %vm612_vm0, %v20287_v9  ;;  %v20253_v10 = vadd.f32 %v26508_v0, %v32451_v7  ;;  %v20046_v15 = vpop.f32.mrb[77].mxu0 }
 0xe70   : > { %20322 = vst.msk [vmem:[%s32457_s25 + $0x10] sm:$0xff] %vm612_vm0, %v20286_v26  ;;  %v20252_v4 = vadd.f32 %v32451_v7, %v20046_v15 }
 0xe71   : > { %v20289_v37 = vmax.f32 %v20253_v10, 0.0 }
 0xe72   : > { %v20288_v54 = vmax.f32 %v20252_v4, 0.0  ;;  %v26511_v43 = vpop.f32.mrb[78].mxu0 }
 0xe73   : > { %20325 = vst.msk [vmem:[%s32457_s25 + $0x28] sm:$0xff] %vm612_vm0, %v20289_v37  ;;  %v20255_v17 = vadd.f32 %v26511_v43, %v32451_v7  ;;  %v20056_v24 = vpop.f32.mrb[79].mxu0 }
 0xe74   : > { %20324 = vst.msk [vmem:[%s32457_s25 + $0x20] sm:$0xff] %vm612_vm0, %v20288_v54  ;;  %v20254_v36 = vadd.f32 %v32451_v7, %v20056_v24 }
 0xe75   : > { %v20291_v16 = vmax.f32 %v20255_v17, 0.0 }
 0xe76   : > { %v20290_v3 = vmax.f32 %v20254_v36, 0.0  ;;  %v26514_v51 = vpop.f32.mrb[80].mxu0 }
 0xe77   : > { %20327 = vst.msk [vmem:[%s32457_s25 + $0x38] sm:$0xff] %vm612_vm0, %v20291_v16  ;;  %v20257_v22 = vadd.f32 %v26514_v51, %v32451_v7  ;;  %v20066_v11 = vpop.f32.mrb[81].mxu0 }
 0xe78   : > { %20326 = vst.msk [vmem:[%s32457_s25 + $0x30] sm:$0xff] %vm612_vm0, %v20290_v3  ;;  %v20256_v40 = vadd.f32 %v32451_v7, %v20066_v11 }
 0xe79   : > { %v20293_v59 = vmax.f32 %v20257_v22, 0.0 }
 0xe7a   : > { %v20292_v50 = vmax.f32 %v20256_v40, 0.0  ;;  %v26517_v58 = vpop.f32.mrb[82].mxu0 }
 0xe7b   : > { %20329 = vst.msk [vmem:[%s32457_s25 + $0x48] sm:$0xff] %vm612_vm0, %v20293_v59  ;;  %v20259_v27 = vadd.f32 %v26517_v58, %v32451_v7  ;;  %v20076_v8 = vpop.f32.mrb[83].mxu0 }
 0xe7c   : > { %20328 = vst.msk [vmem:[%s32457_s25 + $0x40] sm:$0xff] %vm612_vm0, %v20292_v50  ;;  %v20258_v31 = vadd.f32 %v32451_v7, %v20076_v8 }
 0xe7d   : > { %v20295_v56 = vmax.f32 %v20259_v27, 0.0 }
 0xe7e   : > { %v20294_v23 = vmax.f32 %v20258_v31, 0.0  ;;  %v26520_v33 = vpop.f32.mrb[84].mxu0 }
 0xe7f   : > { %20331 = vst.msk [vmem:[%s32457_s25 + $0x58] sm:$0xff] %vm612_vm0, %v20295_v56  ;;  %v20261_v6 = vadd.f32 %v26520_v33, %v32451_v7  ;;  %v20086_v28 = vpop.f32.mrb[85].mxu0 }
 0xe80   : > { %20330 = vst.msk [vmem:[%s32457_s25 + $0x50] sm:$0xff] %vm612_vm0, %v20294_v23  ;;  %v20260_v60 = vadd.f32 %v32451_v7, %v20086_v28 }
 0xe81   : > { %v20297_v39 = vmax.f32 %v20261_v6, 0.0 }
 0xe82   : > { %v20296_v47 = vmax.f32 %v20260_v60, 0.0  ;;  %v26523_v2 = vpop.f32.mrb[86].mxu0 }
 0xe83   : > { %20333 = vst.msk [vmem:[%s32457_s25 + $0x68] sm:$0xff] %vm612_vm0, %v20297_v39  ;;  %v20263_v35 = vadd.f32 %v26523_v2, %v32451_v7  ;;  %v20096_v63 = vpop.f32.mrb[87].mxu0 }
 0xe84   : > { %20332 = vst.msk [vmem:[%s32457_s25 + $0x60] sm:$0xff] %vm612_vm0, %v20296_v47  ;;  %v20262_v14 = vadd.f32 %v32451_v7, %v20096_v63 }
 0xe85   : > { %v20299_v30 = vmax.f32 %v20263_v35, 0.0 }
 0xe86   : > { %v20298_v42 = vmax.f32 %v20262_v14, 0.0  ;;  %v26526_v34 = vpop.f32.mrb[88].mxu0 }
 0xe87   : > { %20335 = vst.msk [vmem:[%s32457_s25 + $0x78] sm:$0xff] %vm612_vm0, %v20299_v30  ;;  %v20265_v20 = vadd.f32 %v26526_v34, %v32451_v7  ;;  %v20106_v45 = vpop.f32.mrb[89].mxu0 }
 0xe88   : > { %20334 = vst.msk [vmem:[%s32457_s25 + $0x70] sm:$0xff] %vm612_vm0, %v20298_v42  ;;  %v20264_v52 = vadd.f32 %v32451_v7, %v20106_v45 }
 0xe89   : > { %v20301_v49 = vmax.f32 %v20265_v20, 0.0 }
 0xe8a   : > { %v20300_v32 = vmax.f32 %v20264_v52, 0.0  ;;  %v26529_v25 = vpop.f32.mrb[90].mxu0 }
 0xe8b   : > { %20337 = vst.msk [vmem:[%s32457_s25 + $0x88] sm:$0xff] %vm612_vm0, %v20301_v49  ;;  %v20267_v18 = vadd.f32 %v26529_v25, %v32451_v7  ;;  %v20116_v44 = vpop.f32.mrb[91].mxu0 }
 0xe8c   : > { %20336 = vst.msk [vmem:[%s32457_s25 + $0x80] sm:$0xff] %vm612_vm0, %v20300_v32  ;;  %v20266_v61 = vadd.f32 %v32451_v7, %v20116_v44 }
 0xe8d   : > { %v20303_v1 = vmax.f32 %v20267_v18, 0.0 }
 0xe8e   : > { %v20302_v38 = vmax.f32 %v20266_v61, 0.0  ;;  %v26532_v41 = vpop.f32.mrb[92].mxu0 }
 0xe8f   : > { %20339 = vst.msk [vmem:[%s32457_s25 + $0x98] sm:$0xff] %vm612_vm0, %v20303_v1  ;;  %v20269_v21 = vadd.f32 %v26532_v41, %v32451_v7  ;;  %v20126_v13 = vpop.f32.mrb[93].mxu0 }
 0xe90   : > { %20338 = vst.msk [vmem:[%s32457_s25 + $0x90] sm:$0xff] %vm612_vm0, %v20302_v38  ;;  %v20268_v48 = vadd.f32 %v32451_v7, %v20126_v13 }
 0xe91   : > { %v20305_v62 = vmax.f32 %v20269_v21, 0.0 }
 0xe92   : > { %v20304_v19 = vmax.f32 %v20268_v48, 0.0  ;;  %v26535_v57 = vpop.f32.mrb[94].mxu0 }
 0xe93   : > { %20341 = vst.msk [vmem:[%s32457_s25 + $0xa8] sm:$0xff] %vm612_vm0, %v20305_v62  ;;  %v20271_v5 = vadd.f32 %v26535_v57, %v32451_v7  ;;  %v20136_v46 = vpop.f32.mrb[95].mxu0 }
 0xe94   : > { %20340 = vst.msk [vmem:[%s32457_s25 + $0xa0] sm:$0xff] %vm612_vm0, %v20304_v19  ;;  %v20270_v55 = vadd.f32 %v32451_v7, %v20136_v46 }
 0xe95   : > { %v20307_v29 = vmax.f32 %v20271_v5, 0.0 }
 0xe96   : > { %v20306_v12 = vmax.f32 %v20270_v55, 0.0  ;;  %v26538_v53 = vpop.f32.mrb[96].mxu0 }
 0xe97   : > { %20343 = vst.msk [vmem:[%s32457_s25 + $0xb8] sm:$0xff] %vm612_vm0, %v20307_v29  ;;  %v20273_v9 = vadd.f32 %v26538_v53, %v32451_v7  ;;  %v20146_v26 = vpop.f32.mrb[97].mxu0 }
 0xe98   : > { %20342 = vst.msk [vmem:[%s32457_s25 + $0xb0] sm:$0xff] %vm612_vm0, %v20306_v12  ;;  %v20272_v0 = vadd.f32 %v32451_v7, %v20146_v26 }
 0xe99   : > { %v20309_v10 = vmax.f32 %v20273_v9, 0.0 }
 0xe9a   : > { %v20308_v15 = vmax.f32 %v20272_v0, 0.0  ;;  %v26541_v4 = vpop.f32.mrb[98].mxu0 }
 0xe9b   : > { %20345 = vst.msk [vmem:[%s32457_s25 + $0xc8] sm:$0xff] %vm612_vm0, %v20309_v10  ;;  %v20275_v37 = vadd.f32 %v26541_v4, %v32451_v7  ;;  %v20156_v54 = vpop.f32.mrb[99].mxu0 }
 0xe9c   : > { %20344 = vst.msk [vmem:[%s32457_s25 + $0xc0] sm:$0xff] %vm612_vm0, %v20308_v15  ;;  %v20274_v43 = vadd.f32 %v32451_v7, %v20156_v54 }
 0xe9d   : > { %v20311_v17 = vmax.f32 %v20275_v37, 0.0 }
 0xe9e   : > { %v20310_v24 = vmax.f32 %v20274_v43, 0.0  ;;  %v26544_v36 = vpop.f32.mrb[100].mxu0 }
 0xe9f   : > { %20347 = vst.msk [vmem:[%s32457_s25 + $0xd8] sm:$0xff] %vm612_vm0, %v20311_v17  ;;  %v20277_v16 = vadd.f32 %v26544_v36, %v32451_v7  ;;  %v20166_v3 = vpop.f32.mrb[101].mxu0 }
 0xea0   : > { %20346 = vst.msk [vmem:[%s32457_s25 + $0xd0] sm:$0xff] %vm612_vm0, %v20310_v24  ;;  %v20276_v51 = vadd.f32 %v32451_v7, %v20166_v3 }
 0xea1   : > { %v20313_v22 = vmax.f32 %v20277_v16, 0.0 }
 0xea2   : > { %v20312_v11 = vmax.f32 %v20276_v51, 0.0  ;;  %v26547_v40 = vpop.f32.mrb[102].mxu0 }
 0xea3   : > { %20349 = vst.msk [vmem:[%s32457_s25 + $0xe8] sm:$0xff] %vm612_vm0, %v20313_v22  ;;  %v20279_v59 = vadd.f32 %v26547_v40, %v32451_v7  ;;  %v20176_v50 = vpop.f32.mrb[103].mxu0 }
 0xea4   : > { %20348 = vst.msk [vmem:[%s32457_s25 + $0xe0] sm:$0xff] %vm612_vm0, %v20312_v11  ;;  %v20278_v58 = vadd.f32 %v32451_v7, %v20176_v50 }
 0xea5   : > { %v20315_v27 = vmax.f32 %v20279_v59, 0.0 }
 0xea6   : > { %v20314_v8 = vmax.f32 %v20278_v58, 0.0  ;;  %v26550_v31 = vpop.f32.mrb[104].mxu0 }
 0xea7   : > { %20351 = vst.msk [vmem:[%s32457_s25 + $0xf8] sm:$0xff] %vm612_vm0, %v20315_v27  ;;  %v20281_v56 = vadd.f32 %v26550_v31, %v32451_v7  ;;  %v20186_v23 = vpop.f32.mrb[105].mxu0 }
 0xea8   : > { %20350 = vst.msk [vmem:[%s32457_s25 + $0xf0] sm:$0xff] %vm612_vm0, %v20314_v8  ;;  %v20280_v33 = vadd.f32 %v32451_v7, %v20186_v23 }
 0xea9   : > { %v20317_v6 = vmax.f32 %v20281_v56, 0.0 }
 0xeaa   : > { %v20316_v28 = vmax.f32 %v20280_v33, 0.0  ;;  %v26553_v60 = vpop.f32.mrb[106].mxu0 }
 0xeab   : > { %20353 = vst.msk [vmem:[%s32457_s25 + $0x108] sm:$0xff] %vm612_vm0, %v20317_v6  ;;  %v20283_v39 = vadd.f32 %v26553_v60, %v32451_v7  ;;  %v20196_v47 = vpop.f32.mrb[107].mxu0 }
 0xeac   : > { %20352 = vst.msk [vmem:[%s32457_s25 + $0x100] sm:$0xff] %vm612_vm0, %v20316_v28  ;;  %v20282_v2 = vadd.f32 %v32451_v7, %v20196_v47 }
 0xead   : > { %v20319_v35 = vmax.f32 %v20283_v39, 0.0 }
 0xeae   : > { %v20318_v63 = vmax.f32 %v20282_v2, 0.0 }
 0xeaf   : > { %20355 = vst.msk [vmem:[%s32457_s25 + $0x118] sm:$0xff] %vm612_vm0, %v20319_v35 }
 0xeb0   : > { %20354 = vst.msk [vmem:[%s32457_s25 + $0x110] sm:$0xff] %vm612_vm0, %v20318_v63 }
 0xeb1 PF: > { %s22_s21 = sadd.s32 1, %s28305_s21  }
 0xeb2   : > { %p19_p4 = scmp.ge.s32.totalorder %s22_s21, 4  }
 0xeb4   :  { %21 = sbr.rel (!%p19_p4) target bundleno = 1 (0x1), region = 98 }

</bundles_post_ra>
